<compile_context>
chip_gen: v6e
topology: v6e:2x2x1
jax: 0.10.0
libtpu: 0.0.40
codegen_flags: <defaults>
</compile_context>

<pallas_src>
import functools

import jax
import jax.numpy as jnp
from jax.experimental import pallas as pl
from jax.experimental.pallas import tpu as pltpu


# ---------------------------------------------------------------------------
# Pallas kernels
# ---------------------------------------------------------------------------
def _backbone_kernel(num_blocks, mp, pad, wpad,
                     x_ref, mask_ref, wblk_ref, bblk_ref, wvp_ref, bvp_ref,
                     out_ref, act_a, act_b, lhs_buf):
    """All residual blocks + fused 1x1 value|policy conv + BN + ReLU.

    x_ref   : (1, E, C)  bf16  zero-extended padded-flat NHWC block (E = mp+2*pad)
    mask_ref: (1, mp, 1) f32   1.0 on interior pixels of the padded grid
    wblk_ref: (num_blocks*2, 9*C, C) bf16  BN-folded conv weights (im2col layout)
    bblk_ref: (num_blocks*2, 1, C)   f32   folded BN biases
    wvp_ref : (C, Cv+Cp) bf16,  bvp_ref: (1, Cv+Cp) f32  fused 1x1 + BN
    out_ref : (1, mp, Cv+Cp) bf16
    scratch : act_a, act_b (E, C) bf16;  lhs_buf (mp, 9*C) bf16
    """
    c = act_a.shape[1]
    act_a[...] = x_ref[0]                     # borders already zero from wrapper
    act_b[...] = jnp.zeros_like(act_b)        # zero extension + border rows
    mask_c = jnp.broadcast_to(mask_ref[0], (mp, c))   # hoisted, reused 2x/block

    def conv3x3(src_ref, conv_idx):
        # Stage the 9 shifted tap windows once into a (mp, 9*C) bf16 buffer,
        # then run a single K=9*C MXU matmul.
        for tap in range(9):
            dy, dx = tap // 3, tap % 3
            start = pad + (dy - 1) * wpad + (dx - 1)        # static row offset
            lhs_buf[:, pl.ds(tap * c, c)] = src_ref[pl.ds(start, mp), :]
        return jnp.dot(lhs_buf[...], wblk_ref[conv_idx],
                       preferred_element_type=jnp.float32)   # (mp, C) f32

    for blk in range(num_blocks):
        # conv1 -> folded bn1 -> relu; border rows re-zeroed via mask
        h1 = conv3x3(act_a, 2 * blk)
        h1 = jnp.maximum(h1 + bblk_ref[2 * blk], 0.0) * mask_c
        act_b[pl.ds(pad, mp), :] = h1.astype(act_b.dtype)
        # conv2 -> folded bn2 -> + identity -> relu (f32 epilogue)
        h2 = conv3x3(act_b, 2 * blk + 1)
        h2 = h2 + bblk_ref[2 * blk + 1] + act_a[pl.ds(pad, mp), :].astype(jnp.float32)
        h2 = jnp.maximum(h2, 0.0) * mask_c
        act_a[pl.ds(pad, mp), :] = h2.astype(act_a.dtype)

    # Fused 1x1 value|policy reduce conv + folded BN + ReLU.
    feat = act_a[pl.ds(pad, mp), :]                          # (mp, C) bf16
    vp = jnp.dot(feat, wvp_ref[...], preferred_element_type=jnp.float32)
    vp = jnp.maximum(vp + bvp_ref[...], 0.0)
    out_ref[0] = vp.astype(out_ref.dtype)


def _heads_kernel(v_ref, p_ref, w1v_ref, b1v_ref, w1p_ref, b1p_ref,
                  w2cat_ref, b2v_ref, b2p_ref, val_ref, pol_ref):
    """fc_value / fc_policy: Linear + folded BN1d + ReLU -> merged final Linear."""
    hv = jnp.maximum(jnp.dot(v_ref[...], w1v_ref[...],
                             preferred_element_type=jnp.float32) + b1v_ref[...], 0.0)
    hp = jnp.maximum(jnp.dot(p_ref[...], w1p_ref[...],
                             preferred_element_type=jnp.float32) + b1p_ref[...], 0.0)
    hcat = jnp.concatenate([hv, hp], axis=1).astype(jnp.bfloat16)   # (n, hid_v+hid_p)
    out = jnp.dot(hcat, w2cat_ref[...], preferred_element_type=jnp.float32)
    fs = val_ref.shape[1]
    val_ref[...] = out[:, :fs] + b2v_ref[...]
    pol_ref[...] = out[:, fs:] + b2p_ref[...]


# ---------------------------------------------------------------------------
# Forward pass (2 pallas_calls total)
# ---------------------------------------------------------------------------
def prediction_forward(packed, x_nchw):
    n, c, h, w = x_nchw.shape
    hp_, wpad = h + 2, w + 2
    rows_img = hp_ * wpad
    # Split the batch over the grid (uses both v7x TensorCores when n is even).
    n_split = 2 if (n % 2 == 0 and n >= 2) else 1
    mp_blk = (n // n_split) * rows_img
    pad = ((wpad + 1 + 15) // 16) * 16        # >= wpad+1, 16-aligned (bf16 sublanes)
    assert pad >= wpad + 1
    e_blk = mp_blk + 2 * pad
    num_blocks = packed['w_blocks'].shape[0] // 2
    ctot = packed['w_vp'].shape[1]
    cv = packed['fc_value_w1'].shape[0] // (h * w)

    # NCHW -> NHWC -> spatial zero-pad -> flatten rows per split -> zero-extend.
    x = jnp.transpose(x_nchw, (0, 2, 3, 1)).astype(jnp.float32)
    x = jnp.pad(x, ((0, 0), (1, 1), (1, 1), (0, 0))).reshape(n_split, mp_blk, c)
    x_ext = jnp.pad(x, ((0, 0), (pad, pad), (0, 0))).astype(jnp.bfloat16)
    mask = (jnp.zeros((n, hp_, wpad), jnp.float32)
            .at[:, 1:h + 1, 1:w + 1].set(1.0)
            .reshape(n_split, mp_blk, 1))

    fmap = pl.pallas_call(
        functools.partial(_backbone_kernel, num_blocks, mp_blk, pad, wpad),
        out_shape=jax.ShapeDtypeStruct((n_split, mp_blk, ctot), jnp.bfloat16),
        grid=(n_split,),
        in_specs=[
            pl.BlockSpec((1, e_blk, c), lambda i: (i, 0, 0)),
            pl.BlockSpec((1, mp_blk, 1), lambda i: (i, 0, 0)),
            pl.BlockSpec(packed['w_blocks'].shape, lambda i: (0, 0, 0)),
            pl.BlockSpec(packed['b_blocks'].shape, lambda i: (0, 0, 0)),
            pl.BlockSpec(packed['w_vp'].shape, lambda i: (0, 0)),
            pl.BlockSpec(packed['b_vp'].shape, lambda i: (0, 0)),
        ],
        out_specs=pl.BlockSpec((1, mp_blk, ctot), lambda i: (i, 0, 0)),
        scratch_shapes=[pltpu.VMEM((e_blk, c), jnp.bfloat16),
                        pltpu.VMEM((e_blk, c), jnp.bfloat16),
                        pltpu.VMEM((mp_blk, 9 * c), jnp.bfloat16)],
        compiler_params=pltpu.CompilerParams(
            dimension_semantics=("parallel",)),
    )(x_ext, mask, packed['w_blocks'], packed['b_blocks'],
      packed['w_vp'], packed['b_vp'])

    # Extract interior pixels; NO transpose (fc w1 rows are pre-permuted to
    # NHWC flatten order at pack time).  Pure slice + reshape glue, in bf16.
    interior = fmap.reshape(n, hp_, wpad, ctot)[:, 1:h + 1, 1:w + 1, :]
    v_flat = interior[..., :cv].reshape(n, h * w * cv)
    p_flat = interior[..., cv:].reshape(n, h * w * (ctot - cv))

    fs = packed['fc_value_b2'].shape[1]
    na = packed['fc_policy_b2'].shape[1]
    head_in = (v_flat, p_flat,
               packed['fc_value_w1'], packed['fc_value_b1'],
               packed['fc_policy_w1'], packed['fc_policy_b1'],
               packed['fc_w2_cat'], packed['fc_value_b2'], packed['fc_policy_b2'])

    value, policy = pl.pallas_call(
        _heads_kernel,
        out_shape=(jax.ShapeDtypeStruct((n, fs), jnp.float32),
                   jax.ShapeDtypeStruct((n, na), jnp.float32)),
        grid=(1,),
        in_specs=[pl.BlockSpec(a.shape, lambda i: (0, 0)) for a in head_in],
        out_specs=(pl.BlockSpec((n, fs), lambda i: (0, 0)),
                   pl.BlockSpec((n, na), lambda i: (0, 0))),
        compiler_params=pltpu.CompilerParams(
            dimension_semantics=("arbitrary",)),
    )(*head_in)

    return policy, value


# ---------------------------------------------------------------------------
# Deterministic synthetic parameters (raw torch-like form + packed kernel form)
# ---------------------------------------------------------------------------
def _he_conv(key, kh, kw, cin, cout):
    std = (2.0 / (kh * kw * cin)) ** 0.5
    return std * jax.random.normal(key, (kh, kw, cin, cout), jnp.float32)


def _bn_stats(key, ch):
    k = jax.random.split(key, 4)
    gamma = 1.0 + 0.1 * jax.random.normal(k[0], (ch,), jnp.float32)
    beta = 0.1 * jax.random.normal(k[1], (ch,), jnp.float32)
    mean = 0.1 * jax.random.normal(k[2], (ch,), jnp.float32)
    var = 1.0 + 0.1 * jnp.abs(jax.random.normal(k[3], (ch,), jnp.float32))
    return gamma, beta, mean, var


def _linear(key, din, dout):
    kw_, kb = jax.random.split(key)
    bound = (1.0 / din) ** 0.5
    w = jax.random.uniform(kw_, (din, dout), jnp.float32, -bound, bound)
    b = jax.random.uniform(kb, (dout,), jnp.float32, -bound, bound)
    return w, b


def _fold_scale_shift(gamma, beta, mean, var, eps=1e-5):
    scale = gamma / jnp.sqrt(var + eps)
    shift = beta - mean * scale
    return scale, shift


def make_raw_params(key, *, num_blocks, num_channels, reduced_value,
                    reduced_policy, fc_value_layers, fc_policy_layers,
                    full_support_size, action_space_size, h, w):
    # TODO(synk): kernel supports the standard single hidden FC layer only.
    assert len(fc_value_layers) == 1 and len(fc_policy_layers) == 1
    keys = jax.random.split(key, 64)
    it = iter(keys)

    blocks = []
    for _ in range(num_blocks):
        blocks.append({
            'w1': _he_conv(next(it), 3, 3, num_channels, num_channels),
            'bn1': _bn_stats(next(it), num_channels),
            'w2': _he_conv(next(it), 3, 3, num_channels, num_channels),
            'bn2': _bn_stats(next(it), num_channels),
        })

    w_value = _he_conv(next(it), 1, 1, num_channels, reduced_value)[0, 0]
    b_value = 0.05 * jax.random.normal(next(it), (reduced_value,), jnp.float32)
    bn_value = _bn_stats(next(it), reduced_value)
    w_policy = _he_conv(next(it), 1, 1, num_channels, reduced_policy)[0, 0]
    b_policy = 0.05 * jax.random.normal(next(it), (reduced_policy,), jnp.float32)
    bn_policy = _bn_stats(next(it), reduced_policy)

    def make_fc(din, hidden, dout):
        w1, b1 = _linear(next(it), din, hidden)
        bn = _bn_stats(next(it), hidden)
        w2, b2 = _linear(next(it), hidden, dout)
        return {'w1': w1, 'b1': b1, 'bn': bn, 'w2': w2, 'b2': b2}

    dv = reduced_value * h * w
    dp = reduced_policy * h * w
    return {
        'blocks': blocks,
        'w_value': w_value, 'b_value': b_value, 'bn_value': bn_value,
        'w_policy': w_policy, 'b_policy': b_policy, 'bn_policy': bn_policy,
        'fc_value': make_fc(dv, fc_value_layers[0], full_support_size),
        'fc_policy': make_fc(dp, fc_policy_layers[0], action_space_size),
    }


def pack_params(raw, h, w, eps=1e-5):
    """Fold eval-mode BN into weights/biases and pack into kernel layout."""
    wb, bb = [], []
    for blk in raw['blocks']:
        for wk, bk in (('w1', 'bn1'), ('w2', 'bn2')):
            scale, shift = _fold_scale_shift(*blk[bk], eps=eps)
            wf = blk[wk] * scale[None, None, None, :]        # (3,3,cin,cout) HWIO
            cin, cout = wf.shape[2], wf.shape[3]
            wb.append(wf.reshape(9 * cin, cout))             # im2col (9*C, C)
            bb.append(shift.reshape(1, cout))
    sv, shv = _fold_scale_shift(*raw['bn_value'], eps=eps)
    sp, shp = _fold_scale_shift(*raw['bn_policy'], eps=eps)
    w_vp = jnp.concatenate([raw['w_value'] * sv[None, :],
                            raw['w_policy'] * sp[None, :]], axis=1)
    b_vp = jnp.concatenate([raw['b_value'] * sv + shv,
                            raw['b_policy'] * sp + shp]).reshape(1, -1)
    packed = {
        'w_blocks': jnp.stack(wb, axis=0).astype(jnp.bfloat16),
        'b_blocks': jnp.stack(bb, axis=0),
        'w_vp': w_vp.astype(jnp.bfloat16),
        'b_vp': b_vp,
    }

    def pack_fc(fc, cc):
        s, sh = _fold_scale_shift(*fc['bn'], eps=eps)
        w1 = fc['w1'] * s[None, :]                           # (cc*h*w, hidden) NCHW rows
        hid = w1.shape[1]
        # Permute rows from NCHW flatten order to NHWC flatten order (offline).
        w1 = jnp.transpose(w1.reshape(cc, h, w, hid), (1, 2, 0, 3)).reshape(h * w * cc, hid)
        b1 = (fc['b1'] * s + sh).reshape(1, -1)
        return w1.astype(jnp.bfloat16), b1, fc['w2'], fc['b2'].reshape(1, -1)

    cv = raw['w_value'].shape[1]
    cp = raw['w_policy'].shape[1]
    w1v, b1v, w2v, b2v = pack_fc(raw['fc_value'], cv)
    w1p, b1p, w2p, b2p = pack_fc(raw['fc_policy'], cp)
    hid_v, hid_p = w2v.shape[0], w2p.shape[0]
    fs, na = w2v.shape[1], w2p.shape[1]
    # Block-diagonal merged final layer: (hid_v+hid_p, fs+na).
    w2_cat = jnp.zeros((hid_v + hid_p, fs + na), jnp.float32)
    w2_cat = w2_cat.at[:hid_v, :fs].set(w2v).at[hid_v:, fs:].set(w2p)
    packed.update({
        'fc_value_w1': w1v, 'fc_value_b1': b1v,
        'fc_policy_w1': w1p, 'fc_policy_b1': b1p,
        'fc_w2_cat': w2_cat.astype(jnp.bfloat16),
        'fc_value_b2': b2v, 'fc_policy_b2': b2p,
    })
    return packed


# ---------------------------------------------------------------------------
# Pure-JAX reference (f32, eval-mode BN) for a correctness cross-check
# ---------------------------------------------------------------------------
def _bn_apply(x, gamma, beta, mean, var, eps=1e-5):
    return (x - mean) / jnp.sqrt(var + eps) * gamma + beta


def reference_forward(raw, x_nchw):
    dn = ('NHWC', 'HWIO', 'NHWC')
    hi = jax.lax.Precision.HIGHEST
    x = jnp.transpose(x_nchw, (0, 2, 3, 1)).astype(jnp.float32)
    for blk in raw['blocks']:
        idn = x
        y = jax.lax.conv_general_dilated(x, blk['w1'], (1, 1), 'SAME',
                                         dimension_numbers=dn, precision=hi)
        y = jax.nn.relu(_bn_apply(y, *blk['bn1']))
        y = jax.lax.conv_general_dilated(y, blk['w2'], (1, 1), 'SAME',
                                         dimension_numbers=dn, precision=hi)
        y = _bn_apply(y, *blk['bn2'])
        x = jax.nn.relu(y + idn)
    n = x.shape[0]

    def head(w1x1, b1x1, bn, fc):
        y = jnp.einsum('nhwc,cd->nhwd', x, w1x1, precision=hi) + b1x1
        y = jax.nn.relu(_bn_apply(y, *bn))
        y = jnp.transpose(y, (0, 3, 1, 2)).reshape(n, -1)    # NCHW flatten order
        hdn = jax.nn.relu(_bn_apply(
            jnp.dot(y, fc['w1'], precision=hi) + fc['b1'], *fc['bn']))
        return jnp.dot(hdn, fc['w2'], precision=hi) + fc['b2']

    value = head(raw['w_value'], raw['b_value'], raw['bn_value'], raw['fc_value'])
    policy = head(raw['w_policy'], raw['b_policy'], raw['bn_policy'], raw['fc_policy'])
    return policy, value


# ---------------------------------------------------------------------------
if __name__ == "__main__":
    key = jax.random.PRNGKey(0)
    kx, kp = jax.random.split(key)

    # Small PredictionNetwork config: hidden state (N, C, H, W) = (2, 32, 8, 8),
    # 2 residual blocks, 16 reduced value/policy channels, one 32-wide FC layer,
    # full_support_size=21, action_space_size=6.
    N, C, H, W = 2, 32, 8, 8
    NUM_BLOCKS = 2
    CV = CP = 16
    FC_LAYERS = [32]
    FULL_SUPPORT = 21
    ACTIONS = 6

    x = jax.random.normal(kx, (N, C, H, W), jnp.float32)
    raw = make_raw_params(kp, num_blocks=NUM_BLOCKS, num_channels=C,
                          reduced_value=CV, reduced_policy=CP,
                          fc_value_layers=FC_LAYERS, fc_policy_layers=FC_LAYERS,
                          full_support_size=FULL_SUPPORT,
                          action_space_size=ACTIONS, h=H, w=W)
    packed = pack_params(raw, h=H, w=W)

    fwd = jax.jit(prediction_forward)
    policy, value = fwd(packed, x)
    jax.block_until_ready((policy, value))

    assert policy.shape == (N, ACTIONS), policy.shape
    assert value.shape == (N, FULL_SUPPORT), value.shape
    assert bool(jnp.all(jnp.isfinite(policy)))
    assert bool(jnp.all(jnp.isfinite(value)))

    # Cross-check vs f32 reference (loose bound: trunk + heads use bf16 MXU
    # operands and bf16 activation storage).
    pol_ref, val_ref = reference_forward(raw, x)
    dp = float(jnp.max(jnp.abs(policy - pol_ref)))
    dv = float(jnp.max(jnp.abs(value - val_ref)))
    assert dp < 3e-1 and dv < 3e-1, (dp, dv)

    print("KERNEL_OK")
</pallas_src>

<mosaic_0001>
module attributes {stable_mosaic.version = 11 : i64} {
  func.func @_backbone_kernel(%arg0: i32, %arg1: memref<1x132x32xbf16, #tpu.memory_space<vmem>>, %arg2: memref<1x100x1xf32, #tpu.memory_space<vmem>>, %arg3: memref<4x288x32xbf16, #tpu.memory_space<vmem>>, %arg4: memref<4x1x32xf32, #tpu.memory_space<vmem>>, %arg5: memref<32x32xbf16, #tpu.memory_space<vmem>>, %arg6: memref<1x32xf32, #tpu.memory_space<vmem>>, %arg7: memref<1x100x32xbf16, #tpu.memory_space<vmem>>, %arg8: memref<132x32xbf16, #tpu.memory_space<vmem>>, %arg9: memref<132x32xbf16, #tpu.memory_space<vmem>>, %arg10: memref<100x288xbf16, #tpu.memory_space<vmem>>) attributes {dimension_semantics = [#tpu.dimension_semantics<parallel>], iteration_bounds = array<i64: 2>, scalar_prefetch = 0 : i64, scratch_operands = 3 : i64, tpu.core_type = #tpu.core_type<tc>, window_params = [{transform_indices = @transform_0, window_bounds = array<i64: 1, 132, 32>}, {transform_indices = @transform_1, window_bounds = array<i64: 1, 100, 1>}, {pipeline_mode = #tpu.pipeline_mode<synchronous>, transform_indices = @transform_2, window_bounds = array<i64: 4, 288, 32>}, {pipeline_mode = #tpu.pipeline_mode<synchronous>, transform_indices = @transform_3, window_bounds = array<i64: 4, 1, 32>}, {pipeline_mode = #tpu.pipeline_mode<synchronous>, transform_indices = @transform_4, window_bounds = array<i64: 32, 32>}, {pipeline_mode = #tpu.pipeline_mode<synchronous>, transform_indices = @transform_5, window_bounds = array<i64: 1, 32>}, {transform_indices = @transform_6, window_bounds = array<i64: 1, 100, 32>}]} {
    %c0 = arith.constant 0 : index
    %c0_0 = arith.constant 0 : index
    %c0_1 = arith.constant 0 : index
    %0 = vector.load %arg1[%c0, %c0_0, %c0_1] : memref<1x132x32xbf16, #tpu.memory_space<vmem>>, vector<1x132x32xbf16>
    %1 = vector.shape_cast %0 : vector<1x132x32xbf16> to vector<132x32xbf16>
    %c0_2 = arith.constant 0 : index
    %c0_3 = arith.constant 0 : index
    %2 = vector.load %arg8[%c0_2, %c0_3] : memref<132x32xbf16, #tpu.memory_space<vmem>>, vector<132x32xbf16>
    tpu.vector_store %arg8[%c0_2, %c0_3], %1 {strides = array<i32>} : memref<132x32xbf16, #tpu.memory_space<vmem>>, vector<132x32xbf16>,
    %cst = arith.constant 0.000000e+00 : bf16
    %3 = vector.broadcast %cst : bf16 to vector<132x32xbf16>
    %c0_4 = arith.constant 0 : index
    %c0_5 = arith.constant 0 : index
    %4 = vector.load %arg9[%c0_4, %c0_5] : memref<132x32xbf16, #tpu.memory_space<vmem>>, vector<132x32xbf16>
    tpu.vector_store %arg9[%c0_4, %c0_5], %3 {strides = array<i32>} : memref<132x32xbf16, #tpu.memory_space<vmem>>, vector<132x32xbf16>,
    %c0_6 = arith.constant 0 : index
    %c0_7 = arith.constant 0 : index
    %c0_8 = arith.constant 0 : index
    %5 = vector.load %arg2[%c0_6, %c0_7, %c0_8] : memref<1x100x1xf32, #tpu.memory_space<vmem>>, vector<1x100x1xf32>
    %6 = vector.shape_cast %5 : vector<1x100x1xf32> to vector<100x1xf32>
    %7 = vector.shape_cast %6 : vector<100x1xf32> to vector<100x1xf32>
    %8 = vector.broadcast %7 : vector<100x1xf32> to vector<100x32xf32>
    %c5 = arith.constant 5 : index
    %c0_9 = arith.constant 0 : index
    %9 = vector.load %arg8[%c5, %c0_9] : memref<132x32xbf16, #tpu.memory_space<vmem>>, vector<100x32xbf16>
    %c0_10 = arith.constant 0 : index
    %c0_11 = arith.constant 0 : index
    %10 = vector.load %arg10[%c0_10, %c0_11] : memref<100x288xbf16, #tpu.memory_space<vmem>>, vector<100x32xbf16>
    tpu.vector_store %arg10[%c0_10, %c0_11], %9 {strides = array<i32>} : memref<100x288xbf16, #tpu.memory_space<vmem>>, vector<100x32xbf16>,
    %c6 = arith.constant 6 : index
    %c0_12 = arith.constant 0 : index
    %11 = vector.load %arg8[%c6, %c0_12] : memref<132x32xbf16, #tpu.memory_space<vmem>>, vector<100x32xbf16>
    %c0_13 = arith.constant 0 : index
    %c32 = arith.constant 32 : index
    %12 = vector.load %arg10[%c0_13, %c32] : memref<100x288xbf16, #tpu.memory_space<vmem>>, vector<100x32xbf16>
    tpu.vector_store %arg10[%c0_13, %c32], %11 {strides = array<i32>} : memref<100x288xbf16, #tpu.memory_space<vmem>>, vector<100x32xbf16>,
    %c7 = arith.constant 7 : index
    %c0_14 = arith.constant 0 : index
    %13 = vector.load %arg8[%c7, %c0_14] : memref<132x32xbf16, #tpu.memory_space<vmem>>, vector<100x32xbf16>
    %c0_15 = arith.constant 0 : index
    %c64 = arith.constant 64 : index
    %14 = vector.load %arg10[%c0_15, %c64] : memref<100x288xbf16, #tpu.memory_space<vmem>>, vector<100x32xbf16>
    tpu.vector_store %arg10[%c0_15, %c64], %13 {strides = array<i32>} : memref<100x288xbf16, #tpu.memory_space<vmem>>, vector<100x32xbf16>,
    %c15 = arith.constant 15 : index
    %c0_16 = arith.constant 0 : index
    %15 = vector.load %arg8[%c15, %c0_16] : memref<132x32xbf16, #tpu.memory_space<vmem>>, vector<100x32xbf16>
    %c0_17 = arith.constant 0 : index
    %c96 = arith.constant 96 : index
    %16 = vector.load %arg10[%c0_17, %c96] : memref<100x288xbf16, #tpu.memory_space<vmem>>, vector<100x32xbf16>
    tpu.vector_store %arg10[%c0_17, %c96], %15 {strides = array<i32>} : memref<100x288xbf16, #tpu.memory_space<vmem>>, vector<100x32xbf16>,
    %c16 = arith.constant 16 : index
    %c0_18 = arith.constant 0 : index
    %17 = vector.load %arg8[%c16, %c0_18] : memref<132x32xbf16, #tpu.memory_space<vmem>>, vector<100x32xbf16>
    %c0_19 = arith.constant 0 : index
    %c128 = arith.constant 128 : index
    %18 = vector.load %arg10[%c0_19, %c128] : memref<100x288xbf16, #tpu.memory_space<vmem>>, vector<100x32xbf16>
    tpu.vector_store %arg10[%c0_19, %c128], %17 {strides = array<i32>} : memref<100x288xbf16, #tpu.memory_space<vmem>>, vector<100x32xbf16>,
    %c17 = arith.constant 17 : index
    %c0_20 = arith.constant 0 : index
    %19 = vector.load %arg8[%c17, %c0_20] : memref<132x32xbf16, #tpu.memory_space<vmem>>, vector<100x32xbf16>
    %c0_21 = arith.constant 0 : index
    %c160 = arith.constant 160 : index
    %20 = vector.load %arg10[%c0_21, %c160] : memref<100x288xbf16, #tpu.memory_space<vmem>>, vector<100x32xbf16>
    tpu.vector_store %arg10[%c0_21, %c160], %19 {strides = array<i32>} : memref<100x288xbf16, #tpu.memory_space<vmem>>, vector<100x32xbf16>,
    %c25 = arith.constant 25 : index
    %c0_22 = arith.constant 0 : index
    %21 = vector.load %arg8[%c25, %c0_22] : memref<132x32xbf16, #tpu.memory_space<vmem>>, vector<100x32xbf16>
    %c0_23 = arith.constant 0 : index
    %c192 = arith.constant 192 : index
    %22 = vector.load %arg10[%c0_23, %c192] : memref<100x288xbf16, #tpu.memory_space<vmem>>, vector<100x32xbf16>
    tpu.vector_store %arg10[%c0_23, %c192], %21 {strides = array<i32>} : memref<100x288xbf16, #tpu.memory_space<vmem>>, vector<100x32xbf16>,
    %c26 = arith.constant 26 : index
    %c0_24 = arith.constant 0 : index
    %23 = vector.load %arg8[%c26, %c0_24] : memref<132x32xbf16, #tpu.memory_space<vmem>>, vector<100x32xbf16>
    %c0_25 = arith.constant 0 : index
    %c224 = arith.constant 224 : index
    %24 = vector.load %arg10[%c0_25, %c224] : memref<100x288xbf16, #tpu.memory_space<vmem>>, vector<100x32xbf16>
    tpu.vector_store %arg10[%c0_25, %c224], %23 {strides = array<i32>} : memref<100x288xbf16, #tpu.memory_space<vmem>>, vector<100x32xbf16>,
    %c27 = arith.constant 27 : index
    %c0_26 = arith.constant 0 : index
    %25 = vector.load %arg8[%c27, %c0_26] : memref<132x32xbf16, #tpu.memory_space<vmem>>, vector<100x32xbf16>
    %c0_27 = arith.constant 0 : index
    %c256 = arith.constant 256 : index
    %26 = vector.load %arg10[%c0_27, %c256] : memref<100x288xbf16, #tpu.memory_space<vmem>>, vector<100x32xbf16>
    tpu.vector_store %arg10[%c0_27, %c256], %25 {strides = array<i32>} : memref<100x288xbf16, #tpu.memory_space<vmem>>, vector<100x32xbf16>,
    %c0_28 = arith.constant 0 : index
    %c0_29 = arith.constant 0 : index
    %27 = vector.load %arg10[%c0_28, %c0_29] : memref<100x288xbf16, #tpu.memory_space<vmem>>, vector<100x288xbf16>
    %c0_30 = arith.constant 0 : index
    %c0_31 = arith.constant 0 : index
    %c0_32 = arith.constant 0 : index
    %28 = vector.load %arg3[%c0_30, %c0_31, %c0_32] : memref<4x288x32xbf16, #tpu.memory_space<vmem>>, vector<1x288x32xbf16>
    %29 = vector.shape_cast %28 : vector<1x288x32xbf16> to vector<288x32xbf16>
    %cst_33 = arith.constant dense<0.000000e+00> : vector<100x32xf32>
    %30 = tpu.matmul %27, %29, %cst_33 {dimension_numbers = #tpu.dot_dimension_numbers<[1], [0], [0], [1], [0, 0, 1, 1], [], []>} : vector<100x288xbf16>, vector<288x32xbf16>, vector<100x32xf32> -> vector<100x32xf32>
    %c0_34 = arith.constant 0 : index
    %c0_35 = arith.constant 0 : index
    %c0_36 = arith.constant 0 : index
    %31 = vector.load %arg4[%c0_34, %c0_35, %c0_36] : memref<4x1x32xf32, #tpu.memory_space<vmem>>, vector<1x1x32xf32>
    %32 = vector.shape_cast %31 : vector<1x1x32xf32> to vector<1x32xf32>
    %33 = vector.broadcast %32 : vector<1x32xf32> to vector<100x32xf32>
    %34 = arith.addf %30, %33 : vector<100x32xf32>
    %cst_37 = arith.constant 0.000000e+00 : f32
    %35 = vector.broadcast %cst_37 : f32 to vector<100x32xf32>
    %36 = arith.maximumf %34, %35 : vector<100x32xf32>
    %37 = arith.mulf %36, %8 : vector<100x32xf32>
    %38 = arith.truncf %37 : vector<100x32xf32> to vector<100x32xbf16>
    %c16_38 = arith.constant 16 : index
    %c0_39 = arith.constant 0 : index
    %39 = vector.load %arg9[%c16_38, %c0_39] : memref<132x32xbf16, #tpu.memory_space<vmem>>, vector<100x32xbf16>
    tpu.vector_store %arg9[%c16_38, %c0_39], %38 {strides = array<i32>} : memref<132x32xbf16, #tpu.memory_space<vmem>>, vector<100x32xbf16>,
    %c5_40 = arith.constant 5 : index
    %c0_41 = arith.constant 0 : index
    %40 = vector.load %arg9[%c5_40, %c0_41] : memref<132x32xbf16, #tpu.memory_space<vmem>>, vector<100x32xbf16>
    %c0_42 = arith.constant 0 : index
    %c0_43 = arith.constant 0 : index
    %41 = vector.load %arg10[%c0_42, %c0_43] : memref<100x288xbf16, #tpu.memory_space<vmem>>, vector<100x32xbf16>
    tpu.vector_store %arg10[%c0_42, %c0_43], %40 {strides = array<i32>} : memref<100x288xbf16, #tpu.memory_space<vmem>>, vector<100x32xbf16>,
    %c6_44 = arith.constant 6 : index
    %c0_45 = arith.constant 0 : index
    %42 = vector.load %arg9[%c6_44, %c0_45] : memref<132x32xbf16, #tpu.memory_space<vmem>>, vector<100x32xbf16>
    %c0_46 = arith.constant 0 : index
    %c32_47 = arith.constant 32 : index
    %43 = vector.load %arg10[%c0_46, %c32_47] : memref<100x288xbf16, #tpu.memory_space<vmem>>, vector<100x32xbf16>
    tpu.vector_store %arg10[%c0_46, %c32_47], %42 {strides = array<i32>} : memref<100x288xbf16, #tpu.memory_space<vmem>>, vector<100x32xbf16>,
    %c7_48 = arith.constant 7 : index
    %c0_49 = arith.constant 0 : index
    %44 = vector.load %arg9[%c7_48, %c0_49] : memref<132x32xbf16, #tpu.memory_space<vmem>>, vector<100x32xbf16>
    %c0_50 = arith.constant 0 : index
    %c64_51 = arith.constant 64 : index
    %45 = vector.load %arg10[%c0_50, %c64_51] : memref<100x288xbf16, #tpu.memory_space<vmem>>, vector<100x32xbf16>
    tpu.vector_store %arg10[%c0_50, %c64_51], %44 {strides = array<i32>} : memref<100x288xbf16, #tpu.memory_space<vmem>>, vector<100x32xbf16>,
    %c15_52 = arith.constant 15 : index
    %c0_53 = arith.constant 0 : index
    %46 = vector.load %arg9[%c15_52, %c0_53] : memref<132x32xbf16, #tpu.memory_space<vmem>>, vector<100x32xbf16>
    %c0_54 = arith.constant 0 : index
    %c96_55 = arith.constant 96 : index
    %47 = vector.load %arg10[%c0_54, %c96_55] : memref<100x288xbf16, #tpu.memory_space<vmem>>, vector<100x32xbf16>
    tpu.vector_store %arg10[%c0_54, %c96_55], %46 {strides = array<i32>} : memref<100x288xbf16, #tpu.memory_space<vmem>>, vector<100x32xbf16>,
    %c16_56 = arith.constant 16 : index
    %c0_57 = arith.constant 0 : index
    %48 = vector.load %arg9[%c16_56, %c0_57] : memref<132x32xbf16, #tpu.memory_space<vmem>>, vector<100x32xbf16>
    %c0_58 = arith.constant 0 : index
    %c128_59 = arith.constant 128 : index
    %49 = vector.load %arg10[%c0_58, %c128_59] : memref<100x288xbf16, #tpu.memory_space<vmem>>, vector<100x32xbf16>
    tpu.vector_store %arg10[%c0_58, %c128_59], %48 {strides = array<i32>} : memref<100x288xbf16, #tpu.memory_space<vmem>>, vector<100x32xbf16>,
    %c17_60 = arith.constant 17 : index
    %c0_61 = arith.constant 0 : index
    %50 = vector.load %arg9[%c17_60, %c0_61] : memref<132x32xbf16, #tpu.memory_space<vmem>>, vector<100x32xbf16>
    %c0_62 = arith.constant 0 : index
    %c160_63 = arith.constant 160 : index
    %51 = vector.load %arg10[%c0_62, %c160_63] : memref<100x288xbf16, #tpu.memory_space<vmem>>, vector<100x32xbf16>
    tpu.vector_store %arg10[%c0_62, %c160_63], %50 {strides = array<i32>} : memref<100x288xbf16, #tpu.memory_space<vmem>>, vector<100x32xbf16>,
    %c25_64 = arith.constant 25 : index
    %c0_65 = arith.constant 0 : index
    %52 = vector.load %arg9[%c25_64, %c0_65] : memref<132x32xbf16, #tpu.memory_space<vmem>>, vector<100x32xbf16>
    %c0_66 = arith.constant 0 : index
    %c192_67 = arith.constant 192 : index
    %53 = vector.load %arg10[%c0_66, %c192_67] : memref<100x288xbf16, #tpu.memory_space<vmem>>, vector<100x32xbf16>
    tpu.vector_store %arg10[%c0_66, %c192_67], %52 {strides = array<i32>} : memref<100x288xbf16, #tpu.memory_space<vmem>>, vector<100x32xbf16>,
    %c26_68 = arith.constant 26 : index
    %c0_69 = arith.constant 0 : index
    %54 = vector.load %arg9[%c26_68, %c0_69] : memref<132x32xbf16, #tpu.memory_space<vmem>>, vector<100x32xbf16>
    %c0_70 = arith.constant 0 : index
    %c224_71 = arith.constant 224 : index
    %55 = vector.load %arg10[%c0_70, %c224_71] : memref<100x288xbf16, #tpu.memory_space<vmem>>, vector<100x32xbf16>
    tpu.vector_store %arg10[%c0_70, %c224_71], %54 {strides = array<i32>} : memref<100x288xbf16, #tpu.memory_space<vmem>>, vector<100x32xbf16>,
    %c27_72 = arith.constant 27 : index
    %c0_73 = arith.constant 0 : index
    %56 = vector.load %arg9[%c27_72, %c0_73] : memref<132x32xbf16, #tpu.memory_space<vmem>>, vector<100x32xbf16>
    %c0_74 = arith.constant 0 : index
    %c256_75 = arith.constant 256 : index
    %57 = vector.load %arg10[%c0_74, %c256_75] : memref<100x288xbf16, #tpu.memory_space<vmem>>, vector<100x32xbf16>
    tpu.vector_store %arg10[%c0_74, %c256_75], %56 {strides = array<i32>} : memref<100x288xbf16, #tpu.memory_space<vmem>>, vector<100x32xbf16>,
    %c0_76 = arith.constant 0 : index
    %c0_77 = arith.constant 0 : index
    %58 = vector.load %arg10[%c0_76, %c0_77] : memref<100x288xbf16, #tpu.memory_space<vmem>>, vector<100x288xbf16>
    %c1 = arith.constant 1 : index
    %c0_78 = arith.constant 0 : index
    %c0_79 = arith.constant 0 : index
    %59 = vector.load %arg3[%c1, %c0_78, %c0_79] : memref<4x288x32xbf16, #tpu.memory_space<vmem>>, vector<1x288x32xbf16>
    %60 = vector.shape_cast %59 : vector<1x288x32xbf16> to vector<288x32xbf16>
    %cst_80 = arith.constant dense<0.000000e+00> : vector<100x32xf32>
    %61 = tpu.matmul %58, %60, %cst_80 {dimension_numbers = #tpu.dot_dimension_numbers<[1], [0], [0], [1], [0, 0, 1, 1], [], []>} : vector<100x288xbf16>, vector<288x32xbf16>, vector<100x32xf32> -> vector<100x32xf32>
    %c1_81 = arith.constant 1 : index
    %c0_82 = arith.constant 0 : index
    %c0_83 = arith.constant 0 : index
    %62 = vector.load %arg4[%c1_81, %c0_82, %c0_83] : memref<4x1x32xf32, #tpu.memory_space<vmem>>, vector<1x1x32xf32>
    %63 = vector.shape_cast %62 : vector<1x1x32xf32> to vector<1x32xf32>
    %64 = vector.broadcast %63 : vector<1x32xf32> to vector<100x32xf32>
    %65 = arith.addf %61, %64 : vector<100x32xf32>
    %c16_84 = arith.constant 16 : index
    %c0_85 = arith.constant 0 : index
    %66 = vector.load %arg8[%c16_84, %c0_85] : memref<132x32xbf16, #tpu.memory_space<vmem>>, vector<100x32xbf16>
    %67 = arith.extf %66 : vector<100x32xbf16> to vector<100x32xf32>
    %68 = arith.addf %65, %67 : vector<100x32xf32>
    %cst_86 = arith.constant 0.000000e+00 : f32
    %69 = vector.broadcast %cst_86 : f32 to vector<100x32xf32>
    %70 = arith.maximumf %68, %69 : vector<100x32xf32>
    %71 = arith.mulf %70, %8 : vector<100x32xf32>
    %72 = arith.truncf %71 : vector<100x32xf32> to vector<100x32xbf16>
    %c16_87 = arith.constant 16 : index
    %c0_88 = arith.constant 0 : index
    %73 = vector.load %arg8[%c16_87, %c0_88] : memref<132x32xbf16, #tpu.memory_space<vmem>>, vector<100x32xbf16>
    tpu.vector_store %arg8[%c16_87, %c0_88], %72 {strides = array<i32>} : memref<132x32xbf16, #tpu.memory_space<vmem>>, vector<100x32xbf16>,
    %c5_89 = arith.constant 5 : index
    %c0_90 = arith.constant 0 : index
    %74 = vector.load %arg8[%c5_89, %c0_90] : memref<132x32xbf16, #tpu.memory_space<vmem>>, vector<100x32xbf16>
    %c0_91 = arith.constant 0 : index
    %c0_92 = arith.constant 0 : index
    %75 = vector.load %arg10[%c0_91, %c0_92] : memref<100x288xbf16, #tpu.memory_space<vmem>>, vector<100x32xbf16>
    tpu.vector_store %arg10[%c0_91, %c0_92], %74 {strides = array<i32>} : memref<100x288xbf16, #tpu.memory_space<vmem>>, vector<100x32xbf16>,
    %c6_93 = arith.constant 6 : index
    %c0_94 = arith.constant 0 : index
    %76 = vector.load %arg8[%c6_93, %c0_94] : memref<132x32xbf16, #tpu.memory_space<vmem>>, vector<100x32xbf16>
    %c0_95 = arith.constant 0 : index
    %c32_96 = arith.constant 32 : index
    %77 = vector.load %arg10[%c0_95, %c32_96] : memref<100x288xbf16, #tpu.memory_space<vmem>>, vector<100x32xbf16>
    tpu.vector_store %arg10[%c0_95, %c32_96], %76 {strides = array<i32>} : memref<100x288xbf16, #tpu.memory_space<vmem>>, vector<100x32xbf16>,
    %c7_97 = arith.constant 7 : index
    %c0_98 = arith.constant 0 : index
    %78 = vector.load %arg8[%c7_97, %c0_98] : memref<132x32xbf16, #tpu.memory_space<vmem>>, vector<100x32xbf16>
    %c0_99 = arith.constant 0 : index
    %c64_100 = arith.constant 64 : index
    %79 = vector.load %arg10[%c0_99, %c64_100] : memref<100x288xbf16, #tpu.memory_space<vmem>>, vector<100x32xbf16>
    tpu.vector_store %arg10[%c0_99, %c64_100], %78 {strides = array<i32>} : memref<100x288xbf16, #tpu.memory_space<vmem>>, vector<100x32xbf16>,
    %c15_101 = arith.constant 15 : index
    %c0_102 = arith.constant 0 : index
    %80 = vector.load %arg8[%c15_101, %c0_102] : memref<132x32xbf16, #tpu.memory_space<vmem>>, vector<100x32xbf16>
    %c0_103 = arith.constant 0 : index
    %c96_104 = arith.constant 96 : index
    %81 = vector.load %arg10[%c0_103, %c96_104] : memref<100x288xbf16, #tpu.memory_space<vmem>>, vector<100x32xbf16>
    tpu.vector_store %arg10[%c0_103, %c96_104], %80 {strides = array<i32>} : memref<100x288xbf16, #tpu.memory_space<vmem>>, vector<100x32xbf16>,
    %c16_105 = arith.constant 16 : index
    %c0_106 = arith.constant 0 : index
    %82 = vector.load %arg8[%c16_105, %c0_106] : memref<132x32xbf16, #tpu.memory_space<vmem>>, vector<100x32xbf16>
    %c0_107 = arith.constant 0 : index
    %c128_108 = arith.constant 128 : index
    %83 = vector.load %arg10[%c0_107, %c128_108] : memref<100x288xbf16, #tpu.memory_space<vmem>>, vector<100x32xbf16>
    tpu.vector_store %arg10[%c0_107, %c128_108], %82 {strides = array<i32>} : memref<100x288xbf16, #tpu.memory_space<vmem>>, vector<100x32xbf16>,
    %c17_109 = arith.constant 17 : index
    %c0_110 = arith.constant 0 : index
    %84 = vector.load %arg8[%c17_109, %c0_110] : memref<132x32xbf16, #tpu.memory_space<vmem>>, vector<100x32xbf16>
    %c0_111 = arith.constant 0 : index
    %c160_112 = arith.constant 160 : index
    %85 = vector.load %arg10[%c0_111, %c160_112] : memref<100x288xbf16, #tpu.memory_space<vmem>>, vector<100x32xbf16>
    tpu.vector_store %arg10[%c0_111, %c160_112], %84 {strides = array<i32>} : memref<100x288xbf16, #tpu.memory_space<vmem>>, vector<100x32xbf16>,
    %c25_113 = arith.constant 25 : index
    %c0_114 = arith.constant 0 : index
    %86 = vector.load %arg8[%c25_113, %c0_114] : memref<132x32xbf16, #tpu.memory_space<vmem>>, vector<100x32xbf16>
    %c0_115 = arith.constant 0 : index
    %c192_116 = arith.constant 192 : index
    %87 = vector.load %arg10[%c0_115, %c192_116] : memref<100x288xbf16, #tpu.memory_space<vmem>>, vector<100x32xbf16>
    tpu.vector_store %arg10[%c0_115, %c192_116], %86 {strides = array<i32>} : memref<100x288xbf16, #tpu.memory_space<vmem>>, vector<100x32xbf16>,
    %c26_117 = arith.constant 26 : index
    %c0_118 = arith.constant 0 : index
    %88 = vector.load %arg8[%c26_117, %c0_118] : memref<132x32xbf16, #tpu.memory_space<vmem>>, vector<100x32xbf16>
    %c0_119 = arith.constant 0 : index
    %c224_120 = arith.constant 224 : index
    %89 = vector.load %arg10[%c0_119, %c224_120] : memref<100x288xbf16, #tpu.memory_space<vmem>>, vector<100x32xbf16>
    tpu.vector_store %arg10[%c0_119, %c224_120], %88 {strides = array<i32>} : memref<100x288xbf16, #tpu.memory_space<vmem>>, vector<100x32xbf16>,
    %c27_121 = arith.constant 27 : index
    %c0_122 = arith.constant 0 : index
    %90 = vector.load %arg8[%c27_121, %c0_122] : memref<132x32xbf16, #tpu.memory_space<vmem>>, vector<100x32xbf16>
    %c0_123 = arith.constant 0 : index
    %c256_124 = arith.constant 256 : index
    %91 = vector.load %arg10[%c0_123, %c256_124] : memref<100x288xbf16, #tpu.memory_space<vmem>>, vector<100x32xbf16>
    tpu.vector_store %arg10[%c0_123, %c256_124], %90 {strides = array<i32>} : memref<100x288xbf16, #tpu.memory_space<vmem>>, vector<100x32xbf16>,
    %c0_125 = arith.constant 0 : index
    %c0_126 = arith.constant 0 : index
    %92 = vector.load %arg10[%c0_125, %c0_126] : memref<100x288xbf16, #tpu.memory_space<vmem>>, vector<100x288xbf16>
    %c2 = arith.constant 2 : index
    %c0_127 = arith.constant 0 : index
    %c0_128 = arith.constant 0 : index
    %93 = vector.load %arg3[%c2, %c0_127, %c0_128] : memref<4x288x32xbf16, #tpu.memory_space<vmem>>, vector<1x288x32xbf16>
    %94 = vector.shape_cast %93 : vector<1x288x32xbf16> to vector<288x32xbf16>
    %cst_129 = arith.constant dense<0.000000e+00> : vector<100x32xf32>
    %95 = tpu.matmul %92, %94, %cst_129 {dimension_numbers = #tpu.dot_dimension_numbers<[1], [0], [0], [1], [0, 0, 1, 1], [], []>} : vector<100x288xbf16>, vector<288x32xbf16>, vector<100x32xf32> -> vector<100x32xf32>
    %c2_130 = arith.constant 2 : index
    %c0_131 = arith.constant 0 : index
    %c0_132 = arith.constant 0 : index
    %96 = vector.load %arg4[%c2_130, %c0_131, %c0_132] : memref<4x1x32xf32, #tpu.memory_space<vmem>>, vector<1x1x32xf32>
    %97 = vector.shape_cast %96 : vector<1x1x32xf32> to vector<1x32xf32>
    %98 = vector.broadcast %97 : vector<1x32xf32> to vector<100x32xf32>
    %99 = arith.addf %95, %98 : vector<100x32xf32>
    %cst_133 = arith.constant 0.000000e+00 : f32
    %100 = vector.broadcast %cst_133 : f32 to vector<100x32xf32>
    %101 = arith.maximumf %99, %100 : vector<100x32xf32>
    %102 = arith.mulf %101, %8 : vector<100x32xf32>
    %103 = arith.truncf %102 : vector<100x32xf32> to vector<100x32xbf16>
    %c16_134 = arith.constant 16 : index
    %c0_135 = arith.constant 0 : index
    %104 = vector.load %arg9[%c16_134, %c0_135] : memref<132x32xbf16, #tpu.memory_space<vmem>>, vector<100x32xbf16>
    tpu.vector_store %arg9[%c16_134, %c0_135], %103 {strides = array<i32>} : memref<132x32xbf16, #tpu.memory_space<vmem>>, vector<100x32xbf16>,
    %c5_136 = arith.constant 5 : index
    %c0_137 = arith.constant 0 : index
    %105 = vector.load %arg9[%c5_136, %c0_137] : memref<132x32xbf16, #tpu.memory_space<vmem>>, vector<100x32xbf16>
    %c0_138 = arith.constant 0 : index
    %c0_139 = arith.constant 0 : index
    %106 = vector.load %arg10[%c0_138, %c0_139] : memref<100x288xbf16, #tpu.memory_space<vmem>>, vector<100x32xbf16>
    tpu.vector_store %arg10[%c0_138, %c0_139], %105 {strides = array<i32>} : memref<100x288xbf16, #tpu.memory_space<vmem>>, vector<100x32xbf16>,
    %c6_140 = arith.constant 6 : index
    %c0_141 = arith.constant 0 : index
    %107 = vector.load %arg9[%c6_140, %c0_141] : memref<132x32xbf16, #tpu.memory_space<vmem>>, vector<100x32xbf16>
    %c0_142 = arith.constant 0 : index
    %c32_143 = arith.constant 32 : index
    %108 = vector.load %arg10[%c0_142, %c32_143] : memref<100x288xbf16, #tpu.memory_space<vmem>>, vector<100x32xbf16>
    tpu.vector_store %arg10[%c0_142, %c32_143], %107 {strides = array<i32>} : memref<100x288xbf16, #tpu.memory_space<vmem>>, vector<100x32xbf16>,
    %c7_144 = arith.constant 7 : index
    %c0_145 = arith.constant 0 : index
    %109 = vector.load %arg9[%c7_144, %c0_145] : memref<132x32xbf16, #tpu.memory_space<vmem>>, vector<100x32xbf16>
    %c0_146 = arith.constant 0 : index
    %c64_147 = arith.constant 64 : index
    %110 = vector.load %arg10[%c0_146, %c64_147] : memref<100x288xbf16, #tpu.memory_space<vmem>>, vector<100x32xbf16>
    tpu.vector_store %arg10[%c0_146, %c64_147], %109 {strides = array<i32>} : memref<100x288xbf16, #tpu.memory_space<vmem>>, vector<100x32xbf16>,
    %c15_148 = arith.constant 15 : index
    %c0_149 = arith.constant 0 : index
    %111 = vector.load %arg9[%c15_148, %c0_149] : memref<132x32xbf16, #tpu.memory_space<vmem>>, vector<100x32xbf16>
    %c0_150 = arith.constant 0 : index
    %c96_151 = arith.constant 96 : index
    %112 = vector.load %arg10[%c0_150, %c96_151] : memref<100x288xbf16, #tpu.memory_space<vmem>>, vector<100x32xbf16>
    tpu.vector_store %arg10[%c0_150, %c96_151], %111 {strides = array<i32>} : memref<100x288xbf16, #tpu.memory_space<vmem>>, vector<100x32xbf16>,
    %c16_152 = arith.constant 16 : index
    %c0_153 = arith.constant 0 : index
    %113 = vector.load %arg9[%c16_152, %c0_153] : memref<132x32xbf16, #tpu.memory_space<vmem>>, vector<100x32xbf16>
    %c0_154 = arith.constant 0 : index
    %c128_155 = arith.constant 128 : index
    %114 = vector.load %arg10[%c0_154, %c128_155] : memref<100x288xbf16, #tpu.memory_space<vmem>>, vector<100x32xbf16>
    tpu.vector_store %arg10[%c0_154, %c128_155], %113 {strides = array<i32>} : memref<100x288xbf16, #tpu.memory_space<vmem>>, vector<100x32xbf16>,
    %c17_156 = arith.constant 17 : index
    %c0_157 = arith.constant 0 : index
    %115 = vector.load %arg9[%c17_156, %c0_157] : memref<132x32xbf16, #tpu.memory_space<vmem>>, vector<100x32xbf16>
    %c0_158 = arith.constant 0 : index
    %c160_159 = arith.constant 160 : index
    %116 = vector.load %arg10[%c0_158, %c160_159] : memref<100x288xbf16, #tpu.memory_space<vmem>>, vector<100x32xbf16>
    tpu.vector_store %arg10[%c0_158, %c160_159], %115 {strides = array<i32>} : memref<100x288xbf16, #tpu.memory_space<vmem>>, vector<100x32xbf16>,
    %c25_160 = arith.constant 25 : index
    %c0_161 = arith.constant 0 : index
    %117 = vector.load %arg9[%c25_160, %c0_161] : memref<132x32xbf16, #tpu.memory_space<vmem>>, vector<100x32xbf16>
    %c0_162 = arith.constant 0 : index
    %c192_163 = arith.constant 192 : index
    %118 = vector.load %arg10[%c0_162, %c192_163] : memref<100x288xbf16, #tpu.memory_space<vmem>>, vector<100x32xbf16>
    tpu.vector_store %arg10[%c0_162, %c192_163], %117 {strides = array<i32>} : memref<100x288xbf16, #tpu.memory_space<vmem>>, vector<100x32xbf16>,
    %c26_164 = arith.constant 26 : index
    %c0_165 = arith.constant 0 : index
    %119 = vector.load %arg9[%c26_164, %c0_165] : memref<132x32xbf16, #tpu.memory_space<vmem>>, vector<100x32xbf16>
    %c0_166 = arith.constant 0 : index
    %c224_167 = arith.constant 224 : index
    %120 = vector.load %arg10[%c0_166, %c224_167] : memref<100x288xbf16, #tpu.memory_space<vmem>>, vector<100x32xbf16>
    tpu.vector_store %arg10[%c0_166, %c224_167], %119 {strides = array<i32>} : memref<100x288xbf16, #tpu.memory_space<vmem>>, vector<100x32xbf16>,
    %c27_168 = arith.constant 27 : index
    %c0_169 = arith.constant 0 : index
    %121 = vector.load %arg9[%c27_168, %c0_169] : memref<132x32xbf16, #tpu.memory_space<vmem>>, vector<100x32xbf16>
    %c0_170 = arith.constant 0 : index
    %c256_171 = arith.constant 256 : index
    %122 = vector.load %arg10[%c0_170, %c256_171] : memref<100x288xbf16, #tpu.memory_space<vmem>>, vector<100x32xbf16>
    tpu.vector_store %arg10[%c0_170, %c256_171], %121 {strides = array<i32>} : memref<100x288xbf16, #tpu.memory_space<vmem>>, vector<100x32xbf16>,
    %c0_172 = arith.constant 0 : index
    %c0_173 = arith.constant 0 : index
    %123 = vector.load %arg10[%c0_172, %c0_173] : memref<100x288xbf16, #tpu.memory_space<vmem>>, vector<100x288xbf16>
    %c3 = arith.constant 3 : index
    %c0_174 = arith.constant 0 : index
    %c0_175 = arith.constant 0 : index
    %124 = vector.load %arg3[%c3, %c0_174, %c0_175] : memref<4x288x32xbf16, #tpu.memory_space<vmem>>, vector<1x288x32xbf16>
    %125 = vector.shape_cast %124 : vector<1x288x32xbf16> to vector<288x32xbf16>
    %cst_176 = arith.constant dense<0.000000e+00> : vector<100x32xf32>
    %126 = tpu.matmul %123, %125, %cst_176 {dimension_numbers = #tpu.dot_dimension_numbers<[1], [0], [0], [1], [0, 0, 1, 1], [], []>} : vector<100x288xbf16>, vector<288x32xbf16>, vector<100x32xf32> -> vector<100x32xf32>
    %c3_177 = arith.constant 3 : index
    %c0_178 = arith.constant 0 : index
    %c0_179 = arith.constant 0 : index
    %127 = vector.load %arg4[%c3_177, %c0_178, %c0_179] : memref<4x1x32xf32, #tpu.memory_space<vmem>>, vector<1x1x32xf32>
    %128 = vector.shape_cast %127 : vector<1x1x32xf32> to vector<1x32xf32>
    %129 = vector.broadcast %128 : vector<1x32xf32> to vector<100x32xf32>
    %130 = arith.addf %126, %129 : vector<100x32xf32>
    %c16_180 = arith.constant 16 : index
    %c0_181 = arith.constant 0 : index
    %131 = vector.load %arg8[%c16_180, %c0_181] : memref<132x32xbf16, #tpu.memory_space<vmem>>, vector<100x32xbf16>
    %132 = arith.extf %131 : vector<100x32xbf16> to vector<100x32xf32>
    %133 = arith.addf %130, %132 : vector<100x32xf32>
    %cst_182 = arith.constant 0.000000e+00 : f32
    %134 = vector.broadcast %cst_182 : f32 to vector<100x32xf32>
    %135 = arith.maximumf %133, %134 : vector<100x32xf32>
    %136 = arith.mulf %135, %8 : vector<100x32xf32>
    %137 = arith.truncf %136 : vector<100x32xf32> to vector<100x32xbf16>
    %c16_183 = arith.constant 16 : index
    %c0_184 = arith.constant 0 : index
    %138 = vector.load %arg8[%c16_183, %c0_184] : memref<132x32xbf16, #tpu.memory_space<vmem>>, vector<100x32xbf16>
    tpu.vector_store %arg8[%c16_183, %c0_184], %137 {strides = array<i32>} : memref<132x32xbf16, #tpu.memory_space<vmem>>, vector<100x32xbf16>,
    %c16_185 = arith.constant 16 : index
    %c0_186 = arith.constant 0 : index
    %139 = vector.load %arg8[%c16_185, %c0_186] : memref<132x32xbf16, #tpu.memory_space<vmem>>, vector<100x32xbf16>
    %c0_187 = arith.constant 0 : index
    %c0_188 = arith.constant 0 : index
    %140 = vector.load %arg5[%c0_187, %c0_188] : memref<32x32xbf16, #tpu.memory_space<vmem>>, vector<32x32xbf16>
    %cst_189 = arith.constant dense<0.000000e+00> : vector<100x32xf32>
    %141 = tpu.matmul %139, %140, %cst_189 {dimension_numbers = #tpu.dot_dimension_numbers<[1], [0], [0], [1], [0, 0, 1, 1], [], []>} : vector<100x32xbf16>, vector<32x32xbf16>, vector<100x32xf32> -> vector<100x32xf32>
    %c0_190 = arith.constant 0 : index
    %c0_191 = arith.constant 0 : index
    %142 = vector.load %arg6[%c0_190, %c0_191] : memref<1x32xf32, #tpu.memory_space<vmem>>, vector<1x32xf32>
    %143 = vector.broadcast %142 : vector<1x32xf32> to vector<100x32xf32>
    %144 = arith.addf %141, %143 : vector<100x32xf32>
    %cst_192 = arith.constant 0.000000e+00 : f32
    %145 = vector.broadcast %cst_192 : f32 to vector<100x32xf32>
    %146 = arith.maximumf %144, %145 : vector<100x32xf32>
    %147 = arith.truncf %146 : vector<100x32xf32> to vector<100x32xbf16>
    %c0_193 = arith.constant 0 : index
    %c0_194 = arith.constant 0 : index
    %c0_195 = arith.constant 0 : index
    %148 = vector.load %arg7[%c0_193, %c0_194, %c0_195] : memref<1x100x32xbf16, #tpu.memory_space<vmem>>, vector<1x100x32xbf16>
    %149 = vector.shape_cast %148 : vector<1x100x32xbf16> to vector<100x32xbf16>
    %150 = vector.shape_cast %147 : vector<100x32xbf16> to vector<1x100x32xbf16>
    tpu.vector_store %arg7[%c0_193, %c0_194, %c0_195], %150 {strides = array<i32>} : memref<1x100x32xbf16, #tpu.memory_space<vmem>>, vector<1x100x32xbf16>,
    return
  }
  func.func @transform_0(%arg0: i32) -> (i32, i32, i32) {
    %c0_i32 = arith.constant 0 : i32
    %c0_i32_0 = arith.constant 0 : i32
    %c0_i32_1 = arith.constant 0 : i32
    return %arg0, %c0_i32, %c0_i32_0 : i32, i32, i32
  }
  func.func @transform_1(%arg0: i32) -> (i32, i32, i32) {
    %c0_i32 = arith.constant 0 : i32
    %c0_i32_0 = arith.constant 0 : i32
    %c0_i32_1 = arith.constant 0 : i32
    return %arg0, %c0_i32, %c0_i32_0 : i32, i32, i32
  }
  func.func @transform_2(%arg0: i32) -> (i32, i32, i32) {
    %c0_i32 = arith.constant 0 : i32
    %c0_i32_0 = arith.constant 0 : i32
    %c0_i32_1 = arith.constant 0 : i32
    %c0_i32_2 = arith.constant 0 : i32
    return %c0_i32, %c0_i32_0, %c0_i32_1 : i32, i32, i32
  }
  func.func @transform_3(%arg0: i32) -> (i32, i32, i32) {
    %c0_i32 = arith.constant 0 : i32
    %c0_i32_0 = arith.constant 0 : i32
    %c0_i32_1 = arith.constant 0 : i32
    %c0_i32_2 = arith.constant 0 : i32
    return %c0_i32, %c0_i32_0, %c0_i32_1 : i32, i32, i32
  }
  func.func @transform_4(%arg0: i32) -> (i32, i32) {
    %c0_i32 = arith.constant 0 : i32
    %c0_i32_0 = arith.constant 0 : i32
    %c0_i32_1 = arith.constant 0 : i32
    return %c0_i32, %c0_i32_0 : i32, i32
  }
  func.func @transform_5(%arg0: i32) -> (i32, i32) {
    %c0_i32 = arith.constant 0 : i32
    %c0_i32_0 = arith.constant 0 : i32
    %c0_i32_1 = arith.constant 0 : i32
    return %c0_i32, %c0_i32_0 : i32, i32
  }
  func.func @transform_6(%arg0: i32) -> (i32, i32, i32) {
    %c0_i32 = arith.constant 0 : i32
    %c0_i32_0 = arith.constant 0 : i32
    %c0_i32_1 = arith.constant 0 : i32
    return %arg0, %c0_i32, %c0_i32_0 : i32, i32, i32
  }
}

module attributes {stable_mosaic.version = 11 : i64} {
  func.func @_heads_kernel(%arg0: i32, %arg1: memref<2x1024xbf16, #tpu.memory_space<vmem>>, %arg2: memref<2x1024xbf16, #tpu.memory_space<vmem>>, %arg3: memref<1024x32xbf16, #tpu.memory_space<vmem>>, %arg4: memref<1x32xf32, #tpu.memory_space<vmem>>, %arg5: memref<1024x32xbf16, #tpu.memory_space<vmem>>, %arg6: memref<1x32xf32, #tpu.memory_space<vmem>>, %arg7: memref<64x27xbf16, #tpu.memory_space<vmem>>, %arg8: memref<1x21xf32, #tpu.memory_space<vmem>>, %arg9: memref<1x6xf32, #tpu.memory_space<vmem>>, %arg10: memref<2x21xf32, #tpu.memory_space<vmem>>, %arg11: memref<2x6xf32, #tpu.memory_space<vmem>>) attributes {dimension_semantics = [#tpu.dimension_semantics<arbitrary>], iteration_bounds = array<i64: 1>, scalar_prefetch = 0 : i64, scratch_operands = 0 : i64, tpu.core_type = #tpu.core_type<tc>, window_params = [{pipeline_mode = #tpu.pipeline_mode<synchronous>, transform_indices = @transform_0, window_bounds = array<i64: 2, 1024>}, {pipeline_mode = #tpu.pipeline_mode<synchronous>, transform_indices = @transform_1, window_bounds = array<i64: 2, 1024>}, {pipeline_mode = #tpu.pipeline_mode<synchronous>, transform_indices = @transform_2, window_bounds = array<i64: 1024, 32>}, {pipeline_mode = #tpu.pipeline_mode<synchronous>, transform_indices = @transform_3, window_bounds = array<i64: 1, 32>}, {pipeline_mode = #tpu.pipeline_mode<synchronous>, transform_indices = @transform_4, window_bounds = array<i64: 1024, 32>}, {pipeline_mode = #tpu.pipeline_mode<synchronous>, transform_indices = @transform_5, window_bounds = array<i64: 1, 32>}, {pipeline_mode = #tpu.pipeline_mode<synchronous>, transform_indices = @transform_6, window_bounds = array<i64: 64, 27>}, {pipeline_mode = #tpu.pipeline_mode<synchronous>, transform_indices = @transform_7, window_bounds = array<i64: 1, 21>}, {pipeline_mode = #tpu.pipeline_mode<synchronous>, transform_indices = @transform_8, window_bounds = array<i64: 1, 6>}, {pipeline_mode = #tpu.pipeline_mode<synchronous>, transform_indices = @transform_9, window_bounds = array<i64: 2, 21>}, {pipeline_mode = #tpu.pipeline_mode<synchronous>, transform_indices = @transform_10, window_bounds = array<i64: 2, 6>}]} {
    %c0 = arith.constant 0 : index
    %c0_0 = arith.constant 0 : index
    %0 = vector.load %arg1[%c0, %c0_0] : memref<2x1024xbf16, #tpu.memory_space<vmem>>, vector<2x1024xbf16>
    %c0_1 = arith.constant 0 : index
    %c0_2 = arith.constant 0 : index
    %1 = vector.load %arg3[%c0_1, %c0_2] : memref<1024x32xbf16, #tpu.memory_space<vmem>>, vector<1024x32xbf16>
    %cst = arith.constant dense<0.000000e+00> : vector<2x32xf32>
    %2 = tpu.matmul %0, %1, %cst {dimension_numbers = #tpu.dot_dimension_numbers<[1], [0], [0], [1], [0, 0, 1, 1], [], []>} : vector<2x1024xbf16>, vector<1024x32xbf16>, vector<2x32xf32> -> vector<2x32xf32>
    %c0_3 = arith.constant 0 : index
    %c0_4 = arith.constant 0 : index
    %3 = vector.load %arg4[%c0_3, %c0_4] : memref<1x32xf32, #tpu.memory_space<vmem>>, vector<1x32xf32>
    %4 = vector.broadcast %3 : vector<1x32xf32> to vector<2x32xf32>
    %5 = arith.addf %2, %4 : vector<2x32xf32>
    %cst_5 = arith.constant 0.000000e+00 : f32
    %6 = vector.broadcast %cst_5 : f32 to vector<2x32xf32>
    %7 = arith.maximumf %5, %6 : vector<2x32xf32>
    %c0_6 = arith.constant 0 : index
    %c0_7 = arith.constant 0 : index
    %8 = vector.load %arg2[%c0_6, %c0_7] : memref<2x1024xbf16, #tpu.memory_space<vmem>>, vector<2x1024xbf16>
    %c0_8 = arith.constant 0 : index
    %c0_9 = arith.constant 0 : index
    %9 = vector.load %arg5[%c0_8, %c0_9] : memref<1024x32xbf16, #tpu.memory_space<vmem>>, vector<1024x32xbf16>
    %cst_10 = arith.constant dense<0.000000e+00> : vector<2x32xf32>
    %10 = tpu.matmul %8, %9, %cst_10 {dimension_numbers = #tpu.dot_dimension_numbers<[1], [0], [0], [1], [0, 0, 1, 1], [], []>} : vector<2x1024xbf16>, vector<1024x32xbf16>, vector<2x32xf32> -> vector<2x32xf32>
    %c0_11 = arith.constant 0 : index
    %c0_12 = arith.constant 0 : index
    %11 = vector.load %arg6[%c0_11, %c0_12] : memref<1x32xf32, #tpu.memory_space<vmem>>, vector<1x32xf32>
    %12 = vector.broadcast %11 : vector<1x32xf32> to vector<2x32xf32>
    %13 = arith.addf %10, %12 : vector<2x32xf32>
    %cst_13 = arith.constant 0.000000e+00 : f32
    %14 = vector.broadcast %cst_13 : f32 to vector<2x32xf32>
    %15 = arith.maximumf %13, %14 : vector<2x32xf32>
    %16 = tpu.concatenate %7, %15 in 1 : vector<2x32xf32>, vector<2x32xf32> -> vector<2x64xf32>
    %17 = arith.truncf %16 : vector<2x64xf32> to vector<2x64xbf16>
    %c0_14 = arith.constant 0 : index
    %c0_15 = arith.constant 0 : index
    %18 = vector.load %arg7[%c0_14, %c0_15] : memref<64x27xbf16, #tpu.memory_space<vmem>>, vector<64x27xbf16>
    %cst_16 = arith.constant dense<0.000000e+00> : vector<2x27xf32>
    %19 = tpu.matmul %17, %18, %cst_16 {dimension_numbers = #tpu.dot_dimension_numbers<[1], [0], [0], [1], [0, 0, 1, 1], [], []>} : vector<2x64xbf16>, vector<64x27xbf16>, vector<2x27xf32> -> vector<2x27xf32>
    %20 = vector.extract_strided_slice %19 {offsets = [0, 0], sizes = [2, 21], strides = [1, 1]} : vector<2x27xf32> to vector<2x21xf32>
    %c0_17 = arith.constant 0 : index
    %c0_18 = arith.constant 0 : index
    %21 = vector.load %arg8[%c0_17, %c0_18] : memref<1x21xf32, #tpu.memory_space<vmem>>, vector<1x21xf32>
    %22 = vector.broadcast %21 : vector<1x21xf32> to vector<2x21xf32>
    %23 = arith.addf %20, %22 : vector<2x21xf32>
    %c0_19 = arith.constant 0 : index
    %c0_20 = arith.constant 0 : index
    %24 = vector.load %arg10[%c0_19, %c0_20] : memref<2x21xf32, #tpu.memory_space<vmem>>, vector<2x21xf32>
    tpu.vector_store %arg10[%c0_19, %c0_20], %23 {strides = array<i32>} : memref<2x21xf32, #tpu.memory_space<vmem>>, vector<2x21xf32>,
    %25 = vector.extract_strided_slice %19 {offsets = [0, 21], sizes = [2, 6], strides = [1, 1]} : vector<2x27xf32> to vector<2x6xf32>
    %c0_21 = arith.constant 0 : index
    %c0_22 = arith.constant 0 : index
    %26 = vector.load %arg9[%c0_21, %c0_22] : memref<1x6xf32, #tpu.memory_space<vmem>>, vector<1x6xf32>
    %27 = vector.broadcast %26 : vector<1x6xf32> to vector<2x6xf32>
    %28 = arith.addf %25, %27 : vector<2x6xf32>
    %c0_23 = arith.constant 0 : index
    %c0_24 = arith.constant 0 : index
    %29 = vector.load %arg11[%c0_23, %c0_24] : memref<2x6xf32, #tpu.memory_space<vmem>>, vector<2x6xf32>
    tpu.vector_store %arg11[%c0_23, %c0_24], %28 {strides = array<i32>} : memref<2x6xf32, #tpu.memory_space<vmem>>, vector<2x6xf32>,
    return
  }
  func.func @transform_0(%arg0: i32) -> (i32, i32) {
    %c0_i32 = arith.constant 0 : i32
    %c0_i32_0 = arith.constant 0 : i32
    %c0_i32_1 = arith.constant 0 : i32
    return %c0_i32, %c0_i32_0 : i32, i32
  }
  func.func @transform_1(%arg0: i32) -> (i32, i32) {
    %c0_i32 = arith.constant 0 : i32
    %c0_i32_0 = arith.constant 0 : i32
    %c0_i32_1 = arith.constant 0 : i32
    return %c0_i32, %c0_i32_0 : i32, i32
  }
  func.func @transform_2(%arg0: i32) -> (i32, i32) {
    %c0_i32 = arith.constant 0 : i32
    %c0_i32_0 = arith.constant 0 : i32
    %c0_i32_1 = arith.constant 0 : i32
    return %c0_i32, %c0_i32_0 : i32, i32
  }
  func.func @transform_3(%arg0: i32) -> (i32, i32) {
    %c0_i32 = arith.constant 0 : i32
    %c0_i32_0 = arith.constant 0 : i32
    %c0_i32_1 = arith.constant 0 : i32
    return %c0_i32, %c0_i32_0 : i32, i32
  }
  func.func @transform_4(%arg0: i32) -> (i32, i32) {
    %c0_i32 = arith.constant 0 : i32
    %c0_i32_0 = arith.constant 0 : i32
    %c0_i32_1 = arith.constant 0 : i32
    return %c0_i32, %c0_i32_0 : i32, i32
  }
  func.func @transform_5(%arg0: i32) -> (i32, i32) {
    %c0_i32 = arith.constant 0 : i32
    %c0_i32_0 = arith.constant 0 : i32
    %c0_i32_1 = arith.constant 0 : i32
    return %c0_i32, %c0_i32_0 : i32, i32
  }
  func.func @transform_6(%arg0: i32) -> (i32, i32) {
    %c0_i32 = arith.constant 0 : i32
    %c0_i32_0 = arith.constant 0 : i32
    %c0_i32_1 = arith.constant 0 : i32
    return %c0_i32, %c0_i32_0 : i32, i32
  }
  func.func @transform_7(%arg0: i32) -> (i32, i32) {
    %c0_i32 = arith.constant 0 : i32
    %c0_i32_0 = arith.constant 0 : i32
    %c0_i32_1 = arith.constant 0 : i32
    return %c0_i32, %c0_i32_0 : i32, i32
  }
  func.func @transform_8(%arg0: i32) -> (i32, i32) {
    %c0_i32 = arith.constant 0 : i32
    %c0_i32_0 = arith.constant 0 : i32
    %c0_i32_1 = arith.constant 0 : i32
    return %c0_i32, %c0_i32_0 : i32, i32
  }
  func.func @transform_9(%arg0: i32) -> (i32, i32) {
    %c0_i32 = arith.constant 0 : i32
    %c0_i32_0 = arith.constant 0 : i32
    %c0_i32_1 = arith.constant 0 : i32
    return %c0_i32, %c0_i32_0 : i32, i32
  }
  func.func @transform_10(%arg0: i32) -> (i32, i32) {
    %c0_i32 = arith.constant 0 : i32
    %c0_i32_0 = arith.constant 0 : i32
    %c0_i32_1 = arith.constant 0 : i32
    return %c0_i32, %c0_i32_0 : i32, i32
  }
}

</mosaic_0001>

<bundles_post_ra>
// kernel: prediction_forward.3
= control target key start
LH: loop header
LB: loop body
LE: loop exit
PB: predicated region body
PF: predicated region fallthrough
CT: control target
= control target key end

     0   :  { %16 = vsyncpa [#allocation3], 0  ;;  %v178_v28 = vlaneseq  ;;  %v2168_v36 = vmov 1966171168   ;;  %s2675_s0 = inlined_call_operand.vmem [shape: bf16[2,1024], index: 0, kind: input, shape index: {}]   ;;  %s2676_s1 = inlined_call_operand.vmem [shape: bf16[2,1024], index: 1, kind: input, shape index: {}]   ;;  %s2677_s2 = inlined_call_operand.vmem [shape: bf16[1024,32], index: 2, kind: input, shape index: {}]   ;;  %s2678_s3 = inlined_call_operand.vmem [shape: f32[1,32], index: 3, kind: input, shape index: {}]   ;;  %s2679_s4 = inlined_call_operand.vmem [shape: bf16[1024,32], index: 4, kind: input, shape index: {}]   ;;  %s2680_s5 = inlined_call_operand.vmem [shape: f32[1,32], index: 5, kind: input, shape index: {}]   ;;  %s2681_s6 = inlined_call_operand.vmem [shape: bf16[64,27], index: 6, kind: input, shape index: {}]   ;;  %s2682_s7 = inlined_call_operand.vmem [shape: f32[1,21], index: 7, kind: input, shape index: {}]   ;;  %s2683_s8 = inlined_call_operand.vmem [shape: f32[1,6], index: 8, kind: input, shape index: {}]   ;;  %s2684_s9 = inlined_call_operand.hbm [shape: f32[2,21], index: 9, kind: output, shape index: {0}]   ;;  %s2685_s10 = inlined_call_operand.hbm [shape: f32[2,6], index: 10, kind: output, shape index: {1}]  }
   0x1   :  { %v1990_v0 = vld [vmem:[%s2677_s2 + $0x78] sm:$0xff]   ;;  %v1994_v4 = vld [vmem:[%s2677_s2 + $0x70] sm:$0xff]   ;;  %v1998_v8 = vld [vmem:[%s2677_s2 + $0x68] sm:$0xff]   ;;  %v176_v37 = vunpack.c.l.s4 %v2168_v36 }
   0x2   :  { %v1991_v1 = vld [vmem:[%s2677_s2 + $0xf8] sm:$0xff]   ;;  %1789 = vmatprep.subr.bf16.mxu0 %v1990_v0  ;;  %v1995_v5 = vld [vmem:[%s2677_s2 + $0xf0] sm:$0xff]   ;;  %v1999_v9 = vld [vmem:[%s2677_s2 + $0xe8] sm:$0xff]   ;;  %v179_v33 = vshrl.u32 %v178_v28, 7 }
   0x3   :  { %v1992_v2 = vld [vmem:[%s2677_s2 + $0x38] sm:$0xff]   ;;  %1811 = vmatprep.subr.bf16.mxu1 %v1991_v1  ;;  %v1996_v6 = vld [vmem:[%s2677_s2 + $0x30] sm:$0xff]   ;;  %v2000_v10 = vld [vmem:[%s2677_s2 + $0x28] sm:$0xff]   ;;  %v177_v40 = vunpack.c.0.s8 %v176_v37 }
   0x4   :  { %v1993_v3 = vld [vmem:[%s2677_s2 + $0xb8] sm:$0xff]   ;;  %1790 = vmatpush3.bf16.msra.mxu0 %v1992_v2  ;;  %v1997_v7 = vld [vmem:[%s2677_s2 + $0xb0] sm:$0xff]   ;;  %v2001_v11 = vld [vmem:[%s2677_s2 + $0xa8] sm:$0xff]  }
   0x5   :  { %1812 = vmatpush3.bf16.msra.mxu1 %v1993_v3  ;;  %1791 = vmatprep.subr.bf16.mxu0 %v1994_v4  ;;  %v2002_v12 = vld [vmem:[%s2677_s2 + $0x60] sm:$0xff]   ;;  %v2006_v16 = vld [vmem:[%s2677_s2 + $0x58] sm:$0xff]   ;;  %v2010_v20 = vld [vmem:[%s2677_s2 + $0x50] sm:$0xff]   ;;  %v2336_v41 = vsub.s32 %v177_v40, %v179_v33 }
   0x6   :  { %1813 = vmatprep.subr.bf16.mxu1 %v1995_v5  ;;  %v2003_v13 = vld [vmem:[%s2677_s2 + $0xe0] sm:$0xff]   ;;  %v2007_v17 = vld [vmem:[%s2677_s2 + $0xd8] sm:$0xff]   ;;  %v2011_v21 = vld [vmem:[%s2677_s2 + $0xd0] sm:$0xff]  }
   0x7   :  { %v2004_v14 = vld [vmem:[%s2677_s2 + $0x20] sm:$0xff]   ;;  %v2008_v18 = vld [vmem:[%s2677_s2 + $0x18] sm:$0xff]   ;;  %v2012_v22 = vld [vmem:[%s2677_s2 + $0x10] sm:$0xff]  }
   0x8   :  { %1792 = vmatpush3.bf16.msra.mxu0 %v1996_v6  ;;  %v2005_v15 = vld [vmem:[%s2677_s2 + $0xa0] sm:$0xff]   ;;  %v2009_v19 = vld [vmem:[%s2677_s2 + $0x98] sm:$0xff]   ;;  %v2013_v23 = vld [vmem:[%s2677_s2 + $0x90] sm:$0xff]  }
   0x9   :  { %1814 = vmatpush3.bf16.msra.mxu1 %v1997_v7  ;;  %1793 = vmatprep.subr.bf16.mxu0 %v1998_v8  ;;  %v2014_v24 = vld [vmem:[%s2677_s2 + $0x48] sm:$0xff]   ;;  %v2018_v29 = vld [vmem:[%s2677_s2 + $0x40] sm:$0xff]   ;;  %v2023_v35 = vld [vmem:[%s2677_s2 + $0x178] sm:$0xff]  }
   0xa   :  { %1815 = vmatprep.subr.bf16.mxu1 %v1999_v9  ;;  %v2015_v25 = vld [vmem:[%s2677_s2 + $0xc8] sm:$0xff]   ;;  %v2019_v30 = vld [vmem:[%s2677_s2 + $0xc0] sm:$0xff]   ;;  %v2024_v38 = vld [vmem:[%s2677_s2 + $0x1f8] sm:$0xff]  }
   0xb   :  { %v2016_v26 = vld [vmem:[%s2677_s2 + $0x8] sm:$0xff]   ;;  %v2020_v31 = vld [vmem:[%s2677_s2] sm:$0xff]   ;;  %v2025_v47 = vld [vmem:[%s2677_s2 + $0x138] sm:$0xff]  }
   0xc   :  { %1794 = vmatpush3.bf16.msra.mxu0 %v2000_v10  ;;  %v2017_v27 = vld [vmem:[%s2677_s2 + $0x88] sm:$0xff]   ;;  %v2021_v32 = vld [vmem:[%s2677_s2 + $0x80] sm:$0xff]   ;;  %v2026_v49 = vld [vmem:[%s2677_s2 + $0x1b8] sm:$0xff]  }
   0xd   :  { %1816 = vmatpush3.bf16.msra.mxu1 %v2001_v11  ;;  %1795 = vmatprep.subr.bf16.mxu0 %v2002_v12  ;;  %v37_v34 = vld [vmem:[%s2675_s0] sm:$0xff]  ;;  %v2027_v52 = vld [vmem:[%s2677_s2 + $0x170] sm:$0xff]   ;;  %v2031_v58 = vld [vmem:[%s2677_s2 + $0x168] sm:$0xff]  }
   0xe   :  { %1817 = vmatprep.subr.bf16.mxu1 %v2003_v13  ;;  %v174_v39 = vcombine.high %v37_v34, %v37_v34  ;;  %v181_v42 = vrot.slane %v37_v34, %v2336_v41  ;;  %v2028_v54 = vld [vmem:[%s2677_s2 + $0x1f0] sm:$0xff]   ;;  %v2032_v59 = vld [vmem:[%s2677_s2 + $0x1e8] sm:$0xff]   ;;  %v2035_v62 = vld [vmem:[%s2677_s2 + $0x160] sm:$0xff]  }
   0xf   :  { %v2029_v55 = vld [vmem:[%s2677_s2 + $0x130] sm:$0xff]   ;;  %v2033_v60 = vld [vmem:[%s2677_s2 + $0x128] sm:$0xff]   ;;  %v2036_v63 = vld [vmem:[%s2677_s2 + $0x1e0] sm:$0xff]  }
  0x10   :  { %1796 = vmatpush3.bf16.msra.mxu0 %v2004_v14  ;;  %v2340_v43 = vrot.slane %v174_v39, %v2336_v41  ;;  %v189_v44 = vcombine.high %v181_v42, %v181_v42  ;;  %v197_v45 = vrot.slane %v181_v42, %v2336_v41  ;;  %v2030_v57 = vld [vmem:[%s2677_s2 + $0x1b0] sm:$0xff]   ;;  %v2034_v61 = vld [vmem:[%s2677_s2 + $0x1a8] sm:$0xff]   ;;  %v2037_v0 = vld [vmem:[%s2677_s2 + $0x120] sm:$0xff]  }
  0x11   :  { %1818 = vmatpush3.bf16.msra.mxu1 %v2005_v15  ;;  %1797 = vmatprep.subr.bf16.mxu0 %v2006_v16  ;;  %v2038_v1 = vld [vmem:[%s2677_s2 + $0x1a0] sm:$0xff]   ;;  %v2039_v2 = vld [vmem:[%s2677_s2 + $0x158] sm:$0xff]   ;;  %v2043_v6 = vld [vmem:[%s2677_s2 + $0x150] sm:$0xff]  }
  0x12   :  { %1819 = vmatprep.subr.bf16.mxu1 %v2007_v17  ;;  %v190_v46 = vcombine.high %v2340_v43, %v2340_v43  ;;  %v211_v48 = vrot.slane %v189_v44, %v2336_v41  ;;  %v219_v51 = vcombine.high %v197_v45, %v197_v45  ;;  %v2040_v3 = vld [vmem:[%s2677_s2 + $0x1d8] sm:$0xff]   ;;  %v2044_v7 = vld [vmem:[%s2677_s2 + $0x1d0] sm:$0xff]   ;;  %v2047_v10 = vld [vmem:[%s2677_s2 + $0x148] sm:$0xff]  }
  0x13   :  { %v2041_v4 = vld [vmem:[%s2677_s2 + $0x118] sm:$0xff]   ;;  %v2045_v8 = vld [vmem:[%s2677_s2 + $0x110] sm:$0xff]   ;;  %v2048_v11 = vld [vmem:[%s2677_s2 + $0x1c8] sm:$0xff]  }
  0x14   :  { %1798 = vmatpush3.bf16.msra.mxu0 %v2008_v18  ;;  %v218_v50 = vrot.slane %v190_v46, %v2336_v41  ;;  %647 = vmatprep.mubr.bf16.mxu0 %v211_v48  ;;  %v221_v53 = vcombine.high %v211_v48, %v211_v48  ;;  %v2042_v5 = vld [vmem:[%s2677_s2 + $0x198] sm:$0xff]   ;;  %v2046_v9 = vld [vmem:[%s2677_s2 + $0x190] sm:$0xff]   ;;  %v2049_v12 = vld [vmem:[%s2677_s2 + $0x108] sm:$0xff]   ;;  %v204_v18 = vrot.slane %v2340_v43, %v2336_v41 }
  0x15   :  { %1820 = vmatpush3.bf16.msra.mxu1 %v2009_v19  ;;  %1799 = vmatprep.subr.bf16.mxu0 %v2010_v20  ;;  %v2050_v13 = vld [vmem:[%s2677_s2 + $0x188] sm:$0xff]   ;;  %v2051_v14 = vld [vmem:[%s2677_s2 + $0x140] sm:$0xff]   ;;  %v2055_v19 = vld [vmem:[%s2679_s4 + $0x78] sm:$0xff]  }
  0x16   :  { %1821 = vmatprep.subr.bf16.mxu1 %v2011_v21  ;;  %v222_v56 = vcombine.high %v218_v50, %v218_v50  ;;  %687 = vmatprep.mubr.bf16.mxu1 %v221_v53  ;;  %v2052_v15 = vld [vmem:[%s2677_s2 + $0x1c0] sm:$0xff]   ;;  %v2056_v20 = vld [vmem:[%s2679_s4 + $0xf8] sm:$0xff]   ;;  %v2063_v28 = vld [vmem:[%s2679_s4 + $0x68] sm:$0xff]  }
  0x17   :  { %v2053_v16 = vld [vmem:[%s2677_s2 + $0x100] sm:$0xff]   ;;  %v2057_v21 = vld [vmem:[%s2679_s4 + $0x38] sm:$0xff]   ;;  %v2075_v40 = vld [vmem:[%s2679_s4 + $0x50] sm:$0xff]  }
  0x18   :  { %1800 = vmatpush3.bf16.msra.mxu0 %v2012_v22  ;;  %v2054_v17 = vld [vmem:[%s2677_s2 + $0x180] sm:$0xff]   ;;  %v2058_v22 = vld [vmem:[%s2679_s4 + $0xb8] sm:$0xff]   ;;  %v2076_v42 = vld [vmem:[%s2679_s4 + $0xd0] sm:$0xff]  }
  0x19   :  { %1822 = vmatpush3.bf16.msra.mxu1 %v2013_v23  ;;  %1801 = vmatprep.subr.bf16.mxu0 %v2014_v24  ;;  %v220_v23 = vcombine.high %v204_v18, %v204_v18  ;;  %v2059_v24 = vld [vmem:[%s2679_s4 + $0x70] sm:$0xff]   ;;  %v2068_v33 = vld [vmem:[%s2679_s4 + $0xe0] sm:$0xff]   ;;  %v2071_v36 = vld [vmem:[%s2679_s4 + $0x58] sm:$0xff]  }
  0x1a   :  { %1823 = vmatprep.subr.bf16.mxu1 %v2015_v25  ;;  %v2060_v25 = vld [vmem:[%s2679_s4 + $0xf0] sm:$0xff]   ;;  %v2069_v34 = vld [vmem:[%s2679_s4 + $0x20] sm:$0xff]   ;;  %v2072_v37 = vld [vmem:[%s2679_s4 + $0xd8] sm:$0xff]  }
  0x1b   :  { %v2074_v39 = vld [vmem:[%s2679_s4 + $0x98] sm:$0xff]   ;;  %v2077_v43 = vld [vmem:[%s2679_s4 + $0x10] sm:$0xff]   ;;  %v776_v46 = vld [vmem:[%s2676_s1] sm:$0xff] }
  0x1c   :  { %1802 = vmatpush3.bf16.msra.mxu0 %v2016_v26  ;;  %v2061_v26 = vld [vmem:[%s2679_s4 + $0x30] sm:$0xff]   ;;  %v920_v48 = vrot.slane %v776_v46, %v2336_v41 }
  0x1d   :  { %1824 = vmatpush3.bf16.msra.mxu1 %v2017_v27  ;;  %1803 = vmatprep.subr.bf16.mxu0 %v2018_v29  ;;  %v2062_v27 = vld [vmem:[%s2679_s4 + $0xb0] sm:$0xff]   ;;  %v2064_v29 = vld [vmem:[%s2679_s4 + $0xe8] sm:$0xff]  }
  0x1e   :  { %1825 = vmatprep.subr.bf16.mxu1 %v2019_v30  ;;  %v2065_v30 = vld [vmem:[%s2679_s4 + $0x28] sm:$0xff]   ;;  %v2078_v44 = vld [vmem:[%s2679_s4 + $0x90] sm:$0xff]  }
  0x20   :  { %1804 = vmatpush3.bf16.msra.mxu0 %v2020_v31  ;;  %v2066_v31 = vld [vmem:[%s2679_s4 + $0xa8] sm:$0xff]  }
  0x21   :  { %1826 = vmatpush3.bf16.msra.mxu1 %v2021_v32  ;;  %1833 = vmatprep.subr.bf16.mxu0 %v2023_v35  ;;  %v2067_v32 = vld [vmem:[%s2679_s4 + $0x60] sm:$0xff]  }
  0x22   :  { %1855 = vmatprep.subr.bf16.mxu1 %v2024_v38  ;;  %v2070_v35 = vld [vmem:[%s2679_s4 + $0xa0] sm:$0xff]   ;;  %v2073_v38 = vld [vmem:[%s2679_s4 + $0x18] sm:$0xff]  }
  0x23   :  { %648 = vmatmul.mubr.bf16.vlgmr.msra.gmra.mxu0 %v197_v45  ;;  %v2079_v45 = vld [vmem:[%s2679_s4 + $0x48] sm:$0xff]  }
  0x24   :  { %1834 = vmatpush3.bf16.msra.mxu0 %v2025_v47  ;;  %688 = vmatmul.mubr.bf16.vlgmr.msra.gmra.mxu1 %v219_v51  ;;  %v2080_v47 = vld [vmem:[%s2679_s4 + $0xc8] sm:$0xff]  }
  0x25   :  { %1835 = vmatprep.subr.bf16.mxu0 %v2027_v52  ;;  %1856 = vmatpush3.bf16.msra.mxu1 %v2026_v49  ;;  %v913_v49 = vcombine.high %v776_v46, %v776_v46  ;;  %v2082_v51 = vld [vmem:[%s2679_s4 + $0x88] sm:$0xff]   ;;  %v928_v52 = vcombine.high %v920_v48, %v920_v48 }
  0x26   :  { %727 = vmatprep.mubr.bf16.mxu0 %v218_v50  ;;  %1857 = vmatprep.subr.bf16.mxu1 %v2028_v54  ;;  %v2081_v50 = vld [vmem:[%s2679_s4 + $0x8] sm:$0xff]   ;;  %v2083_v54 = vld [vmem:[%s2679_s4 + $0x40] sm:$0xff]  }
  0x27   :  { %767 = vmatprep.mubr.bf16.mxu1 %v222_v56  ;;  %v2528_v53 = vrot.slane %v913_v49, %v2336_v41  ;;  %v950_v56 = vrot.slane %v928_v52, %v2336_v41 }
  0x28   :  { %1836 = vmatpush3.bf16.msra.mxu0 %v2029_v55  ;;  %v2084_v55 = vld [vmem:[%s2679_s4 + $0xc0] sm:$0xff]  }
  0x29   :  { %1837 = vmatprep.subr.bf16.mxu0 %v2031_v58  ;;  %1858 = vmatpush3.bf16.msra.mxu1 %v2030_v57  ;;  %v929_v57 = vcombine.high %v2528_v53, %v2528_v53  ;;  %v2085_v58 = vld [vmem:[%s2679_s4] sm:$0xff]  }
  0x2a   :  { %1859 = vmatprep.subr.bf16.mxu1 %v2032_v59  ;;  %v2086_v59 = vld [vmem:[%s2679_s4 + $0x80] sm:$0xff]  }
  0x2c   :  { %1838 = vmatpush3.bf16.msra.mxu0 %v2033_v60  ;;  %v960_v60 = vcombine.high %v950_v56, %v950_v56 }
  0x2d   :  { %1839 = vmatprep.subr.bf16.mxu0 %v2035_v62  ;;  %1860 = vmatpush3.bf16.msra.mxu1 %v2034_v61  ;;  %v936_v61 = vrot.slane %v920_v48, %v2336_v41  ;;  %v2087_v62 = vld [vmem:[%s2679_s4 + $0x178] sm:$0xff]  }
  0x2e   :  { %1861 = vmatprep.subr.bf16.mxu1 %v2036_v63  ;;  %v2088_v63 = vld [vmem:[%s2679_s4 + $0x1f8] sm:$0xff]  }
  0x30   :  { %1840 = vmatpush3.bf16.msra.mxu0 %v2037_v0  ;;  %v957_v0 = vrot.slane %v929_v57, %v2336_v41 }
  0x31   :  { %1841 = vmatprep.subr.bf16.mxu0 %v2039_v2  ;;  %1862 = vmatpush3.bf16.msra.mxu1 %v2038_v1  ;;  %v2089_v1 = vld [vmem:[%s2679_s4 + $0x138] sm:$0xff]  }
  0x32   :  { %1863 = vmatprep.subr.bf16.mxu1 %v2040_v3  ;;  %v2090_v2 = vld [vmem:[%s2679_s4 + $0x1b8] sm:$0xff]   ;;  %v958_v3 = vcombine.high %v936_v61, %v936_v61 }
  0x34   :  { %1842 = vmatpush3.bf16.msra.mxu0 %v2041_v4  ;;  %v2091_v4 = vld [vmem:[%s2679_s4 + $0x170] sm:$0xff]  }
  0x35   :  { %1843 = vmatprep.subr.bf16.mxu0 %v2043_v6  ;;  %1864 = vmatpush3.bf16.msra.mxu1 %v2042_v5  ;;  %v2092_v5 = vld [vmem:[%s2679_s4 + $0x1f0] sm:$0xff]   ;;  %v961_v6 = vcombine.high %v957_v0, %v957_v0 }
  0x36   :  { %1865 = vmatprep.subr.bf16.mxu1 %v2044_v7  ;;  %v2093_v7 = vld [vmem:[%s2679_s4 + $0x130] sm:$0xff]  }
  0x38   :  { %1844 = vmatpush3.bf16.msra.mxu0 %v2045_v8  ;;  %v2094_v8 = vld [vmem:[%s2679_s4 + $0x1b0] sm:$0xff]  }
  0x39   :  { %1845 = vmatprep.subr.bf16.mxu0 %v2047_v10  ;;  %1866 = vmatpush3.bf16.msra.mxu1 %v2046_v9  ;;  %v2095_v9 = vld [vmem:[%s2679_s4 + $0x168] sm:$0xff]  }
  0x3a   :  { %1867 = vmatprep.subr.bf16.mxu1 %v2048_v11  ;;  %v2096_v10 = vld [vmem:[%s2679_s4 + $0x1e8] sm:$0xff]  }
  0x3b   :  { %v2097_v11 = vld [vmem:[%s2679_s4 + $0x128] sm:$0xff]  }
  0x3c   :  { %1846 = vmatpush3.bf16.msra.mxu0 %v2049_v12  ;;  %v2098_v12 = vld [vmem:[%s2679_s4 + $0x1a8] sm:$0xff]  }
  0x3d   :  { %1847 = vmatprep.subr.bf16.mxu0 %v2051_v14  ;;  %1868 = vmatpush3.bf16.msra.mxu1 %v2050_v13  ;;  %v2099_v13 = vld [vmem:[%s2679_s4 + $0x160] sm:$0xff]  }
  0x3e   :  { %1869 = vmatprep.subr.bf16.mxu1 %v2052_v15  ;;  %v2100_v14 = vld [vmem:[%s2679_s4 + $0x1e0] sm:$0xff]  }
  0x3f   :  { %v2101_v15 = vld [vmem:[%s2679_s4 + $0x120] sm:$0xff]  }
  0x40   :  { %1848 = vmatpush3.bf16.msra.mxu0 %v2053_v16  ;;  %v2102_v16 = vld [vmem:[%s2679_s4 + $0x1a0] sm:$0xff]  }
  0x41   :  { %1877 = vmatprep.subr.bf16.mxu0 %v2055_v19  ;;  %1870 = vmatpush3.bf16.msra.mxu1 %v2054_v17  ;;  %v2103_v17 = vld [vmem:[%s2679_s4 + $0x158] sm:$0xff]  }
  0x42   :  { %1899 = vmatprep.subr.bf16.mxu1 %v2056_v20  ;;  %v2105_v19 = vld [vmem:[%s2679_s4 + $0x118] sm:$0xff]  }
  0x43   :  { %728 = vmatmul.mubr.bf16.vlgmr.msra.gmra.mxu0 %v204_v18  ;;  %v2104_v18 = vld [vmem:[%s2679_s4 + $0x1d8] sm:$0xff]  }
  0x44   :  { %1878 = vmatpush3.bf16.msra.mxu0 %v2057_v21  ;;  %768 = vmatmul.mubr.bf16.vlgmr.msra.gmra.mxu1 %v220_v23  ;;  %v2106_v20 = vld [vmem:[%s2679_s4 + $0x198] sm:$0xff]   ;;  %v2107_v21 = vld [vmem:[%s2679_s4 + $0x150] sm:$0xff]  }
  0x45   :  { %1879 = vmatprep.subr.bf16.mxu0 %v2059_v24  ;;  %1900 = vmatpush3.bf16.msra.mxu1 %v2058_v22  ;;  %v2108_v22 = vld [vmem:[%s2679_s4 + $0x1d0] sm:$0xff]  }
  0x46   :  { %1901 = vmatprep.subr.bf16.mxu1 %v2060_v25  ;;  %1386 = vmatprep.mubr.bf16.mxu0 %v950_v56  ;;  %v2109_v23 = vld [vmem:[%s2679_s4 + $0x110] sm:$0xff]   ;;  %v2111_v25 = vld [vmem:[%s2679_s4 + $0x148] sm:$0xff]  }
  0x47   :  { %1426 = vmatprep.mubr.bf16.mxu1 %v960_v60  ;;  %v2110_v24 = vld [vmem:[%s2679_s4 + $0x190] sm:$0xff]  }
  0x48   :  { %1880 = vmatpush3.bf16.msra.mxu0 %v2061_v26  ;;  %v2112_v26 = vld [vmem:[%s2679_s4 + $0x1c8] sm:$0xff]  }
  0x49   :  { %1881 = vmatprep.subr.bf16.mxu0 %v2063_v28  ;;  %1902 = vmatpush3.bf16.msra.mxu1 %v2062_v27  ;;  %v2113_v27 = vld [vmem:[%s2679_s4 + $0x108] sm:$0xff]  }
  0x4a   :  { %1903 = vmatprep.subr.bf16.mxu1 %v2064_v29 }
  0x4c   :  { %1882 = vmatpush3.bf16.msra.mxu0 %v2065_v30 }
  0x4d   :  { %1883 = vmatprep.subr.bf16.mxu0 %v2067_v32  ;;  %1904 = vmatpush3.bf16.msra.mxu1 %v2066_v31 }
  0x4e   :  { %1905 = vmatprep.subr.bf16.mxu1 %v2068_v33 }
  0x50   :  { %1884 = vmatpush3.bf16.msra.mxu0 %v2069_v34 }
  0x51   :  { %1885 = vmatprep.subr.bf16.mxu0 %v2071_v36  ;;  %1906 = vmatpush3.bf16.msra.mxu1 %v2070_v35 }
  0x52   :  { %1907 = vmatprep.subr.bf16.mxu1 %v2072_v37 }
  0x54   :  { %1886 = vmatpush3.bf16.msra.mxu0 %v2073_v38 }
  0x55   :  { %1887 = vmatprep.subr.bf16.mxu0 %v2075_v40  ;;  %1908 = vmatpush3.bf16.msra.mxu1 %v2074_v39 }
  0x56   :  { %1909 = vmatprep.subr.bf16.mxu1 %v2076_v42 }
  0x58   :  { %1888 = vmatpush3.bf16.msra.mxu0 %v2077_v43 }
  0x59   :  { %1889 = vmatprep.subr.bf16.mxu0 %v2079_v45  ;;  %1910 = vmatpush3.bf16.msra.mxu1 %v2078_v44 }
  0x5a   :  { %1911 = vmatprep.subr.bf16.mxu1 %v2080_v47 }
  0x5c   :  { %1890 = vmatpush3.bf16.msra.mxu0 %v2081_v50 }
  0x5d   :  { %1891 = vmatprep.subr.bf16.mxu0 %v2083_v54  ;;  %1912 = vmatpush3.bf16.msra.mxu1 %v2082_v51 }
  0x5e   :  { %1913 = vmatprep.subr.bf16.mxu1 %v2084_v55 }
  0x60   :  { %1892 = vmatpush3.bf16.msra.mxu0 %v2085_v58 }
  0x61   :  { %1921 = vmatprep.subr.bf16.mxu0 %v2087_v62  ;;  %1914 = vmatpush3.bf16.msra.mxu1 %v2086_v59 }
  0x62   :  { %1943 = vmatprep.subr.bf16.mxu1 %v2088_v63 }
  0x63   :  { %1387 = vmatmul.mubr.bf16.vlgmr.msra.gmra.mxu0 %v936_v61 }
  0x64   :  { %1922 = vmatpush3.bf16.msra.mxu0 %v2089_v1  ;;  %1466 = vmatprep.mubr.bf16.mxu0 %v957_v0 }
  0x65   :  { %1427 = vmatmul.mubr.bf16.vlgmr.msra.gmra.mxu1 %v958_v3  ;;  %1923 = vmatprep.subr.bf16.mxu0 %v2091_v4 }
  0x66   :  { %1944 = vmatpush3.bf16.msra.mxu1 %v2090_v2  ;;  %1506 = vmatprep.mubr.bf16.mxu1 %v961_v6 }
  0x67   :  { %1945 = vmatprep.subr.bf16.mxu1 %v2092_v5 }
  0x68   :  { %1924 = vmatpush3.bf16.msra.mxu0 %v2093_v7 }
  0x69   :  { %1925 = vmatprep.subr.bf16.mxu0 %v2095_v9 }
  0x6a   :  { %1946 = vmatpush3.bf16.msra.mxu1 %v2094_v8 }
  0x6b   :  { %1947 = vmatprep.subr.bf16.mxu1 %v2096_v10 }
  0x6c   :  { %1926 = vmatpush3.bf16.msra.mxu0 %v2097_v11 }
  0x6d   :  { %1927 = vmatprep.subr.bf16.mxu0 %v2099_v13 }
  0x6e   :  { %1948 = vmatpush3.bf16.msra.mxu1 %v2098_v12 }
  0x6f   :  { %1949 = vmatprep.subr.bf16.mxu1 %v2100_v14 }
  0x70   :  { %1928 = vmatpush3.bf16.msra.mxu0 %v2101_v15 }
  0x71   :  { %1929 = vmatprep.subr.bf16.mxu0 %v2103_v17 }
  0x72   :  { %1950 = vmatpush3.bf16.msra.mxu1 %v2102_v16 }
  0x73   :  { %1951 = vmatprep.subr.bf16.mxu1 %v2104_v18 }
  0x74   :  { %1930 = vmatpush3.bf16.msra.mxu0 %v2105_v19 }
  0x75   :  { %1931 = vmatprep.subr.bf16.mxu0 %v2107_v21 }
  0x76   :  { %1952 = vmatpush3.bf16.msra.mxu1 %v2106_v20 }
  0x77   :  { %1953 = vmatprep.subr.bf16.mxu1 %v2108_v22 }
  0x78   :  { %1932 = vmatpush3.bf16.msra.mxu0 %v2109_v23 }
  0x79   :  { %17 = vsyncpa [#allocation5], 0  ;;  %1933 = vmatprep.subr.bf16.mxu0 %v2111_v25  ;;  %v2115_v28 = vld [vmem:[%s2679_s4 + $0x140] sm:$0xff]   ;;  %v2114_v29 = vld [vmem:[%s2679_s4 + $0x188] sm:$0xff]   ;;  %v943_v32 = vrot.slane %v2528_v53, %v2336_v41  ;;  %v2169_v36 = vmov 0.0   ;;  %vm2170_vm0 = vmmov 0  }
  0x7a   :  { %1954 = vmatpush3.bf16.msra.mxu1 %v2110_v24  ;;  %v2116_v30 = vld [vmem:[%s2679_s4 + $0x1c0] sm:$0xff]   ;;  %v2120_v35 = vld [vmem:[%s2681_s6 + $0x18] sm:$0xff]   ;;  %v2121_v41 = vld [vmem:[%s2681_s6 + $0x10] sm:$0xff]   ;;  %s2172_s24 = smov 21   ;;  %vm1519_vm1 = vcmask 261120   ;;  %vm1554_vm2 = vcmask 523264  }
  0x7b   :  { %1955 = vmatprep.subr.bf16.mxu1 %v2112_v26  ;;  %v2117_v31 = vld [vmem:[%s2679_s4 + $0x100] sm:$0xff]   ;;  %v959_v34 = vcombine.high %v943_v32, %v943_v32  ;;  %v2122_v37 = vld [vmem:[%s2681_s6 + $0x8] sm:$0xff]   ;;  %s2173_s26 = smov [#allocation2]   ;;  %vm1606_vm3 = vcmask 164864  }
  0x7c   :  { %1934 = vmatpush3.bf16.msra.mxu0 %v2113_v27  ;;  %v2118_v33 = vld [vmem:[%s2679_s4 + $0x180] sm:$0xff]   ;;  %s1630_s27 = sshll.u32 %s2173_s26, 4  ;;  %s1631_s27 = int_to_ptr.vmem [resolvable:$true] %s1630_s27 }
  0x7d   :  { %1935 = vmatprep.subr.bf16.mxu0 %v2115_v28  ;;  %v1652_v40 = vld [vmem:[%s2678_s3] ss:$0 sm:$0xff]  ;;  %s2124_s28 = scalar_lea.vmem %s1631_s27, 32  ;;  %p2129_p1 = scmp.lt.s32.totalorder %s1631_s27, %s1631_s27 }
  0x7e   :  { %1956 = vmatpush3.bf16.msra.mxu1 %v2114_v29  ;;  %v1717_v9 = vld [vmem:[%s2680_s5] ss:$0 sm:$0xff]  ;;  %s2171_s5 = smov 32   ;;  %p2125_p0 = scmp.ne.s32.totalorder %s1631_s27, %s2124_s28 }
  0x7f   :  { %1957 = vmatprep.subr.bf16.mxu1 %v2116_v30  ;;  %v2123_v10 = vld [vmem:[%s2681_s6] sm:$0xff]   ;;  %p2130_p2 = scmp.lt.s32.totalorder %s2124_s28, %s2124_s28 }
  0x80   :  { %1936 = vmatpush3.bf16.msra.mxu0 %v2117_v31  ;;  %v1788_v27 = vld [vmem:[%s2683_s8] ss:$0 sm:$0xff]  ;;  %s2174_s8 = smov 107  }
  0x81   :  { %1970 = vmatprep.subr.bf16.mxu0 %v2169_v36  ;;  %p2131_p3 = por %p2130_p2, %p2129_p1 }
  0x82   :  { %1958 = vmatpush3.bf16.msra.mxu1 %v2118_v33  ;;  %v1787_v33 = vld [vmem:[%s2682_s7] ss:$0 sm:$0xff] }
  0x83   :  { %1467 = vmatmul.mubr.bf16.vlgmr.msra.gmra.mxu0 %v943_v32  ;;  %p2132_p4 = pnand %p2131_p3, %p2125_p0 }
  0x84   :  { %1971 = vmatpush3.bf16.msra.mxu0 %v2120_v35  ;;  %1978 = vmatprep.mubr.msk.bf16.mxu0 %vm2170_vm0, %v2169_v36 }
  0x85   :  { %1507 = vmatmul.mubr.bf16.vlgmr.msra.gmra.mxu1 %v959_v34  ;;  %1972 = vmatprep.subr.bf16.mxu0 %v2169_v36 }
  0x88   :  { %1973 = vmatpush3.bf16.msra.mxu0 %v2121_v41 }
  0x89   :  { %1974 = vmatprep.subr.bf16.mxu0 %v2169_v36 }
  0x8c   :  { %1975 = vmatpush3.bf16.msra.mxu0 %v2122_v37 }
  0x8d   :  { %1976 = vmatprep.subr.bf16.mxu0 %v2169_v36 }
  0x90   :  { %1977 = vmatpush3.bf16.msra.mxu0 %v2123_v10 }
  0xe3   :  { %v1805_v38 = vpop.f32.mrf.mxu0 }
  0xe4   :  { %v1827_v39 = vpop.f32.mrf.mxu1 }
  0xe5   :  { %v1806_v42 = vpop.f32.mrf.mxu0 }
  0xe6   :  { %v1807_v43 = vadd.f32 %v1806_v42, %v1805_v38  ;;  %v1828_v44 = vpop.f32.mrf.mxu1 }
  0xe7   :  { %v1808_v45 = vpop.f32.mrf.mxu0  ;;  %v1829_v47 = vadd.f32 %v1828_v44, %v1827_v39 }
  0xe8   :  { %v650_v46 = vadd.f32 %v1807_v43, %v1652_v40  ;;  %v1830_v48 = vpop.f32.mrf.mxu1 }
  0xe9   :  { %v1809_v49 = vpop.f32.mrf.mxu0 }
  0xea   :  { %v690_v50 = vadd.f32 %v1829_v47, %v650_v46  ;;  %v1831_v51 = vpop.f32.mrf.mxu1 }
 0x103   :  { %v1849_v52 = vpop.f32.mrf.mxu0 }
 0x104   :  { %v1871_v53 = vpop.f32.mrf.mxu1 }
 0x105   :  { %v1850_v54 = vpop.f32.mrf.mxu0 }
 0x106   :  { %v1851_v55 = vadd.f32 %v1850_v54, %v1849_v52  ;;  %v1872_v56 = vpop.f32.mrf.mxu1 }
 0x107   :  { %v1852_v57 = vpop.f32.mrf.mxu0  ;;  %v1873_v59 = vadd.f32 %v1872_v56, %v1871_v53 }
 0x108   :  { %v730_v58 = vadd.f32 %v1851_v55, %v690_v50  ;;  %v1874_v60 = vpop.f32.mrf.mxu1 }
 0x109   :  { %v1853_v61 = vpop.f32.mrf.mxu0 }
 0x10a   :  { %v770_v62 = vadd.f32 %v1873_v59, %v730_v58  ;;  %v1875_v63 = vpop.f32.mrf.mxu1 }
 0x10c   :  { %v775_v28 = vmax.f32 %v770_v62, 0.0 }
 0x123   :  { %v1893_v0 = vpop.f32.mrf.mxu0 }
 0x125   :  { %v1915_v1 = vpop.f32.mrf.mxu1  ;;  %v1894_v2 = vpop.f32.mrf.mxu0 }
 0x126   :  { %v1895_v8 = vadd.f32 %v1894_v2, %v1893_v0 }
 0x127   :  { %v1916_v3 = vpop.f32.mrf.mxu1  ;;  %v1896_v4 = vpop.f32.mrf.mxu0 }
 0x128   :  { %v1389_v11 = vadd.f32 %v1895_v8, %v1717_v9  ;;  %v1917_v12 = vadd.f32 %v1916_v3, %v1915_v1 }
 0x129   :  { %v1918_v5 = vpop.f32.mrf.mxu1  ;;  %v1897_v6 = vpop.f32.mrf.mxu0 }
 0x12a   :  { %v1429_v16 = vadd.f32 %v1917_v12, %v1389_v11 }
 0x12b   :  { %v1919_v7 = vpop.f32.mrf.mxu1 }
 0x143   :  { %v1937_v13 = vpop.f32.mrf.mxu0 }
 0x145   :  { %v1959_v14 = vpop.f32.mrf.mxu1  ;;  %v1938_v15 = vpop.f32.mrf.mxu0 }
 0x146   :  { %v1939_v17 = vadd.f32 %v1938_v15, %v1937_v13 }
 0x147   :  { %v1960_v18 = vpop.f32.mrf.mxu1  ;;  %v1940_v19 = vpop.f32.mrf.mxu0 }
 0x148   :  { %v1469_v20 = vadd.f32 %v1939_v17, %v1429_v16  ;;  %v1961_v21 = vadd.f32 %v1960_v18, %v1959_v14 }
 0x149   :  { %v1962_v22 = vpop.f32.mrf.mxu1  ;;  %v1941_v23 = vpop.f32.mrf.mxu0 }
 0x14a   :  { %v1509_v24 = vadd.f32 %v1961_v21, %v1469_v20 }
 0x14b   :  { %v1963_v25 = vpop.f32.mrf.mxu1 }
 0x14c   :  { %v1514_v26 = vmax.f32 %v1509_v24, 0.0 }
 0x14e   :  { %1516 = vrot.lane.b32.xlu0 %v1514_v26, %s2171_s5 }
 0x152   :  { %1614 = vrot.lane.b32.xlu0 %v1788_v27, %s2172_s24 }
 0x1c0   :  { %v1517_v29 = vpop.permute.xlu0 %1516 }
 0x1c1   :  { %v1520_v30 = vsel %vm1519_vm1, %v775_v28, %v1517_v29 }
 0x1c2   :  { %v1521_v31 = vpack.c.bf16 %v1520_v30, %v1520_v30 }
 0x1c4   :  { %1979 = vmatmul.mubr.msk.bf16.vlgmr.msra.gmra.mxu0 %vm1554_vm2, %v1521_v31  ;;  %v1615_v32 = vpop.permute.xlu0 %1614 }
 0x284   :  { %v1592_v34 = vpop.f32.mrf.mxu0 }
 0x285   :  { %v1605_v35 = vadd.f32 %v1787_v33, %v1592_v34  ;;  %v1617_v36 = vadd.f32 %v1615_v32, %v1592_v34 }
 0x286   :  { %v1980_v41 = vpop.f32.mrf.mxu0 }
 0x287   :  { %1619 = vrot.lane.b32.xlu1 %v1617_v36, %s2174_s8  ;;  %1607 = vst.msk [vmem:[#allocation2] sm:$0x3] %vm1606_vm3, %v1605_v35 }
 0x288   :  { %v1595_v37 = vpop.f32.mrf.mxu0 }
 0x289   :  { %2135 = shalt.err (!%p2132_p4)
}
 0x28a   :  { %1633 = dma.vmem_to_hbm [thread:$0]  %s1631_s27, 32, %s2684_s9, [#allocation3]   ;;  %v1981_v38 = vpop.f32.mrf.mxu0  ;;  %vm1622_vm4 = vcmask 41984  }
 0x28b   :  { %s2175_s30 = smov [#allocation4]  }
 0x28c   :  { %s1640_s11 = sshll.u32 %s2175_s30, 4  ;;  %s1641_s11 = int_to_ptr.vmem [resolvable:$true] %s1640_s11 }
 0x28d   :  { %s2144_s1 = scalar_lea.vmem %s1641_s11, 32  ;;  %p2149_p6 = scmp.lt.s32.totalorder %s1641_s11, %s1641_s11 }
 0x28e   :  { %p2145_p5 = scmp.ne.s32.totalorder %s1641_s11, %s2144_s1  ;;  %p2150_p7 = scmp.lt.s32.totalorder %s2144_s1, %s2144_s1 }
 0x290   :  { %p2151_p8 = por %p2150_p7, %p2149_p6 }
 0x292   :  { %p2152_p9 = pnand %p2151_p8, %p2145_p5 }
 0x2f9   :  { %v1620_v39 = vpop.permute.xlu1 %1619 }
 0x2fa   :  { %1623 = vst.msk [vmem:[#allocation4] sm:$0x3] %vm1622_vm4, %v1620_v39 }
 0x2fb   :  { %2155 = shalt.err (!%p2152_p9)
}
 0x2fc   :  { %1643 = dma.vmem_to_hbm [thread:$0]  %s1641_s11, 32, %s2685_s10, [#allocation5]  }
 0x2fd   :  { %2164 = dma.done.wait [#allocation3], 32  }
 0x2fe   :  { %2165 = vsyncadd [#allocation3], 4294967264 }
 0x2ff   :  { %2166 = dma.done.wait [#allocation5], 32  }
 0x300   :  { %2167 = vsyncadd [#allocation5], 4294967264 }
 0x301   :  { %1650 = vsyncpa [#allocation3], 1 }
 0x302   :  { %1651 = vsyncpa [#allocation5], 1 }

// kernel: prediction_forward.2
= control target key start
LH: loop header
LB: loop body
LE: loop exit
PB: predicated region body
PF: predicated region fallthrough
CT: control target
= control target key end

     0   :  { %s9760_s21 = smov 0   ;;  %s14167_s0 = inlined_call_operand.vmem [shape: bf16[2,132,32], index: 0, kind: input, shape index: {}]   ;;  %s14168_s1 = inlined_call_operand.vmem [shape: f32[2,100,1], index: 1, kind: input, shape index: {}]   ;;  %s14169_s2 = inlined_call_operand.vmem [shape: bf16[4,288,32], index: 2, kind: input, shape index: {}]   ;;  %s14170_s3 = inlined_call_operand.vmem [shape: f32[4,1,32], index: 3, kind: input, shape index: {}]   ;;  %s14171_s4 = inlined_call_operand.vmem [shape: bf16[32,32], index: 4, kind: input, shape index: {}]   ;;  %s14172_s5 = inlined_call_operand.vmem [shape: f32[1,32], index: 5, kind: input, shape index: {}]   ;;  %s14173_s6 = inlined_call_operand.vmem [shape: bf16[2,100,32], index: 6, kind: output, shape index: {}]  }
   0x1 LB: > { %s8565_s22 = sadd.s32 4294967295, %s9717_s21   ;;  %p8569_p0 = scmp.ge.s32.totalorder %s9717_s21, 1  ;;  %s9717_s21 = sphi %s9760_s21, %s16_s21  }
   0x2   : > { %p222_p1 = scmp.lt.s32.totalorder %s9717_s21, 3 }
   0x4   : > { %p223_p2 = pnand %p8569_p0, %p222_p1 }
   0x6   : > { %226 = sbr.rel (%p223_p2) target bundleno = 2028 (0x7ec), region = 44 }
   0xb   : > { %p257_p3 = scmp.lt.s32.totalorder %s8565_s22, 1  ;;  %vm290_vm0 = vcmask 257024   ;;  %vm307_vm1 = vcmask 254976   ;;  %vm609_vm2 = vcmask 1040384   ;;  %vm610_vm3 = vcmask 1044484   ;;  %v9557_v14 = vld [vmem:[%s14169_s2 + $0x78] sm:$0xff]  }
   0xc   : > { %vm1530_vm4 = vcmask 1042432   ;;  %vm1531_vm5 = vcmask 1046532   ;;  %vm720_vm6 = vsmask.f32 256  ;;  %v9558_v15 = vld [vmem:[%s14169_s2 + $0x38] sm:$0xff]   ;;  %vm9813_vm7 = vmor %vm609_vm2, %vm610_vm3  ;;  %9097 = vmatprep.subr.bf16.mxu0 %v9557_v14  ;;  %s9719_s7 = smov 32  }
   0xd   : > { %s14314_s22 = smov (!%p257_p3, %s8565_s22), 1  ;;  %vm721_vm8 = vsmask.f32 4368  ;;  %9098 = vmatpush3.bf16.msra.mxu0 %v9558_v15  ;;  %vm9829_vm9 = vmor %vm1530_vm4, %vm1531_vm5  ;;  %v9559_v45 = vld [vmem:[%s14169_s2 + $0x70] sm:$0xff]   ;;  %vm1126_vm10 = vsmask.f32 3328 }
   0xe   : > { %s9538_s23 = smul.u32 68, %s14314_s22  ;;  %s9720_s10 = smov 96   ;;  %9099 = vmatprep.subr.bf16.mxu0 %v9559_v45  ;;  %v9560_v56 = vld [vmem:[%s14169_s2 + $0x30] sm:$0xff]   ;;  %vm9868_vm11 = vmor %vm720_vm6, %vm721_vm8  ;;  %v9561_v63 = vld [vmem:[%s14169_s2 + $0x68] sm:$0xff]   ;;  %vm1127_vm12 = vsmask.f32 7440 }
   0xf   : > { %vm9911_vm13 = vmor %vm1126_vm10, %vm1127_vm12  ;;  %vm418_vm14 = vsmask.f32 1280  ;;  %vm419_vm15 = vsmask.f32 5392  ;;  %vm691_vm3 = vcmask 519424   ;;  %vm883_vm4 = vcmask 781824  }
  0x10   : > { %s9774_s26 = scalar_lea.vmem %s14167_s0, %s9538_s23  ;;  %s9721_s23 = smov 64   ;;  %vm10354_vm2 = vmor %vm418_vm14, %vm419_vm15  ;;  %vm1636_vm5 = vsmask.f32 2304  ;;  %vm1637_vm6 = vsmask.f32 6416  ;;  %vm9723_vm8 = vmmov 0  }
  0x11   : > { %v273_v0 = vld [vmem:[%s9774_s26] sm:$0xf]  ;;  %v274_v1 = vld [vmem:[%s9774_s26 + $0x4] sm:$0xf]  ;;  %v277_v2 = vld [vmem:[%s9774_s26 + $0x10] sm:$0xf]  ;;  %9100 = vmatpush3.bf16.msra.mxu0 %v9560_v56 }
  0x12   : > { %291 = vst.msk [vmem:[#allocation2] sm:$0xf] %vm290_vm0, %v273_v0  ;;  %292 = vst.msk [vmem:[#allocation2 + $0x4] sm:$0xf] %vm290_vm0, %v274_v1  ;;  %v278_v3 = vld [vmem:[%s9774_s26 + $0x14] sm:$0xf]  ;;  %9101 = vmatprep.subr.bf16.mxu0 %v9561_v63 }
  0x13   : > { %v276_v4 = vld [vmem:[%s9774_s26 + $0xc] sm:$0xf]  ;;  %295 = vst.msk [vmem:[#allocation2 + $0x10] sm:$0xf] %vm290_vm0, %v277_v2  ;;  %296 = vst.msk [vmem:[#allocation2 + $0x14] sm:$0xf] %vm290_vm0, %v278_v3 }
  0x14   : > { %294 = vst.msk [vmem:[#allocation2 + $0xc] sm:$0xf] %vm290_vm0, %v276_v4  ;;  %v275_v5 = vld [vmem:[%s9774_s26 + $0x8] sm:$0xf]  ;;  %v279_v6 = vld [vmem:[%s9774_s26 + $0x18] sm:$0xf]  ;;  %vm10661_vm12 = vmor %vm1636_vm5, %vm1637_vm6 }
  0x15   : > { %v280_v7 = vld [vmem:[%s9774_s26 + $0x1c] sm:$0xf]  ;;  %293 = vst.msk [vmem:[#allocation2 + $0x8] sm:$0xf] %vm290_vm0, %v275_v5  ;;  %297 = vst.msk [vmem:[#allocation2 + $0x18] sm:$0xf] %vm290_vm0, %v279_v6 }
  0x16   : > { %298 = vst.msk [vmem:[#allocation2 + $0x1c] sm:$0xf] %vm290_vm0, %v280_v7  ;;  %v281_v8 = vld [vmem:[%s9774_s26 + $0x20] sm:$0xf]  ;;  %v282_v9 = vld [vmem:[%s9774_s26 + $0x24] sm:$0xf] }
  0x17   : > { %v283_v10 = vld [vmem:[%s9774_s26 + $0x28] sm:$0xf]  ;;  %299 = vst.msk [vmem:[#allocation2 + $0x20] sm:$0xf] %vm290_vm0, %v281_v8  ;;  %300 = vst.msk [vmem:[#allocation2 + $0x24] sm:$0xf] %vm290_vm0, %v282_v9 }
  0x18   : > { %301 = vst.msk [vmem:[#allocation2 + $0x28] sm:$0xf] %vm290_vm0, %v283_v10  ;;  %v284_v11 = vld [vmem:[%s9774_s26 + $0x2c] sm:$0xf]  ;;  %v285_v12 = vld [vmem:[%s9774_s26 + $0x30] sm:$0xf] }
  0x19   : > { %v286_v13 = vld [vmem:[%s9774_s26 + $0x34] sm:$0xf]  ;;  %302 = vst.msk [vmem:[#allocation2 + $0x2c] sm:$0xf] %vm290_vm0, %v284_v11  ;;  %303 = vst.msk [vmem:[#allocation2 + $0x30] sm:$0xf] %vm290_vm0, %v285_v12 }
  0x1a   : > { %304 = vst.msk [vmem:[#allocation2 + $0x34] sm:$0xf] %vm290_vm0, %v286_v13  ;;  %v287_v16 = vld [vmem:[%s9774_s26 + $0x38] sm:$0xf]  ;;  %v581_v18 = vld [vmem:[#allocation2] sm:$0x8] }
  0x1b   : > { %305 = vst.msk [vmem:[#allocation2 + $0x38] sm:$0xf] %vm290_vm0, %v287_v16  ;;  %v582_v19 = vld [vmem:[#allocation2 + $0x4] sm:$0xf]  ;;  %v8573_v21 = vrot.slane %v581_v18, 11  ;;  %v9562_v5 = vld [vmem:[%s14169_s2 + $0x28] sm:$0xff]  }
  0x1c   : > { %v9818_v20 = vld [vmem:[#allocation2 + $0x4] sm:$0xf]  ;;  %v614_v22 = vrot.slane %v582_v19, 7  ;;  %v1505_v23 = vld [vmem:[#allocation2 + $0x10] sm:$0xf]  ;;  %9102 = vmatpush3.bf16.msra.mxu0 %v9562_v5  ;;  %vm1072_vm10 = vcmask 1044224  }
  0x1d   : > { %v9820_v24 = vld [vmem:[#allocation2 + $0x14] sm:$0xf]  ;;  %v1535_v25 = vrot.slane %v1505_v23, 5  ;;  %v1504_v27 = vld [vmem:[#allocation2 + $0xc] sm:$0xe]  ;;  %v729_v42 = vshrl.u32 %v9818_v20, 16 }
  0x1e   : > { %v1538_v26 = vrot.slane %v9820_v24, 5  ;;  %v9823_v28 = vld [vmem:[#allocation2 + $0xc] sm:$0xf]  ;;  %v615_v29 = vsel %vm9813_vm7, %v8573_v21, %v614_v22  ;;  %v8576_v31 = vrot.slane %v1504_v27, 9  ;;  %v9833_v32 = vld [vmem:[#allocation2 + $0x10] sm:$0xf] }
  0x1f   : > { %v620_v33 = vrot.slane %v9823_v28, 7  ;;  %v583_v34 = vld [vmem:[#allocation2 + $0x8] sm:$0xf]  ;;  %652 = vrot.lane.b32.xlu0 %v615_v29, %s9719_s7  ;;  %v1537_v35 = vrot.slane %v1535_v25, 4  ;;  %v623_v36 = vrot.slane %v9833_v32, 7  ;;  %v616_v37 = vrot.slane %v614_v22, 4 }
  0x20   : > { %v617_v38 = vrot.slane %v583_v34, 7  ;;  %v708_v39 = vld [vmem:[#allocation2 + $0x8] sm:$0xf]  ;;  %v1536_v40 = vsel %vm9829_vm9, %v8576_v31, %v1535_v25  ;;  %v900_v49 = vld [vmem:[#allocation2 + $0xc] sm:$0xf]  ;;  %v731_v52 = vrot.slane %v729_v42, 7 }
  0x21   : > { %v622_v41 = vrot.slane %v620_v33, 4  ;;  %v738_v43 = vshrl.u32 %v708_v39, 16  ;;  %v9843_v44 = vld [vmem:[#allocation2 + $0x8] sm:$0xf]  ;;  %v1539_v46 = vsel %vm9829_vm9, %v1537_v35, %v1538_v26  ;;  %v741_v47 = vshll.u32 %v708_v39, 16  ;;  %v9563_v21 = vld [vmem:[%s14169_s2 + $0x60] sm:$0xff]  }
  0x22   : > { %v619_v48 = vrot.slane %v617_v38, 4  ;;  %v706_v50 = vld [vmem:[#allocation2] sm:$0x8]  ;;  %1573 = vrot.lane.b32.xlu1 %v1539_v46, %s9720_s10  ;;  %v618_v51 = vsel %vm9813_vm7, %v616_v37, %v617_v38  ;;  %v918_v54 = vshrl.u32 %v9843_v44, 16  ;;  %v1113_v55 = vld [vmem:[#allocation2 + $0x8] sm:$0xf]  ;;  %9103 = vmatprep.subr.bf16.mxu0 %v9563_v21 }
  0x23   : > { %v9855_v53 = vrot.slane %v738_v43, 7  ;;  %1571 = vrot.lane.b32.xlu0 %v1536_v40, %s9720_s10  ;;  %v624_v57 = vsel %vm9813_vm7, %v622_v41, %v623_v36  ;;  %v927_v59 = vshrl.u32 %v900_v49, 16  ;;  %v930_v60 = vshll.u32 %v900_v49, 16  ;;  %v1114_v62 = vld [vmem:[#allocation2 + $0xc] sm:$0xf]  ;;  %v9564_v31 = vld [vmem:[%s14169_s2 + $0x20] sm:$0xff]  }
  0x24   : > { %v724_v61 = vshrl.u32 %v706_v50, 16  ;;  %v736_v0 = vrot.slane %v731_v52, 4  ;;  %v920_v2 = vrot.slane %v918_v54, 7  ;;  %v732_v3 = vshll.u32 %v9818_v20, 16  ;;  %v898_v4 = vld [vmem:[#allocation2 + $0x4] sm:$0x8]  ;;  %9104 = vmatpush3.bf16.msra.mxu0 %v9564_v31 }
  0x25   : > { %v743_v1 = vor.u32 %v741_v47, %v9855_v53  ;;  %v9880_v6 = vrot.slane %v927_v59, 7  ;;  %v1130_v8 = vshrl.u32 %v1113_v55, 16  ;;  %v1133_v9 = vshll.u32 %v1113_v55, 16  ;;  %v1115_v14 = vld [vmem:[#allocation2 + $0x10] sm:$0xf]  ;;  %v9565_v41 = vld [vmem:[%s14169_s2 + $0x58] sm:$0xff]  }
  0x26   : > { %v8574_v7 = vrot.slane %v724_v61, 11  ;;  %658 = vrot.lane.b32.xlu1 %v624_v57, %s9719_s7  ;;  %v925_v11 = vrot.slane %v920_v2, 4  ;;  %v734_v12 = vor.u32 %v732_v3, %v731_v52  ;;  %v1139_v13 = vshll.u32 %v1114_v62, 16  ;;  %v1310_v20 = vld [vmem:[#allocation2 + $0xc] sm:$0xf]  ;;  %9105 = vmatprep.subr.bf16.mxu0 %v9565_v41  ;;  %v9566_v57 = vld [vmem:[%s14169_s2 + $0x18] sm:$0xff]  }
  0x27   : > { %v744_v10 = vsel %vm9868_vm11, %v736_v0, %v743_v1  ;;  %654 = vrot.lane.b32.xlu0 %v618_v51, %s9719_s7  ;;  %v932_v15 = vor.u32 %v930_v60, %v9880_v6  ;;  %v1132_v16 = vrot.slane %v1130_v8, 4  ;;  %v1135_v18 = vrot.slane %v1133_v9, 5  ;;  %v1311_v29 = vld [vmem:[#allocation2 + $0x10] sm:$0xf]  ;;  %v9903_v40 = vld [vmem:[#allocation2 + $0x14] sm:$0xf] }
  0x28   : > { %v913_v19 = vshrl.u32 %v898_v4, 16  ;;  %v621_v22 = vsel %vm9813_vm7, %v619_v48, %v620_v33  ;;  %v1141_v23 = vrot.slane %v1139_v13, 5  ;;  %v921_v25 = vshll.u32 %v9843_v44, 16  ;;  %v1116_v46 = vld [vmem:[#allocation2 + $0x14] sm:$0xf]  ;;  %9106 = vmatpush3.bf16.msra.mxu0 %v9566_v57  ;;  %s9539_s25 = smul.u32 104, %s14314_s22 }
  0x29   : > { %v1143_v27 = vshrl.u32 %v1114_v62, 16  ;;  %v735_v34 = vsel %vm9868_vm11, %v8574_v7, %v734_v12  ;;  %v1136_v35 = vor.u32 %v1135_v18, %v1132_v16  ;;  %v1149_v37 = vshll.u32 %v1115_v14, 16  ;;  %v9920_v63 = vld [vmem:[#allocation2 + $0x18] sm:$0xf]  ;;  %v9567_v0 = vld [vmem:[%s14169_s2 + $0x50] sm:$0xff]   ;;  %v9569_v16 = vld [vmem:[%s14169_s2 + $0x48] sm:$0xff]  }
  0x2a   : > { %846 = vrot.lane.b32.xlu1 %v744_v10, %s9721_s23  ;;  %v933_v28 = vsel %vm9868_vm11, %v925_v11, %v932_v15  ;;  %v1324_v38 = vshrl.u32 %v1310_v20, 16  ;;  %v1327_v39 = vshll.u32 %v1310_v20, 16  ;;  %v8575_v43 = vrot.slane %v913_v19, 11  ;;  %v709_v4 = vld [vmem:[#allocation2 + $0xc] sm:$0xf]  ;;  %v9568_v11 = vld [vmem:[%s14169_s2 + $0x10] sm:$0xff]   ;;  %9107 = vmatprep.subr.bf16.mxu0 %v9567_v0  ;;  %s10836_s29 = scalar_lea.vmem %s14168_s1, %s9539_s25 }
  0x2b   : > { %v1145_v33 = vrot.slane %v1143_v27, 4  ;;  %656 = vrot.lane.b32.xlu0 %v621_v22, %s9719_s7  ;;  %v1137_v42 = vrot.slane %v1136_v35, 4  ;;  %v1333_v44 = vshll.u32 %v1311_v29, 16  ;;  %v1337_v45 = vshrl.u32 %v1311_v29, 16  ;;  %v710_v10 = vld [vmem:[#allocation2 + $0x10] sm:$0xf] }
  0x2c   : > { %v923_v48 = vor.u32 %v921_v25, %v920_v2  ;;  %v1326_v50 = vrot.slane %v1324_v38, 4  ;;  %v1329_v51 = vrot.slane %v1327_v39, 5  ;;  %v1151_v52 = vrot.slane %v1149_v37, 5  ;;  %v1313_v15 = vld [vmem:[#allocation2 + $0x18] sm:$0xf]  ;;  %9108 = vmatpush3.bf16.msra.mxu0 %v9568_v11  ;;  %s9540_s15 = smul.u32 52, %s14314_s22 }
  0x2d   : > { %v1146_v49 = vor.u32 %v1145_v33, %v1141_v23  ;;  %v1335_v54 = vrot.slane %v1333_v44, 5  ;;  %v1339_v55 = vrot.slane %v1337_v45, 4  ;;  %v1343_v56 = vshll.u32 %v9903_v40, 16  ;;  %9109 = vmatprep.subr.bf16.mxu0 %v9569_v16 }
  0x2e   : > { %1035 = vrot.lane.b32.xlu1 %v933_v28, %s9720_s10  ;;  %v1330_v60 = vor.u32 %v1329_v51, %v1326_v50  ;;  %v1153_v61 = vshrl.u32 %v1115_v14, 16  ;;  %v1159_v62 = vshll.u32 %v1116_v46, 16  ;;  %v1142_v1 = vsel %vm9911_vm13, %v1137_v42, %v1141_v23  ;;  %v9946_v28 = vld [vmem:[#allocation2 + $0x1c] sm:$0xf]  ;;  %s14124_s18 = scalar_lea.vmem %s14173_s6, %s9540_s15 }
  0x2f   : > { %v1147_v59 = vrot.slane %v1146_v49, 4  ;;  %844 = vrot.lane.b32.xlu0 %v735_v34, %s9721_s23  ;;  %v1340_v2 = vor.u32 %v1339_v55, %v1335_v54  ;;  %v1163_v3 = vshrl.u32 %v1116_v46, 16  ;;  %v924_v5 = vsel %vm9868_vm11, %v8575_v43, %v923_v48  ;;  %v901_v43 = vld [vmem:[#allocation2 + $0x10] sm:$0xf]  ;;  %v902_v48 = vld [vmem:[#allocation2 + $0x14] sm:$0xf] }
  0x30   : > { %v1331_v7 = vrot.slane %v1330_v60, 4  ;;  %v1155_v8 = vrot.slane %v1153_v61, 4  ;;  %v1161_v9 = vrot.slane %v1159_v62, 5  ;;  %v1345_v12 = vrot.slane %v1343_v56, 5  ;;  %v1507_v60 = vld [vmem:[#allocation2 + $0x18] sm:$0xf] }
  0x31   : > { %v1165_v13 = vrot.slane %v1163_v3, 4  ;;  %v1169_v14 = vshll.u32 %v9920_v63, 16  ;;  %v1152_v18 = vsel %vm9911_vm13, %v1147_v59, %v1151_v52  ;;  %v1341_v19 = vrot.slane %v1340_v2, 4  ;;  %v9966_v2 = vld [vmem:[#allocation2 + $0x14] sm:$0xf] }
  0x32   : > { %1258 = vrot.lane.b32.xlu1 %v1142_v1, %s9719_s7  ;;  %v1156_v20 = vor.u32 %v1155_v8, %v1151_v52  ;;  %v747_v21 = vshrl.u32 %v709_v4, 16  ;;  %v1336_v22 = vsel %vm9911_vm13, %v1331_v7, %v1335_v54  ;;  %v750_v25 = vshll.u32 %v709_v4, 16  ;;  %v9964_v1 = vld [vmem:[#allocation2 + $0x1c] sm:$0xf]  ;;  %v9570_v8 = vld [vmem:[%s14169_s2 + $0x8] sm:$0xff]  }
  0x33   : > { %1033 = vrot.lane.b32.xlu0 %v924_v5, %s9720_s10  ;;  %v1166_v23 = vor.u32 %v1165_v13, %v1161_v9  ;;  %v756_v27 = vshrl.u32 %v710_v10, 16  ;;  %v1347_v34 = vshrl.u32 %v9903_v40, 16  ;;  %v1353_v35 = vshll.u32 %v1313_v15, 16  ;;  %v1118_v7 = vld [vmem:[#allocation2 + $0x1c] sm:$0xf]  ;;  %v9571_v13 = vld [vmem:[%s14169_s2 + $0x40] sm:$0xff]   ;;  %9110 = vmatpush3.bf16.msra.mxu0 %v9570_v8 }
  0x34   : > { %v1157_v29 = vrot.slane %v1156_v20, 4  ;;  %v749_v31 = vrot.slane %v747_v21, 7  ;;  %v9944_v37 = vrot.slane %v1169_v14, 5  ;;  %v1357_v33 = vshrl.u32 %v1313_v15, 16  ;;  %9111 = vmatprep.subr.bf16.mxu0 %v9571_v13 }
  0x35   : > { %v745_v38 = vrot.slane %v9855_v53, 4  ;;  %v9950_v39 = vrot.slane %v756_v27, 7  ;;  %v759_v41 = vshll.u32 %v710_v10, 16  ;;  %v1349_v42 = vrot.slane %v1347_v34, 4 }
  0x36   : > { %1260 = vrot.lane.b32.xlu1 %v1152_v18, %s9719_s7  ;;  %v1346_v40 = vsel %vm9911_vm13, %v1341_v19, %v1345_v12  ;;  %v1167_v44 = vrot.slane %v1166_v23, 4  ;;  %v1355_v45 = vrot.slane %v1353_v35, 5  ;;  %v1359_v46 = vrot.slane %v1357_v33, 4  ;;  %v9987_v19 = vld [vmem:[#allocation2 + $0x20] sm:$0xf] }
  0x37   : > { %1452 = vrot.lane.b32.xlu0 %v1336_v22, %s9721_s23  ;;  %v1162_v49 = vsel %vm9911_vm13, %v1157_v29, %v1161_v9  ;;  %v752_v50 = vor.u32 %v750_v25, %v749_v31  ;;  %v1350_v51 = vor.u32 %v1349_v42, %v1345_v12  ;;  %v1363_v53 = vshll.u32 %v9946_v28, 16  ;;  %v711_v22 = vld [vmem:[#allocation2 + $0x14] sm:$0xf]  ;;  %v1315_v35 = vld [vmem:[#allocation2 + $0x20] sm:$0xf] }
  0x38   : > { %v1360_v52 = vor.u32 %v1359_v46, %v1355_v45  ;;  %v936_v54 = vshrl.u32 %v901_v43, 16  ;;  %v754_v55 = vrot.slane %v749_v31, 4  ;;  %v761_v56 = vor.u32 %v759_v41, %v9950_v39  ;;  %v712_v31 = vld [vmem:[#allocation2 + $0x18] sm:$0xf] }
  0x39   : > { %v939_v57 = vshll.u32 %v901_v43, 16  ;;  %v945_v59 = vshrl.u32 %v902_v48, 16  ;;  %v1172_v61 = vsel %vm9911_vm13, %v1167_v44, %v9944_v37  ;;  %v1351_v62 = vrot.slane %v1350_v51, 4  ;;  %v10012_v43 = vld [vmem:[#allocation2 + $0x18] sm:$0xf] }
  0x3a   : > { %1454 = vrot.lane.b32.xlu1 %v1346_v40, %s9721_s23  ;;  %v938_v0 = vrot.slane %v936_v54, 7  ;;  %v753_v3 = vsel %vm9868_vm11, %v745_v38, %v752_v50  ;;  %v1361_v4 = vrot.slane %v1360_v52, 4  ;;  %v9970_v5 = vrot.slane %v1363_v53, 5 }
  0x3b   : > { %1262 = vrot.lane.b32.xlu0 %v1162_v49, %s9719_s7  ;;  %v9975_v9 = vrot.slane %v945_v59, 7  ;;  %v948_v10 = vshll.u32 %v902_v48, 16  ;;  %v1540_v11 = vrot.slane %v1538_v26, 4  ;;  %v1541_v12 = vrot.slane %v1507_v60, 5  ;;  %v903_v60 = vld [vmem:[#allocation2 + $0x18] sm:$0xf] }
  0x3c   : > { %v762_v14 = vsel %vm9868_vm11, %v754_v55, %v761_v56  ;;  %v934_v15 = vrot.slane %v9880_v6, 4  ;;  %v941_v16 = vor.u32 %v939_v57, %v938_v0  ;;  %v1544_v18 = vrot.slane %v9964_v1, 5  ;;  %v9572_v6 = vld [vmem:[%s14169_s2] sm:$0xff]  }
  0x3d   : > { %v1356_v24 = vsel %vm9911_vm13, %v1351_v62, %v1355_v45  ;;  %v625_v26 = vrot.slane %v623_v36, 4  ;;  %v1173_v20 = vshrl.u32 %v9920_v63, 16  ;;  %v1179_v21 = vshll.u32 %v1118_v7, 16  ;;  %9112 = vmatpush3.bf16.msra.mxu0 %v9572_v6  ;;  %v10019_v56 = vld [vmem:[#allocation2 + $0x24] sm:$0xf] }
  0x3e   : > { %1264 = vrot.lane.b32.xlu1 %v1172_v61, %s9719_s7  ;;  %v1366_v23 = vsel %vm9911_vm13, %v1361_v4, %v9970_v5  ;;  %v943_v25 = vrot.slane %v938_v0, 4  ;;  %v626_v27 = vrot.slane %v9966_v2, 7  ;;  %v1183_v29 = vshrl.u32 %v1118_v7, 16 }
  0x3f   : > { %848 = vrot.lane.b32.xlu0 %v753_v3, %s9721_s23  ;;  %v950_v32 = vor.u32 %v948_v10, %v9975_v9  ;;  %v1542_v36 = vsel %vm9829_vm9, %v1540_v11, %v1541_v12  ;;  %v1175_v63 = vrot.slane %v1173_v20, 4  ;;  %v10005_v34 = vrot.slane %v1179_v21, 5  ;;  %v10037_v10 = vld [vmem:[#allocation2 + $0x1c] sm:$0xf]  ;;  %v10058_v21 = vld [vmem:[#allocation2 + $0x24] sm:$0xf] }
  0x40   : > { %v942_v33 = vsel %vm9868_vm11, %v934_v15, %v941_v16  ;;  %v1185_v38 = vrot.slane %v1183_v29, 4  ;;  %v1189_v41 = vshll.u32 %v9987_v19, 16  ;;  %v765_v42 = vshrl.u32 %v711_v22, 16  ;;  %v1120_v29 = vld [vmem:[#allocation2 + $0x24] sm:$0xf] }
  0x41   : > { %v1176_v40 = vor.u32 %v1175_v63, %v9944_v37  ;;  %v768_v44 = vshll.u32 %v711_v22, 16  ;;  %v774_v45 = vshrl.u32 %v712_v31, 16  ;;  %v1367_v46 = vshrl.u32 %v9946_v28, 16 }
  0x42   : > { %850 = vrot.lane.b32.xlu1 %v762_v14, %s9721_s23  ;;  %v1186_v48 = vor.u32 %v1185_v38, %v10005_v34  ;;  %v767_v49 = vrot.slane %v765_v42, 7  ;;  %v1373_v50 = vshll.u32 %v1315_v35, 16  ;;  %v1377_v51 = vshrl.u32 %v1315_v35, 16  ;;  %v713_v42 = vld [vmem:[#allocation2 + $0x1c] sm:$0xf] }
  0x43   : > { %1456 = vrot.lane.b32.xlu0 %v1356_v24, %s9721_s23  ;;  %v1543_v53 = vrot.slane %v1541_v12, 4  ;;  %v10017_v52 = vrot.slane %v774_v45, 7  ;;  %v777_v54 = vshll.u32 %v712_v31, 16  ;;  %v1369_v55 = vrot.slane %v1367_v46, 4  ;;  %v714_v46 = vld [vmem:[#allocation2 + $0x20] sm:$0xf] }
  0x44   : > { %v951_v37 = vsel %vm9868_vm11, %v943_v25, %v950_v32  ;;  %v628_v57 = vrot.slane %v626_v27, 4  ;;  %v629_v28 = vrot.slane %v10012_v43, 7  ;;  %v10025_v59 = vrot.slane %v1373_v50, 5  ;;  %v1087_v50 = vld [vmem:[#allocation2 + $0x8] sm:$0xf] }
  0x45   : > { %v10028_v61 = vrot.slane %v1176_v40, 4  ;;  %v763_v62 = vrot.slane %v9950_v39, 4  ;;  %v1370_v0 = vor.u32 %v1369_v55, %v9970_v5  ;;  %v1379_v2 = vrot.slane %v1377_v51, 4  ;;  %1100 = vst.msk [vmem:[#allocation4 + $0x4] sm:$0xf] %vm290_vm0, %v1087_v50 }
  0x46   : > { %1458 = vrot.lane.b32.xlu1 %v1366_v23, %s9721_s23  ;;  %v10032_v3 = vrot.slane %v1186_v48, 4  ;;  %v10034_v4 = vrot.slane %v1189_v41, 5  ;;  %v770_v7 = vor.u32 %v768_v44, %v767_v49  ;;  %v1383_v8 = vshll.u32 %v10019_v56, 16 }
  0x47   : > { %1037 = vrot.lane.b32.xlu0 %v942_v33, %s9720_s10  ;;  %v772_v11 = vrot.slane %v767_v49, 4  ;;  %v779_v12 = vor.u32 %v777_v54, %v10017_v52  ;;  %v1380_v13 = vor.u32 %v1379_v2, %v10025_v59  ;;  %v954_v14 = vshrl.u32 %v903_v60, 16  ;;  %v10101_v54 = vld [vmem:[#allocation2 + $0x20] sm:$0xf] }
  0x48   : > { %v627_v39 = vsel %vm9813_vm7, %v625_v26, %v626_v27  ;;  %v10044_v5 = vrot.slane %v1370_v0, 4  ;;  %v1545_v15 = vsel %vm9829_vm9, %v1543_v53, %v1544_v18  ;;  %v630_v16 = vsel %vm9813_vm7, %v628_v57, %v629_v28  ;;  %v1509_v26 = vld [vmem:[#allocation2 + $0x20] sm:$0xf]  ;;  %v10070_v27 = vld [vmem:[#allocation2 + $0x1c] sm:$0xf] }
  0x49   : > { %v1182_v24 = vsel %vm9911_vm13, %v10028_v61, %v10005_v34  ;;  %v963_v20 = vshrl.u32 %v10037_v10, 16  ;;  %v1192_v22 = vsel %vm9911_vm13, %v10032_v3, %v10034_v4  ;;  %v771_v6 = vsel %vm9868_vm11, %v763_v62, %v770_v7  ;;  %v10079_v34 = vld [vmem:[#allocation2 + $0x28] sm:$0xf]  ;;  %v10115_v7 = vld [vmem:[#allocation2 + $0x2c] sm:$0xf] }
  0x4a   : > { %1039 = vrot.lane.b32.xlu1 %v951_v37, %s9720_s10  ;;  %v10066_v23 = vrot.slane %v1380_v13, 4  ;;  %v10068_v25 = vrot.slane %v1383_v8, 5  ;;  %v10074_v31 = vsel %vm9868_vm11, %v772_v11, %v779_v12  ;;  %v952_v32 = vrot.slane %v9975_v9, 4  ;;  %v1317_v37 = vld [vmem:[#allocation2 + $0x28] sm:$0xf] }
  0x4b   : > { %1575 = vrot.lane.b32.xlu0 %v1542_v36, %s9720_s10  ;;  %v10077_v36 = vrot.slane %v954_v14, 7  ;;  %v957_v63 = vshll.u32 %v903_v60, 16  ;;  %v1376_v35 = vsel %vm9911_vm13, %v10044_v5, %v10025_v59  ;;  %v966_v33 = vshll.u32 %v10037_v10, 16  ;;  %v10118_v13 = vld [vmem:[#allocation2 + $0x20] sm:$0xf] }
  0x4c   : > { %v1546_v38 = vrot.slane %v1544_v18, 4  ;;  %v1547_v41 = vrot.slane %v1509_v26, 5  ;;  %v10090_v43 = vrot.slane %v963_v20, 7  ;;  %v1550_v40 = vrot.slane %v10058_v21, 5  ;;  %v10180_v5 = vld [vmem:[#allocation2 + $0x2c] sm:$0xf] }
  0x4d   : > { %v1193_v44 = vshrl.u32 %v9987_v19, 16  ;;  %v1199_v45 = vshll.u32 %v1120_v29, 16  ;;  %v1386_v48 = vsel %vm9911_vm13, %v10066_v23, %v10068_v25  ;;  %v631_v49 = vrot.slane %v629_v28, 4  ;;  %v10216_v23 = vld [vmem:[#allocation2 + $0x28] sm:$0xf] }
  0x4e   : > { %1577 = vrot.lane.b32.xlu1 %v1545_v15, %s9720_s10  ;;  %v632_v1 = vrot.slane %v10070_v27, 7  ;;  %v1203_v18 = vshrl.u32 %v1120_v29, 16  ;;  %v959_v51 = vor.u32 %v957_v63, %v10077_v36  ;;  %v961_v53 = vrot.slane %v10077_v36, 4  ;;  %v288_v27 = vld [vmem:[%s9774_s26 + $0x3c] sm:$0xf] }
  0x4f   : > { %660 = vrot.lane.b32.xlu0 %v627_v39, %s9719_s7  ;;  %v1195_v55 = vrot.slane %v1193_v44, 4  ;;  %v10103_v19 = vrot.slane %v1199_v45, 5  ;;  %v10109_v57 = vsel %vm9829_vm9, %v1546_v38, %v1547_v41  ;;  %v1209_v60 = vshll.u32 %v10079_v34, 16  ;;  %306 = vst.msk [vmem:[#allocation2 + $0x3c] sm:$0xf] %vm290_vm0, %v288_v27 }
  0x50   : > { %v1205_v28 = vrot.slane %v1203_v18, 4  ;;  %v783_v61 = vshrl.u32 %v713_v42, 16  ;;  %v786_v0 = vshll.u32 %v713_v42, 16  ;;  %v792_v2 = vshrl.u32 %v714_v46, 16  ;;  %v1088_v38 = vld [vmem:[#allocation2 + $0xc] sm:$0xf] }
  0x51   : > { %v1196_v62 = vor.u32 %v1195_v55, %v10034_v4  ;;  %v1387_v3 = vshrl.u32 %v10019_v56, 16  ;;  %v1393_v11 = vshll.u32 %v1317_v37, 16  ;;  %v1397_v12 = vshrl.u32 %v1317_v37, 16  ;;  %1101 = vst.msk [vmem:[#allocation4 + $0x10] sm:$0xf] %vm290_vm0, %v1088_v38 }
  0x52   : > { %662 = vrot.lane.b32.xlu1 %v630_v16, %s9719_s7  ;;  %v1206_v8 = vor.u32 %v1205_v28, %v10103_v19  ;;  %v785_v10 = vrot.slane %v783_v61, 7  ;;  %v968_v14 = vor.u32 %v966_v33, %v10090_v43  ;;  %v10121_v39 = vrot.slane %v792_v2, 7  ;;  %v10123_v16 = vld [vmem:[#allocation2 + $0x24] sm:$0xf]  ;;  %v1511_v37 = vld [vmem:[#allocation2 + $0x28] sm:$0xf] }
  0x53   : > { %1266 = vrot.lane.b32.xlu0 %v1182_v24, %s9719_s7  ;;  %v795_v15 = vshll.u32 %v714_v46, 16  ;;  %v1389_v4 = vrot.slane %v1387_v3, 4  ;;  %v1549_v56 = vrot.slane %v1547_v41, 4  ;;  %v634_v24 = vrot.slane %v632_v1, 4  ;;  %v10198_v2 = vld [vmem:[#allocation2 + $0x24] sm:$0xf] }
  0x54   : > { %v635_v20 = vrot.slane %v10101_v54, 7  ;;  %v10127_v26 = vrot.slane %v1393_v11, 5  ;;  %v10131_v29 = vrot.slane %v1196_v62, 4  ;;  %v10133_v36 = vrot.slane %v1206_v8, 4 }
  0x55   : > { %v10135_v63 = vrot.slane %v1209_v60, 5  ;;  %v1399_v33 = vrot.slane %v1397_v12, 4  ;;  %v788_v41 = vor.u32 %v786_v0, %v785_v10  ;;  %v1390_v42 = vor.u32 %v1389_v4, %v10068_v25  ;;  %v1319_v25 = vld [vmem:[#allocation2 + $0x30] sm:$0xf] }
  0x56   : > { %1268 = vrot.lane.b32.xlu1 %v1192_v22, %s9719_s7  ;;  %v781_v22 = vrot.slane %v10017_v52, 4  ;;  %v1403_v44 = vshll.u32 %v10115_v7, 16  ;;  %v797_v45 = vor.u32 %v795_v15, %v10121_v39  ;;  %v972_v18 = vshrl.u32 %v10118_v13, 16 }
  0x57   : > { %852 = vrot.lane.b32.xlu0 %v771_v6, %s9721_s23  ;;  %v790_v6 = vrot.slane %v785_v10, 4  ;;  %v1400_v46 = vor.u32 %v1399_v33, %v10127_v26  ;;  %v960_v52 = vsel %vm9868_vm11, %v952_v32, %v959_v51  ;;  %v969_v50 = vsel %vm9868_vm11, %v961_v53, %v968_v14 }
  0x58   : > { %v10155_v54 = vsel %vm9813_vm7, %v631_v49, %v632_v1  ;;  %v981_v55 = vshrl.u32 %v10123_v16, 16  ;;  %v1551_v9 = vsel %vm9829_vm9, %v1549_v56, %v1550_v40  ;;  %v1202_v32 = vsel %vm9911_vm13, %v10131_v29, %v10103_v19  ;;  %v1122_v49 = vld [vmem:[#allocation2 + $0x2c] sm:$0xf]  ;;  %v1090_v56 = vld [vmem:[#allocation2 + $0x14] sm:$0xf] }
  0x59   : > { %v1212_v59 = vsel %vm9911_vm13, %v10133_v36, %v10135_v63  ;;  %v10182_v1 = vrot.slane %v1390_v42, 4  ;;  %v10184_v51 = vrot.slane %v1400_v46, 4  ;;  %v10186_v53 = vrot.slane %v1403_v44, 5  ;;  %1103 = vst.msk [vmem:[#allocation4 + $0x28] sm:$0xf] %vm290_vm0, %v1090_v56 }
  0x5a   : > { %854 = vrot.lane.b32.xlu1 %v10074_v31, %s9721_s23  ;;  %v10170_v31 = vsel %vm9813_vm7, %v634_v24, %v635_v20  ;;  %v970_v28 = vrot.slane %v10090_v43, 4  ;;  %v10191_v60 = vsel %vm9868_vm11, %v781_v22, %v788_v41  ;;  %v10195_v61 = vsel %vm9868_vm11, %v790_v6, %v797_v45  ;;  %v1092_v19 = vld [vmem:[#allocation2 + $0x1c] sm:$0xf] }
  0x5b   : > { %1460 = vrot.lane.b32.xlu0 %v1376_v35, %s9721_s23  ;;  %v590_v35 = vld [vmem:[#allocation2 + $0x24] sm:$0xf]  ;;  %v974_v62 = vrot.slane %v972_v18, 7  ;;  %v975_v0 = vshll.u32 %v10118_v13, 16  ;;  %v10206_v43 = vrot.slane %v981_v55, 7  ;;  %v984_v3 = vshll.u32 %v10123_v16, 16 }
  0x5c   : > { %v1552_v8 = vrot.slane %v1550_v40, 4  ;;  %v1553_v10 = vrot.slane %v1511_v37, 5  ;;  %v1556_v11 = vrot.slane %v10180_v5, 5  ;;  %v638_v12 = vrot.slane %v590_v35, 7  ;;  %v10213_v13 = vld [vmem:[#allocation2 + $0x28] sm:$0xf] }
  0x5d   : > { %v1213_v14 = vshrl.u32 %v10079_v34, 16  ;;  %v1219_v15 = vshll.u32 %v1122_v49, 16  ;;  %v1396_v21 = vsel %vm9911_vm13, %v10182_v1, %v10127_v26  ;;  %v1406_v40 = vsel %vm9911_vm13, %v10184_v51, %v10186_v53  ;;  %v1089_v16 = vld [vmem:[#allocation2 + $0x10] sm:$0xf]  ;;  %1105 = vst.msk [vmem:[#allocation4 + $0x40] sm:$0xf] %vm290_vm0, %v1092_v19 }
  0x5e   : > { %1462 = vrot.lane.b32.xlu1 %v1386_v48, %s9721_s23  ;;  %v637_v48 = vrot.slane %v635_v20, 4  ;;  %v1223_v4 = vshrl.u32 %v1122_v49, 16  ;;  %v977_v24 = vor.u32 %v975_v0, %v974_v62  ;;  %v979_v34 = vrot.slane %v974_v62, 4  ;;  %1102 = vst.msk [vmem:[#allocation4 + $0x1c] sm:$0xf] %vm290_vm0, %v1089_v16 }
  0x5f   : > { %1041 = vrot.lane.b32.xlu0 %v960_v52, %s9720_s10  ;;  %v1215_v27 = vrot.slane %v1213_v14, 4  ;;  %v10226_v33 = vrot.slane %v1219_v15, 5  ;;  %v986_v38 = vor.u32 %v984_v3, %v10206_v43  ;;  %v10234_v22 = vsel %vm9829_vm9, %v1552_v8, %v1553_v10  ;;  %v10236_v20 = vld [vmem:[#allocation2 + $0x30] sm:$0xf]  ;;  %v10251_v62 = vld [vmem:[#allocation2 + $0x34] sm:$0xf] }
  0x60   : > { %v1225_v41 = vrot.slane %v1223_v4, 4  ;;  %v801_v42 = vshrl.u32 %v10198_v2, 16  ;;  %v1555_v44 = vrot.slane %v1553_v10, 4  ;;  %v640_v6 = vrot.slane %v638_v12, 4  ;;  %v405_v0 = vld [vmem:[#allocation2 + $0x4] sm:$0xf] }
  0x61   : > { %v1216_v45 = vor.u32 %v1215_v27, %v10135_v63  ;;  %v1407_v46 = vshrl.u32 %v10115_v7, 16  ;;  %v641_v18 = vrot.slane %v10213_v13, 7  ;;  %v810_v52 = vshrl.u32 %v10216_v23, 16  ;;  %v10265_v14 = vld [vmem:[#allocation2 + $0x2c] sm:$0xf] }
  0x62   : > { %1043 = vrot.lane.b32.xlu1 %v969_v50, %s9720_s10  ;;  %v1413_v50 = vshll.u32 %v1319_v25, 16  ;;  %v1417_v55 = vshrl.u32 %v1319_v25, 16  ;;  %v10247_v37 = vsel %vm9813_vm7, %v637_v48, %v638_v12  ;;  %v1226_v35 = vor.u32 %v1225_v41, %v10226_v33  ;;  %v10263_v12 = vld [vmem:[#allocation2 + $0x28] sm:$0xf]  ;;  %v404_v27 = vld [vmem:[#allocation2] sm:$0xc] }
  0x63   : > { %1579 = vrot.lane.b32.xlu0 %v10109_v57, %s9720_s10  ;;  %v1229_v57 = vshll.u32 %v10236_v20, 16  ;;  %v1409_v49 = vrot.slane %v1407_v46, 4  ;;  %v10256_v7 = vsel %vm9868_vm11, %v970_v28, %v977_v24  ;;  %v10258_v3 = vrot.slane %v801_v42, 7  ;;  %v1091_v46 = vld [vmem:[#allocation2 + $0x18] sm:$0xf] }
  0x64   : > { %v804_v8 = vshll.u32 %v10198_v2, 16  ;;  %v10261_v10 = vrot.slane %v1413_v50, 5  ;;  %v10277_v28 = vsel %vm9829_vm9, %v1555_v44, %v1556_v11  ;;  %v10279_v2 = vrot.slane %v1216_v45, 4  ;;  %v408_v45 = vld [vmem:[#allocation2 + $0x10] sm:$0xf] }
  0x65   : > { %v1419_v15 = vrot.slane %v1417_v55, 4  ;;  %v10285_v25 = vsel %vm9813_vm7, %v640_v6, %v641_v18  ;;  %v10288_v48 = vrot.slane %v810_v52, 7  ;;  %v813_v4 = vshll.u32 %v10216_v23, 16  ;;  %1104 = vst.msk [vmem:[#allocation4 + $0x34] sm:$0xf] %vm290_vm0, %v1091_v46 }
  0x66   : > { %1581 = vrot.lane.b32.xlu1 %v1551_v9, %s9720_s10  ;;  %v10271_v9 = vsel %vm9868_vm11, %v979_v34, %v986_v38  ;;  %v10291_v16 = vrot.slane %v1226_v35, 4  ;;  %v10293_v56 = vrot.slane %v1229_v57, 5  ;;  %v1410_v24 = vor.u32 %v1409_v49, %v10186_v53  ;;  %v1124_v19 = vld [vmem:[#allocation2 + $0x34] sm:$0xf]  ;;  %v10393_v5 = vld [vmem:[#allocation2 + $0x30] sm:$0xf] }
  0x67   : > { %664 = vrot.lane.b32.xlu0 %v10155_v54, %s9719_s7  ;;  %v799_v54 = vrot.slane %v10121_v39, 4  ;;  %v1423_v34 = vshll.u32 %v10251_v62, 16  ;;  %v806_v38 = vor.u32 %v804_v8, %v10258_v3  ;;  %v808_v39 = vrot.slane %v10258_v3, 4  ;;  %v407_v3 = vld [vmem:[#allocation2 + $0xc] sm:$0xf] }
  0x68   : > { %v1420_v41 = vor.u32 %v1419_v15, %v10261_v10  ;;  %v431_v42 = vshrl.u32 %v405_v0, 16  ;;  %v1222_v23 = vsel %vm9911_vm13, %v10279_v2, %v10226_v33  ;;  %v999_v44 = vshrl.u32 %v10265_v14, 16  ;;  %v10380_v1 = vld [vmem:[#allocation2 + $0x34] sm:$0xf] }
  0x69   : > { %v434_v6 = vshll.u32 %v405_v0, 16  ;;  %v815_v52 = vor.u32 %v813_v4, %v10288_v48  ;;  %v422_v55 = vshrl.u32 %v404_v27, 16  ;;  %v425_v35 = vshll.u32 %v404_v27, 16 }
  0x6a   : > { %666 = vrot.lane.b32.xlu1 %v10170_v31, %s9719_s7  ;;  %v990_v31 = vshrl.u32 %v10263_v12, 16  ;;  %v433_v50 = vrot.slane %v431_v42, 6  ;;  %v10316_v29 = vrot.slane %v1410_v24, 4  ;;  %v993_v57 = vshll.u32 %v10263_v12, 16  ;;  %v1093_v24 = vld [vmem:[#allocation2 + $0x20] sm:$0xf] }
  0x6b   : > { %1270 = vrot.lane.b32.xlu0 %v1202_v32, %s9719_s7  ;;  %v10318_v32 = vrot.slane %v1423_v34, 5  ;;  %v436_v49 = vrot.slane %v434_v6, 7  ;;  %v10328_v0 = vrot.slane %v1420_v41, 4  ;;  %v1002_v8 = vshll.u32 %v10265_v14, 16  ;;  %1106 = vst.msk [vmem:[#allocation4 + $0x4c] sm:$0xf] %vm290_vm0, %v1093_v24 }
  0x6c   : > { %v424_v15 = vrot.slane %v422_v55, 6  ;;  %v427_v4 = vrot.slane %v425_v35, 7  ;;  %v1232_v12 = vsel %vm9911_vm13, %v10291_v16, %v10293_v56  ;;  %v10339_v34 = vsel %vm9868_vm11, %v799_v54, %v806_v38  ;;  %v1513_v41 = vld [vmem:[#allocation2 + $0x30] sm:$0xf]  ;;  %v10385_v24 = vld [vmem:[#allocation2 + $0x2c] sm:$0xf] }
  0x6d   : > { %v992_v36 = vrot.slane %v990_v31, 7  ;;  %v10341_v63 = vrot.slane %v999_v44, 7  ;;  %v10344_v14 = vor.u32 %v436_v49, %v433_v50  ;;  %v464_v42 = vshll.u32 %v408_v45, 16 }
  0x6e   : > { %1272 = vrot.lane.b32.xlu1 %v1212_v59, %s9719_s7  ;;  %v1094_v59 = vld [vmem:[#allocation2 + $0x24] sm:$0xf]  ;;  %v428_v27 = vor.u32 %v427_v4, %v424_v15  ;;  %v10349_v6 = vsel %vm9868_vm11, %v808_v39, %v815_v52  ;;  %v988_v54 = vrot.slane %v10206_v43, 4  ;;  %v451_v31 = vshrl.u32 %v407_v3, 16  ;;  %v406_v43 = vld [vmem:[#allocation2 + $0x8] sm:$0xf] }
  0x6f   : > { %856 = vrot.lane.b32.xlu0 %v10191_v60, %s9721_s23  ;;  %v461_v60 = vshrl.u32 %v408_v45, 16  ;;  %1107 = vst.msk [vmem:[#allocation4 + $0x58] sm:$0xf] %vm290_vm0, %v1094_v59  ;;  %v454_v44 = vshll.u32 %v407_v3, 16  ;;  %v1416_v45 = vsel %vm9911_vm13, %v10316_v29, %v10261_v10  ;;  %v466_v52 = vrot.slane %v464_v42, 7 }
  0x70   : > { %v429_v39 = vrot.slane %v428_v27, 4  ;;  %v995_v50 = vor.u32 %v993_v57, %v992_v36  ;;  %v453_v55 = vrot.slane %v451_v31, 6  ;;  %v997_v49 = vrot.slane %v992_v36, 4  ;;  %v10407_v31 = vld [vmem:[#allocation2 + $0x38] sm:$0x7] }
  0x71   : > { %v463_v46 = vrot.slane %v461_v60, 6  ;;  %v456_v35 = vrot.slane %v454_v44, 7  ;;  %v1004_v3 = vor.u32 %v1002_v8, %v10341_v63  ;;  %v1558_v26 = vrot.slane %v1556_v11, 4  ;;  %v10398_v60 = vld [vmem:[#allocation2 + $0x30] sm:$0xf] }
  0x72   : > { %858 = vrot.lane.b32.xlu1 %v10195_v61, %s9721_s23  ;;  %v1426_v61 = vsel %vm9911_vm13, %v10328_v0, %v10318_v32  ;;  %v438_v15 = vsel %vm10354_vm2, %v429_v39, %v10344_v14  ;;  %v441_v36 = vshrl.u32 %v406_v43, 16  ;;  %v444_v11 = vshll.u32 %v406_v43, 16 }
  0x73   : > { %1464 = vrot.lane.b32.xlu0 %v1396_v21, %s9721_s23  ;;  %568 = vst.msk [vmem:[#allocation4] sm:$0xf] %vm290_vm0, %v438_v15  ;;  %v1559_v21 = vrot.slane %v1513_v41, 5  ;;  %v10383_v4 = vor.u32 %v466_v52, %v463_v46  ;;  %v457_v57 = vor.u32 %v456_v35, %v453_v55  ;;  %v1233_v8 = vshrl.u32 %v10236_v20, 16  ;;  %v10396_v41 = vld [vmem:[#allocation2 + $0x2c] sm:$0xf] }
  0x74   : > { %v1239_v59 = vshll.u32 %v1124_v19, 16  ;;  %v1243_v27 = vshrl.u32 %v1124_v19, 16  ;;  %v10404_v42 = vsel %vm9868_vm11, %v988_v54, %v995_v50  ;;  %v1562_v51 = vrot.slane %v10380_v1, 5  ;;  %v1095_v20 = vld [vmem:[#allocation2 + $0x28] sm:$0xf] }
  0x75   : > { %v459_v53 = vrot.slane %v457_v57, 4  ;;  %v10411_v44 = vsel %vm9868_vm11, %v997_v49, %v1004_v3  ;;  %v644_v39 = vrot.slane %v10385_v24, 7  ;;  %v439_v46 = vrot.slane %v10344_v14, 4  ;;  %v1321_v52 = vld [vmem:[#allocation2 + $0x38] sm:$0xf] }
  0x76   : > { %1466 = vrot.lane.b32.xlu1 %v1406_v40, %s9721_s23  ;;  %v443_v40 = vrot.slane %v441_v36, 6  ;;  %1108 = vst.msk [vmem:[#allocation4 + $0x64] sm:$0xf] %vm290_vm0, %v1095_v20  ;;  %v1096_v54 = vld [vmem:[#allocation2 + $0x2c] sm:$0xf]  ;;  %v1561_v43 = vrot.slane %v1559_v21, 4  ;;  %v10426_v14 = vsel %vm9829_vm9, %v1558_v26, %v1559_v21 }
  0x77   : > { %1045 = vrot.lane.b32.xlu0 %v10256_v7, %s9720_s10  ;;  %v446_v7 = vrot.slane %v444_v11, 7  ;;  %v468_v50 = vsel %vm10354_vm2, %v459_v53, %v10383_v4  ;;  %v643_v55 = vrot.slane %v641_v18, 4  ;;  %v1235_v35 = vrot.slane %v1233_v8, 4  ;;  %1109 = vst.msk [vmem:[#allocation4 + $0x70] sm:$0xf] %vm290_vm0, %v1096_v54 }
  0x78   : > { %571 = vst.msk [vmem:[#allocation4 + $0x24] sm:$0xf] %vm290_vm0, %v468_v50  ;;  %v10429_v49 = vrot.slane %v1239_v59, 5  ;;  %v1245_v3 = vrot.slane %v1243_v27, 4  ;;  %v647_v13 = vrot.slane %v10393_v5, 7  ;;  %v819_v18 = vshrl.u32 %v10396_v41, 16 }
  0x79   : > { %v447_v19 = vor.u32 %v446_v7, %v443_v40  ;;  %v828_v15 = vshrl.u32 %v10398_v60, 16  ;;  %v10437_v24 = vld [vmem:[#allocation2 + $0x3c] sm:$0x7]  ;;  %v646_v26 = vrot.slane %v644_v39, 4  ;;  %v1249_v36 = vshll.u32 %v10407_v31, 16 }
  0x7a   : > { %1047 = vrot.lane.b32.xlu1 %v10271_v9, %s9720_s10  ;;  %v1427_v9 = vshrl.u32 %v10251_v62, 16  ;;  %v10442_v8 = vld [vmem:[#allocation2 + $0x30] sm:$0xf]  ;;  %v822_v59 = vshll.u32 %v10396_v41, 16  ;;  %v1433_v53 = vshll.u32 %v1321_v52, 16  ;;  %v1246_v40 = vor.u32 %v1245_v3, %v10429_v49 }
  0x7b   : > { %1583 = vrot.lane.b32.xlu0 %v10234_v22, %s9720_s10  ;;  %v448_v21 = vsel %vm10354_vm2, %v439_v46, %v447_v19  ;;  %v449_v11 = vrot.slane %v447_v19, 4  ;;  %v1236_v22 = vor.u32 %v1235_v35, %v10293_v56  ;;  %v910_v62 = vld [vmem:[#allocation2 + $0x34] sm:$0xf]  ;;  %v831_v46 = vshll.u32 %v10398_v60, 16 }
  0x7c   : > { %569 = vst.msk [vmem:[#allocation4 + $0xc] sm:$0xf] %vm290_vm0, %v448_v21  ;;  %v1429_v27 = vrot.slane %v1427_v9, 4  ;;  %v1437_v7 = vshrl.u32 %v1321_v52, 16  ;;  %v10459_v41 = vsel %vm9829_vm9, %v1561_v43, %v1562_v51  ;;  %v10462_v54 = vrot.slane %v828_v15, 7 }
  0x7d   : > { %v458_v20 = vsel %vm10354_vm2, %v449_v11, %v457_v57  ;;  %v10465_v57 = vrot.slane %v1249_v36, 5  ;;  %v10467_v60 = vrot.slane %v1433_v53, 5  ;;  %v10472_v35 = vsel %vm9813_vm7, %v643_v55, %v644_v39  ;;  %v1515_v9 = vld [vmem:[#allocation2 + $0x38] sm:$0xf]  ;;  %v10498_v36 = vld [vmem:[#allocation2 + $0x3c] sm:$0x7] }
  0x7e   : > { %1585 = vrot.lane.b32.xlu1 %v10277_v28, %s9720_s10  ;;  %570 = vst.msk [vmem:[#allocation4 + $0x18] sm:$0xf] %vm290_vm0, %v458_v20  ;;  %v821_v28 = vrot.slane %v819_v18, 7  ;;  %v1430_v50 = vor.u32 %v1429_v27, %v10318_v32  ;;  %v1439_v52 = vrot.slane %v1437_v7, 4  ;;  %v10478_v43 = vsel %vm9813_vm7, %v646_v26, %v647_v13  ;;  %v10541_v7 = vld [vmem:[#allocation2 + $0x38] sm:$0x3] }
  0x7f   : > { %668 = vrot.lane.b32.xlu0 %v10247_v37, %s9719_s7  ;;  %v1443_v37 = vshll.u32 %v10437_v24, 16  ;;  %v817_v19 = vrot.slane %v10288_v48, 4  ;;  %v1008_v3 = vshrl.u32 %v10442_v8, 16  ;;  %v10484_v18 = vrot.slane %v1236_v22, 4  ;;  %v1097_v32 = vld [vmem:[#allocation2 + $0x30] sm:$0xf] }
  0x80   : > { %v10486_v15 = vrot.slane %v1246_v40, 4  ;;  %v1440_v39 = vor.u32 %v1439_v52, %v10467_v60  ;;  %v1017_v55 = vshrl.u32 %v910_v62, 16  ;;  %v824_v48 = vor.u32 %v822_v59, %v821_v28  ;;  %v10503_v40 = vld [vmem:[#allocation2 + $0x34] sm:$0x3]  ;;  %v410_v52 = vld [vmem:[#allocation2 + $0x18] sm:$0xf] }
  0x81   : > { %v826_v26 = vrot.slane %v821_v28, 4  ;;  %v833_v21 = vor.u32 %v831_v46, %v10462_v54  ;;  %v10500_v11 = vrot.slane %v1443_v37, 5  ;;  %v1010_v22 = vrot.slane %v1008_v3, 7  ;;  %v10511_v59 = vld [vmem:[#allocation2 + $0x34] sm:$0x1] }
  0x82   : > { %670 = vrot.lane.b32.xlu1 %v10285_v25, %s9719_s7  ;;  %v10496_v25 = vrot.slane %v1430_v50, 4  ;;  %v1011_v27 = vshll.u32 %v10442_v8, 16  ;;  %v1020_v53 = vshll.u32 %v910_v62, 16  ;;  %v10505_v20 = vrot.slane %v1440_v39, 4  ;;  %v411_v39 = vld [vmem:[#allocation2 + $0x1c] sm:$0xf] }
  0x83   : > { %1274 = vrot.lane.b32.xlu0 %v1222_v23, %s9719_s7  ;;  %v10507_v33 = vrot.slane %v1017_v55, 7  ;;  %v1564_v2 = vrot.slane %v1562_v51, 4  ;;  %v1565_v23 = vrot.slane %v1515_v9, 5  ;;  %v1242_v8 = vsel %vm9911_vm13, %v10484_v18, %v10429_v49  ;;  %1110 = vst.msk [vmem:[#allocation4 + $0x7c] sm:$0xf] %vm290_vm0, %v1097_v32 }
  0x84   : > { %v1252_v1 = vsel %vm9911_vm13, %v10486_v15, %v10465_v57  ;;  %v1006_v51 = vrot.slane %v10341_v63, 4  ;;  %v1253_v62 = vshrl.u32 %v10407_v31, 16  ;;  %v10533_v16 = vsel %vm9868_vm11, %v817_v19, %v824_v48  ;;  %v409_v63 = vld [vmem:[#allocation2 + $0x14] sm:$0xf]  ;;  %v414_v32 = vld [vmem:[#allocation2 + $0x28] sm:$0xf] }
  0x85   : > { %v10537_v56 = vsel %vm9868_vm11, %v826_v26, %v833_v21  ;;  %v1447_v46 = vshrl.u32 %v10437_v24, 16  ;;  %v1013_v31 = vor.u32 %v1011_v27, %v1010_v22  ;;  %v1015_v28 = vrot.slane %v1010_v22, 4  ;;  %v412_v22 = vld [vmem:[#allocation2 + $0x20] sm:$0xf]  ;;  %v1632_v15 = vld [vmem:[#allocation2 + $0x30] sm:$0xf] }
  0x86   : > { %1276 = vrot.lane.b32.xlu1 %v1232_v12, %s9719_s7  ;;  %v14174_v12 = vrot.slane %v10498_v36, 5  ;;  %v837_v50 = vshrl.u32 %v10503_v40, 16  ;;  %v1446_v37 = vsel %vm9911_vm13, %v10505_v20, %v10500_v11  ;;  %v1022_v24 = vor.u32 %v1020_v53, %v10507_v33  ;;  %v1627_v53 = vld [vmem:[#allocation2 + $0x1c] sm:$0xf] }
  0x87   : > { %860 = vrot.lane.b32.xlu0 %v10339_v34, %s9721_s23  ;;  %v1436_v34 = vsel %vm9911_vm13, %v10496_v25, %v10467_v60  ;;  %v10555_v19 = vsel %vm9829_vm9, %v1564_v2, %v1565_v23  ;;  %v10559_v3 = vrot.slane %v647_v13, 4  ;;  %v10563_v55 = vrot.slane %v1565_v23, 4 }
  0x88   : > { %v10565_v9 = vrot.slane %v1253_v62, 4  ;;  %v10575_v5 = vrot.slane %v1447_v46, 4  ;;  %v10577_v13 = vrot.slane %v837_v50, 7  ;;  %v10582_v21 = vrot.slane %v14174_v12, 4  ;;  %v10590_v46 = vld [vmem:[%s14169_s2 + $0x88] sm:$0xff]  }
  0x89   : > { %v471_v2 = vshrl.u32 %v409_v63, 16  ;;  %v474_v23 = vshll.u32 %v409_v63, 16  ;;  %v469_v10 = vrot.slane %v10383_v4, 4  ;;  %v481_v29 = vshrl.u32 %v410_v52, 16 }
  0x8a   : > { %862 = vrot.lane.b32.xlu1 %v10349_v6, %s9721_s23  ;;  %v491_v62 = vshrl.u32 %v411_v39, 16  ;;  %v10600_v63 = vsel %vm9868_vm11, %v1006_v51, %v1013_v31  ;;  %v10604_v4 = vsel %vm9868_vm11, %v1015_v28, %v1022_v24  ;;  %v494_v12 = vshll.u32 %v411_v39, 16  ;;  %v1628_v6 = vld [vmem:[#allocation2 + $0x20] sm:$0xf]  ;;  %v1098_v28 = vld [vmem:[#allocation2 + $0x34] sm:$0xf] }
  0x8b   : > { %1468 = vrot.lane.b32.xlu0 %v1416_v45, %s9721_s23  ;;  %v484_v45 = vshll.u32 %v410_v52, 16  ;;  %v473_v50 = vrot.slane %v471_v2, 6  ;;  %v476_v52 = vrot.slane %v474_v23, 7  ;;  %v483_v27 = vrot.slane %v481_v29, 6  ;;  %1111 = vst.msk [vmem:[#allocation4 + $0x88] sm:$0xf] %vm290_vm0, %v1098_v28 }
  0x8c   : > { %v493_v48 = vrot.slane %v491_v62, 6  ;;  %v501_v51 = vshrl.u32 %v412_v22, 16  ;;  %v504_v31 = vshll.u32 %v412_v22, 16  ;;  %v496_v23 = vrot.slane %v494_v12, 7 }
  0x8d   : > { %v486_v26 = vrot.slane %v484_v45, 7  ;;  %v14177_v62 = vmov 0.0   ;;  %v1689_v28 = vshrl.u32 %v1628_v6, 16  ;;  %vm2071_vm14 = vcmask 261120  }
  0x8e   : > { %1470 = vrot.lane.b32.xlu1 %v1426_v61, %s9721_s23  ;;  %v477_v61 = vor.u32 %v476_v52, %v473_v50  ;;  %v503_v29 = vrot.slane %v501_v51, 6  ;;  %v506_v45 = vrot.slane %v504_v31, 7  ;;  %9534 = vmatprep.subr.bf16.mxu1 %v14177_v62  ;;  %v413_v52 = vld [vmem:[#allocation2 + $0x24] sm:$0xf]  ;;  %vm704_vm15 = vcmask 517376  }
  0x8f   : > { %1049 = vrot.lane.b32.xlu0 %v10404_v42, %s9720_s10  ;;  %v487_v2 = vor.u32 %v486_v26, %v483_v27  ;;  %v1629_v42 = vld [vmem:[#allocation2 + $0x24] sm:$0xf]  ;;  %v497_v26 = vor.u32 %v496_v23, %v493_v48  ;;  %9536 = vmatpush3.bf16.msra.mxu1 %v10590_v46  ;;  %v1682_v48 = vshll.u32 %v1627_v53, 16  ;;  %vm896_vm5 = vcmask 779776  }
  0x90   : > { %v478_v39 = vsel %vm10354_vm2, %v469_v10, %v477_v61  ;;  %v479_v22 = vrot.slane %v477_v61, 4  ;;  %v10631_v50 = vor.u32 %v506_v45, %v503_v29  ;;  %9535 = vmatprep.subr.bf16.mxu1 %v14177_v62  ;;  %9386 = vmatprep.mubr.msk.bf16.mxu1 %vm9723_vm8, %v14177_v62  ;;  %v1691_v45 = vrot.slane %v1689_v28, 5 }
  0x91   : > { %v653_v24 = vpop.permute.xlu0 %652  ;;  %572 = vst.msk [vmem:[#allocation4 + $0x30] sm:$0xf] %vm290_vm0, %v478_v39  ;;  %v489_v12 = vrot.slane %v487_v2, 4  ;;  %v499_v31 = vrot.slane %v497_v26, 4  ;;  %9374 = vmatprep.subr.bf16.mxu0 %v14177_v62  ;;  %v1684_v23 = vrot.slane %v1682_v48, 6  ;;  %v1699_v39 = vshrl.u32 %v1629_v42, 16 }
  0x92   : > { %1051 = vrot.lane.b32.xlu1 %v10411_v44, %s9720_s10  ;;  %692 = vst.msk [vmem:[#allocation4] sm:$0xf] %vm691_vm3, %v653_v24  ;;  %v10625_v44 = vld [vmem:[%s14169_s2 + $0x80] sm:$0xff]   ;;  %v488_v10 = vsel %vm10354_vm2, %v479_v22, %v487_v2  ;;  %v1692_v24 = vshll.u32 %v1628_v6, 16  ;;  %v10641_v2 = vld [vmem:[#allocation2 + $0x28] sm:$0xf] }
  0x93   : > { %1587 = vrot.lane.b32.xlu0 %v10426_v14, %s9720_s10  ;;  %v1679_v14 = vshrl.u32 %v1627_v53, 16  ;;  %573 = vst.msk [vmem:[#allocation4 + $0x3c] sm:$0xf] %vm290_vm0, %v488_v10  ;;  %v498_v51 = vsel %vm10354_vm2, %v489_v12, %v497_v26  ;;  %v1702_v22 = vshll.u32 %v1629_v42, 16  ;;  %v508_v6 = vsel %vm10354_vm2, %v499_v31, %v10631_v50  ;;  %9537 = vmatpush3.bf16.msra.mxu1 %v10625_v44 }
  0x94   : > { %v10627_v27 = vpop.permute.xlu1 %1573  ;;  %574 = vst.msk [vmem:[#allocation4 + $0x48] sm:$0xf] %vm290_vm0, %v498_v51  ;;  %575 = vst.msk [vmem:[#allocation4 + $0x54] sm:$0xf] %vm290_vm0, %v508_v6  ;;  %v1701_v10 = vrot.slane %v1699_v39, 5  ;;  %v14229_v51 = vmov 0 }
  0x95   : > { %v10636_v61 = vpop.permute.xlu0 %1571  ;;  %v1681_v53 = vrot.slane %v1679_v14, 5  ;;  %v1704_v42 = vrot.slane %v1702_v22, 6  ;;  %v509_v14 = vrot.slane %v10631_v50, 4  ;;  %v14230_v51 = vsel %vm10661_vm12, 4294967295, %v14229_v51 }
  0x96   : > { %1589 = vrot.lane.b32.xlu1 %v10459_v41, %s9720_s10  ;;  %v1694_v41 = vrot.slane %v1692_v24, 6  ;;  %14231 = vst [vmem:[#allocation5_spill] sm:$0xff] %v14230_v51  ;;  %v511_v28 = vshrl.u32 %v413_v52, 16  ;;  %v514_v24 = vshll.u32 %v413_v52, 16  ;;  %v521_v6 = vshrl.u32 %v414_v32, 16 }
  0x97   : > { %672 = vrot.lane.b32.xlu0 %v10472_v35, %s9719_s7  ;;  %v10655_v26 = vor.u32 %v1684_v23, %v1681_v53  ;;  %v1631_v35 = vld [vmem:[#allocation2 + $0x2c] sm:$0xf]  ;;  %v1705_v23 = vor.u32 %v1704_v42, %v1701_v10  ;;  %v524_v39 = vshll.u32 %v414_v32, 16  ;;  %v1709_v22 = vshrl.u32 %v10641_v2, 16 }
  0x98   : > { %v659_v12 = vpop.permute.xlu1 %658  ;;  %v1695_v31 = vor.u32 %v1694_v41, %v1691_v45  ;;  %v415_v53 = vld [vmem:[#allocation2 + $0x2c] sm:$0xf]  ;;  %v513_v45 = vrot.slane %v511_v28, 6  ;;  %v516_v41 = vrot.slane %v514_v24, 7  ;;  %v1712_v18 = vshll.u32 %v10641_v2, 16 }
  0x99   : > { %695 = vst.msk [vmem:[#allocation4 + $0x24] sm:$0xf] %vm691_vm3, %v659_v12  ;;  %v655_v48 = vpop.permute.xlu0 %654  ;;  %v1687_v50 = vrot.slane %v10655_v26, 4  ;;  %v523_v12 = vrot.slane %v521_v6, 6  ;;  %v526_v10 = vrot.slane %v524_v39, 7  ;;  %v1707_v32 = vrot.slane %v1705_v23, 4 }
  0x9a   : > { %674 = vrot.lane.b32.xlu1 %v10478_v43, %s9719_s7  ;;  %693 = vst.msk [vmem:[#allocation4 + $0xc] sm:$0xf] %vm691_vm3, %v655_v48  ;;  %v1697_v52 = vrot.slane %v1695_v31, 4  ;;  %v1711_v42 = vrot.slane %v1709_v22, 5  ;;  %v517_v49 = vor.u32 %v516_v41, %v513_v45  ;;  %v1722_v28 = vshll.u32 %v1631_v35, 16 }
  0x9b   : > { %1278 = vrot.lane.b32.xlu0 %v1242_v8, %s9719_s7  ;;  %v1696_v48 = vsel %vm10661_vm12, %v1687_v50, %v1695_v31  ;;  %v1719_v8 = vshrl.u32 %v1631_v35, 16  ;;  %v527_v31 = vor.u32 %v526_v10, %v523_v12  ;;  %v531_v24 = vshrl.u32 %v415_v53, 16  ;;  %v416_v50 = vld [vmem:[#allocation2 + $0x30] sm:$0xf]  ;;  %v1633_v45 = vld [vmem:[#allocation2 + $0x34] sm:$0xf] }
  0x9c   : > { %v847_v43 = vpop.permute.xlu1 %846  ;;  %v1706_v0 = vsel %vm10661_vm12, %v1697_v52, %v1705_v23  ;;  %1785 = vst.msk [vmem:[#allocation4 + $0x38] sm:$0xf] %vm290_vm0, %v1696_v48  ;;  %v534_v6 = vshll.u32 %v415_v53, 16  ;;  %v518_v2 = vsel %vm10354_vm2, %v509_v14, %v517_v49  ;;  %v519_v23 = vrot.slane %v517_v49, 4  ;;  %v10699_v48 = vld [vmem:[#allocation2 + $0x38] sm:$0xf] }
  0x9d   : > { %885 = vst.msk [vmem:[#allocation4 + $0xc] sm:$0xf] %vm883_vm4, %v847_v43  ;;  %v657_v29 = vpop.permute.xlu0 %656  ;;  %v1714_v39 = vrot.slane %v1712_v18, 6  ;;  %v1721_v22 = vrot.slane %v1719_v8, 5  ;;  %v533_v52 = vrot.slane %v531_v24, 6  ;;  %v541_v14 = vshrl.u32 %v416_v50, 16 }
  0x9e   : > { %1280 = vrot.lane.b32.xlu1 %v1252_v1, %s9719_s7  ;;  %694 = vst.msk [vmem:[#allocation4 + $0x18] sm:$0xf] %vm691_vm3, %v657_v29  ;;  %v1724_v29 = vrot.slane %v1722_v28, 6  ;;  %v536_v35 = vrot.slane %v534_v6, 7  ;;  %v544_v12 = vshll.u32 %v416_v50, 16  ;;  %v1729_v18 = vshrl.u32 %v1632_v15, 16 }
  0x9f   : > { %1786 = vst.msk [vmem:[#allocation4 + $0x44] sm:$0xf] %vm290_vm0, %v1706_v0  ;;  %864 = vrot.lane.b32.xlu0 %v10533_v16, %s9721_s23  ;;  %576 = vst.msk [vmem:[#allocation4 + $0x60] sm:$0xf] %vm290_vm0, %v518_v2  ;;  %v529_v0 = vrot.slane %v527_v31, 4  ;;  %v528_v16 = vsel %vm10354_vm2, %v519_v23, %v527_v31  ;;  %v1715_v41 = vor.u32 %v1714_v39, %v1711_v42  ;;  %v1732_v8 = vshll.u32 %v1632_v15, 16 }
  0xa0   : > { %v1036_v1 = vpop.permute.xlu1 %1035  ;;  %v417_v43 = vld [vmem:[#allocation2 + $0x34] sm:$0x1]  ;;  %577 = vst.msk [vmem:[#allocation4 + $0x6c] sm:$0xf] %vm290_vm0, %v528_v16  ;;  %v1725_v10 = vor.u32 %v1724_v29, %v1721_v22  ;;  %v537_v49 = vor.u32 %v536_v35, %v533_v52  ;;  %v546_v28 = vrot.slane %v544_v12, 7  ;;  %v1731_v39 = vrot.slane %v1729_v18, 5 }
  0xa1   : > { %1074 = vst.msk [vmem:[#allocation4 + $0xc] sm:$0xf] %vm1072_vm10, %v1036_v1  ;;  %v845_v53 = vpop.permute.xlu0 %844  ;;  %v1716_v42 = vsel %vm10661_vm12, %v1707_v32, %v1715_v41  ;;  %v1717_v31 = vrot.slane %v1715_v41, 4  ;;  %v1099_v24 = vld [vmem:[#allocation2 + $0x38] sm:$0x3]  ;;  %v1734_v22 = vrot.slane %v1732_v8, 6 }
  0xa2   : > { %866 = vrot.lane.b32.xlu1 %v10537_v56, %s9721_s23  ;;  %884 = vst.msk [vmem:[#allocation4] sm:$0xf] %vm883_vm4, %v845_v53  ;;  %v543_v56 = vrot.slane %v541_v14, 6  ;;  %v538_v50 = vsel %vm10354_vm2, %v529_v0, %v537_v49  ;;  %v539_v2 = vrot.slane %v537_v49, 4  ;;  %v1727_v23 = vrot.slane %v1725_v10, 4 }
  0xa3   : > { %1472 = vrot.lane.b32.xlu0 %v1436_v34, %s9721_s23  ;;  %1787 = vst.msk [vmem:[#allocation4 + $0x50] sm:$0xf] %vm290_vm0, %v1716_v42  ;;  %v1726_v34 = vsel %vm10661_vm12, %v1717_v31, %v1725_v10  ;;  %578 = vst.msk [vmem:[#allocation4 + $0x78] sm:$0xf] %vm290_vm0, %v538_v50  ;;  %v1739_v15 = vshrl.u32 %v1633_v45, 16  ;;  %v14232_v1 = vshll.u32 %v10503_v40, 16 }
  0xa4   : > { %v1259_v6 = vpop.permute.xlu1 %1258  ;;  %1112 = vst.msk [vmem:[#allocation4 + $0x94] sm:$0x3] %vm307_vm1, %v1099_v24  ;;  %v547_v32 = vor.u32 %v546_v28, %v543_v56  ;;  %v1742_v0 = vshll.u32 %v1633_v45, 16  ;;  %v551_v52 = vshll.u32 %v417_v43, 16  ;;  %v1749_v35 = vshrl.u32 %v10699_v48, 16 }
  0xa5   : > { %1297 = vst.msk [vmem:[#allocation4 + $0x4] sm:$0xf] %vm691_vm3, %v1259_v6  ;;  %v1034_v60 = vpop.permute.xlu0 %1033  ;;  %v10731_v29 = vor.u32 %v14232_v1, %v10577_v13  ;;  %v1741_v53 = vrot.slane %v1739_v15, 5  ;;  %v1635_v40 = vld [vmem:[#allocation2 + $0x3c] sm:$0xf]  ;;  %v14233_v41 = vshrl.u32 %v10541_v7, 16  ;;  %v14235_v24 = vor.u32 %v10565_v9, %v10465_v57 }
  0xa6   : > { %v9575_v25 = vld [vmem:[#allocation4 + $0x38] ss:$12 sps:$4 sm:$0xff]   ;;  %1474 = vrot.lane.b32.xlu1 %v1446_v37, %s9721_s23  ;;  %1073 = vst.msk [vmem:[#allocation4] sm:$0xf] %vm1072_vm10, %v1034_v60  ;;  %v548_v20 = vsel %vm10354_vm2, %v539_v2, %v547_v32  ;;  %v1735_v37 = vor.u32 %v1734_v22, %v1731_v39  ;;  %v549_v16 = vrot.slane %v547_v32, 4  ;;  %v1744_v45 = vrot.slane %v1742_v0, 6 }
  0xa7   : > { %1788 = vst.msk [vmem:[#allocation4 + $0x5c] sm:$0xf] %vm290_vm0, %v1726_v34  ;;  %1053 = vrot.lane.b32.xlu0 %v10600_v63, %s9720_s10  ;;  %9387 = vmatmul.mubr.msk.bf16.vlgmr.msra.gmra.mxu1 %vm2071_vm14, %v9575_v25  ;;  %v1028_v14 = vrot.slane %v14233_v41, 7  ;;  %579 = vst.msk [vmem:[#allocation4 + $0x84] sm:$0xf] %vm290_vm0, %v548_v20  ;;  %v553_v63 = vrot.slane %v551_v52, 7 }
  0xa8   : > { %v1261_v13 = vpop.permute.xlu1 %1260  ;;  %9390 = vmatprep.mubr.msk.bf16.mxu1 %vm9723_vm8, %v14177_v62  ;;  %v1751_v12 = vrot.slane %v1749_v35, 5  ;;  %v1736_v10 = vsel %vm10661_vm12, %v1727_v23, %v1735_v37  ;;  %v1737_v49 = vrot.slane %v1735_v37, 4  ;;  %v1752_v18 = vshll.u32 %v10699_v48, 16  ;;  %v1623_v34 = vld [vmem:[#allocation2 + $0xc] sm:$0xe] }
  0xa9   : > { %1298 = vst.msk [vmem:[#allocation4 + $0x10] sm:$0xf] %vm691_vm3, %v1261_v13  ;;  %v1453_v43 = vpop.permute.xlu0 %1452  ;;  %v1745_v8 = vor.u32 %v1744_v45, %v1741_v53  ;;  %v554_v42 = vsel %vm10354_vm2, %v549_v16, %v553_v63  ;;  %v9724_v31 = vmov 0   ;;  %v1762_v48 = vshll.u32 %v1635_v40, 16 }
  0xaa   : > { %1055 = vrot.lane.b32.xlu1 %v10604_v4, %s9720_s10  ;;  %1491 = vst.msk [vmem:[#allocation4 + $0x4] sm:$0xf] %vm883_vm4, %v1453_v43  ;;  %9555 = vset.pattern.permute.xlu0 %v9724_v31  ;;  %v1759_v4 = vshrl.u32 %v1635_v40, 16  ;;  %v14234_v56 = vrot.slane %v10498_v36, 5  ;;  %v1257_v6 = vrot.slane %v14235_v24, 4  ;;  %v14236_v50 = vrot.slane %v10511_v59, 7 }
  0xab   : > { %1789 = vst.msk [vmem:[#allocation4 + $0x68] sm:$0xf] %vm290_vm0, %v1736_v10  ;;  %309 = vst.msk [vmem:[#allocation3] sm:$0xf] %vm290_vm0, %v9724_v31  ;;  %1591 = vrot.lane.b32.xlu0 %v10555_v19, %s9720_s10  ;;  %9556 = vset.pattern.permute.xlu1 %v9724_v31  ;;  %v1754_v19 = vrot.slane %v1752_v18, 6  ;;  %v1746_v36 = vsel %vm10661_vm12, %v1737_v49, %v1745_v8  ;;  %v1747_v23 = vrot.slane %v1745_v8, 4 }
  0xac   : > { %310 = vst.msk [vmem:[#allocation3 + $0x4] sm:$0xf] %vm290_vm0, %v9724_v31  ;;  %311 = vst.msk [vmem:[#allocation3 + $0x8] sm:$0xf] %vm290_vm0, %v9724_v31  ;;  %v1569_v28 = vsel %vm9829_vm9, %v10563_v55, %v14234_v56  ;;  %v651_v2 = vsel %vm9813_vm7, %v10559_v3, %v14236_v50  ;;  %v1761_v55 = vrot.slane %v1759_v4, 5  ;;  %v1764_v39 = vrot.slane %v1762_v48, 6 }
  0xad   : > { %312 = vst.msk [vmem:[#allocation3 + $0xc] sm:$0xf] %vm290_vm0, %v9724_v31  ;;  %313 = vst.msk [vmem:[#allocation3 + $0x10] sm:$0xf] %vm290_vm0, %v9724_v31  ;;  %v1263_v57 = vpop.permute.xlu0 %1262  ;;  %v1450_v59 = vor.u32 %v10575_v5, %v10500_v11  ;;  %v14237_v3 = vrot.slane %v10462_v54, 4  ;;  %v1755_v25 = vor.u32 %v1754_v19, %v1751_v12  ;;  %v14238_v11 = vshll.u32 %v10541_v7, 16 }
  0xae   : > { %314 = vst.msk [vmem:[#allocation3 + $0x14] sm:$0xf] %vm290_vm0, %v9724_v31  ;;  %315 = vst.msk [vmem:[#allocation3 + $0x18] sm:$0xf] %vm290_vm0, %v9724_v31  ;;  %v9576_v60 = vld [vmem:[#allocation4 + $0x50] ss:$12 sps:$4 sm:$0xff]   ;;  %1593 = vrot.lane.b32.xlu1 %v1569_v28, %s9720_s10  ;;  %v1765_v32 = vor.u32 %v1764_v39, %v1761_v55 }
  0xaf   : > { %316 = vst.msk [vmem:[#allocation3 + $0x1c] sm:$0xf] %vm290_vm0, %v9724_v31  ;;  %317 = vst.msk [vmem:[#allocation3 + $0x20] sm:$0xf] %vm290_vm0, %v9724_v31  ;;  %v843_v9 = vsel %vm9868_vm11, %v14237_v3, %v10731_v29  ;;  %v1031_v5 = vor.u32 %v14238_v11, %v1028_v14  ;;  %v1624_v54 = vld [vmem:[#allocation2 + $0x10] sm:$0xf]  ;;  %676 = vrot.lane.b32.xlu0 %v651_v2, %s9719_s7  ;;  %9391 = vmatmul.mubr.msk.bf16.gmra.mxu1 %vm2071_vm14, %v9576_v60 }
  0xb0   : > { %318 = vst.msk [vmem:[#allocation3 + $0x24] sm:$0xf] %vm290_vm0, %v9724_v31  ;;  %319 = vst.msk [vmem:[#allocation3 + $0x28] sm:$0xf] %vm290_vm0, %v9724_v31  ;;  %v1640_v22 = vshrl.u32 %v1623_v34, 16  ;;  %v1643_v15 = vshll.u32 %v1623_v34, 16  ;;  %v1756_v1 = vsel %vm10661_vm12, %v1747_v23, %v1755_v25  ;;  %9394 = vmatprep.mubr.msk.bf16.mxu1 %vm9723_vm8, %v14177_v62 }
  0xb1   : > { %320 = vst.msk [vmem:[#allocation3 + $0x2c] sm:$0xf] %vm290_vm0, %v9724_v31  ;;  %321 = vst.msk [vmem:[#allocation3 + $0x30] sm:$0xf] %vm290_vm0, %v9724_v31  ;;  %v1757_v29 = vrot.slane %v1755_v25, 4  ;;  %v1649_v0 = vshrl.u32 %v1624_v54, 16  ;;  %v849_v16 = vpop.permute.xlu0 %848 }
  0xb2   : > { %322 = vst.msk [vmem:[#allocation3 + $0x34] sm:$0xf] %vm290_vm0, %v9724_v31  ;;  %323 = vst.msk [vmem:[#allocation3 + $0x38] sm:$0xf] %vm290_vm0, %v9724_v31  ;;  %v1652_v52 = vshll.u32 %v1624_v54, 16  ;;  %v1642_v7 = vrot.slane %v1640_v22, 5  ;;  %1282 = vrot.lane.b32.xlu1 %v1257_v6, %s9719_s7 }
  0xb3   : > { %324 = vst.msk [vmem:[#allocation3 + $0x3c] sm:$0xf] %vm290_vm0, %v9724_v31  ;;  %1790 = vst.msk [vmem:[#allocation4 + $0x74] sm:$0xf] %vm290_vm0, %v1746_v36  ;;  %v1645_v20 = vrot.slane %v1643_v15, 6  ;;  %v1766_v40 = vsel %vm10661_vm12, %v1757_v29, %v1765_v32  ;;  %v1651_v13 = vrot.slane %v1649_v0, 5  ;;  %868 = vrot.lane.b32.xlu0 %v843_v9, %s9721_s23 }
  0xb4   : > { %1610 = vst.msk [vmem:[#allocation4 + $0x4] sm:$0xf] %vm1072_vm10, %v10636_v61  ;;  %v1455_v61 = vpop.permute.xlu1 %1454  ;;  %v1654_v41 = vrot.slane %v1652_v52, 6  ;;  %v1451_v14 = vrot.slane %v1450_v59, 4  ;;  %v1767_v43 = vrot.slane %v1765_v32, 4  ;;  %v14239_v8 = vrot.slane %v10507_v33, 4 }
  0xb5   : > { %580 = vst.msk [vmem:[#allocation4 + $0x90] sm:$0x3] %vm307_vm1, %v554_v42  ;;  %v1646_v45 = vor.u32 %v1645_v20, %v1642_v7  ;;  %v1457_v28 = vpop.permute.xlu0 %1456  ;;  %v1626_v6 = vld [vmem:[#allocation2 + $0x18] sm:$0xf]  ;;  %v326_v55 = vld [vmem:[%s10836_s29] sm:$0xff]  ;;  %v327_v25 = vld [vmem:[%s10836_s29 + $0x8] sm:$0xff] }
  0xb6   : > { %1492 = vst.msk [vmem:[#allocation4 + $0x10] sm:$0xf] %vm883_vm4, %v1455_v61  ;;  %886 = vst.msk [vmem:[#allocation4 + $0x18] sm:$0xf] %vm883_vm4, %v849_v16  ;;  %v1655_v10 = vor.u32 %v1654_v41, %v1651_v13  ;;  %v1032_v42 = vsel %vm9868_vm11, %v14239_v8, %v1031_v5  ;;  %1476 = vrot.lane.b32.xlu1 %v1451_v14, %s9721_s23  ;;  %v1669_v19 = vshrl.u32 %v1626_v6, 16  ;;  %v1672_v36 = vshll.u32 %v1626_v6, 16 }
  0xb7   : > { %1611 = vst.msk [vmem:[#allocation4 + $0x10] sm:$0xf] %vm1072_vm10, %v10627_v27  ;;  %v1625_v27 = vld [vmem:[#allocation2 + $0x14] sm:$0xf]  ;;  %v1647_v4 = vrot.slane %v1646_v45, 4  ;;  %1057 = vrot.lane.b32.xlu0 %v1032_v42, %s9720_s10  ;;  %v329_v54 = vld [vmem:[%s10836_s29 + $0x18] sm:$0xff] }
  0xb8   : > { %1299 = vst.msk [vmem:[#allocation4 + $0x1c] sm:$0xf] %vm691_vm3, %v1263_v57  ;;  %v1265_v35 = vpop.permute.xlu1 %1264  ;;  %v1659_v37 = vshrl.u32 %v1625_v27, 16  ;;  %v1662_v53 = vshll.u32 %v1625_v27, 16  ;;  %v1657_v24 = vrot.slane %v1655_v10, 4  ;;  %v1671_v57 = vrot.slane %v1669_v19, 5 }
  0xb9   : > { %1791 = vst.msk [vmem:[#allocation4 + $0x80] sm:$0xf] %vm290_vm0, %v1756_v1  ;;  %1792 = vst.msk [vmem:[#allocation4 + $0x8c] sm:$0xf] %vm290_vm0, %v1766_v40  ;;  %v1656_v2 = vsel %vm10661_vm12, %v1647_v4, %v1655_v10  ;;  %v1038_v59 = vpop.permute.xlu0 %1037  ;;  %v1674_v34 = vrot.slane %v1672_v36, 6  ;;  %v328_v27 = vld [vmem:[%s10836_s29 + $0x10] sm:$0xff] }
  0xba   : > { %1300 = vst.msk [vmem:[#allocation4 + $0x28] sm:$0xf] %vm691_vm3, %v1265_v35  ;;  %v1661_v63 = vrot.slane %v1659_v37, 5  ;;  %v1664_v12 = vrot.slane %v1662_v53, 6  ;;  %v9577_v31 = vld [vmem:[#allocation4 + $0x68] ss:$12 sps:$4 sm:$0xff]   ;;  %1595 = vrot.lane.b32.xlu1 %v10582_v21, %s9720_s10 }
  0xbb   : > { %v1794_v49 = vld [vmem:[#allocation4] sm:$0xff]  ;;  %1793 = vst.msk [vmem:[#allocation4 + $0x98] sm:$0x3] %vm307_vm1, %v1767_v43  ;;  %9395 = vmatmul.mubr.msk.bf16.gmra.mxu1 %vm2071_vm14, %v9577_v31  ;;  %v3571_v39 = vld [vmem:[#allocation3 + $0x3c] sm:$0xf]  ;;  %341 = vperm.xlu0 %9555, %v326_v55   ;;  %v1675_v15 = vor.u32 %v1674_v34, %v1671_v57  ;;  %v333_v53 = vld [vmem:[%s10836_s29 + $0x38] sm:$0xff] }
  0xbc   : > { %v851_v18 = vpop.permute.xlu1 %850  ;;  %v1665_v48 = vor.u32 %v1664_v12, %v1661_v63  ;;  %1493 = vst.msk [vmem:[#allocation4 + $0x1c] sm:$0xf] %vm883_vm4, %v1457_v28  ;;  %9398 = vmatprep.mubr.msk.bf16.mxu1 %vm9723_vm8, %v14177_v62  ;;  %v3692_v9 = vshrl.u32 %v3571_v39, 16  ;;  %v3695_v60 = vshll.u32 %v3571_v39, 16  ;;  %v331_v35 = vld [vmem:[%s10836_s29 + $0x28] sm:$0xff]  ;;  %v330_v37 = vld [vmem:[%s10836_s29 + $0x20] sm:$0xff] }
  0xbd   : > { %887 = vst.msk [vmem:[#allocation4 + $0x24] sm:$0xf] %vm883_vm4, %v851_v18  ;;  %v1576_v21 = vpop.permute.xlu0 %1575  ;;  %v1677_v29 = vrot.slane %v1675_v15, 4  ;;  %v332_v40 = vld [vmem:[%s10836_s29 + $0x30] sm:$0xff]  ;;  %v335_v13 = vld [vmem:[%s10836_s29 + $0x48] sm:$0xff]  ;;  %v334_v10 = vld [vmem:[%s10836_s29 + $0x40] sm:$0xff] }
  0xbe   : > { %v1796_v56 = vld [vmem:[#allocation4 + $0xc] sm:$0xff]  ;;  %v1666_v61 = vsel %vm10661_vm12, %v1657_v24, %v1665_v48  ;;  %1781 = vst.msk [vmem:[#allocation4 + $0x8] sm:$0xf] %vm290_vm0, %v1656_v2  ;;  %v3694_v11 = vrot.slane %v3692_v9, 5  ;;  %v3697_v5 = vrot.slane %v3695_v60, 6  ;;  %v1667_v22 = vrot.slane %v1665_v48, 4  ;;  %346 = vperm.xlu1 %9556, %v327_v25  }
  0xbf   : > { %v8579_v50 = vcombine.high %v1794_v49, %v1796_v56  ;;  %v8578_v33 = vcombine.low %v1794_v49, %v1796_v56  ;;  %1782 = vst.msk [vmem:[#allocation4 + $0x14] sm:$0xf] %vm290_vm0, %v1666_v61  ;;  %356 = vperm.xlu0 %9555, %v329_v54   ;;  %v1686_v7 = vsel %vm10661_vm12, %v1677_v29, %v10655_v26  ;;  %v337_v49 = vld [vmem:[%s10836_s29 + $0x58] sm:$0xff]  ;;  %v336_v42 = vld [vmem:[%s10836_s29 + $0x50] sm:$0xff]  ;;  %v338_v48 = vld [vmem:[%s10836_s29 + $0x60] sm:$0xf] }
  0xc0   : > { %v1459_v23 = vpop.permute.xlu1 %1458  ;;  %v9578_v3 = vld [vmem:[#allocation4 + $0x80] ss:$12 sps:$4 sm:$0xff]   ;;  %1075 = vst.msk [vmem:[#allocation4 + $0x18] sm:$0xf] %vm1072_vm10, %v1038_v59  ;;  %v10854_v1 = vor.u32 %v3697_v5, %v3694_v11  ;;  %1612 = vst.msk [vmem:[#allocation4 + $0x1c] sm:$0xf] %vm1072_vm10, %v1576_v21 }
  0xc1   : > { %2125 = vmatprep.mubr.bf16.mxu0 %v8579_v50  ;;  %1494 = vst.msk [vmem:[#allocation4 + $0x28] sm:$0xf] %vm883_vm4, %v1459_v23  ;;  %v661_v20 = vpop.permute.xlu0 %660  ;;  %vm1085_vm6 = vcmask 1042176   ;;  %v9710_v17 = vld [vmem:[#allocation3 + $0x3c] sm:$0x7] }
  0xc2   : > { %2126 = vmatmul.mubr.bf16.vlgmr.msra.gmra.mxu0 %v8578_v33  ;;  %14240 = vst [vmem:[#allocation6_spill] sm:$0xff] %v10854_v1  ;;  %v3700_v0 = vrot.slane %v10854_v1, 4  ;;  %1784 = vst.msk [vmem:[#allocation4 + $0x2c] sm:$0xf] %vm290_vm0, %v1686_v7  ;;  %351 = vperm.xlu1 %9556, %v328_v27  }
  0xc3   : > { %9375 = vmatpush3.bf16.msra.mxu0 %v10590_v46  ;;  %v1676_v46 = vsel %vm10661_vm12, %v1667_v22, %v1675_v15  ;;  %9399 = vmatmul.mubr.msk.bf16.gmra.mxu1 %vm2071_vm14, %v9578_v3  ;;  %696 = vst.msk [vmem:[#allocation4 + $0x30] sm:$0xf] %vm691_vm3, %v661_v20 }
  0xc4   : > { %9376 = vmatprep.subr.bf16.mxu0 %v14177_v62  ;;  %v1040_v32 = vpop.permute.xlu1 %1039  ;;  %1783 = vst.msk [vmem:[#allocation4 + $0x20] sm:$0xf] %vm290_vm0, %v1676_v46  ;;  %9402 = vmatprep.mubr.msk.bf16.mxu1 %vm9723_vm8, %v14177_v62 }
  0xc5   : > { %1076 = vst.msk [vmem:[#allocation4 + $0x24] sm:$0xf] %vm1072_vm10, %v1040_v32  ;;  %366 = vperm.xlu0 %9555, %v331_v35   ;;  %v1267_v26 = vpop.permute.xlu0 %1266 }
  0xc6   : > { %1301 = vst.msk [vmem:[#allocation4 + $0x34] sm:$0xf] %vm691_vm3, %v1267_v26  ;;  %361 = vperm.xlu1 %9556, %v330_v37  }
  0xc7   : > { %9377 = vmatpush3.bf16.msra.mxu0 %v10625_v44  ;;  %v9579_v44 = vld [vmem:[#allocation4 + $0x98] ss:$0 sps:$4 sm:$0x33]  }
  0xc8   : > { %v1578_v52 = vpop.permute.xlu1 %1577  ;;  %9406 = vmatprep.subr.bf16.mxu0 %v14177_v62  ;;  %3726 = vst.msk [vmem:[#allocation4 + $0x98] sm:$0x3] %vm307_vm1, %v3700_v0  ;;  %v1798_v41 = vld [vmem:[#allocation4 + $0x18] sm:$0xff] }
  0xc9   : > { %1613 = vst.msk [vmem:[#allocation4 + $0x28] sm:$0xf] %vm1072_vm10, %v1578_v52  ;;  %376 = vperm.xlu0 %9555, %v333_v53   ;;  %v853_v63 = vpop.permute.xlu0 %852 }
  0xca   : > { %888 = vst.msk [vmem:[#allocation4 + $0x30] sm:$0xf] %vm883_vm4, %v853_v63  ;;  %371 = vperm.xlu1 %9556, %v332_v40  }
  0xcb   : > { %9403 = vmatmul.mubr.msk.bf16.gmra.mxu1 %vm2071_vm14, %v9579_v44 }
  0xcc   : > { %v663_v16 = vpop.permute.xlu1 %662 }
  0xcd   : > { %697 = vst.msk [vmem:[#allocation4 + $0x3c] sm:$0xf] %vm691_vm3, %v663_v16  ;;  %386 = vperm.xlu0 %9555, %v335_v13   ;;  %v1461_v8 = vpop.permute.xlu0 %1460 }
  0xce   : > { %1495 = vst.msk [vmem:[#allocation4 + $0x34] sm:$0xf] %vm883_vm4, %v1461_v8  ;;  %381 = vperm.xlu1 %9556, %v334_v10  }
  0xd0   : > { %v1800_v14 = vld [vmem:[#allocation4 + $0x24] sm:$0xff]  ;;  %v1269_v45 = vpop.permute.xlu1 %1268 }
  0xd1   : > { %1302 = vst.msk [vmem:[#allocation4 + $0x40] sm:$0xf] %vm691_vm3, %v1269_v45  ;;  %v8582_v12 = vcombine.high %v1798_v41, %v1800_v14  ;;  %v8581_v43 = vcombine.low %v1798_v41, %v1800_v14  ;;  %396 = vperm.xlu0 %9555, %v337_v49   ;;  %v1042_v4 = vpop.permute.xlu0 %1041 }
  0xd2   : > { %1077 = vst.msk [vmem:[#allocation4 + $0x30] sm:$0xf] %vm1072_vm10, %v1042_v4  ;;  %391 = vperm.xlu1 %9556, %v336_v42  }
  0xd3   : > { %2133 = vmatprep.mubr.bf16.mxu0 %v8582_v12 }
  0xd4   : > { %v855_v18 = vpop.permute.xlu1 %854  ;;  %2134 = vmatmul.mubr.bf16.gmra.mxu0 %v8581_v43 }
  0xd5   : > { %889 = vst.msk [vmem:[#allocation4 + $0x3c] sm:$0xf] %vm883_vm4, %v855_v18  ;;  %v1580_v28 = vpop.permute.xlu0 %1579 }
  0xd6   : > { %1614 = vst.msk [vmem:[#allocation4 + $0x34] sm:$0xf] %vm1072_vm10, %v1580_v28  ;;  %401 = vperm.xlu1 %9556, %v338_v48  }
  0xd8   : > { %v1463_v31 = vpop.permute.xlu1 %1462 }
  0xd9   : > { %1496 = vst.msk [vmem:[#allocation4 + $0x40] sm:$0xf] %vm883_vm4, %v1463_v31  ;;  %v665_v6 = vpop.permute.xlu0 %664 }
  0xda   : > { %698 = vst.msk [vmem:[#allocation4 + $0x48] sm:$0xf] %vm691_vm3, %v665_v6 }
  0xdc   : > { %v1044_v56 = vpop.permute.xlu1 %1043 }
  0xdd   : > { %1078 = vst.msk [vmem:[#allocation4 + $0x3c] sm:$0xf] %vm1072_vm10, %v1044_v56  ;;  %v1271_v33 = vpop.permute.xlu0 %1270  ;;  %v1802_v2 = vld [vmem:[#allocation4 + $0x30] sm:$0xff] }
  0xde   : > { %1303 = vst.msk [vmem:[#allocation4 + $0x4c] sm:$0xf] %vm691_vm3, %v1271_v33 }
  0xe0   : > { %v1582_v24 = vpop.permute.xlu1 %1581 }
  0xe1   : > { %1615 = vst.msk [vmem:[#allocation4 + $0x40] sm:$0xf] %vm1072_vm10, %v1582_v24  ;;  %v857_v36 = vpop.permute.xlu0 %856 }
  0xe2   : > { %890 = vst.msk [vmem:[#allocation4 + $0x48] sm:$0xf] %vm883_vm4, %v857_v36  ;;  %v10937_v36 = vld [vmem:[#allocation3 + $0x4] sm:$0xf] }
  0xe4   : > { %v667_v50 = vpop.permute.xlu1 %666 }
  0xe5   : > { %699 = vst.msk [vmem:[#allocation4 + $0x54] sm:$0xf] %vm691_vm3, %v667_v50  ;;  %v1465_v57 = vpop.permute.xlu0 %1464 }
  0xe6   : > { %1497 = vst.msk [vmem:[#allocation4 + $0x4c] sm:$0xf] %vm883_vm4, %v1465_v57 }
  0xe8   : > { %v1804_v19 = vld [vmem:[#allocation4 + $0x3c] sm:$0xff]  ;;  %v1273_v61 = vpop.permute.xlu1 %1272 }
  0xe9   : > { %1304 = vst.msk [vmem:[#allocation4 + $0x58] sm:$0xf] %vm691_vm3, %v1273_v61  ;;  %v8585_v23 = vcombine.high %v1802_v2, %v1804_v19  ;;  %v8584_v55 = vcombine.low %v1802_v2, %v1804_v19  ;;  %v1046_v3 = vpop.permute.xlu0 %1045  ;;  %v2535_v61 = vld [vmem:[#allocation3] sm:$0x8] }
  0xea   : > { %1079 = vst.msk [vmem:[#allocation4 + $0x48] sm:$0xf] %vm1072_vm10, %v1046_v3 }
  0xeb   : > { %2141 = vmatprep.mubr.bf16.mxu0 %v8585_v23  ;;  %v2656_v23 = vld [vmem:[#allocation3 + $0x4] sm:$0xf] }
  0xec   : > { %v859_v39 = vpop.permute.xlu1 %858  ;;  %2142 = vmatmul.mubr.bf16.gmra.mxu0 %v8584_v55  ;;  %v8637_v55 = vrot.slane %v2535_v61, 11  ;;  %v2675_v57 = vshrl.u32 %v2656_v23, 16  ;;  %v11000_v61 = vld [vmem:[%s14170_s3] ss:$0 sm:$0xff] }
  0xed   : > { %891 = vst.msk [vmem:[#allocation4 + $0x54] sm:$0xf] %vm883_vm4, %v859_v39  ;;  %v1584_v60 = vpop.permute.xlu0 %1583  ;;  %v14179_v39 = vrot.slane %v10937_v36, 7 }
  0xee   : > { %1616 = vst.msk [vmem:[#allocation4 + $0x4c] sm:$0xf] %vm1072_vm10, %v1584_v60  ;;  %v10946_v60 = vrot.slane %v2675_v57, 7  ;;  %v9582_v57 = vld [vmem:[%s14169_s2 + $0x118] sm:$0xff]  }
  0xef   : > { %v2566_v3 = vsel %vm9813_vm7, %v8637_v55, %v14179_v39 }
  0xf0   : > { %v1467_v59 = vpop.permute.xlu1 %1466  ;;  %2603 = vrot.lane.b32.xlu0 %v2566_v3, %s9719_s7 }
  0xf1   : > { %1498 = vst.msk [vmem:[#allocation4 + $0x58] sm:$0xf] %vm883_vm4, %v1467_v59  ;;  %v669_v34 = vpop.permute.xlu0 %668  ;;  %v2655_v59 = vld [vmem:[#allocation3] sm:$0x8] }
  0xf2   : > { %700 = vst.msk [vmem:[#allocation4 + $0x60] sm:$0xf] %vm691_vm3, %v669_v34 }
  0xf4   : > { %v1048_v9 = vpop.permute.xlu1 %1047 }
  0xf5   : > { %1080 = vst.msk [vmem:[#allocation4 + $0x54] sm:$0xf] %vm1072_vm10, %v1048_v9  ;;  %v1275_v5 = vpop.permute.xlu0 %1274  ;;  %v1806_v32 = vld [vmem:[#allocation4 + $0x48] sm:$0xff]  ;;  %v2670_v9 = vshrl.u32 %v2655_v59, 16  ;;  %v2362_v59 = vld [vmem:[#allocation3 + $0x4] sm:$0xf] }
  0xf6   : > { %1305 = vst.msk [vmem:[#allocation4 + $0x64] sm:$0xf] %vm691_vm3, %v1275_v5  ;;  %v9580_v5 = vld [vmem:[#allocation4 + $0x8] ss:$12 sps:$4 sm:$0xff]  }
  0xf7   : > { %v8638_v34 = vrot.slane %v2670_v9, 11 }
  0xf8   : > { %v1586_v25 = vpop.permute.xlu1 %1585 }
  0xf9   : > { %1617 = vst.msk [vmem:[#allocation4 + $0x58] sm:$0xf] %vm1072_vm10, %v1586_v25  ;;  %v861_v15 = vpop.permute.xlu0 %860  ;;  %v2678_v25 = vshll.u32 %v2656_v23, 16 }
  0xfa   : > { %892 = vst.msk [vmem:[#allocation4 + $0x60] sm:$0xf] %vm883_vm4, %v861_v15 }
  0xfc   : > { %v671_v11 = vpop.permute.xlu1 %670 }
  0xfd   : > { %701 = vst.msk [vmem:[#allocation4 + $0x6c] sm:$0xf] %vm691_vm3, %v671_v11  ;;  %v1469_v27 = vpop.permute.xlu0 %1468  ;;  %v2680_v11 = vor.u32 %v2678_v25, %v10946_v60 }
  0xfe   : > { %1499 = vst.msk [vmem:[#allocation4 + $0x64] sm:$0xf] %vm883_vm4, %v1469_v27 }
 0x100   : > { %v1808_v54 = vld [vmem:[#allocation4 + $0x54] sm:$0xff]  ;;  %v1277_v22 = vpop.permute.xlu1 %1276 }
 0x101   : > { %1306 = vst.msk [vmem:[#allocation4 + $0x70] sm:$0xf] %vm691_vm3, %v1277_v22  ;;  %v8588_v21 = vcombine.high %v1806_v32, %v1808_v54  ;;  %v8587_v46 = vcombine.low %v1806_v32, %v1808_v54  ;;  %v1050_v52 = vpop.permute.xlu0 %1049  ;;  %v2681_v32 = vsel %vm9868_vm11, %v8638_v34, %v2680_v11  ;;  %v9581_v54 = vld [vmem:[#allocation4 + $0x20] ss:$12 sps:$4 sm:$0xff]   ;;  %v2385_v11 = vshrl.u32 %v2362_v59, 16 }
 0x102   : > { %1081 = vst.msk [vmem:[#allocation4 + $0x60] sm:$0xf] %vm1072_vm10, %v1050_v52  ;;  %2790 = vrot.lane.b32.xlu0 %v2681_v32, %s9721_s23 }
 0x103   : > { %2149 = vmatprep.mubr.bf16.mxu0 %v8588_v21 }
 0x104   : > { %v863_v29 = vpop.permute.xlu1 %862  ;;  %2150 = vmatmul.mubr.bf16.gmra.mxu0 %v8587_v46 }
 0x105   : > { %893 = vst.msk [vmem:[#allocation4 + $0x6c] sm:$0xf] %vm883_vm4, %v863_v29  ;;  %v1588_v44 = vpop.permute.xlu0 %1587 }
 0x106   : > { %1618 = vst.msk [vmem:[#allocation4 + $0x64] sm:$0xf] %vm1072_vm10, %v1588_v44 }
 0x108   : > { %v1471_v0 = vpop.permute.xlu1 %1470 }
 0x109   : > { %1500 = vst.msk [vmem:[#allocation4 + $0x70] sm:$0xf] %vm883_vm4, %v1471_v0  ;;  %v673_v20 = vpop.permute.xlu0 %672 }
 0x10a   : > { %702 = vst.msk [vmem:[#allocation4 + $0x78] sm:$0xf] %vm691_vm3, %v673_v20 }
 0x10c   : > { %v1052_v35 = vpop.permute.xlu1 %1051 }
 0x10d   : > { %1082 = vst.msk [vmem:[#allocation4 + $0x6c] sm:$0xf] %vm1072_vm10, %v1052_v35  ;;  %v1279_v53 = vpop.permute.xlu0 %1278  ;;  %v1810_v16 = vld [vmem:[#allocation4 + $0x60] sm:$0xff] }
 0x10e   : > { %1307 = vst.msk [vmem:[#allocation4 + $0x7c] sm:$0xf] %vm691_vm3, %v1279_v53 }
 0x110   : > { %v1590_v7 = vpop.permute.xlu1 %1589 }
 0x111   : > { %1619 = vst.msk [vmem:[#allocation4 + $0x70] sm:$0xf] %vm1072_vm10, %v1590_v7  ;;  %v865_v13 = vpop.permute.xlu0 %864 }
 0x112   : > { %894 = vst.msk [vmem:[#allocation4 + $0x78] sm:$0xf] %vm883_vm4, %v865_v13 }
 0x114   : > { %v675_v37 = vpop.permute.xlu1 %674 }
 0x115   : > { %703 = vst.msk [vmem:[#allocation4 + $0x84] sm:$0xf] %vm691_vm3, %v675_v37  ;;  %v1473_v63 = vpop.permute.xlu0 %1472 }
 0x116   : > { %1501 = vst.msk [vmem:[#allocation4 + $0x7c] sm:$0xf] %vm883_vm4, %v1473_v63 }
 0x118   : > { %v1812_v26 = vld [vmem:[#allocation4 + $0x6c] sm:$0xff]  ;;  %v1281_v40 = vpop.permute.xlu1 %1280 }
 0x119   : > { %1308 = vst.msk [vmem:[#allocation4 + $0x88] sm:$0xf] %vm691_vm3, %v1281_v40  ;;  %v8591_v41 = vcombine.high %v1810_v16, %v1812_v26  ;;  %v8590_v14 = vcombine.low %v1810_v16, %v1812_v26  ;;  %v1054_v43 = vpop.permute.xlu0 %1053 }
 0x11a   : > { %1083 = vst.msk [vmem:[#allocation4 + $0x78] sm:$0xf] %vm1072_vm10, %v1054_v43 }
 0x11b   : > { %2157 = vmatprep.mubr.bf16.mxu0 %v8591_v41 }
 0x11c   : > { %v867_v45 = vpop.permute.xlu1 %866  ;;  %2158 = vmatmul.mubr.bf16.gmra.mxu0 %v8590_v14 }
 0x11d   : > { %895 = vst.msk [vmem:[#allocation4 + $0x84] sm:$0xf] %vm883_vm4, %v867_v45  ;;  %v1592_v49 = vpop.permute.xlu0 %1591 }
 0x11e   : > { %1620 = vst.msk [vmem:[#allocation4 + $0x7c] sm:$0xf] %vm1072_vm10, %v1592_v49 }
 0x120   : > { %v1475_v12 = vpop.permute.xlu1 %1474 }
 0x121   : > { %1502 = vst.msk [vmem:[#allocation4 + $0x88] sm:$0xf] %vm883_vm4, %v1475_v12  ;;  %v677_v8 = vpop.permute.xlu0 %676 }
 0x122   : > { %705 = vst.msk [vmem:[#allocation4 + $0x90] sm:$0x3] %vm704_vm15, %v677_v8 }
 0x124   : > { %v1056_v10 = vpop.permute.xlu1 %1055 }
 0x125   : > { %1084 = vst.msk [vmem:[#allocation4 + $0x84] sm:$0xf] %vm1072_vm10, %v1056_v10  ;;  %v869_v31 = vpop.permute.xlu0 %868  ;;  %v1814_v4 = vld [vmem:[#allocation4 + $0x78] sm:$0xff] }
 0x126   : > { %897 = vst.msk [vmem:[#allocation4 + $0x90] sm:$0x3] %vm896_vm5, %v869_v31 }
 0x128   : > { %v1594_v18 = vpop.permute.xlu1 %1593 }
 0x129   : > { %1621 = vst.msk [vmem:[#allocation4 + $0x88] sm:$0xf] %vm1072_vm10, %v1594_v18  ;;  %v1058_v24 = vpop.permute.xlu0 %1057 }
 0x12a   : > { %1086 = vst.msk [vmem:[#allocation4 + $0x90] sm:$0x3] %vm1085_vm6, %v1058_v24 }
 0x12c   : > { %v1283_v42 = vpop.permute.xlu1 %1282 }
 0x12d   : > { %1309 = vst.msk [vmem:[#allocation4 + $0x94] sm:$0x3] %vm704_vm15, %v1283_v42 }
 0x130   : > { %v1816_v48 = vld [vmem:[#allocation4 + $0x84] sm:$0xff]  ;;  %v1477_v56 = vpop.permute.xlu1 %1476 }
 0x131   : > { %1503 = vst.msk [vmem:[#allocation4 + $0x94] sm:$0x3] %vm896_vm5, %v1477_v56  ;;  %v8594_v28 = vcombine.high %v1814_v4, %v1816_v48  ;;  %v8593_v6 = vcombine.low %v1814_v4, %v1816_v48 }
 0x133   : > { %2165 = vmatprep.mubr.bf16.mxu0 %v8594_v28 }
 0x134   : > { %v1596_v50 = vpop.permute.xlu1 %1595  ;;  %2166 = vmatmul.mubr.bf16.gmra.mxu0 %v8593_v6 }
 0x135   : > { %1622 = vst.msk [vmem:[#allocation4 + $0x94] sm:$0x3] %vm1085_vm6, %v1596_v50 }
 0x136   : > { %v10981_v8 = vpop.permute.xlu0 %341 }
 0x137   : > { %14241 = vst [vmem:[#allocation7_spill] sm:$0xff] %v10981_v8 }
 0x139   : > { %v10989_v56 = vpop.permute.xlu1 %346 }
 0x13a   : > { %v10983_v31 = vpop.permute.xlu0 %356  ;;  %14244 = vst [vmem:[#allocation10_spill] sm:$0xff] %v10989_v56 }
 0x13b   : > { %14242 = vst [vmem:[#allocation8_spill] sm:$0xff] %v10983_v31 }
 0x13c   : > { %v1818_v33 = vld [vmem:[#allocation4 + $0x90] sm:$0x33] }
 0x13d   : > { %v8597_v2 = vcombine.high %v1818_v33, %v1818_v33  ;;  %v8596_v19 = vcombine.low %v1818_v33, %v1818_v33  ;;  %v10995_v33 = vpop.permute.xlu1 %351 }
 0x13e   : > { %14246 = vst [vmem:[#allocation12_spill] sm:$0xff] %v10995_v33 }
 0x13f   : > { %2173 = vmatprep.mubr.bf16.mxu0 %v8597_v2 }
 0x140   : > { %2174 = vmatmul.mubr.bf16.gmra.mxu0 %v8596_v19  ;;  %v10987_v48 = vpop.permute.xlu0 %366 }
 0x141   : > { %9378 = vmatprep.mubr.msk.bf16.mxu0 %vm9723_vm8, %v14177_v62  ;;  %14243 = vst [vmem:[#allocation9_spill] sm:$0xff] %v10987_v48  ;;  %v11008_v34 = vpop.permute.xlu1 %361 }
 0x142   : > { %14247 = vst [vmem:[#allocation13_spill] sm:$0xff] %v11008_v34 }
 0x144   : > { %v10993_v24 = vpop.permute.xlu0 %376 }
 0x145   : > { %14245 = vst [vmem:[#allocation11_spill] sm:$0xff] %v10993_v24 }
 0x148   : > { %9379 = vmatmul.mubr.msk.bf16.vlgmr.msra.gmra.mxu0 %vm2071_vm14, %v9580_v5  ;;  %v11002_v23 = vpop.permute.xlu0 %386  ;;  %v2388_v5 = vshll.u32 %v2362_v59, 16 }
 0x149   : > { %9382 = vmatprep.mubr.msk.bf16.mxu0 %vm9723_vm8, %v14177_v62  ;;  %9407 = vmatpush3.bf16.msra.mxu0 %v9582_v57 }
 0x14a   : > { %9408 = vmatprep.subr.bf16.mxu0 %v14177_v62 }
 0x150   : > { %9383 = vmatmul.mubr.msk.bf16.gmra.mxu0 %vm2071_vm14, %v9581_v54 }
 0x151   : > { %9410 = vmatprep.mubr.msk.bf16.mxu0 %vm9723_vm8, %v14177_v62 }
 0x167   : > { %v2231_v22 = vpop.f32.mrf.mxu1 }
 0x169   : > { %v9388_v15 = vpop.f32.mrf.mxu1 }
 0x16a   : > { %v9583_v15 = vld [vmem:[%s14169_s2 + $0x110] sm:$0xff]  }
 0x16b   : > { %v2234_v21 = vpop.f32.mrf.mxu1  ;;  %9409 = vmatpush3.bf16.msra.mxu0 %v9583_v15 }
 0x16c   : > { %9438 = vmatprep.subr.bf16.mxu0 %v14177_v62 }
 0x16d   : > { %v9389_v46 = vpop.f32.mrf.mxu1 }
 0x16e   : > { %v2361_v46 = vld [vmem:[#allocation3] sm:$0xc] }
 0x16f   : > { %v10959_v29 = vpop.f32.mrf.mxu1 }
 0x171   : > { %v9392_v27 = vpop.f32.mrf.mxu1 }
 0x172   : > { %v11015_v27 = vpop.permute.xlu0 %396 }
 0x173   : > { %v10961_v0 = vpop.f32.mrf.mxu1  ;;  %14248 = vst [vmem:[#allocation14_spill] sm:$0xff] %v11015_v27 }
 0x175   : > { %v9393_v52 = vpop.f32.mrf.mxu1 }
 0x176   : > { %v2376_v52 = vshrl.u32 %v2361_v46, 16 }
 0x17b   : > { %v10963_v35 = vpop.f32.mrf.mxu1 }
 0x17d   : > { %v9396_v7 = vpop.f32.mrf.mxu1 }
 0x17f   : > { %v10965_v37 = vpop.f32.mrf.mxu1 }
 0x181   : > { %v9397_v16 = vpop.f32.mrf.mxu1 }
 0x182   : > { %v9113_v44 = vpop.f32.mrf.mxu0 }
 0x183   : > { %v10969_v26 = vpop.f32.mrf.mxu1 }
 0x184   : > { %v9114_v20 = vpop.f32.mrf.mxu0 }
 0x185   : > { %v10967_v53 = vadd.f32 %v9114_v20, %v9113_v44  ;;  %v9400_v40 = vpop.f32.mrf.mxu1  ;;  %v2378_v20 = vrot.slane %v2376_v52, 6 }
 0x186   : > { %v10973_v41 = vpop.f32.mrf.mxu0  ;;  %v2387_v40 = vrot.slane %v2385_v11, 6 }
 0x187   : > { %v10971_v13 = vpop.f32.mrf.mxu1 }
 0x188   : > { %v10975_v45 = vpop.f32.mrf.mxu0 }
 0x189   : > { %v9401_v14 = vpop.f32.mrf.mxu1 }
 0x18a   : > { %v2390_v14 = vrot.slane %v2388_v5, 7 }
 0x18b   : > { %v10977_v12 = vpop.f32.mrf.mxu1 }
 0x18d   : > { %v9404_v49 = vpop.f32.mrf.mxu1 }
 0x18f   : > { %v2266_v18 = vpop.f32.mrf.mxu1 }
 0x190   : > { %v2604_v18 = vpop.permute.xlu0 %2603 }
 0x191   : > { %v9405_v42 = vpop.f32.mrf.mxu1 }
 0x194   : > { %v9119_v63 = vpop.f32.mrf.mxu0 }
 0x196   : > { %v9120_v43 = vpop.f32.mrf.mxu0 }
 0x197   : > { %v10979_v10 = vadd.f32 %v9120_v43, %v9119_v63 }
 0x198   : > { %v10985_v4 = vpop.f32.mrf.mxu0 }
 0x19a   : > { %v10991_v28 = vpop.f32.mrf.mxu0 }
 0x1ac   : > { %v9125_v6 = vpop.f32.mrf.mxu0 }
 0x1ae   : > { %v9126_v50 = vpop.f32.mrf.mxu0 }
 0x1af   : > { %v9127_v2 = vadd.f32 %v9126_v50, %v9125_v6  ;;  %v11021_v50 = vor.u32 %v2390_v14, %v2387_v40 }
 0x1b0   : > { %v9128_v19 = vpop.f32.mrf.mxu0 }
 0x1b1   : > { %v2144_v55 = vadd.f32 %v9127_v2, %v11000_v61  ;;  %14249 = vst [vmem:[#allocation15_spill] sm:$0xff] %v11021_v50 }
 0x1b2   : > { %v9129_v3 = vpop.f32.mrf.mxu0 }
 0x1b3   : > { %v2232_v9 = vadd.f32 %v2231_v22, %v2144_v55  ;;  %v9130_v25 = vadd.f32 %v9129_v3, %v9128_v19  ;;  %v2379_v22 = vshll.u32 %v2361_v46, 16  ;;  %v2791_v19 = vpop.permute.xlu0 %2790 }
 0x1b5   : > { %v2273_v32 = vmax.f32 %v2232_v9, 0.0  ;;  %v2147_v54 = vadd.f32 %v9130_v25, %v11000_v61  ;;  %v2381_v16 = vrot.slane %v2379_v22, 7 }
 0x1b7   : > { %v2235_v44 = vadd.f32 %v2234_v21, %v2147_v54  ;;  %v2286_v7 = vmul.f32 %v2273_v32, %v11008_v34  ;;  %v2382_v49 = vor.u32 %v2381_v16, %v2378_v20 }
 0x1b9   : > { %v2274_v63 = vmax.f32 %v2235_v44, 0.0  ;;  %v8976_v43 = vpack.c.bf16 %v2286_v7, %v2286_v7  ;;  %v2383_v6 = vrot.slane %v2382_v49, 4 }
 0x1bb   : > { %2352 = vst.msk [vmem:[#allocation3 + $0x18] sm:$0xf] %vm290_vm0, %v8976_v43  ;;  %v2287_v42 = vmul.f32 %v2274_v63, %v10987_v48  ;;  %v2392_v2 = vsel %vm10354_vm2, %v2383_v6, %v11021_v50 }
 0x1bc   : > { %2522 = vst.msk [vmem:[#allocation4] sm:$0xf] %vm290_vm0, %v2392_v2 }
 0x1bd   : > { %v8977_v21 = vpack.c.bf16 %v2287_v42, %v2287_v42  ;;  %2642 = vst.msk [vmem:[#allocation4] sm:$0xf] %vm691_vm3, %v2604_v18 }
 0x1be   : > { %2829 = vst.msk [vmem:[#allocation4] sm:$0xf] %vm883_vm4, %v2791_v19 }
 0x1bf   : > { %2353 = vst.msk [vmem:[#allocation3 + $0x1c] sm:$0xf] %vm290_vm0, %v8977_v21 }
 0x1c2   : > { %v11030_v55 = vld [vmem:[#allocation3 + $0x18] sm:$0xf] }
 0x1c3   : > { %14250 = vst [vmem:[#allocation16_spill] sm:$0xff] %v11030_v55  ;;  %v11032_v57 = vld [vmem:[#allocation3 + $0x18] sm:$0xf]  ;;  %v14175_v59 = vrot.slane %v11030_v55, 5 }
 0x1c4   : > { %14251 = vst [vmem:[#allocation17_spill] sm:$0xff] %v11032_v57  ;;  %v14176_v3 = vrot.slane %v11032_v57, 7  ;;  %v3252_v9 = vld [vmem:[#allocation3 + $0x18] sm:$0xf]  ;;  %v9131_v25 = vpop.f32.mrf.mxu0 }
 0x1c5   : > { %v3292_v11 = vshll.u32 %v3252_v9, 16  ;;  %v3296_v5 = vshrl.u32 %v3252_v9, 16  ;;  %v3479_v52 = vrot.slane %v14175_v59, 4  ;;  %v3059_v43 = vld [vmem:[#allocation3 + $0x18] sm:$0xf] }
 0x1c6   : > { %v9132_v32 = vpop.f32.mrf.mxu0  ;;  %v11036_v54 = vld [vmem:[#allocation3 + $0x1c] sm:$0xf]  ;;  %v2582_v44 = vrot.slane %v14176_v3, 4  ;;  %v3562_v9 = vld [vmem:[#allocation3 + $0x18] sm:$0xf] }
 0x1c7   : > { %v11038_v15 = vld [vmem:[#allocation3 + $0x1c] sm:$0xf]  ;;  %v9133_v46 = vadd.f32 %v9132_v32, %v9131_v25  ;;  %v14180_v22 = vrot.slane %v11036_v54, 5  ;;  %v11046_v40 = vrot.slane %v3292_v11, 5  ;;  %v3298_v14 = vrot.slane %v3296_v5, 4 }
 0x1c8   : > { %v3253_v7 = vld [vmem:[#allocation3 + $0x1c] sm:$0xf]  ;;  %v9134_v20 = vpop.f32.mrf.mxu0  ;;  %v14181_v16 = vrot.slane %v11038_v15, 7  ;;  %v3108_v5 = vshll.u32 %v3059_v43, 16  ;;  %v3112_v32 = vshrl.u32 %v3059_v43, 16 }
 0x1c9   : > { %14252 = vst [vmem:[#allocation18_spill] sm:$0xff] %v11046_v40  ;;  %v3302_v63 = vshll.u32 %v3253_v7, 16  ;;  %v2152_v49 = vadd.f32 %v9133_v46, %v11000_v61  ;;  %v3481_v18 = vsel %vm9829_vm9, %v3479_v52, %v14180_v22  ;;  %v3060_v42 = vld [vmem:[#allocation3 + $0x1c] sm:$0xf]  ;;  %v3299_v2 = vor.u32 %v3298_v14, %v11046_v40  ;;  %v3033_v46 = vld [vmem:[#allocation3 + $0x18] sm:$0xf] }
 0x1ca   : > { %v9135_v6 = vpop.f32.mrf.mxu0  ;;  %3513 = vrot.lane.b32.xlu1 %v3481_v18, %s9720_s10  ;;  %v2584_v21 = vsel %vm9813_vm7, %v2582_v44, %v14181_v16  ;;  %v3034_v52 = vld [vmem:[#allocation3 + $0x1c] sm:$0xf]  ;;  %v3306_v59 = vshrl.u32 %v3253_v7, 16  ;;  %v3118_v3 = vshll.u32 %v3060_v42, 16  ;;  %v3122_v62 = vshrl.u32 %v3060_v42, 16 }
 0x1cb   : > { %v11059_v19 = vrot.slane %v3302_v63, 5  ;;  %v9136_v25 = vadd.f32 %v9135_v6, %v9134_v20  ;;  %v2240_v11 = vadd.f32 %v10959_v29, %v2152_v49  ;;  %2615 = vrot.lane.b32.xlu0 %v2584_v21, %s9719_s7  ;;  %v3300_v18 = vrot.slane %v3299_v2, 4  ;;  %v2847_v39 = vld [vmem:[#allocation3 + $0x18] sm:$0xf]  ;;  %3046 = vst.msk [vmem:[#allocation4 + $0x34] sm:$0xf] %vm290_vm0, %v3033_v46  ;;  %v11068_v49 = vpop.permute.xlu1 %371 }
 0x1cc   : > { %3047 = vst.msk [vmem:[#allocation4 + $0x40] sm:$0xf] %vm290_vm0, %v3034_v52  ;;  %v11066_v14 = vrot.slane %v3108_v5, 5  ;;  %v3114_v29 = vrot.slane %v3112_v32, 4  ;;  %v2848_v63 = vld [vmem:[#allocation3 + $0x1c] sm:$0xf] }
 0x1cd   : > { %v2275_v44 = vmax.f32 %v2240_v11, 0.0  ;;  %v2155_v20 = vadd.f32 %v9136_v25, %v11000_v61  ;;  %14254 = vst [vmem:[#allocation20_spill] sm:$0xff] %v11068_v49  ;;  %v3305_v7 = vsel %vm9911_vm13, %v3300_v18, %v11059_v19  ;;  %v3120_v43 = vrot.slane %v3118_v3, 5  ;;  %v3563_v6 = vld [vmem:[#allocation3 + $0x1c] sm:$0xf] }
 0x1ce   : > { %14253 = vst [vmem:[#allocation19_spill] sm:$0xff] %v11066_v14  ;;  %v3124_v42 = vrot.slane %v3122_v62, 4  ;;  %3397 = vrot.lane.b32.xlu1 %v3305_v7, %s9721_s23  ;;  %v3115_v25 = vor.u32 %v3114_v29, %v11066_v14  ;;  %v2898_v11 = vshrl.u32 %v2847_v39, 16  ;;  %v3602_v5 = vshrl.u32 %v3562_v9, 16  ;;  %v2662_v22 = vld [vmem:[#allocation3 + $0x1c] sm:$0xf] }
 0x1cf   : > { %v2288_v21 = vmul.f32 %v2275_v44, %v11068_v49  ;;  %v2243_v2 = vadd.f32 %v10961_v0, %v2155_v20  ;;  %v3605_v32 = vshll.u32 %v3562_v9, 16  ;;  %v3308_v46 = vrot.slane %v3306_v59, 4  ;;  %v2661_v62 = vld [vmem:[#allocation3 + $0x18] sm:$0xf]  ;;  %v2368_v20 = vld [vmem:[#allocation3 + $0x1c] sm:$0xf] }
 0x1d0   : > { %v2907_v52 = vshrl.u32 %v2848_v63, 16  ;;  %v3116_v18 = vrot.slane %v3115_v25, 4  ;;  %v11077_v3 = vrot.slane %v2898_v11, 7  ;;  %v3612_v34 = vshrl.u32 %v3563_v6, 16 }
 0x1d1   : > { %v8978_v16 = vpack.c.bf16 %v2288_v21, %v2288_v21  ;;  %v2276_v48 = vmax.f32 %v2243_v2, 0.0  ;;  %v3615_v44 = vshll.u32 %v3563_v6, 16  ;;  %v2910_v0 = vshll.u32 %v2848_v63, 16 }
 0x1d2   : > { %14255 = vst [vmem:[#allocation21_spill] sm:$0xff] %v11077_v3  ;;  %v11079_v49 = vrot.slane %v2907_v52, 7  ;;  %v3121_v59 = vsel %vm9911_vm13, %v3116_v18, %v3120_v43  ;;  %v3125_v9 = vor.u32 %v3124_v42, %v3120_v43  ;;  %v2729_v29 = vshrl.u32 %v2662_v22, 16  ;;  %v2367_v52 = vld [vmem:[#allocation3 + $0x18] sm:$0xf] }
 0x1d3   : > { %2354 = vst.msk [vmem:[#allocation3 + $0x20] sm:$0xf] %vm290_vm0, %v8978_v16  ;;  %v2289_v39 = vmul.f32 %v2276_v48, %v10993_v24  ;;  %v3604_v7 = vrot.slane %v3602_v5, 5  ;;  %3205 = vrot.lane.b32.xlu0 %v3121_v59, %s9719_s7  ;;  %v2905_v21 = vrot.slane %v11077_v3, 4  ;;  %v2720_v2 = vshrl.u32 %v2661_v62, 16 }
 0x1d4   : > { %v2912_v6 = vor.u32 %v2910_v0, %v11079_v49  ;;  %v3607_v25 = vrot.slane %v3605_v32, 6  ;;  %v3309_v11 = vor.u32 %v3308_v46, %v11059_v19  ;;  %v2445_v16 = vshrl.u32 %v2368_v20, 16 }
 0x1d5   : > { %v8979_v63 = vpack.c.bf16 %v2289_v39, %v2289_v39  ;;  %v3614_v48 = vrot.slane %v3612_v34, 5  ;;  %v11091_v43 = vrot.slane %v2729_v29, 7  ;;  %v2448_v42 = vshll.u32 %v2368_v20, 16 }
 0x1d6   : > { %v2913_v18 = vsel %vm9868_vm11, %v2905_v21, %v2912_v6  ;;  %v3617_v5 = vrot.slane %v3615_v44, 6  ;;  %v14256_v62 = vrot.slane %v11038_v15, 7  ;;  %v14257_v0 = vrot.slane %v11036_v54, 5 }
 0x1d7   : > { %2355 = vst.msk [vmem:[#allocation3 + $0x24] sm:$0xf] %vm290_vm0, %v8979_v63  ;;  %2987 = vrot.lane.b32.xlu1 %v2913_v18, %s9720_s10  ;;  %v3126_v46 = vrot.slane %v3125_v9, 4  ;;  %v11099_v39 = vrot.slane %v2720_v2, 7  ;;  %v2732_v34 = vshll.u32 %v2662_v22, 16  ;;  %v2435_v59 = vshrl.u32 %v2367_v52, 16 }
 0x1d8   : > { %v2585_v32 = vrot.slane %v14256_v62, 4  ;;  %v3482_v19 = vrot.slane %v14257_v0, 4  ;;  %v2438_v21 = vshll.u32 %v2367_v52, 16  ;;  %v11101_v29 = vrot.slane %v3309_v11, 4 }
 0x1d9   : > { %14258 = vst [vmem:[#allocation22_spill] sm:$0xff] %v11099_v39  ;;  %v2447_v20 = vrot.slane %v2445_v16, 6  ;;  %v2450_v6 = vrot.slane %v2448_v42, 7  ;;  %v2734_v62 = vor.u32 %v2732_v34, %v11091_v43  ;;  %v2727_v44 = vrot.slane %v11099_v39, 4 }
 0x1da   : > { %v3564_v63 = vld [vmem:[#allocation3 + $0x20] sm:$0xf]  ;;  %v2437_v16 = vrot.slane %v2435_v59, 6  ;;  %v2440_v42 = vrot.slane %v2438_v21, 7  ;;  %v11119_v40 = vor.u32 %v3607_v25, %v3604_v7 }
 0x1db   : > { %v11104_v18 = vld [vmem:[#allocation3 + $0x20] sm:$0xf]  ;;  %v3622_v54 = vshrl.u32 %v3564_v63, 16  ;;  %v3625_v0 = vshll.u32 %v3564_v63, 16 }
 0x1dc   : > { %v3448_v15 = vld [vmem:[#allocation3 + $0x20] sm:$0xf]  ;;  %v14194_v9 = vrot.slane %v11104_v18, 7  ;;  %v9137_v52 = vpop.f32.mrf.mxu0  ;;  %v11135_v39 = vor.u32 %v2440_v42, %v2437_v16 }
 0x1dd   : > { %v3483_v2 = vrot.slane %v3448_v15, 5  ;;  %v11108_v22 = vld [vmem:[#allocation3 + $0x20] sm:$0xf]  ;;  %v2736_v15 = vrot.slane %v11091_v43, 4  ;;  %v3624_v43 = vrot.slane %v3622_v54, 5  ;;  %v3627_v7 = vrot.slane %v3625_v0, 6 }
 0x1de   : > { %v3128_v11 = vshll.u32 %v11108_v22, 16  ;;  %v2587_v24 = vsel %vm9813_vm7, %v2585_v32, %v14194_v9  ;;  %v3254_v63 = vld [vmem:[#allocation3 + $0x20] sm:$0xf]  ;;  %v3565_v14 = vld [vmem:[#allocation3 + $0x24] sm:$0xf]  ;;  %v9138_v55 = vpop.f32.mrf.mxu0  ;;  %v2735_v32 = vsel %vm9868_vm11, %v2727_v44, %v2734_v62  ;;  %v11131_v9 = vor.u32 %v3617_v5, %v3614_v48 }
 0x1df   : > { %v3484_v34 = vsel %vm9829_vm9, %v3482_v19, %v3483_v2  ;;  %v2663_v50 = vld [vmem:[#allocation3 + $0x20] sm:$0xf]  ;;  %2617 = vrot.lane.b32.xlu1 %v2587_v24, %s9719_s7  ;;  %v11127_v21 = vld [vmem:[#allocation3 + $0x24] sm:$0xf]  ;;  %v11129_v19 = vor.u32 %v2450_v6, %v2447_v20  ;;  %v9139_v25 = vadd.f32 %v9138_v55, %v9137_v52  ;;  %v3132_v1 = vshrl.u32 %v11108_v22, 16 }
 0x1e0   : > { %3515 = vrot.lane.b32.xlu0 %v3484_v34, %s9720_s10  ;;  %v11123_v59 = vrot.slane %v3128_v11, 5  ;;  %v9140_v3 = vpop.f32.mrf.mxu0  ;;  %v14199_v24 = vrot.slane %v11127_v21, 5  ;;  %v3312_v34 = vshll.u32 %v3254_v63, 16  ;;  %v2738_v11 = vshrl.u32 %v2663_v50, 16  ;;  %v2849_v57 = vld [vmem:[#allocation3 + $0x20] sm:$0xf] }
 0x1e1   : > { %v3632_v44 = vshrl.u32 %v3565_v14, 16  ;;  %v2160_v62 = vadd.f32 %v9139_v25, %v11000_v61  ;;  %v3485_v5 = vrot.slane %v3483_v2, 4  ;;  %v3635_v20 = vshll.u32 %v3565_v14, 16  ;;  %v11148_v25 = vld [vmem:[#allocation3 + $0x24] sm:$0xf] }
 0x1e2   : > { %v3131_v48 = vsel %vm9911_vm13, %v3126_v46, %v11123_v59  ;;  %v9141_v55 = vpop.f32.mrf.mxu0  ;;  %v3314_v6 = vrot.slane %v3312_v34, 5  ;;  %v11143_v54 = vrot.slane %v2738_v11, 7  ;;  %v2741_v0 = vshll.u32 %v2663_v50, 16  ;;  %v2544_v46 = vld [vmem:[#allocation3 + $0x24] sm:$0xf] }
 0x1e3   : > { %3207 = vrot.lane.b32.xlu1 %v3131_v48, %s9719_s7  ;;  %v11145_v22 = vor.u32 %v3627_v7, %v3624_v43  ;;  %v9142_v52 = vadd.f32 %v9141_v55, %v9140_v3  ;;  %v2248_v16 = vadd.f32 %v10963_v35, %v2160_v62  ;;  %v2916_v42 = vshrl.u32 %v2849_v57, 16  ;;  %v3035_v43 = vld [vmem:[#allocation3 + $0x20] sm:$0xf]  ;;  %v3036_v3 = vld [vmem:[#allocation3 + $0x24] sm:$0xf]  ;;  %v11161_v48 = vpop.permute.xlu1 %381 }
 0x1e4   : > { %2802 = vrot.lane.b32.xlu0 %v2735_v32, %s9721_s23  ;;  %v3487_v14 = vsel %vm9829_vm9, %v3485_v5, %v14199_v24  ;;  %v3315_v2 = vsel %vm9911_vm13, %v11101_v29, %v3314_v6  ;;  %v2743_v50 = vor.u32 %v2741_v0, %v11143_v54  ;;  %v3316_v32 = vshrl.u32 %v3254_v63, 16  ;;  %v2850_v62 = vld [vmem:[#allocation3 + $0x24] sm:$0xf]  ;;  %3048 = vst.msk [vmem:[#allocation4 + $0x4c] sm:$0xf] %vm290_vm0, %v3035_v43 }
 0x1e5   : > { %v2277_v7 = vmax.f32 %v2248_v16, 0.0  ;;  %v2163_v35 = vadd.f32 %v9142_v52, %v11000_v61  ;;  %v2918_v34 = vrot.slane %v2916_v42, 7  ;;  %v2919_v11 = vshll.u32 %v2849_v57, 16  ;;  %3049 = vst.msk [vmem:[#allocation4 + $0x58] sm:$0xf] %vm290_vm0, %v3036_v3  ;;  %14259 = vst [vmem:[#allocation23_spill] sm:$0xff] %v11161_v48 }
 0x1e6   : > { %v3634_v5 = vrot.slane %v3632_v44, 5  ;;  %v3637_v55 = vrot.slane %v3635_v20, 6  ;;  %v3318_v29 = vrot.slane %v3316_v32, 4  ;;  %v3322_v63 = vshll.u32 %v11148_v25, 16 }
 0x1e7   : > { %3517 = vrot.lane.b32.xlu1 %v3487_v14, %s9720_s10  ;;  %v2290_v0 = vmul.f32 %v2277_v7, %v11161_v48  ;;  %v2251_v57 = vadd.f32 %v10965_v37, %v2163_v35  ;;  %v2744_v52 = vsel %vm9868_vm11, %v2736_v15, %v2743_v50  ;;  %v2921_v16 = vor.u32 %v2919_v11, %v2918_v34  ;;  %v3062_v14 = vld [vmem:[#allocation3 + $0x24] sm:$0xf] }
 0x1e8   : > { %3399 = vrot.lane.b32.xlu0 %v3315_v2, %s9721_s23  ;;  %v3319_v42 = vor.u32 %v3318_v29, %v3314_v6  ;;  %v14260_v43 = vrot.slane %v11104_v18, 7  ;;  %v2589_v20 = vrot.slane %v2544_v46, 7  ;;  %v2925_v3 = vshrl.u32 %v2850_v62, 16  ;;  %v2664_v46 = vld [vmem:[#allocation3 + $0x24] sm:$0xf] }
 0x1e9   : > { %v8980_v24 = vpack.c.bf16 %v2290_v0, %v2290_v0  ;;  %v2278_v2 = vmax.f32 %v2251_v57, 0.0  ;;  %v14261_v32 = vrot.slane %v11079_v49, 4  ;;  %v11176_v48 = vrot.slane %v3322_v63, 5 }
 0x1ea   : > { %v2588_v44 = vrot.slane %v14260_v43, 4  ;;  %v3320_v37 = vrot.slane %v3319_v42, 4  ;;  %v11180_v15 = vrot.slane %v2925_v3, 7  ;;  %v2928_v18 = vshll.u32 %v2850_v62, 16 }
 0x1eb   : > { %v2922_v7 = vsel %vm9868_vm11, %v14261_v32, %v2921_v16  ;;  %2804 = vrot.lane.b32.xlu1 %v2744_v52, %s9721_s23  ;;  %v3134_v6 = vrot.slane %v3132_v1, 4  ;;  %v11182_v50 = vor.u32 %v3637_v55, %v3634_v5  ;;  %2356 = vst.msk [vmem:[#allocation3 + $0x28] sm:$0xf] %vm290_vm0, %v8980_v24  ;;  %v2291_v49 = vmul.f32 %v2278_v2, %v11002_v23 }
 0x1ec   : > { %2989 = vrot.lane.b32.xlu0 %v2922_v7, %s9720_s10  ;;  %v2923_v35 = vrot.slane %v2918_v34, 4  ;;  %v3138_v11 = vshll.u32 %v3062_v14, 16  ;;  %v2590_v29 = vsel %vm9813_vm7, %v2588_v44, %v2589_v20  ;;  %v2930_v63 = vor.u32 %v2928_v18, %v11180_v15 }
 0x1ed   : > { %v3135_v0 = vor.u32 %v3134_v6, %v11123_v59  ;;  %v3142_v57 = vshrl.u32 %v3062_v14, 16  ;;  %v8981_v52 = vpack.c.bf16 %v2291_v49, %v2291_v49  ;;  %v3325_v1 = vsel %vm9911_vm13, %v3320_v37, %v11176_v48 }
 0x1ee   : > { %v3140_v62 = vrot.slane %v3138_v11, 5  ;;  %v2747_v5 = vshrl.u32 %v2664_v46, 16  ;;  %v3630_v24 = vrot.slane %v11145_v22, 4  ;;  %v2591_v55 = vrot.slane %v2589_v20, 4 }
 0x1ef   : > { %3401 = vrot.lane.b32.xlu1 %v3325_v1, %s9721_s23  ;;  %v3136_v34 = vrot.slane %v3135_v0, 4  ;;  %v3144_v16 = vrot.slane %v3142_v57, 4  ;;  %2357 = vst.msk [vmem:[#allocation3 + $0x2c] sm:$0xf] %vm290_vm0, %v8981_v52  ;;  %v2931_v59 = vsel %vm9868_vm11, %v2923_v35, %v2930_v63  ;;  %v14262_v42 = vrot.slane %v11127_v21, 5 }
 0x1f0   : > { %2619 = vrot.lane.b32.xlu0 %v2590_v29, %s9719_s7  ;;  %v3326_v44 = vshrl.u32 %v11148_v25, 16  ;;  %v2443_v3 = vrot.slane %v11135_v39, 4  ;;  %v11203_v14 = vrot.slane %v2747_v5, 7  ;;  %v3610_v2 = vrot.slane %v11119_v40, 4 }
 0x1f1   : > { %v3488_v43 = vrot.slane %v14262_v42, 4  ;;  %v3620_v32 = vrot.slane %v11131_v9, 4  ;;  %v3639_v20 = vsel %vm10661_vm12, %v3630_v24, %v11182_v50  ;;  %v3141_v7 = vsel %vm9911_vm13, %v3136_v34, %v3140_v62 }
 0x1f2   : > { %v2750_v37 = vshll.u32 %v2664_v46, 16  ;;  %v3328_v21 = vrot.slane %v3326_v44, 4  ;;  %v2452_v25 = vsel %vm10354_vm2, %v2443_v3, %v11129_v19  ;;  %3719 = vst.msk [vmem:[#allocation4 + $0x44] sm:$0xf] %vm290_vm0, %v3639_v20  ;;  %v3566_v18 = vld [vmem:[#allocation3 + $0x28] sm:$0xf]  ;;  %v3145_v35 = vor.u32 %v3144_v16, %v3140_v62 }
 0x1f3   : > { %2991 = vrot.lane.b32.xlu1 %v2931_v59, %s9720_s10  ;;  %v11218_v6 = vld [vmem:[#allocation3 + $0x28] sm:$0xf]  ;;  %2528 = vst.msk [vmem:[#allocation4 + $0x48] sm:$0xf] %vm290_vm0, %v2452_v25  ;;  %v3619_v46 = vsel %vm10661_vm12, %v3610_v2, %v11131_v9  ;;  %v3629_v11 = vsel %vm10661_vm12, %v3620_v32, %v11145_v22  ;;  %v3642_v29 = vshrl.u32 %v3566_v18, 16  ;;  %v3645_v63 = vshll.u32 %v3566_v18, 16 }
 0x1f4   : > { %3209 = vrot.lane.b32.xlu0 %v3141_v7, %s9719_s7  ;;  %v3450_v49 = vld [vmem:[#allocation3 + $0x28] sm:$0xf]  ;;  %v2592_v0 = vrot.slane %v11218_v6, 7  ;;  %3717 = vst.msk [vmem:[#allocation4 + $0x2c] sm:$0xf] %vm290_vm0, %v3619_v46  ;;  %v9143_v1 = vpop.f32.mrf.mxu0  ;;  %v2745_v5 = vrot.slane %v11143_v54, 4  ;;  %v2752_v9 = vor.u32 %v2750_v37, %v11203_v14  ;;  %v3329_v24 = vor.u32 %v3328_v21, %v11176_v48 }
 0x1f5   : > { %v3489_v57 = vrot.slane %v3450_v49, 5  ;;  %v3063_v52 = vld [vmem:[#allocation3 + $0x28] sm:$0xf]  ;;  %3718 = vst.msk [vmem:[#allocation4 + $0x38] sm:$0xf] %vm290_vm0, %v3629_v11  ;;  %v3644_v34 = vrot.slane %v3642_v29, 5 }
 0x1f6   : > { %v3148_v62 = vshll.u32 %v3063_v52, 16  ;;  %v3647_v22 = vrot.slane %v3645_v63, 6  ;;  %v2593_v16 = vsel %vm9813_vm7, %v2591_v55, %v2592_v0  ;;  %v3256_v42 = vld [vmem:[#allocation3 + $0x28] sm:$0xf]  ;;  %v3567_v44 = vld [vmem:[#allocation3 + $0x2c] sm:$0xf]  ;;  %v9144_v3 = vpop.f32.mrf.mxu0 }
 0x1f7   : > { %v3490_v59 = vsel %vm9829_vm9, %v3488_v43, %v3489_v57  ;;  %2621 = vrot.lane.b32.xlu1 %v2593_v16, %s9719_s7  ;;  %v11241_v2 = vld [vmem:[#allocation3 + $0x2c] sm:$0xf]  ;;  %v2754_v48 = vrot.slane %v11203_v14, 4  ;;  %v3652_v32 = vshrl.u32 %v3567_v44, 16  ;;  %v3655_v20 = vshll.u32 %v3567_v44, 16 }
 0x1f8   : > { %3519 = vrot.lane.b32.xlu0 %v3490_v59, %s9720_s10  ;;  %v3150_v54 = vrot.slane %v3148_v62, 5  ;;  %v9145_v7 = vadd.f32 %v9144_v3, %v9143_v1  ;;  %v3146_v37 = vrot.slane %v3145_v35, 4  ;;  %v2665_v55 = vld [vmem:[#allocation3 + $0x28] sm:$0xf]  ;;  %v9146_v21 = vpop.f32.mrf.mxu0  ;;  %v2753_v43 = vsel %vm9868_vm11, %v2745_v5, %v2752_v9  ;;  %v3064_v63 = vld [vmem:[#allocation3 + $0x2c] sm:$0xf] }
 0x1f9   : > { %v3491_v25 = vrot.slane %v3489_v57, 4  ;;  %v3492_v18 = vrot.slane %v11241_v2, 5  ;;  %v3332_v49 = vshll.u32 %v3256_v42, 16  ;;  %v11247_v46 = vor.u32 %v3647_v22, %v3644_v34 }
 0x1fa   : > { %v2168_v11 = vadd.f32 %v9145_v7, %v11000_v61  ;;  %v3151_v14 = vsel %vm9911_vm13, %v3146_v37, %v3150_v54  ;;  %v3330_v29 = vrot.slane %v3329_v24, 4  ;;  %v3654_v1 = vrot.slane %v3652_v32, 5  ;;  %v9147_v62 = vpop.f32.mrf.mxu0  ;;  %v3257_v24 = vld [vmem:[#allocation3 + $0x2c] sm:$0xf] }
 0x1fb   : > { %v3657_v35 = vrot.slane %v3655_v20, 6  ;;  %3211 = vrot.lane.b32.xlu1 %v3151_v14, %s9719_s7  ;;  %v3334_v57 = vrot.slane %v3332_v49, 5  ;;  %v2756_v5 = vshrl.u32 %v2665_v55, 16  ;;  %v9148_v9 = vadd.f32 %v9147_v62, %v9146_v21  ;;  %v3037_v49 = vld [vmem:[#allocation3 + $0x28] sm:$0xf] }
 0x1fc   : > { %2806 = vrot.lane.b32.xlu0 %v2753_v43, %s9721_s23  ;;  %v2256_v34 = vadd.f32 %v10969_v26, %v2168_v11  ;;  %v3493_v22 = vsel %vm9829_vm9, %v3491_v25, %v3492_v18  ;;  %v3152_v16 = vshrl.u32 %v3063_v52, 16  ;;  %v2759_v44 = vshll.u32 %v2665_v55, 16  ;;  %v11264_v26 = vpop.permute.xlu1 %391  ;;  %3050 = vst.msk [vmem:[#allocation4 + $0x64] sm:$0xf] %vm290_vm0, %v3037_v49 }
 0x1fd   : > { %v11259_v59 = vrot.slane %v2756_v5, 7  ;;  %v3158_v3 = vshll.u32 %v3064_v63, 16  ;;  %v3336_v32 = vshrl.u32 %v3256_v42, 16  ;;  %v2171_v7 = vadd.f32 %v9148_v9, %v11000_v61  ;;  %14263 = vst [vmem:[#allocation24_spill] sm:$0xff] %v11264_v26 }
 0x1fe   : > { %v2279_v20 = vmax.f32 %v2256_v34, 0.0  ;;  %v3335_v37 = vsel %vm9911_vm13, %v3330_v29, %v3334_v57  ;;  %v3154_v21 = vrot.slane %v3152_v16, 4  ;;  %v3342_v55 = vshll.u32 %v3257_v24, 16  ;;  %v3038_v29 = vld [vmem:[#allocation3 + $0x2c] sm:$0xf] }
 0x1ff   : > { %3521 = vrot.lane.b32.xlu1 %v3493_v22, %s9720_s10  ;;  %v2761_v52 = vor.u32 %v2759_v44, %v11259_v59  ;;  %v3160_v43 = vrot.slane %v3158_v3, 5  ;;  %v3338_v25 = vrot.slane %v3336_v32, 4  ;;  %v2259_v11 = vadd.f32 %v10971_v13, %v2171_v7  ;;  %3051 = vst.msk [vmem:[#allocation4 + $0x70] sm:$0xf] %vm290_vm0, %v3038_v29 }
 0x200   : > { %3403 = vrot.lane.b32.xlu0 %v3335_v37, %s9721_s23  ;;  %v2292_v42 = vmul.f32 %v2279_v20, %v11264_v26  ;;  %v3155_v14 = vor.u32 %v3154_v21, %v3150_v54  ;;  %v3162_v62 = vshrl.u32 %v3064_v63, 16  ;;  %v9149_v5 = vpop.f32.mrf.mxu0  ;;  %v3344_v22 = vrot.slane %v3342_v55, 5 }
 0x201   : > { %v2762_v9 = vsel %vm9868_vm11, %v2754_v48, %v2761_v52  ;;  %v3339_v34 = vor.u32 %v3338_v25, %v3334_v57  ;;  %v3346_v16 = vshrl.u32 %v3257_v24, 16  ;;  %v2280_v3 = vmax.f32 %v2259_v11, 0.0  ;;  %v2369_v25 = vld [vmem:[#allocation3 + $0x20] sm:$0xf] }
 0x202   : > { %v8982_v44 = vpack.c.bf16 %v2292_v42, %v2292_v42  ;;  %v3156_v32 = vrot.slane %v3155_v14, 4  ;;  %v3164_v20 = vrot.slane %v3162_v62, 4  ;;  %v11275_v37 = vor.u32 %v3657_v35, %v3654_v1  ;;  %v9150_v13 = vpop.f32.mrf.mxu0 }
 0x203   : > { %2808 = vrot.lane.b32.xlu1 %v2762_v9, %s9721_s23  ;;  %v3340_v54 = vrot.slane %v3339_v34, 4  ;;  %v3348_v63 = vrot.slane %v3346_v16, 4  ;;  %v2293_v48 = vmul.f32 %v2280_v3, %v11015_v27  ;;  %v9151_v57 = vadd.f32 %v9150_v13, %v9149_v5  ;;  %v11304_v3 = vpop.permute.xlu1 %401 }
 0x204   : > { %2358 = vst.msk [vmem:[#allocation3 + $0x30] sm:$0xf] %vm290_vm0, %v8982_v44  ;;  %v3161_v24 = vsel %vm9911_vm13, %v3156_v32, %v3160_v43  ;;  %v3640_v7 = vrot.slane %v11182_v50, 4  ;;  %v3650_v21 = vrot.slane %v11247_v46, 4  ;;  %v9152_v1 = vpop.f32.mrf.mxu0  ;;  %v3165_v35 = vor.u32 %v3164_v20, %v3160_v43  ;;  %14264 = vst [vmem:[#allocation25_spill] sm:$0xff] %v11304_v3 }
 0x205   : > { %3213 = vrot.lane.b32.xlu0 %v3161_v24, %s9719_s7  ;;  %v3349_v52 = vor.u32 %v3348_v63, %v3344_v22  ;;  %v8983_v55 = vpack.c.bf16 %v2293_v48, %v2293_v48  ;;  %v2176_v49 = vadd.f32 %v9151_v57, %v11000_v61  ;;  %v3345_v42 = vsel %vm9911_vm13, %v3340_v54, %v3344_v22 }
 0x206   : > { %v9118_v11 = vadd.f32 %v10975_v45, %v10973_v41  ;;  %v9153_v14 = vpop.f32.mrf.mxu0  ;;  %v3649_v50 = vsel %vm10661_vm12, %v3640_v7, %v11247_v46  ;;  %v3659_v43 = vsel %vm10661_vm12, %v3650_v21, %v11275_v37  ;;  %v2128_v29 = vadd.f32 %v10967_v53, %v11000_v61 }
 0x207   : > { %3405 = vrot.lane.b32.xlu1 %v3345_v42, %s9721_s23  ;;  %2359 = vst.msk [vmem:[#allocation3 + $0x34] sm:$0xf] %vm290_vm0, %v8983_v55  ;;  %v2264_v62 = vadd.f32 %v10977_v12, %v2176_v49  ;;  %3720 = vst.msk [vmem:[#allocation4 + $0x50] sm:$0xf] %vm290_vm0, %v3649_v50  ;;  %v2455_v41 = vshrl.u32 %v2369_v25, 16  ;;  %v3166_v5 = vrot.slane %v3165_v35, 4  ;;  %v2136_v20 = vadd.f32 %v10979_v10, %v11000_v61 }
 0x208   : > { %3721 = vst.msk [vmem:[#allocation4 + $0x5c] sm:$0xf] %vm290_vm0, %v3659_v43  ;;  %v2215_v45 = vpop.f32.mrf.mxu0  ;;  %v3350_v9 = vrot.slane %v3349_v52, 4  ;;  %v2458_v46 = vshll.u32 %v2369_v25, 16  ;;  %v2453_v16 = vrot.slane %v11129_v19, 4  ;;  %v2131_v53 = vadd.f32 %v9118_v11, %v11000_v61 }
 0x209   : > { %v2281_v34 = vmax.f32 %v2264_v62, 0.0  ;;  %v2216_v22 = vadd.f32 %v2215_v45, %v2128_v29  ;;  %v2457_v44 = vrot.slane %v2455_v41, 6  ;;  %v9124_v29 = vadd.f32 %v10991_v28, %v10985_v4 }
 0x20a   : > { %v9380_v32 = vpop.f32.mrf.mxu0  ;;  %v2460_v35 = vrot.slane %v2458_v46, 7 }
 0x20b   : > { %v3568_v12 = vld [vmem:[#allocation3 + $0x30] sm:$0xf]  ;;  %v2294_v57 = vmul.f32 %v2281_v34, %v11304_v3  ;;  %v2269_v24 = vmax.f32 %v2216_v22, 0.0 }
 0x20c   : > { %v11309_v13 = vld [vmem:[#allocation3 + $0x30] sm:$0xf]  ;;  %v3662_v63 = vshrl.u32 %v3568_v12, 16  ;;  %v3665_v48 = vshll.u32 %v3568_v12, 16  ;;  %v2218_v7 = vpop.f32.mrf.mxu0  ;;  %v11318_v62 = vor.u32 %v2460_v35, %v2457_v44 }
 0x20d   : > { %v3258_v54 = vld [vmem:[#allocation3 + $0x30] sm:$0xf]  ;;  %v3168_v19 = vshll.u32 %v11309_v13, 16  ;;  %v8984_v55 = vpack.c.bf16 %v2294_v57, %v2294_v57  ;;  %v2282_v49 = vmul.f32 %v2269_v24, %v10981_v8  ;;  %v2219_v42 = vadd.f32 %v2218_v7, %v2131_v53 }
 0x20e   : > { %v3352_v21 = vshll.u32 %v3258_v54, 16  ;;  %v3356_v1 = vshrl.u32 %v3258_v54, 16  ;;  %v3664_v52 = vrot.slane %v3662_v63, 5  ;;  %v3667_v25 = vrot.slane %v3665_v48, 6  ;;  %v3569_v10 = vld [vmem:[#allocation3 + $0x34] sm:$0xf]  ;;  %v9381_v11 = vpop.f32.mrf.mxu0 }
 0x20f   : > { %v11314_v14 = vrot.slane %v3168_v19, 5  ;;  %v11316_v43 = vld [vmem:[#allocation3 + $0x34] sm:$0xf]  ;;  %v3672_v41 = vshrl.u32 %v3569_v10, 16  ;;  %v3675_v45 = vshll.u32 %v3569_v10, 16  ;;  %v8972_v46 = vpack.c.bf16 %v2282_v49, %v2282_v49 }
 0x210   : > { %v3354_v50 = vrot.slane %v3352_v21, 5  ;;  %2360 = vst.msk [vmem:[#allocation3 + $0x38] sm:$0x3] %vm307_vm1, %v8984_v55  ;;  %v2270_v34 = vmax.f32 %v2219_v42, 0.0  ;;  %v2223_v22 = vpop.f32.mrf.mxu0  ;;  %v3358_v53 = vrot.slane %v3356_v1, 4  ;;  %v3668_v44 = vor.u32 %v3667_v25, %v3664_v52 }
 0x211   : > { %v3171_v12 = vsel %vm9911_vm13, %v3166_v5, %v11314_v14  ;;  %v3674_v54 = vrot.slane %v3672_v41, 5  ;;  %v3677_v63 = vrot.slane %v3675_v45, 6  ;;  %2348 = vst.msk [vmem:[#allocation3 + $0x8] sm:$0xf] %vm290_vm0, %v8972_v46  ;;  %v2224_v4 = vadd.f32 %v2223_v22, %v2136_v20  ;;  %v2842_v20 = vld [vmem:[#allocation3 + $0x4] sm:$0x8] }
 0x212   : > { %v3355_v32 = vsel %vm9911_vm13, %v3350_v9, %v3354_v50  ;;  %3215 = vrot.lane.b32.xlu1 %v3171_v12, %s9719_s7  ;;  %v2283_v28 = vmul.f32 %v2270_v34, %v10989_v56  ;;  %v9384_v48 = vpop.f32.mrf.mxu0  ;;  %v3359_v57 = vor.u32 %v3358_v53, %v3354_v50  ;;  %v3362_v5 = vshll.u32 %v11316_v43, 16  ;;  %v3040_v55 = vld [vmem:[#allocation3 + $0x34] sm:$0xf] }
 0x213   : > { %3407 = vrot.lane.b32.xlu0 %v3355_v32, %s9721_s23  ;;  %v2462_v9 = vsel %vm10354_vm2, %v2453_v16, %v11318_v62  ;;  %v3660_v24 = vrot.slane %v11275_v37, 4  ;;  %v2271_v7 = vmax.f32 %v2224_v4, 0.0  ;;  %v2139_v19 = vadd.f32 %v9124_v29, %v11000_v61  ;;  %3053 = vst.msk [vmem:[#allocation4 + $0x88] sm:$0xf] %vm290_vm0, %v3040_v55  ;;  %v3039_v61 = vld [vmem:[#allocation3 + $0x30] sm:$0xf] }
 0x214   : > { %2529 = vst.msk [vmem:[#allocation4 + $0x54] sm:$0xf] %vm290_vm0, %v2462_v9  ;;  %v3678_v21 = vor.u32 %v3677_v63, %v3674_v54  ;;  %v8973_v1 = vpack.c.bf16 %v2283_v28, %v2283_v28  ;;  %v2226_v35 = vpop.f32.mrf.mxu0  ;;  %v3360_v52 = vrot.slane %v3359_v57, 4  ;;  %v11339_v25 = vrot.slane %v3362_v5, 5  ;;  %3052 = vst.msk [vmem:[#allocation4 + $0x7c] sm:$0xf] %vm290_vm0, %v3039_v61 }
 0x215   : > { %v2284_v49 = vmul.f32 %v2271_v7, %v10995_v33  ;;  %v2227_v10 = vadd.f32 %v2226_v35, %v2139_v19  ;;  %v14265_v16 = vrot.slane %v10937_v36, 7  ;;  %v2682_v37 = vrot.slane %v10946_v60, 4  ;;  %v9590_v57 = vld [vmem:[%s14169_s2 + $0x108] sm:$0xff]  }
 0x216   : > { %v3670_v11 = vrot.slane %v3668_v44, 4  ;;  %2349 = vst.msk [vmem:[#allocation3 + $0xc] sm:$0xf] %vm290_vm0, %v8973_v1  ;;  %v3365_v29 = vsel %vm9911_vm13, %v3360_v52, %v11339_v25  ;;  %v9385_v41 = vpop.f32.mrf.mxu0  ;;  %v2857_v45 = vshrl.u32 %v2842_v20, 16  ;;  %v3669_v46 = vsel %vm10661_vm12, %v3660_v24, %v3668_v44  ;;  %9164 = vmatprep.subr.bf16.mxu1 %v9590_v57  ;;  %v9591_v55 = vld [vmem:[%s14169_s2 + $0xc8] sm:$0xff]  }
 0x217   : > { %v2567_v42 = vrot.slane %v14265_v16, 4  ;;  %v3570_v50 = vld [vmem:[#allocation3 + $0x38] sm:$0xf]  ;;  %v8974_v22 = vpack.c.bf16 %v2284_v49, %v2284_v49  ;;  %v2272_v12 = vmax.f32 %v2227_v10, 0.0  ;;  %3409 = vrot.lane.b32.xlu1 %v3365_v29, %s9721_s23  ;;  %3722 = vst.msk [vmem:[#allocation4 + $0x68] sm:$0xf] %vm290_vm0, %v3669_v46  ;;  %9165 = vmatpush3.bf16.msra.mxu1 %v9591_v55 }
 0x218   : > { %v3682_v36 = vshrl.u32 %v3570_v50, 16  ;;  %v3685_v34 = vshll.u32 %v3570_v50, 16  ;;  %v2537_v32 = vld [vmem:[#allocation3 + $0x8] sm:$0xf]  ;;  %v3679_v63 = vsel %vm10661_vm12, %v3670_v11, %v3678_v21  ;;  %v3680_v5 = vrot.slane %v3678_v21, 4 }
 0x219   : > { %v2843_v53 = vld [vmem:[#allocation3 + $0x8] sm:$0xf]  ;;  %2350 = vst.msk [vmem:[#allocation3 + $0x10] sm:$0xf] %vm290_vm0, %v8974_v22  ;;  %v2285_v44 = vmul.f32 %v2272_v12, %v10983_v31  ;;  %v2568_v48 = vrot.slane %v2537_v32, 7  ;;  %v8639_v9 = vrot.slane %v2857_v45, 11 }
 0x21a   : > { %v2657_v54 = vld [vmem:[#allocation3 + $0x8] sm:$0xf]  ;;  %v3684_v4 = vrot.slane %v3682_v36, 5  ;;  %v3687_v28 = vrot.slane %v3685_v34, 6  ;;  %3723 = vst.msk [vmem:[#allocation4 + $0x74] sm:$0xf] %vm290_vm0, %v3679_v63 }
 0x21b   : > { %v2862_v24 = vshrl.u32 %v2843_v53, 16  ;;  %v2684_v7 = vshrl.u32 %v2657_v54, 16  ;;  %v3055_v19 = vld [vmem:[#allocation3 + $0x8] sm:$0xf]  ;;  %v8975_v1 = vpack.c.bf16 %v2285_v44, %v2285_v44  ;;  %v2569_v35 = vsel %vm9813_vm7, %v2567_v42, %v2568_v48 }
 0x21c   : > { %v11363_v20 = vor.u32 %v3687_v28, %v3684_v4  ;;  %v2865_v52 = vshll.u32 %v2843_v53, 16  ;;  %2605 = vrot.lane.b32.xlu1 %v2569_v35, %s9719_s7  ;;  %v2687_v10 = vshll.u32 %v2657_v54, 16  ;;  %v2570_v16 = vrot.slane %v2568_v48, 4  ;;  %v3029_v61 = vld [vmem:[#allocation3 + $0x8] sm:$0xf] }
 0x21d   : > { %v2864_v49 = vrot.slane %v2862_v24, 7  ;;  %v11371_v21 = vrot.slane %v2684_v7, 7  ;;  %v3559_v11 = vld [vmem:[#allocation3 + $0xc] sm:$0xe]  ;;  %2351 = vst.msk [vmem:[#allocation3 + $0x14] sm:$0xf] %vm290_vm0, %v8975_v1 }
 0x21e   : > { %v11374_v50 = vld [vmem:[#allocation3 + $0xc] sm:$0xf]  ;;  %v3069_v42 = vshrl.u32 %v3055_v19, 16  ;;  %v3072_v29 = vshll.u32 %v3055_v19, 16  ;;  %v3689_v41 = vsel %vm10661_vm12, %v3680_v5, %v11363_v20  ;;  %3042 = vst.msk [vmem:[#allocation4 + $0x4] sm:$0xf] %vm290_vm0, %v3029_v61 }
 0x21f   : > { %v3573_v45 = vshrl.u32 %v3559_v11, 16  ;;  %v3576_v46 = vshll.u32 %v3559_v11, 16  ;;  %v2867_v36 = vor.u32 %v2865_v52, %v2864_v49  ;;  %v2689_v34 = vor.u32 %v2687_v10, %v11371_v21  ;;  %v2844_v22 = vld [vmem:[#allocation3 + $0xc] sm:$0xf]  ;;  %3724 = vst.msk [vmem:[#allocation4 + $0x80] sm:$0xf] %vm290_vm0, %v3689_v41 }
 0x220   : > { %v2571_v12 = vrot.slane %v11374_v50, 7  ;;  %v2869_v32 = vrot.slane %v2864_v49, 4  ;;  %v2871_v53 = vshrl.u32 %v2844_v22, 16  ;;  %v2874_v54 = vshll.u32 %v2844_v22, 16  ;;  %v11383_v63 = vld [vmem:[#allocation3 + $0xc] sm:$0xf] }
 0x221   : > { %v3575_v4 = vrot.slane %v3573_v45, 5  ;;  %v3578_v28 = vrot.slane %v3576_v46, 6  ;;  %v3560_v44 = vld [vmem:[#allocation3 + $0x10] sm:$0xf]  ;;  %v2868_v48 = vsel %vm9868_vm11, %v8639_v9, %v2867_v36  ;;  %v2690_v57 = vsel %vm9868_vm11, %v2682_v37, %v2689_v34  ;;  %v9592_v1 = vld [vmem:[%s14169_s2 + $0x100] sm:$0xff]   ;;  %v9594_v46 = vld [vmem:[%s14169_s2 + $0xf8] sm:$0xff]  }
 0x222   : > { %v3582_v5 = vshrl.u32 %v3560_v44, 16  ;;  %v3585_v24 = vshll.u32 %v3560_v44, 16  ;;  %2977 = vrot.lane.b32.xlu0 %v2868_v48, %s9720_s10  ;;  %2792 = vrot.lane.b32.xlu1 %v2690_v57, %s9721_s23  ;;  %v11393_v7 = vrot.slane %v2871_v53, 7  ;;  %v11395_v19 = vld [vmem:[#allocation3 + $0x10] sm:$0xf]  ;;  %v3071_v35 = vrot.slane %v3069_v42, 4 }
 0x223   : > { %v3579_v9 = vor.u32 %v3578_v28, %v3575_v4  ;;  %v3074_v60 = vrot.slane %v3072_v29, 5  ;;  %v3078_v52 = vshll.u32 %v11383_v63, 16  ;;  %v9593_v37 = vld [vmem:[%s14169_s2 + $0xc0] sm:$0xff]   ;;  %v2572_v10 = vsel %vm9813_vm7, %v2570_v16, %v2571_v12  ;;  %v11407_v11 = vld [vmem:[#allocation3 + $0x10] sm:$0xf]  ;;  %9166 = vmatprep.subr.bf16.mxu1 %v9592_v1  ;;  %v9595_v48 = vld [vmem:[%s14169_s2 + $0xb8] sm:$0xff]  }
 0x224   : > { %v3584_v55 = vrot.slane %v3582_v5, 5  ;;  %v3587_v49 = vrot.slane %v3585_v24, 6  ;;  %v2876_v61 = vor.u32 %v2874_v54, %v11393_v7  ;;  %v3561_v41 = vld [vmem:[#allocation3 + $0x14] sm:$0xf]  ;;  %v2574_v45 = vrot.slane %v11395_v19, 7  ;;  %9167 = vmatpush3.bf16.msra.mxu1 %v9593_v37  ;;  %v9596_v1 = vld [vmem:[%s14169_s2 + $0xf0] sm:$0xff]  }
 0x225   : > { %v3580_v50 = vrot.slane %v3579_v9, 4  ;;  %v3075_v42 = vor.u32 %v3074_v60, %v3071_v35  ;;  %v3080_v29 = vrot.slane %v3078_v52, 5  ;;  %v3592_v34 = vshrl.u32 %v3561_v41, 16  ;;  %v3443_v53 = vld [vmem:[#allocation3 + $0xc] sm:$0xe]  ;;  %9168 = vmatprep.subr.bf16.mxu1 %v9594_v46  ;;  %v9603_v19 = vld [vmem:[%s14169_s2 + $0x98] sm:$0xff]  }
 0x226   : > { %v3588_v36 = vor.u32 %v3587_v49, %v3584_v55  ;;  %v3595_v22 = vshll.u32 %v3561_v41, 16  ;;  %2607 = vrot.lane.b32.xlu0 %v2572_v10, %s9719_s7  ;;  %v2877_v16 = vsel %vm9868_vm11, %v2869_v32, %v2876_v61  ;;  %v11416_v54 = vld [vmem:[#allocation3 + $0x10] sm:$0xf]  ;;  %v3471_v28 = vrot.slane %v11407_v11, 5  ;;  %v2658_v44 = vld [vmem:[#allocation3 + $0xc] sm:$0xf] }
 0x227   : > { %2979 = vrot.lane.b32.xlu1 %v2877_v16, %s9720_s10  ;;  %v3076_v4 = vrot.slane %v3075_v42, 4  ;;  %v3594_v5 = vrot.slane %v3592_v34, 5  ;;  %v2573_v32 = vrot.slane %v2571_v12, 4  ;;  %v8640_v35 = vrot.slane %v3443_v53, 9  ;;  %v3249_v37 = vld [vmem:[#allocation3 + $0xc] sm:$0xf] }
 0x228   : > { %v3589_v57 = vsel %vm10661_vm12, %v3580_v50, %v3588_v36  ;;  %v3597_v24 = vrot.slane %v3595_v22, 6  ;;  %v3082_v60 = vshrl.u32 %v11383_v63, 16  ;;  %v3088_v52 = vshll.u32 %v11416_v54, 16  ;;  %9169 = vmatpush3.bf16.msra.mxu1 %v9595_v48  ;;  %v3250_v61 = vld [vmem:[#allocation3 + $0x10] sm:$0xf] }
 0x229   : > { %3714 = vst.msk [vmem:[#allocation4 + $0x8] sm:$0xf] %vm290_vm0, %v3589_v57  ;;  %v3081_v9 = vsel %vm9911_vm13, %v3076_v4, %v3080_v29  ;;  %v3590_v55 = vrot.slane %v3588_v36, 4  ;;  %v2575_v12 = vsel %vm9813_vm7, %v2573_v32, %v2574_v45  ;;  %v2693_v10 = vshrl.u32 %v2658_v44, 16  ;;  %9170 = vmatprep.subr.bf16.mxu1 %v9596_v1  ;;  %v9597_v63 = vld [vmem:[%s14169_s2 + $0xb0] sm:$0xff]  }
 0x22a   : > { %v3598_v49 = vor.u32 %v3597_v24, %v3594_v5  ;;  %3197 = vrot.lane.b32.xlu0 %v3081_v9, %s9719_s7  ;;  %v3472_v11 = vsel %vm9829_vm9, %v8640_v35, %v3471_v28  ;;  %v3084_v50 = vrot.slane %v3082_v60, 4  ;;  %v11444_v41 = vld [vmem:[#allocation3 + $0x14] sm:$0xf]  ;;  %v2659_v42 = vld [vmem:[#allocation3 + $0x10] sm:$0xf]  ;;  %v2696_v34 = vshll.u32 %v2658_v44, 16 }
 0x22b   : > { %2609 = vrot.lane.b32.xlu1 %v2575_v12, %s9719_s7  ;;  %v11448_v36 = vrot.slane %v2693_v10, 7  ;;  %v3263_v22 = vshrl.u32 %v3249_v37, 16  ;;  %v2845_v16 = vld [vmem:[#allocation3 + $0x10] sm:$0xf]  ;;  %v11451_v4 = vrot.slane %v3088_v52, 5  ;;  %v3266_v48 = vshll.u32 %v3249_v37, 16 }
 0x22c   : > { %v3599_v46 = vsel %vm10661_vm12, %v3590_v55, %v3598_v49  ;;  %v3085_v53 = vor.u32 %v3084_v50, %v3080_v29  ;;  %v3272_v57 = vshll.u32 %v3250_v61, 16  ;;  %9171 = vmatpush3.bf16.msra.mxu1 %v9597_v63  ;;  %v2702_v32 = vshrl.u32 %v2659_v42, 16  ;;  %v11464_v63 = vld [vmem:[#allocation3 + $0x14] sm:$0xf] }
 0x22d   : > { %3715 = vst.msk [vmem:[#allocation4 + $0x14] sm:$0xf] %vm290_vm0, %v3599_v46  ;;  %v2698_v5 = vor.u32 %v2696_v34, %v11448_v36  ;;  %v3265_v24 = vrot.slane %v3263_v22, 4  ;;  %v3600_v1 = vrot.slane %v3598_v49, 4  ;;  %v2691_v44 = vrot.slane %v11371_v21, 4  ;;  %v9598_v46 = vld [vmem:[%s14169_s2 + $0xe8] sm:$0xff]  }
 0x22e   : > { %3507 = vrot.lane.b32.xlu0 %v3472_v11, %s9720_s10  ;;  %v3086_v9 = vrot.slane %v3085_v53, 4  ;;  %v3268_v35 = vrot.slane %v3266_v48, 5  ;;  %v3474_v60 = vrot.slane %v11444_v41, 5  ;;  %v3274_v55 = vrot.slane %v3272_v57, 5  ;;  %v9599_v57 = vld [vmem:[%s14169_s2 + $0xa8] sm:$0xff]   ;;  %9172 = vmatprep.subr.bf16.mxu1 %v9598_v46 }
 0x22f   : > { %v11457_v29 = vrot.slane %v2702_v32, 7  ;;  %v2880_v52 = vshrl.u32 %v2845_v16, 16  ;;  %v2699_v12 = vsel %vm9868_vm11, %v2691_v44, %v2698_v5  ;;  %v3276_v49 = vshrl.u32 %v3250_v61, 16  ;;  %v3030_v61 = vld [vmem:[#allocation3 + $0xc] sm:$0xf] }
 0x230   : > { %v3091_v37 = vsel %vm9911_vm13, %v3086_v9, %v11451_v4  ;;  %v3269_v10 = vor.u32 %v3268_v35, %v3265_v24  ;;  %v3473_v21 = vrot.slane %v3471_v28, 4  ;;  %v2705_v11 = vshll.u32 %v2659_v42, 16  ;;  %3043 = vst.msk [vmem:[#allocation4 + $0x10] sm:$0xf] %vm290_vm0, %v3030_v61  ;;  %v2540_v9 = vld [vmem:[#allocation3 + $0x14] sm:$0xf]  ;;  %9173 = vmatpush3.bf16.msra.mxu1 %v9599_v57 }
 0x231   : > { %3199 = vrot.lane.b32.xlu1 %v3091_v37, %s9719_s7  ;;  %v11468_v50 = vrot.slane %v2880_v52, 7  ;;  %v2883_v22 = vshll.u32 %v2845_v16, 16  ;;  %v3278_v53 = vrot.slane %v3276_v49, 4  ;;  %v3609_v48 = vsel %vm10661_vm12, %v3600_v1, %v11119_v40  ;;  %v11491_v44 = vld [vmem:[#allocation3 + $0x14] sm:$0xf] }
 0x232   : > { %2794 = vrot.lane.b32.xlu0 %v2699_v12, %s9721_s23  ;;  %v3270_v34 = vrot.slane %v3269_v10, 4  ;;  %v2707_v28 = vor.u32 %v2705_v11, %v11457_v29  ;;  %v3282_v5 = vshll.u32 %v11464_v63, 16  ;;  %3716 = vst.msk [vmem:[#allocation4 + $0x20] sm:$0xf] %vm290_vm0, %v3609_v48  ;;  %v3092_v24 = vshrl.u32 %v11416_v54, 16 }
 0x233   : > { %v3475_v40 = vsel %vm9829_vm9, %v3473_v21, %v3474_v60  ;;  %v2885_v32 = vor.u32 %v2883_v22, %v11468_v50  ;;  %v3279_v1 = vor.u32 %v3278_v53, %v3274_v55  ;;  %v11493_v35 = vld [vmem:[#allocation3 + $0x28] sm:$0xf]  ;;  %v3031_v54 = vld [vmem:[#allocation3 + $0x10] sm:$0xf]  ;;  %v2700_v52 = vrot.slane %v11448_v36, 4 }
 0x234   : > { %v9584_v42 = vld [vmem:[#allocation4 + $0x8] ss:$12 sps:$4 sm:$0xff]   ;;  %v3275_v16 = vsel %vm9911_vm13, %v3270_v34, %v3274_v55  ;;  %v3094_v37 = vrot.slane %v3092_v24, 4  ;;  %v11498_v12 = vld [vmem:[#allocation3 + $0x14] sm:$0xf]  ;;  %v2878_v55 = vrot.slane %v11393_v7, 4 }
 0x235   : > { %3509 = vrot.lane.b32.xlu1 %v3475_v40, %s9720_s10  ;;  %3044 = vst.msk [vmem:[#allocation4 + $0x1c] sm:$0xf] %vm290_vm0, %v3031_v54  ;;  %v3032_v10 = vld [vmem:[#allocation3 + $0x14] sm:$0xf]  ;;  %9411 = vmatmul.mubr.msk.bf16.vlgmr.msra.gmra.mxu0 %vm2071_vm14, %v9584_v42  ;;  %v11503_v49 = vld [vmem:[#allocation3 + $0x2c] sm:$0xf]  ;;  %v2708_v11 = vsel %vm9868_vm11, %v2700_v52, %v2707_v28 }
 0x236   : > { %3391 = vrot.lane.b32.xlu0 %v3275_v16, %s9721_s23  ;;  %3045 = vst.msk [vmem:[#allocation4 + $0x28] sm:$0xf] %vm290_vm0, %v3032_v10  ;;  %v3041_v21 = vld [vmem:[#allocation3 + $0x38] sm:$0x3]  ;;  %v11508_v46 = vrot.slane %v3282_v5, 5  ;;  %v2577_v36 = vrot.slane %v2540_v9, 7  ;;  %v2886_v7 = vsel %vm9868_vm11, %v2878_v55, %v2885_v32  ;;  %v3095_v61 = vor.u32 %v3094_v37, %v11451_v4 }
 0x237   : > { %v14266_v34 = vmov 0.0   ;;  %v3098_v22 = vshll.u32 %v11491_v44, 16  ;;  %v11513_v53 = vld [vmem:[#allocation3 + $0x14] sm:$0xf]  ;;  %3054 = vst.msk [vmem:[#allocation4 + $0x94] sm:$0x3] %vm307_vm1, %v3041_v21 }
 0x238   : > { %9414 = vmatprep.mubr.msk.bf16.mxu0 %vm9723_vm8, %v14266_v34  ;;  %v3280_v48 = vrot.slane %v3279_v1, 4  ;;  %v2889_v57 = vshrl.u32 %v11498_v12, 16  ;;  %v9600_v28 = vld [vmem:[%s14169_s2 + $0xe0] sm:$0xff]   ;;  %v9602_v5 = vld [vmem:[%s14169_s2 + $0xd8] sm:$0xff]   ;;  %v2576_v4 = vrot.slane %v2574_v45, 4  ;;  %v2934_v24 = vshrl.u32 %v11493_v35, 16 }
 0x239   : > { %v9601_v42 = vld [vmem:[%s14169_s2 + $0xa0] sm:$0xff]   ;;  %2796 = vrot.lane.b32.xlu1 %v2708_v11, %s9721_s23  ;;  %v2943_v40 = vshrl.u32 %v11503_v49, 16  ;;  %v9707_v16 = vld [vmem:[#allocation3 + $0x18] sm:$0xf]  ;;  %9174 = vmatprep.subr.bf16.mxu1 %v9600_v28  ;;  %v2579_v9 = vrot.slane %v2577_v36, 4  ;;  %v11537_v54 = vrot.slane %v3098_v22, 5 }
 0x23a   : > { %2981 = vrot.lane.b32.xlu0 %v2886_v7, %s9720_s10  ;;  %v2723_v32 = vshll.u32 %v9707_v16, 16  ;;  %v2578_v1 = vsel %vm9813_vm7, %v2576_v4, %v2577_v36  ;;  %v2711_v52 = vshrl.u32 %v11513_v53, 16  ;;  %9175 = vmatpush3.bf16.msra.mxu1 %v9601_v42  ;;  %v3285_v45 = vsel %vm9911_vm13, %v3280_v48, %v11508_v46  ;;  %v9585_v37 = vld [vmem:[#allocation4 + $0x20] ss:$12 sps:$4 sm:$0xff]   ;;  %v9708_v28 = vld [vmem:[#allocation3 + $0x18] sm:$0xf] }
 0x23b   : > { %v3096_v10 = vrot.slane %v3095_v61, 4  ;;  %v11546_v55 = vrot.slane %v2889_v57, 7  ;;  %v3102_v21 = vshrl.u32 %v11491_v44, 16  ;;  %9176 = vmatprep.subr.bf16.mxu1 %v9602_v5  ;;  %v9604_v11 = vld [vmem:[%s14169_s2 + $0xd0] sm:$0xff]   ;;  %v11554_v22 = vrot.slane %v2934_v24, 7 }
 0x23c   : > { %v11556_v7 = vrot.slane %v2943_v40, 7  ;;  %v3690_v48 = vrot.slane %v11363_v20, 4  ;;  %v2892_v44 = vshll.u32 %v11498_v12, 16  ;;  %v14267_v61 = vld [vmem:[#allocation22_spill] sm:$0xff]  ;;  %v2901_v42 = vshll.u32 %v9708_v28, 16  ;;  %v11574_v16 = vpop.permute.xlu1 %3513  ;;  %v14272_v28 = vld [vmem:[#allocation16_spill] sm:$0xff] }
 0x23d   : > { %3393 = vrot.lane.b32.xlu1 %v3285_v45, %s9721_s23  ;;  %v2616_v36 = vpop.permute.xlu0 %2615  ;;  %9415 = vmatmul.mubr.msk.bf16.gmra.mxu0 %vm2071_vm14, %v9585_v37  ;;  %v11563_v57 = vor.u32 %v2723_v32, %v14267_v61  ;;  %v2370_v5 = vld [vmem:[#allocation3 + $0x24] sm:$0xf]  ;;  %v3476_v4 = vrot.slane %v3474_v60, 4  ;;  %v2713_v24 = vrot.slane %v2711_v52, 7  ;;  %v2946_v20 = vshll.u32 %v11503_v49, 16  ;;  %v9605_v12 = vld [vmem:[%s14169_s2 + $0x90] sm:$0xff]  }
 0x23e   : > { %2611 = vrot.lane.b32.xlu0 %v2578_v1, %s9719_s7  ;;  %2648 = vst.msk [vmem:[#allocation4 + $0x48] sm:$0xf] %vm691_vm3, %v2616_v36  ;;  %9418 = vmatprep.mubr.msk.bf16.mxu0 %vm9723_vm8, %v14266_v34  ;;  %v3286_v40 = vshrl.u32 %v11464_v63, 16  ;;  %v14268_v32 = vld [vmem:[#allocation17_spill] sm:$0xff]  ;;  %v3101_v60 = vsel %vm9911_vm13, %v3096_v10, %v11537_v54  ;;  %v2894_v49 = vor.u32 %v2892_v44, %v11546_v55  ;;  %v3104_v52 = vrot.slane %v3102_v21, 4  ;;  %v14271_v21 = vld [vmem:[#allocation6_spill] sm:$0xff] }
 0x23f   : > { %9177 = vmatpush3.bf16.msra.mxu1 %v9603_v19  ;;  %v14269_v1 = vrot.slane %v14268_v32, 7  ;;  %v14270_v63 = vld [vmem:[#allocation21_spill] sm:$0xff]  ;;  %v2941_v45 = vrot.slane %v11554_v22, 4  ;;  %v2948_v37 = vor.u32 %v2946_v20, %v11556_v7  ;;  %v2887_v36 = vrot.slane %v11468_v50, 4  ;;  %v11592_v61 = vld [vmem:[#allocation3 + $0x2c] sm:$0xf] }
 0x240   : > { %9178 = vmatprep.subr.bf16.mxu1 %v9604_v11  ;;  %v2903_v19 = vor.u32 %v2901_v42, %v14270_v63  ;;  %v2714_v10 = vshll.u32 %v11513_v53, 16  ;;  %v3699_v11 = vsel %vm10661_vm12, %v3690_v48, %v14271_v21  ;;  %v2465_v44 = vshrl.u32 %v2370_v5, 16  ;;  %v11605_v21 = vld [vmem:[#allocation3 + $0x30] sm:$0xf] }
 0x241   : > { %v2581_v41 = vsel %vm9813_vm7, %v2579_v9, %v14269_v1  ;;  %v2932_v9 = vrot.slane %v11180_v15, 4  ;;  %v14273_v32 = vrot.slane %v14272_v28, 5  ;;  %v2718_v1 = vrot.slane %v2713_v24, 4  ;;  %3725 = vst.msk [vmem:[#allocation4 + $0x8c] sm:$0xf] %vm290_vm0, %v3699_v11 }
 0x242   : > { %2613 = vrot.lane.b32.xlu1 %v2581_v41, %s9719_s7  ;;  %3201 = vrot.lane.b32.xlu0 %v3101_v60, %s9719_s7  ;;  %v3288_v20 = vrot.slane %v3286_v40, 4  ;;  %v3066_v41 = vld [vmem:[#allocation3 + $0x34] sm:$0xf]  ;;  %v2468_v50 = vshll.u32 %v2370_v5, 16  ;;  %v2895_v53 = vsel %vm9868_vm11, %v2887_v36, %v2894_v49  ;;  %v9586_v60 = vld [vmem:[#allocation4 + $0x38] ss:$12 sps:$4 sm:$0xff]   ;;  %v2716_v63 = vor.u32 %v2714_v10, %v2713_v24  ;;  %v11614_v36 = vpop.permute.xlu1 %3397 }
 0x243   : > { %v3478_v42 = vsel %vm9829_vm9, %v3476_v4, %v14273_v32  ;;  %9179 = vmatpush3.bf16.msra.mxu1 %v9605_v12  ;;  %v3105_v48 = vor.u32 %v3104_v52, %v11537_v54  ;;  %v2467_v28 = vrot.slane %v2465_v44, 6  ;;  %v2896_v4 = vrot.slane %v11546_v55, 4  ;;  %v11610_v40 = vld [vmem:[#allocation3 + $0x30] sm:$0xf]  ;;  %v11622_v10 = vld [vmem:[#allocation3 + $0x34] sm:$0xf] }
 0x244   : > { %v2937_v5 = vshll.u32 %v11493_v35, 16  ;;  %v2595_v12 = vrot.slane %v11592_v61, 7  ;;  %v2470_v49 = vrot.slane %v2468_v50, 7  ;;  %v2709_v54 = vrot.slane %v11457_v29, 4  ;;  %v11628_v44 = vld [vmem:[#allocation3 + $0x2c] sm:$0xf] }
 0x245   : > { %v3206_v24 = vpop.permute.xlu0 %3205  ;;  %9419 = vmatmul.mubr.msk.bf16.gmra.mxu0 %vm2071_vm14, %v9586_v60  ;;  %v11620_v52 = vsel %vm9868_vm11, %v2941_v45, %v2948_v37  ;;  %v3178_v55 = vshll.u32 %v3066_v41, 16  ;;  %v3182_v11 = vshrl.u32 %v3066_v41, 16  ;;  %v3289_v35 = vor.u32 %v3288_v20, %v11508_v46  ;;  %v2371_v46 = vld [vmem:[#allocation3 + $0x28] sm:$0xf]  ;;  %v3260_v60 = vld [vmem:[#allocation3 + $0x38] sm:$0xf] }
 0x246   : > { %2983 = vrot.lane.b32.xlu1 %v2895_v53, %s9720_s10  ;;  %3511 = vrot.lane.b32.xlu0 %v3478_v42, %s9720_s10  ;;  %3240 = vst.msk [vmem:[#allocation4 + $0x34] sm:$0xf] %vm691_vm3, %v3206_v24  ;;  %v2774_v32 = vshrl.u32 %v11605_v21, 16  ;;  %v2463_v29 = vrot.slane %v11318_v62, 4  ;;  %v11632_v42 = vor.u32 %v2470_v49, %v2467_v28  ;;  %v2726_v45 = vsel %vm9868_vm11, %v2718_v1, %v11563_v57  ;;  %v11640_v53 = vld [vmem:[#allocation3 + $0x38] sm:$0x7] }
 0x247   : > { %9422 = vmatprep.mubr.msk.bf16.mxu0 %vm9723_vm8, %v14266_v34  ;;  %v2717_v37 = vsel %vm9868_vm11, %v2709_v54, %v2716_v63  ;;  %v3106_v41 = vrot.slane %v3105_v48, 4  ;;  %v2939_v50 = vor.u32 %v2937_v5, %v11554_v22  ;;  %v2904_v62 = vsel %vm9868_vm11, %v2896_v4, %v2903_v19  ;;  %v11656_v19 = vld [vmem:[#allocation3 + $0x30] sm:$0xf]  ;;  %v14275_v57 = vld [vmem:[#allocation18_spill] sm:$0xff] }
 0x248   : > { %v3495_v20 = vrot.slane %v11610_v40, 5  ;;  %v2472_v1 = vsel %vm10354_vm2, %v2463_v29, %v11632_v42  ;;  %v11651_v22 = vrot.slane %v3178_v55, 5  ;;  %v3184_v63 = vrot.slane %v3182_v11, 4  ;;  %v14274_v54 = vld [vmem:[#allocation19_spill] sm:$0xff] }
 0x249   : > { %v2765_v48 = vshrl.u32 %v11628_v44, 16  ;;  %2530 = vst.msk [vmem:[#allocation4 + $0x60] sm:$0xf] %vm290_vm0, %v2472_v1  ;;  %v3172_v28 = vshrl.u32 %v11309_v13, 16  ;;  %v3290_v5 = vrot.slane %v3289_v35, 4  ;;  %v3188_v4 = vshll.u32 %v11640_v53, 16  ;;  %v11661_v24 = vpop.permute.xlu1 %2987 }
 0x24a   : > { %2800 = vrot.lane.b32.xlu1 %v2726_v45, %s9721_s23  ;;  %2798 = vrot.lane.b32.xlu0 %v2717_v37, %s9721_s23  ;;  %v11659_v40 = vrot.slane %v2774_v32, 7  ;;  %v2475_v49 = vshrl.u32 %v2371_v46, 16  ;;  %v3111_v55 = vsel %vm9911_vm13, %v3106_v41, %v14274_v54  ;;  %v9587_v11 = vld [vmem:[#allocation4 + $0x50] ss:$12 sps:$4 sm:$0xff]   ;;  %v3372_v29 = vshll.u32 %v3260_v60, 16 }
 0x24b   : > { %v3376_v45 = vshrl.u32 %v3260_v60, 16  ;;  %v2478_v37 = vshll.u32 %v2371_v46, 16  ;;  %v3497_v13 = vrot.slane %v3495_v20, 4  ;;  %v2940_v35 = vsel %vm9868_vm11, %v2932_v9, %v2939_v50  ;;  %v11675_v46 = vld [vmem:[#allocation3 + $0x3c] sm:$0x7] }
 0x24c   : > { %v2777_v32 = vshll.u32 %v11605_v21, 16  ;;  %v2477_v1 = vrot.slane %v2475_v49, 6  ;;  %v3185_v41 = vor.u32 %v3184_v63, %v11651_v22  ;;  %v2767_v54 = vrot.slane %v2765_v48, 7 }
 0x24d   : > { %9423 = vmatmul.mubr.msk.bf16.gmra.mxu0 %vm2071_vm14, %v9587_v11  ;;  %v3174_v60 = vrot.slane %v3172_v28, 4  ;;  %v14202_v15 = vrot.slane %v11656_v19, 7  ;;  %v11683_v9 = vrot.slane %v3188_v4, 5  ;;  %v11688_v48 = vrot.slane %v3372_v29, 5  ;;  %v11704_v29 = vld [vmem:[#allocation3 + $0x34] sm:$0xf] }
 0x24e   : > { %3203 = vrot.lane.b32.xlu1 %v3111_v55, %s9719_s7  ;;  %2985 = vrot.lane.b32.xlu0 %v2904_v62, %s9720_s10  ;;  %v2480_v55 = vrot.slane %v2478_v37, 7  ;;  %v3295_v62 = vsel %vm9911_vm13, %v3290_v5, %v14275_v57  ;;  %v2779_v21 = vor.u32 %v2777_v32, %v11659_v40  ;;  %v3378_v28 = vrot.slane %v3376_v45, 4  ;;  %v11709_v32 = vld [vmem:[#allocation3 + $0x30] sm:$0xf] }
 0x24f   : > { %9426 = vmatprep.mubr.msk.bf16.mxu0 %vm9723_vm8, %v14266_v34  ;;  %v2473_v49 = vrot.slane %v11632_v42, 4  ;;  %v2597_v57 = vrot.slane %v2595_v12, 4  ;;  %v3494_v5 = vrot.slane %v3492_v18, 4  ;;  %v2594_v4 = vrot.slane %v2592_v0, 4 }
 0x250   : > { %v11691_v11 = vor.u32 %v2480_v55, %v2477_v1  ;;  %v3382_v42 = vshll.u32 %v11675_v46, 16  ;;  %v11706_v45 = vrot.slane %v3185_v41, 4  ;;  %v3175_v37 = vor.u32 %v3174_v60, %v11314_v14  ;;  %v2363_v41 = vld [vmem:[#allocation3 + $0x8] sm:$0xf] }
 0x251   : > { %v2618_v50 = vpop.permute.xlu1 %2617  ;;  %v14276_v2 = vrot.slane %v11622_v10, 5  ;;  %v2599_v0 = vsel %vm9813_vm7, %v2597_v57, %v14202_v15  ;;  %v3496_v18 = vsel %vm9829_vm9, %v3494_v5, %v3495_v20  ;;  %v11728_v14 = vsel %vm9813_vm7, %v2594_v4, %v2595_v12  ;;  %v2373_v57 = vld [vmem:[#allocation3 + $0x30] sm:$0xf] }
 0x252   : > { %v11686_v63 = vpop.permute.xlu0 %3515  ;;  %2995 = vrot.lane.b32.xlu1 %v11620_v52, %s9720_s10  ;;  %2649 = vst.msk [vmem:[#allocation4 + $0x54] sm:$0xf] %vm691_vm3, %v2618_v50  ;;  %3395 = vrot.lane.b32.xlu0 %v3295_v62, %s9721_s23  ;;  %v2772_v52 = vrot.slane %v2767_v54, 4  ;;  %v2482_v1 = vsel %vm10354_vm2, %v2473_v49, %v11691_v11  ;;  %v3191_v62 = vsel %vm9911_vm13, %v11706_v45, %v11683_v9  ;;  %v2961_v12 = vshrl.u32 %v11704_v29, 16  ;;  %v2364_v50 = vld [vmem:[#allocation3 + $0xc] sm:$0xf] }
 0x253   : > { %v3499_v6 = vsel %vm9829_vm9, %v3497_v13, %v14276_v2  ;;  %2531 = vst.msk [vmem:[#allocation4 + $0x6c] sm:$0xf] %vm290_vm0, %v2482_v1  ;;  %v9588_v13 = vld [vmem:[#allocation4 + $0x68] ss:$12 sps:$4 sm:$0xff]   ;;  %v3379_v61 = vor.u32 %v3378_v28, %v11688_v48  ;;  %v11745_v49 = vrot.slane %v3382_v42, 5  ;;  %v11751_v4 = vrot.slane %v3175_v37, 4 }
 0x254   : > { %v11737_v20 = vsel %vm9868_vm11, %v2772_v52, %v2779_v21  ;;  %v2768_v21 = vshll.u32 %v11628_v44, 16  ;;  %v2365_v28 = vld [vmem:[#allocation3 + $0x10] sm:$0xf]  ;;  %v3366_v52 = vshrl.u32 %v11316_v43, 16  ;;  %v2395_v1 = vshrl.u32 %v2363_v41, 16 }
 0x255   : > { %v3208_v60 = vpop.permute.xlu1 %3207  ;;  %9427 = vmatmul.mubr.msk.bf16.gmra.mxu0 %vm2071_vm14, %v9588_v13  ;;  %v2398_v42 = vshll.u32 %v2363_v41, 16  ;;  %v2405_v2 = vshrl.u32 %v2364_v50, 16  ;;  %v2408_v44 = vshll.u32 %v2364_v50, 16  ;;  %v11761_v13 = vrot.slane %v3379_v61, 4  ;;  %v2366_v43 = vld [vmem:[#allocation3 + $0x14] sm:$0xf] }
 0x256   : > { %v2803_v55 = vpop.permute.xlu0 %2802  ;;  %3525 = vrot.lane.b32.xlu1 %v3499_v6, %s9720_s10  ;;  %3241 = vst.msk [vmem:[#allocation4 + $0x40] sm:$0xf] %vm691_vm3, %v3208_v60  ;;  %2993 = vrot.lane.b32.xlu0 %v2940_v35, %s9720_s10  ;;  %v11757_v35 = vor.u32 %v2768_v21, %v2767_v54  ;;  %v2372_v6 = vld [vmem:[#allocation3 + $0x2c] sm:$0xf]  ;;  %v11763_v37 = vrot.slane %v2961_v12, 7  ;;  %v2397_v15 = vrot.slane %v2395_v1, 6  ;;  %v3181_v61 = vsel %vm9911_vm13, %v11751_v4, %v11651_v22 }
 0x257   : > { %2835 = vst.msk [vmem:[#allocation4 + $0x48] sm:$0xf] %vm883_vm4, %v2803_v55  ;;  %9430 = vmatprep.mubr.msk.bf16.mxu0 %vm9723_vm8, %v14266_v34  ;;  %v2415_v45 = vshrl.u32 %v2365_v28, 16  ;;  %v14277_v54 = vld [vmem:[#allocation15_spill] sm:$0xff]  ;;  %v2400_v50 = vrot.slane %v2398_v42, 7  ;;  %v2407_v21 = vrot.slane %v2405_v2, 6 }
 0x258   : > { %v2393_v41 = vrot.slane %v14277_v54, 4  ;;  %v2410_v5 = vrot.slane %v2408_v44, 7  ;;  %v11775_v12 = vrot.slane %v3366_v52, 4  ;;  %v2418_v1 = vshll.u32 %v2365_v28, 16  ;;  %v9589_v44 = vld [vmem:[#allocation4 + $0x80] ss:$12 sps:$4 sm:$0xff]  }
 0x259   : > { %v11759_v60 = vpop.permute.xlu1 %3517  ;;  %v2425_v3 = vshrl.u32 %v2366_v43, 16  ;;  %v2428_v54 = vshll.u32 %v2366_v43, 16  ;;  %v2485_v27 = vshrl.u32 %v2372_v6, 16  ;;  %v2488_v26 = vshll.u32 %v2372_v6, 16  ;;  %v2374_v6 = vld [vmem:[#allocation3 + $0x34] sm:$0x1] }
 0x25a   : > { %v3400_v55 = vpop.permute.xlu0 %3399  ;;  %2625 = vrot.lane.b32.xlu1 %v2599_v0, %s9719_s7  ;;  %3523 = vrot.lane.b32.xlu0 %v3496_v18, %s9720_s10  ;;  %v2417_v0 = vrot.slane %v2415_v45, 6  ;;  %v2411_v18 = vor.u32 %v2410_v5, %v2407_v21  ;;  %v2420_v51 = vrot.slane %v2418_v1, 7  ;;  %v2483_v21 = vrot.slane %v11691_v11, 4 }
 0x25b   : > { %3434 = vst.msk [vmem:[#allocation4 + $0x34] sm:$0xf] %vm883_vm4, %v3400_v55  ;;  %v2401_v55 = vor.u32 %v2400_v50, %v2397_v15  ;;  %v2427_v28 = vrot.slane %v2425_v3, 6  ;;  %v2430_v45 = vrot.slane %v2428_v54, 7  ;;  %v2490_v52 = vrot.slane %v2488_v26, 7 }
 0x25c   : > { %3550 = vst.msk [vmem:[#allocation4 + $0x34] sm:$0xf] %vm1072_vm10, %v11686_v63  ;;  %v2495_v63 = vshrl.u32 %v2373_v57, 16  ;;  %v2413_v5 = vrot.slane %v2411_v18, 4  ;;  %v2421_v4 = vor.u32 %v2420_v51, %v2417_v0  ;;  %v14278_v11 = vrot.slane %v11259_v59, 4 }
 0x25d   : > { %v2805_v42 = vpop.permute.xlu1 %2804  ;;  %v2402_v22 = vsel %vm10354_vm2, %v2393_v41, %v2401_v55  ;;  %v2403_v15 = vrot.slane %v2401_v55, 4  ;;  %9431 = vmatmul.mubr.msk.bf16.gmra.mxu0 %vm2071_vm14, %v9589_v44  ;;  %v2431_v26 = vor.u32 %v2430_v45, %v2427_v28  ;;  %v14279_v1 = vshrl.u32 %v11709_v32, 16  ;;  %v11827_v28 = vld [vmem:[#allocation3 + $0x3c] sm:$0x7] }
 0x25e   : > { %v2990_v2 = vpop.permute.xlu0 %2989  ;;  %3219 = vrot.lane.b32.xlu1 %v3191_v62, %s9719_s7  ;;  %2836 = vst.msk [vmem:[#allocation4 + $0x54] sm:$0xf] %vm883_vm4, %v2805_v42  ;;  %2623 = vrot.lane.b32.xlu0 %v11728_v14, %s9719_s7  ;;  %v2487_v62 = vrot.slane %v2485_v27, 6  ;;  %v2497_v50 = vrot.slane %v2495_v63, 6  ;;  %v2498_v14 = vshll.u32 %v2373_v57, 16  ;;  %v2422_v51 = vsel %vm10354_vm2, %v2413_v5, %v2421_v4 }
 0x25f   : > { %3022 = vst.msk [vmem:[#allocation4 + $0x48] sm:$0xf] %vm1072_vm10, %v2990_v2  ;;  %v2412_v43 = vsel %vm10354_vm2, %v2403_v15, %v2411_v18  ;;  %9434 = vmatprep.mubr.msk.bf16.mxu0 %vm9723_vm8, %v14266_v34  ;;  %v2423_v27 = vrot.slane %v2421_v4, 4  ;;  %v2771_v57 = vsel %vm9868_vm11, %v14278_v11, %v11757_v35  ;;  %v2954_v55 = vrot.slane %v14279_v1, 7  ;;  %v11806_v18 = vld [vmem:[#allocation3 + $0x38] sm:$0xf] }
 0x260   : > { %2523 = vst.msk [vmem:[#allocation4 + $0xc] sm:$0xf] %vm290_vm0, %v2402_v22  ;;  %2524 = vst.msk [vmem:[#allocation4 + $0x18] sm:$0xf] %vm290_vm0, %v2412_v43  ;;  %v2491_v0 = vor.u32 %v2490_v52, %v2487_v62  ;;  %v2505_v54 = vshll.u32 %v2374_v6, 16  ;;  %v2433_v42 = vrot.slane %v2431_v26, 4 }
 0x261   : > { %v3402_v3 = vpop.permute.xlu1 %3401  ;;  %2525 = vst.msk [vmem:[#allocation4 + $0x24] sm:$0xf] %vm290_vm0, %v2422_v51  ;;  %v2432_v59 = vsel %vm10354_vm2, %v2423_v27, %v2431_v26  ;;  %v3192_v2 = vshrl.u32 %v11640_v53, 16  ;;  %v14280_v15 = vshll.u32 %v11704_v29, 16  ;;  %v3501_v53 = vrot.slane %v11806_v18, 5 }
 0x262   : > { %v2620_v41 = vpop.permute.xlu0 %2619  ;;  %2812 = vrot.lane.b32.xlu1 %v11737_v20, %s9721_s23  ;;  %3435 = vst.msk [vmem:[#allocation4 + $0x40] sm:$0xf] %vm883_vm4, %v3402_v3  ;;  %3217 = vrot.lane.b32.xlu0 %v3181_v61, %s9719_s7  ;;  %v2500_v20 = vrot.slane %v2498_v14, 7  ;;  %v3369_v61 = vor.u32 %v11775_v12, %v11339_v25  ;;  %v2492_v35 = vsel %vm10354_vm2, %v2483_v21, %v2491_v0  ;;  %v2493_v44 = vrot.slane %v2491_v0, 4  ;;  %v2855_v18 = vld [vmem:[#allocation3 + $0x38] sm:$0x3] }
 0x263   : > { %2650 = vst.msk [vmem:[#allocation4 + $0x60] sm:$0xf] %vm691_vm3, %v2620_v41  ;;  %v2507_v22 = vrot.slane %v2505_v54, 7  ;;  %v3385_v25 = vsel %vm9911_vm13, %v11761_v13, %v11745_v49  ;;  %v2966_v5 = vor.u32 %v14280_v15, %v11763_v37  ;;  %v2442_v4 = vsel %vm10354_vm2, %v2433_v42, %v11135_v39 }
 0x264   : > { %3551 = vst.msk [vmem:[#allocation4 + $0x40] sm:$0xf] %vm1072_vm10, %v11759_v60  ;;  %v2501_v63 = vor.u32 %v2500_v20, %v2497_v50  ;;  %v3386_v13 = vshrl.u32 %v11675_v46, 16  ;;  %v2959_v62 = vrot.slane %v2954_v55, 4  ;;  %v3370_v52 = vrot.slane %v3369_v61, 4 }
 0x265   : > { %2526 = vst.msk [vmem:[#allocation4 + $0x30] sm:$0xf] %vm290_vm0, %v2432_v59  ;;  %2532 = vst.msk [vmem:[#allocation4 + $0x78] sm:$0xf] %vm290_vm0, %v2492_v35  ;;  %v2992_v60 = vpop.permute.xlu1 %2991  ;;  %v2955_v39 = vshll.u32 %v11709_v32, 16  ;;  %v3504_v6 = vrot.slane %v11827_v28, 5 }
 0x266   : > { %v3210_v12 = vpop.permute.xlu0 %3209  ;;  %3413 = vrot.lane.b32.xlu1 %v3385_v25, %s9721_s23  ;;  %3023 = vst.msk [vmem:[#allocation4 + $0x54] sm:$0xf] %vm1072_vm10, %v2992_v60  ;;  %2810 = vrot.lane.b32.xlu0 %v2771_v57, %s9721_s23  ;;  %v2502_v29 = vsel %vm10354_vm2, %v2493_v44, %v2501_v63  ;;  %v2503_v45 = vrot.slane %v2501_v63, 4  ;;  %v3194_v43 = vrot.slane %v3192_v2, 4  ;;  %v2967_v46 = vsel %vm9868_vm11, %v2959_v62, %v2966_v5  ;;  %v2668_v32 = vld [vmem:[#allocation3 + $0x34] sm:$0x3] }
 0x267   : > { %3242 = vst.msk [vmem:[#allocation4 + $0x4c] sm:$0xf] %vm691_vm3, %v3210_v12  ;;  %v3375_v3 = vsel %vm9911_vm13, %v3370_v52, %v11688_v48  ;;  %v3503_v41 = vrot.slane %v3501_v53, 4  ;;  %v2957_v51 = vor.u32 %v2955_v39, %v2954_v55  ;;  %v3388_v27 = vrot.slane %v3386_v13, 4  ;;  %v5544_v39 = vld [vmem:[#allocation2 + $0x3c] sm:$0xf] }
 0x268   : > { %2527 = vst.msk [vmem:[#allocation4 + $0x3c] sm:$0xf] %vm290_vm0, %v2442_v4  ;;  %2533 = vst.msk [vmem:[#allocation4 + $0x84] sm:$0xf] %vm290_vm0, %v2502_v29  ;;  %v2508_v50 = vsel %vm10354_vm2, %v2503_v45, %v2507_v22  ;;  %v2950_v26 = vrot.slane %v11556_v7, 4  ;;  %v3195_v0 = vor.u32 %v3194_v43, %v11683_v9  ;;  %v2783_v55 = vshrl.u32 %v2668_v32, 16 }
 0x269   : > { %v2622_v14 = vpop.permute.xlu1 %2621  ;;  %2534 = vst.msk [vmem:[#allocation4 + $0x90] sm:$0x3] %vm307_vm1, %v2508_v50  ;;  %v3505_v11 = vsel %vm9829_vm9, %v3503_v41, %v3504_v6  ;;  %v2548_v7 = vld [vmem:[#allocation3 + $0x34] sm:$0x1]  ;;  %v3389_v9 = vor.u32 %v3388_v27, %v11745_v49  ;;  %v14281_v20 = vrot.slane %v11622_v10, 5  ;;  %v2970_v63 = vshrl.u32 %v2855_v18, 16 }
 0x26a   : > { %v3520_v21 = vpop.permute.xlu0 %3519  ;;  %2999 = vrot.lane.b32.xlu1 %v2967_v46, %s9720_s10  ;;  %2651 = vst.msk [vmem:[#allocation4 + $0x6c] sm:$0xf] %vm691_vm3, %v2622_v14  ;;  %3411 = vrot.lane.b32.xlu0 %v3375_v3, %s9721_s23  ;;  %v2958_v1 = vsel %vm9868_vm11, %v2950_v26, %v2957_v51  ;;  %v3196_v61 = vrot.slane %v3195_v0, 4  ;;  %v2601_v2 = vrot.slane %v2548_v7, 7  ;;  %v2785_v44 = vrot.slane %v2783_v55, 7 }
 0x26b   : > { %v3500_v54 = vrot.slane %v14281_v20, 4  ;;  %v3390_v49 = vrot.slane %v3389_v9, 4  ;;  %v14282_v10 = vrot.slane %v11656_v19, 7  ;;  %v2786_v25 = vshll.u32 %v2668_v32, 16 }
 0x26c   : > { %v2972_v5 = vrot.slane %v2970_v63, 7  ;;  %v3506_v28 = vrot.slane %v3504_v6, 4  ;;  %v2781_v4 = vrot.slane %v11659_v40, 4  ;;  %v2973_v13 = vshll.u32 %v2855_v18, 16 }
 0x26d   : > { %v3212_v48 = vpop.permute.xlu1 %3211  ;;  %v3502_v35 = vsel %vm9829_vm9, %v3500_v54, %v3501_v53  ;;  %v2600_v22 = vrot.slane %v14282_v10, 4  ;;  %v2788_v15 = vor.u32 %v2786_v25, %v2785_v44  ;;  %v2968_v62 = vrot.slane %v11763_v37, 4  ;;  %v9608_v52 = vld [vmem:[#allocation4 + $0x98] ss:$0 sps:$4 sm:$0x33]  }
 0x26e   : > { %v2807_v57 = vpop.permute.xlu0 %2806  ;;  %3529 = vrot.lane.b32.xlu1 %v3505_v11, %s9720_s10  ;;  %3243 = vst.msk [vmem:[#allocation4 + $0x58] sm:$0xf] %vm691_vm3, %v3212_v48  ;;  %2997 = vrot.lane.b32.xlu0 %v2958_v1, %s9720_s10  ;;  %v2975_v45 = vor.u32 %v2973_v13, %v2972_v5  ;;  %v5665_v6 = vshrl.u32 %v5544_v39, 16  ;;  %v5668_v43 = vshll.u32 %v5544_v39, 16 }
 0x26f   : > { %2837 = vst.msk [vmem:[#allocation4 + $0x60] sm:$0xf] %vm883_vm4, %v2807_v57  ;;  %v2602_v12 = vsel %vm9813_vm7, %v2600_v22, %v2601_v2  ;;  %v2789_v29 = vsel %vm9868_vm11, %v2781_v4, %v2788_v15  ;;  %9435 = vmatmul.mubr.msk.bf16.gmra.mxu0 %vm2071_vm14, %v9608_v52 }
 0x270   : > { %v2976_v40 = vsel %vm9868_vm11, %v2968_v62, %v2975_v45  ;;  %v5667_v14 = vrot.slane %v5665_v6, 5  ;;  %9442 = vmatprep.mubr.msk.bf16.mxu0 %vm9723_vm8, %v14266_v34 }
 0x271   : > { %v3522_v59 = vpop.permute.xlu1 %3521 }
 0x272   : > { %v3404_v42 = vpop.permute.xlu0 %3403  ;;  %3221 = vrot.lane.b32.xlu1 %v3196_v61, %s9719_s7  ;;  %3527 = vrot.lane.b32.xlu0 %v3502_v35, %s9720_s10 }
 0x273   : > { %3436 = vst.msk [vmem:[#allocation4 + $0x4c] sm:$0xf] %vm883_vm4, %v3404_v42 }
 0x274   : > { %3552 = vst.msk [vmem:[#allocation4 + $0x4c] sm:$0xf] %vm1072_vm10, %v3520_v21  ;;  %v5670_v21 = vrot.slane %v5668_v43, 6 }
 0x275   : > { %v2809_v60 = vpop.permute.xlu1 %2808 }
 0x276   : > { %2838 = vst.msk [vmem:[#allocation4 + $0x6c] sm:$0xf] %vm883_vm4, %v2809_v60  ;;  %2627 = vrot.lane.b32.xlu0 %v2602_v12, %s9719_s7  ;;  %3415 = vrot.lane.b32.xlu1 %v3390_v49, %s9721_s23  ;;  %v11898_v37 = vor.u32 %v5670_v21, %v5667_v14 }
 0x277   : > { %v3214_v53 = vpop.permute.xlu0 %3213 }
 0x278   : > { %3244 = vst.msk [vmem:[#allocation4 + $0x64] sm:$0xf] %vm691_vm3, %v3214_v53  ;;  %v5673_v3 = vrot.slane %v11898_v37, 4 }
 0x279   : > { %v3406_v19 = vpop.permute.xlu1 %3405 }
 0x27a   : > { %3437 = vst.msk [vmem:[#allocation4 + $0x58] sm:$0xf] %vm883_vm4, %v3406_v19  ;;  %2814 = vrot.lane.b32.xlu0 %v2789_v29, %s9721_s23  ;;  %3531 = vrot.lane.b32.xlu1 %v3506_v28, %s9720_s10 }
 0x27b   : > { %3553 = vst.msk [vmem:[#allocation4 + $0x58] sm:$0xf] %vm1072_vm10, %v3522_v59 }
 0x27c   : > { %5699 = vst.msk [vmem:[#allocation4 + $0x98] sm:$0x3] %vm307_vm1, %v5673_v3 }
 0x27e   : > { %3001 = vrot.lane.b32.xlu0 %v2976_v40, %s9720_s10 }
 0x282   : > { %v3741_v43 = vld [vmem:[#allocation4 + $0x54] sm:$0xff] }
 0x284   : > { %v3216_v50 = vpop.permute.xlu1 %3215 }
 0x285   : > { %v3408_v46 = vpop.permute.xlu0 %3407  ;;  %3245 = vst.msk [vmem:[#allocation4 + $0x70] sm:$0xf] %vm691_vm3, %v3216_v50  ;;  %v3739_v50 = vld [vmem:[#allocation4 + $0x48] sm:$0xff] }
 0x286   : > { %3438 = vst.msk [vmem:[#allocation4 + $0x64] sm:$0xf] %vm883_vm4, %v3408_v46  ;;  %v8689_v3 = vcombine.high %v3739_v50, %v3741_v43 }
 0x289   : > { %v3410_v41 = vpop.permute.xlu1 %3409 }
 0x28a   : > { %3439 = vst.msk [vmem:[#allocation4 + $0x70] sm:$0xf] %vm883_vm4, %v3410_v41 }
 0x28e   : > { %v2606_v51 = vpop.permute.xlu1 %2605 }
 0x28f   : > { %2643 = vst.msk [vmem:[#allocation4 + $0xc] sm:$0xf] %vm691_vm3, %v2606_v51 }
 0x294   : > { %v2978_v32 = vpop.permute.xlu0 %2977  ;;  %v2793_v27 = vpop.permute.xlu1 %2792 }
 0x295   : > { %3016 = vst.msk [vmem:[#allocation4] sm:$0xf] %vm1072_vm10, %v2978_v32 }
 0x296   : > { %2830 = vst.msk [vmem:[#allocation4 + $0xc] sm:$0xf] %vm883_vm4, %v2793_v27 }
 0x298   : > { %v2608_v26 = vpop.permute.xlu0 %2607 }
 0x299   : > { %2644 = vst.msk [vmem:[#allocation4 + $0x18] sm:$0xf] %vm691_vm3, %v2608_v26  ;;  %v2980_v0 = vpop.permute.xlu1 %2979  ;;  %v8688_v26 = vcombine.low %v3739_v50, %v3741_v43 }
 0x29a   : > { %3017 = vst.msk [vmem:[#allocation4 + $0xc] sm:$0xf] %vm1072_vm10, %v2980_v0 }
 0x29c   : > { %v3198_v11 = vpop.permute.xlu0 %3197 }
 0x29d   : > { %3236 = vst.msk [vmem:[#allocation4 + $0x4] sm:$0xf] %vm691_vm3, %v3198_v11  ;;  %v2610_v48 = vpop.permute.xlu1 %2609 }
 0x29e   : > { %2645 = vst.msk [vmem:[#allocation4 + $0x24] sm:$0xf] %vm691_vm3, %v2610_v48 }
 0x2a0   : > { %v3508_v57 = vpop.permute.xlu0 %3507 }
 0x2a3   : > { %v3200_v1 = vpop.permute.xlu1 %3199 }
 0x2a4   : > { %v2795_v55 = vpop.permute.xlu0 %2794  ;;  %3237 = vst.msk [vmem:[#allocation4 + $0x10] sm:$0xf] %vm691_vm3, %v3200_v1 }
 0x2a5   : > { %2831 = vst.msk [vmem:[#allocation4 + $0x18] sm:$0xf] %vm883_vm4, %v2795_v55 }
 0x2a7   : > { %v3510_v7 = vpop.permute.xlu1 %3509 }
 0x2a8   : > { %v3392_v9 = vpop.permute.xlu0 %3391 }
 0x2a9   : > { %3430 = vst.msk [vmem:[#allocation4 + $0x4] sm:$0xf] %vm883_vm4, %v3392_v9 }
 0x2aa   : > { %3546 = vst.msk [vmem:[#allocation4 + $0x4] sm:$0xf] %vm1072_vm10, %v3508_v57 }
 0x2ab   : > { %v2797_v18 = vpop.permute.xlu1 %2796 }
 0x2ac   : > { %v2982_v20 = vpop.permute.xlu0 %2981  ;;  %2832 = vst.msk [vmem:[#allocation4 + $0x24] sm:$0xf] %vm883_vm4, %v2797_v18 }
 0x2ad   : > { %3018 = vst.msk [vmem:[#allocation4 + $0x18] sm:$0xf] %vm1072_vm10, %v2982_v20 }
 0x2af   : > { %v3394_v54 = vpop.permute.xlu1 %3393 }
 0x2b0   : > { %v2612_v61 = vpop.permute.xlu0 %2611  ;;  %3431 = vst.msk [vmem:[#allocation4 + $0x10] sm:$0xf] %vm883_vm4, %v3394_v54 }
 0x2b1   : > { %2646 = vst.msk [vmem:[#allocation4 + $0x30] sm:$0xf] %vm691_vm3, %v2612_v61  ;;  %v3727_v44 = vld [vmem:[#allocation4] sm:$0xff] }
 0x2b2   : > { %3547 = vst.msk [vmem:[#allocation4 + $0x10] sm:$0xf] %vm1072_vm10, %v3510_v7 }
 0x2b4   : > { %v2614_v59 = vpop.permute.xlu1 %2613  ;;  %v3202_v42 = vpop.permute.xlu0 %3201 }
 0x2b5   : > { %2647 = vst.msk [vmem:[#allocation4 + $0x3c] sm:$0xf] %vm691_vm3, %v2614_v59  ;;  %3238 = vst.msk [vmem:[#allocation4 + $0x1c] sm:$0xf] %vm691_vm3, %v3202_v42 }
 0x2b8   : > { %v2984_v35 = vpop.permute.xlu1 %2983  ;;  %v3512_v2 = vpop.permute.xlu0 %3511 }
 0x2b9   : > { %v3729_v63 = vld [vmem:[#allocation4 + $0xc] sm:$0xff]  ;;  %3019 = vst.msk [vmem:[#allocation4 + $0x24] sm:$0xf] %vm1072_vm10, %v2984_v35 }
 0x2ba   : > { %v8680_v49 = vcombine.high %v3727_v44, %v3729_v63  ;;  %v8679_v10 = vcombine.low %v3727_v44, %v3729_v63 }
 0x2bc   : > { %v2801_v22 = vpop.permute.xlu1 %2800  ;;  %4059 = vmatprep.mubr.bf16.mxu1 %v8680_v49  ;;  %v2799_v25 = vpop.permute.xlu0 %2798 }
 0x2bd   : > { %2834 = vst.msk [vmem:[#allocation4 + $0x3c] sm:$0xf] %vm883_vm4, %v2801_v22  ;;  %4060 = vmatmul.mubr.bf16.vlgmr.msra.gmra.mxu1 %v8679_v10  ;;  %2833 = vst.msk [vmem:[#allocation4 + $0x30] sm:$0xf] %vm883_vm4, %v2799_v25 }
 0x2be   : > { %3021 = vst.msk [vmem:[#allocation4 + $0x3c] sm:$0xf] %vm1072_vm10, %v11661_v24 }
 0x2c0   : > { %v3204_v60 = vpop.permute.xlu1 %3203  ;;  %v2986_v12 = vpop.permute.xlu0 %2985 }
 0x2c1   : > { %3239 = vst.msk [vmem:[#allocation4 + $0x28] sm:$0xf] %vm691_vm3, %v3204_v60 }
 0x2c2   : > { %3020 = vst.msk [vmem:[#allocation4 + $0x30] sm:$0xf] %vm1072_vm10, %v2986_v12 }
 0x2c3   : > { %3433 = vst.msk [vmem:[#allocation4 + $0x28] sm:$0xf] %vm883_vm4, %v11614_v36 }
 0x2c4   : > { %3549 = vst.msk [vmem:[#allocation4 + $0x28] sm:$0xf] %vm1072_vm10, %v11574_v16  ;;  %v2996_v15 = vpop.permute.xlu1 %2995  ;;  %v3396_v5 = vpop.permute.xlu0 %3395 }
 0x2c5   : > { %3025 = vst.msk [vmem:[#allocation4 + $0x6c] sm:$0xf] %vm1072_vm10, %v2996_v15  ;;  %v3737_v45 = vld [vmem:[#allocation4 + $0x3c] sm:$0xff] }
 0x2c6   : > { %3432 = vst.msk [vmem:[#allocation4 + $0x1c] sm:$0xf] %vm883_vm4, %v3396_v5 }
 0x2c7   : > { %3548 = vst.msk [vmem:[#allocation4 + $0x1c] sm:$0xf] %vm1072_vm10, %v3512_v2 }
 0x2c8   : > { %v3526_v24 = vpop.permute.xlu1 %3525  ;;  %v2994_v28 = vpop.permute.xlu0 %2993 }
 0x2c9   : > { %3555 = vst.msk [vmem:[#allocation4 + $0x70] sm:$0xf] %vm1072_vm10, %v3526_v24  ;;  %3024 = vst.msk [vmem:[#allocation4 + $0x60] sm:$0xf] %vm1072_vm10, %v2994_v28  ;;  %v3735_v13 = vld [vmem:[#allocation4 + $0x30] sm:$0xff] }
 0x2ca   : > { %v8686_v52 = vcombine.high %v3735_v13, %v3737_v45  ;;  %v8685_v46 = vcombine.low %v3735_v13, %v3737_v45 }
 0x2cb   : > { %v3733_v36 = vld [vmem:[#allocation4 + $0x24] sm:$0xff] }
 0x2cc   : > { %v2626_v53 = vpop.permute.xlu1 %2625  ;;  %v3524_v4 = vpop.permute.xlu0 %3523 }
 0x2cd   : > { %2653 = vst.msk [vmem:[#allocation4 + $0x84] sm:$0xf] %vm691_vm3, %v2626_v53 }
 0x2ce   : > { %v3731_v19 = vld [vmem:[#allocation4 + $0x18] sm:$0xff]  ;;  %3554 = vst.msk [vmem:[#allocation4 + $0x64] sm:$0xf] %vm1072_vm10, %v3524_v4 }
 0x2cf   : > { %v8683_v16 = vcombine.high %v3731_v19, %v3733_v36  ;;  %v8682_v29 = vcombine.low %v3731_v19, %v3733_v36  ;;  %v4508_v19 = vld [vmem:[#allocation2] sm:$0x8] }
 0x2d0   : > { %v3220_v62 = vpop.permute.xlu1 %3219  ;;  %v2624_v40 = vpop.permute.xlu0 %2623  ;;  %v3745_v27 = vld [vmem:[#allocation4 + $0x6c] sm:$0xff]  ;;  %v8738_v45 = vrot.slane %v4508_v19, 11 }
 0x2d1   : > { %4067 = vmatprep.mubr.bf16.mxu1 %v8683_v16  ;;  %3247 = vst.msk [vmem:[#allocation4 + $0x88] sm:$0xf] %vm691_vm3, %v3220_v62  ;;  %2652 = vst.msk [vmem:[#allocation4 + $0x78] sm:$0xf] %vm691_vm3, %v2624_v40  ;;  %v11970_v16 = vld [vmem:[#allocation2 + $0x4] sm:$0xf] }
 0x2d2   : > { %4068 = vmatmul.mubr.bf16.gmra.mxu1 %v8682_v29  ;;  %v4538_v62 = vrot.slane %v11970_v16, 7 }
 0x2d3   : > { %4075 = vmatprep.mubr.bf16.mxu1 %v8686_v52 }
 0x2d4   : > { %v2813_v39 = vpop.permute.xlu1 %2812  ;;  %v3218_v6 = vpop.permute.xlu0 %3217  ;;  %v4539_v52 = vsel %vm9813_vm7, %v8738_v45, %v4538_v62 }
 0x2d5   : > { %2840 = vst.msk [vmem:[#allocation4 + $0x84] sm:$0xf] %vm883_vm4, %v2813_v39  ;;  %v3743_v32 = vld [vmem:[#allocation4 + $0x60] sm:$0xff]  ;;  %4576 = vrot.lane.b32.xlu0 %v4539_v52, %s9719_s7 }
 0x2d6   : > { %3246 = vst.msk [vmem:[#allocation4 + $0x7c] sm:$0xf] %vm691_vm3, %v3218_v6  ;;  %v8692_v48 = vcombine.high %v3743_v32, %v3745_v27  ;;  %v8691_v55 = vcombine.low %v3743_v32, %v3745_v27 }
 0x2d8   : > { %v3414_v14 = vpop.permute.xlu1 %3413  ;;  %v2811_v21 = vpop.permute.xlu0 %2810 }
 0x2d9   : > { %3441 = vst.msk [vmem:[#allocation4 + $0x88] sm:$0xf] %vm883_vm4, %v3414_v14  ;;  %2839 = vst.msk [vmem:[#allocation4 + $0x78] sm:$0xf] %vm883_vm4, %v2811_v21  ;;  %v4628_v21 = vld [vmem:[#allocation2] sm:$0x8] }
 0x2da   : > { %4076 = vmatmul.mubr.bf16.gmra.mxu1 %v8685_v46 }
 0x2db   : > { %4083 = vmatprep.mubr.bf16.mxu1 %v8689_v3  ;;  %v4629_v3 = vld [vmem:[#allocation2 + $0x4] sm:$0xf] }
 0x2dc   : > { %v3000_v41 = vpop.permute.xlu1 %2999  ;;  %v3412_v51 = vpop.permute.xlu0 %3411  ;;  %v4648_v32 = vshrl.u32 %v4629_v3, 16  ;;  %v4651_v27 = vshll.u32 %v4629_v3, 16 }
 0x2dd   : > { %3027 = vst.msk [vmem:[#allocation4 + $0x84] sm:$0xf] %vm1072_vm10, %v3000_v41 }
 0x2de   : > { %3440 = vst.msk [vmem:[#allocation4 + $0x7c] sm:$0xf] %vm883_vm4, %v3412_v51  ;;  %v4643_v51 = vshrl.u32 %v4628_v21, 16 }
 0x2e0   : > { %v3530_v0 = vpop.permute.xlu1 %3529  ;;  %v2998_v11 = vpop.permute.xlu0 %2997 }
 0x2e1   : > { %3557 = vst.msk [vmem:[#allocation4 + $0x88] sm:$0xf] %vm1072_vm10, %v3530_v0  ;;  %3026 = vst.msk [vmem:[#allocation4 + $0x78] sm:$0xf] %vm1072_vm10, %v2998_v11  ;;  %v8739_v0 = vrot.slane %v4643_v51, 11  ;;  %v11988_v11 = vrot.slane %v4648_v32, 7 }
 0x2e2   : > { %4084 = vmatmul.mubr.bf16.gmra.mxu1 %v8688_v26  ;;  %v12018_v32 = vld [vmem:[#allocation2 + $0x4] sm:$0xf] }
 0x2e3   : > { %4091 = vmatprep.mubr.bf16.mxu1 %v8692_v48  ;;  %v4653_v48 = vor.u32 %v4651_v27, %v11988_v11  ;;  %v12023_v27 = vld [vmem:[#allocation2 + $0x20] sm:$0xff]  }
 0x2e4   : > { %v3222_v57 = vpop.permute.xlu1 %3221  ;;  %v3528_v1 = vpop.permute.xlu0 %3527  ;;  %v9051_v16 = vunpack.c.l.bf16 %v12023_v27 }
 0x2e5   : > { %3248 = vst.msk [vmem:[#allocation4 + $0x94] sm:$0x3] %vm704_vm15, %v3222_v57  ;;  %v4654_v57 = vsel %vm9868_vm11, %v8739_v0, %v4653_v48  ;;  %v4540_v48 = vrot.slane %v4538_v62, 4  ;;  %v9052_v62 = vunpack.c.h.bf16 %v12023_v27 }
 0x2e6   : > { %3556 = vst.msk [vmem:[#allocation4 + $0x7c] sm:$0xf] %vm1072_vm10, %v3528_v1  ;;  %4763 = vrot.lane.b32.xlu0 %v4654_v57, %s9721_s23  ;;  %v9609_v1 = vld [vmem:[%s14169_s2 + $0x1a8] sm:$0xff]  }
 0x2e7   : > { %9439 = vmatpush3.bf16.msra.mxu0 %v9609_v1  ;;  %v4655_v1 = vrot.slane %v11988_v11, 4 }
 0x2e8   : > { %v2628_v7 = vpop.permute.xlu0 %2627  ;;  %v3416_v9 = vpop.permute.xlu1 %3415  ;;  %v3749_v18 = vld [vmem:[#allocation4 + $0x84] sm:$0xff]  ;;  %9440 = vmatprep.subr.bf16.mxu0 %v14266_v34 }
 0x2e9   : > { %2654 = vst.msk [vmem:[#allocation4 + $0x90] sm:$0x3] %vm704_vm15, %v2628_v7 }
 0x2ea   : > { %4092 = vmatmul.mubr.bf16.gmra.mxu1 %v8691_v55  ;;  %3442 = vst.msk [vmem:[#allocation4 + $0x94] sm:$0x3] %vm896_vm5, %v3416_v9  ;;  %v9610_v55 = vld [vmem:[%s14169_s2 + $0x1a0] sm:$0xff]  }
 0x2eb   : > { %9441 = vmatpush3.bf16.msra.mxu0 %v9610_v55 }
 0x2ec   : > { %v2815_v54 = vpop.permute.xlu0 %2814  ;;  %v3532_v61 = vpop.permute.xlu1 %3531  ;;  %9470 = vmatprep.subr.bf16.mxu0 %v14266_v34 }
 0x2ed   : > { %v3747_v20 = vld [vmem:[#allocation4 + $0x78] sm:$0xff]  ;;  %2841 = vst.msk [vmem:[#allocation4 + $0x90] sm:$0x3] %vm896_vm5, %v2815_v54 }
 0x2ee   : > { %v8695_v59 = vcombine.high %v3747_v20, %v3749_v18  ;;  %3558 = vst.msk [vmem:[#allocation4 + $0x94] sm:$0x3] %vm1085_vm6, %v3532_v61  ;;  %v8694_v42 = vcombine.low %v3747_v20, %v3749_v18  ;;  %v12007_v61 = vld [vmem:[%s14170_s3 + $0x1] ss:$0 sm:$0xff] }
 0x2f0   : > { %4099 = vmatprep.mubr.bf16.mxu1 %v8695_v59  ;;  %v3002_v35 = vpop.permute.xlu0 %3001 }
 0x2f1   : > { %3028 = vst.msk [vmem:[#allocation4 + $0x90] sm:$0x3] %vm1085_vm6, %v3002_v35 }
 0x2f2   : > { %4100 = vmatmul.mubr.bf16.gmra.mxu1 %v8694_v42  ;;  %v9085_v42 = vld [vmem:[#allocation2 + $0x8] sm:$0xff]  }
 0x2f5   : > { %v11956_v2 = vpop.f32.mrf.mxu0 }
 0x2f7   : > { %v9412_v63 = vpop.f32.mrf.mxu0 }
 0x2f8   : > { %v3751_v44 = vld [vmem:[#allocation4 + $0x90] sm:$0x33] }
 0x2f9   : > { %v8698_v49 = vcombine.high %v3751_v44, %v3751_v44  ;;  %v8697_v10 = vcombine.low %v3751_v44, %v3751_v44  ;;  %v11958_v22 = vpop.f32.mrf.mxu0 }
 0x2fb   : > { %4107 = vmatprep.mubr.bf16.mxu1 %v8698_v49  ;;  %v9413_v25 = vpop.f32.mrf.mxu0  ;;  %v9039_v49 = vunpack.c.l.bf16 %v9085_v42 }
 0x2fc   : > { %4108 = vmatmul.mubr.bf16.gmra.mxu1 %v8697_v10 }
 0x2fd   : > { %v11960_v60 = vpop.f32.mrf.mxu0 }
 0x2ff   : > { %v9416_v12 = vpop.f32.mrf.mxu0 }
 0x301   : > { %v11962_v15 = vpop.f32.mrf.mxu0 }
 0x303   : > { %v9417_v5 = vpop.f32.mrf.mxu0 }
 0x305   : > { %v11964_v24 = vpop.f32.mrf.mxu0 }
 0x307   : > { %v9420_v28 = vpop.f32.mrf.mxu0 }
 0x309   : > { %v11966_v53 = vpop.f32.mrf.mxu0 }
 0x30b   : > { %v9421_v4 = vpop.f32.mrf.mxu0 }
 0x30c   : > { %v9040_v4 = vunpack.c.h.bf16 %v9085_v42 }
 0x30d   : > { %v11968_v36 = vpop.f32.mrf.mxu0 }
 0x30f   : > { %v9424_v13 = vpop.f32.mrf.mxu0 }
 0x311   : > { %v11972_v29 = vpop.f32.mrf.mxu0 }
 0x313   : > { %v9425_v40 = vpop.f32.mrf.mxu0 }
 0x315   : > { %v11980_v39 = vpop.f32.mrf.mxu0 }
 0x317   : > { %v9428_v6 = vpop.f32.mrf.mxu0 }
 0x319   : > { %v11982_v43 = vpop.f32.mrf.mxu0 }
 0x31b   : > { %v9429_v50 = vpop.f32.mrf.mxu0 }
 0x31c   : > { %v4815_v50 = vld [vmem:[#allocation2 + $0x4] sm:$0x8] }
 0x31d   : > { %v11984_v46 = vpop.f32.mrf.mxu0  ;;  %v4830_v3 = vshrl.u32 %v4815_v50, 16 }
 0x31f   : > { %v9432_v14 = vpop.f32.mrf.mxu0 }
 0x321   : > { %v11986_v41 = vpop.f32.mrf.mxu0 }
 0x323   : > { %v9433_v26 = vpop.f32.mrf.mxu0 }
 0x32f   : > { %v12002_v7 = vpop.f32.mrf.mxu0 }
 0x331   : > { %v9436_v9 = vpop.f32.mrf.mxu0 }
 0x332   : > { %v8740_v9 = vrot.slane %v4830_v3, 11 }
 0x333   : > { %v4200_v18 = vpop.f32.mrf.mxu0 }
 0x335   : > { %v9437_v20 = vpop.f32.mrf.mxu0 }
 0x37d   : > { %v9180_v54 = vpop.f32.mrf.mxu1 }
 0x37f   : > { %v9181_v59 = vpop.f32.mrf.mxu1 }
 0x380   : > { %v9182_v35 = vadd.f32 %v9181_v59, %v9180_v54 }
 0x381   : > { %v9183_v44 = vpop.f32.mrf.mxu1 }
 0x382   : > { %v4062_v63 = vadd.f32 %v9182_v35, %v12007_v61 }
 0x383   : > { %v9184_v10 = vpop.f32.mrf.mxu1 }
 0x384   : > { %v4150_v25 = vadd.f32 %v11956_v2, %v4062_v63  ;;  %v9185_v12 = vadd.f32 %v9184_v10, %v9183_v44  ;;  %v12016_v2 = vld [vmem:[#allocation2 + $0x10] sm:$0xff]  }
 0x385   : > { %v9043_v0 = vunpack.c.l.bf16 %v12016_v2  ;;  %v9044_v57 = vunpack.c.h.bf16 %v12016_v2 }
 0x386   : > { %v4229_v5 = vadd.f32 %v9039_v49, %v4150_v25  ;;  %v4065_v28 = vadd.f32 %v9185_v12, %v12007_v61 }
 0x388   : > { %v4242_v13 = vmax.f32 %v4229_v5, 0.0  ;;  %v4153_v19 = vadd.f32 %v11958_v22, %v4065_v28  ;;  %v12021_v22 = vld [vmem:[#allocation2 + $0x18] sm:$0xff]   ;;  %v12037_v5 = vld [vmem:[#allocation2 + $0x28] sm:$0xff]  }
 0x389   : > { %v9047_v44 = vunpack.c.l.bf16 %v12021_v22  ;;  %v9048_v63 = vunpack.c.h.bf16 %v12021_v22 }
 0x38a   : > { %v4255_v45 = vmul.f32 %v4242_v13, %v10981_v8  ;;  %v4230_v40 = vadd.f32 %v9040_v4, %v4153_v19 }
 0x38c   : > { %v8985_v52 = vpack.c.bf16 %v4255_v45, %v4255_v45  ;;  %v4243_v6 = vmax.f32 %v4230_v40, 0.0 }
 0x38e   : > { %4321 = vst.msk [vmem:[#allocation2 + $0x8] sm:$0xf] %vm290_vm0, %v8985_v52  ;;  %v4256_v14 = vmul.f32 %v4243_v6, %v10989_v56 }
 0x390   : > { %v8986_v21 = vpack.c.bf16 %v4256_v14, %v4256_v14 }
 0x392   : > { %v9186_v51 = vpop.f32.mrf.mxu1  ;;  %4322 = vst.msk [vmem:[#allocation2 + $0xc] sm:$0xf] %vm290_vm0, %v8986_v21 }
 0x394   : > { %v9187_v26 = vpop.f32.mrf.mxu1 }
 0x395   : > { %v9188_v55 = vadd.f32 %v9187_v26, %v9186_v51  ;;  %v4510_v59 = vld [vmem:[#allocation2 + $0x8] sm:$0xf] }
 0x396   : > { %v9189_v54 = vpop.f32.mrf.mxu1  ;;  %v4816_v42 = vld [vmem:[#allocation2 + $0x8] sm:$0xf]  ;;  %v4541_v49 = vrot.slane %v4510_v59, 7  ;;  %v9055_v59 = vunpack.c.l.bf16 %v12037_v5 }
 0x397   : > { %v4630_v35 = vld [vmem:[#allocation2 + $0x8] sm:$0xf]  ;;  %v4070_v11 = vadd.f32 %v9188_v55, %v12007_v61  ;;  %v4835_v10 = vshrl.u32 %v4816_v42, 16  ;;  %v4838_v25 = vshll.u32 %v4816_v42, 16  ;;  %v9056_v42 = vunpack.c.h.bf16 %v12037_v5 }
 0x398   : > { %v5028_v12 = vld [vmem:[#allocation2 + $0x8] sm:$0xf]  ;;  %v9190_v28 = vpop.f32.mrf.mxu1  ;;  %v4657_v4 = vshrl.u32 %v4630_v35, 16  ;;  %v4660_v13 = vshll.u32 %v4630_v35, 16  ;;  %v4542_v52 = vsel %vm9813_vm7, %v4540_v48, %v4541_v49  ;;  %v4543_v26 = vrot.slane %v4541_v49, 4  ;;  %v9617_v49 = vld [vmem:[%s14169_s2 + $0x198] sm:$0xff]  }
 0x399   : > { %v5042_v19 = vshrl.u32 %v5028_v12, 16  ;;  %v5045_v45 = vshll.u32 %v5028_v12, 16  ;;  %v4158_v40 = vadd.f32 %v11960_v60, %v4070_v11  ;;  %v9191_v6 = vadd.f32 %v9190_v28, %v9189_v54  ;;  %v5002_v14 = vld [vmem:[#allocation2 + $0x8] sm:$0xf]  ;;  %4578 = vrot.lane.b32.xlu1 %v4542_v52, %s9719_s7  ;;  %v4511_v51 = vld [vmem:[#allocation2 + $0xc] sm:$0xf]  ;;  %9231 = vmatprep.subr.bf16.mxu1 %v9617_v49 }
 0x39a   : > { %v4837_v50 = vrot.slane %v4835_v10, 7  ;;  %v9192_v21 = vpop.f32.mrf.mxu1  ;;  %v12043_v3 = vrot.slane %v4657_v4, 7  ;;  %v4817_v55 = vld [vmem:[#allocation2 + $0xc] sm:$0xf]  ;;  %5015 = vst.msk [vmem:[#allocation4 + $0x4] sm:$0xf] %vm290_vm0, %v5002_v14 }
 0x39b   : > { %v4231_v60 = vadd.f32 %v9043_v0, %v4158_v40  ;;  %v4073_v48 = vadd.f32 %v9191_v6, %v12007_v61  ;;  %v4544_v35 = vrot.slane %v4511_v51, 7  ;;  %v4844_v28 = vshrl.u32 %v4817_v55, 16  ;;  %v5029_v6 = vld [vmem:[#allocation2 + $0xc] sm:$0xf] }
 0x39c   : > { %v4840_v54 = vor.u32 %v4838_v25, %v4837_v50  ;;  %v4662_v11 = vor.u32 %v4660_v13, %v12043_v3  ;;  %v9193_v10 = vpop.f32.mrf.mxu1  ;;  %v4842_v12 = vrot.slane %v4837_v50, 4  ;;  %v4847_v4 = vshll.u32 %v4817_v55, 16  ;;  %v12056_v25 = vld [vmem:[#allocation2 + $0xc] sm:$0xe]  ;;  %v9618_v13 = vld [vmem:[%s14169_s2 + $0x158] sm:$0xff]  }
 0x39d   : > { %v4244_v52 = vmax.f32 %v4231_v60, 0.0  ;;  %v4161_v20 = vadd.f32 %v11962_v15, %v4073_v48  ;;  %v9194_v40 = vadd.f32 %v9193_v10, %v9192_v21  ;;  %v4545_v15 = vsel %vm9813_vm7, %v4543_v26, %v4544_v35  ;;  %v5003_v21 = vld [vmem:[#allocation2 + $0xc] sm:$0xf]  ;;  %9232 = vmatpush3.bf16.msra.mxu1 %v9618_v13 }
 0x39e   : > { %v4841_v0 = vsel %vm9868_vm11, %v8740_v9, %v4840_v54  ;;  %v4663_v50 = vsel %vm9868_vm11, %v4655_v1, %v4662_v11  ;;  %v9195_v14 = vpop.f32.mrf.mxu1  ;;  %v12066_v51 = vrot.slane %v4844_v28, 7  ;;  %v5044_v9 = vrot.slane %v5042_v19, 4  ;;  %5016 = vst.msk [vmem:[#allocation4 + $0x10] sm:$0xf] %vm290_vm0, %v5003_v21  ;;  %v4631_v28 = vld [vmem:[#allocation2 + $0xc] sm:$0xf] }
 0x39f   : > { %4950 = vrot.lane.b32.xlu0 %v4841_v0, %s9720_s10  ;;  %v4257_v55 = vmul.f32 %v4244_v52, %v10995_v33  ;;  %v4232_v60 = vadd.f32 %v9044_v57, %v4161_v20  ;;  %4765 = vrot.lane.b32.xlu1 %v4663_v50, %s9721_s23  ;;  %v4078_v48 = vadd.f32 %v9194_v40, %v12007_v61  ;;  %v5047_v54 = vrot.slane %v5045_v45, 5  ;;  %v12079_v52 = vld [vmem:[#allocation2 + $0xc] sm:$0xf] }
 0x3a0   : > { %v4849_v1 = vor.u32 %v4847_v4, %v12066_v51  ;;  %v9196_v26 = vpop.f32.mrf.mxu1  ;;  %v5051_v11 = vshll.u32 %v5029_v6, 16  ;;  %v8741_v19 = vrot.slane %v12056_v25, 9  ;;  %v12076_v10 = vrot.slane %v4544_v35, 4 }
 0x3a1   : > { %v8987_v49 = vpack.c.bf16 %v4257_v55, %v4257_v55  ;;  %v4245_v2 = vmax.f32 %v4232_v60, 0.0  ;;  %v4166_v57 = vadd.f32 %v11964_v24, %v4078_v48  ;;  %v9197_v20 = vadd.f32 %v9196_v26, %v9195_v14  ;;  %v9620_v60 = vld [vmem:[%s14169_s2 + $0x150] sm:$0xff]  }
 0x3a2   : > { %v4850_v45 = vsel %vm9868_vm11, %v4842_v12, %v4849_v1  ;;  %v9198_v4 = vpop.f32.mrf.mxu1  ;;  %v5048_v0 = vor.u32 %v5047_v54, %v5044_v9  ;;  %v5053_v40 = vrot.slane %v5051_v11, 5  ;;  %v4664_v13 = vrot.slane %v12043_v3, 4  ;;  %v9619_v3 = vld [vmem:[%s14169_s2 + $0x190] sm:$0xff]  }
 0x3a3   : > { %4580 = vrot.lane.b32.xlu0 %v4545_v15, %s9719_s7  ;;  %4323 = vst.msk [vmem:[#allocation2 + $0x10] sm:$0xf] %vm290_vm0, %v8987_v49  ;;  %v4258_v35 = vmul.f32 %v4245_v2, %v10983_v31  ;;  %v4233_v24 = vadd.f32 %v9047_v44, %v4166_v57  ;;  %4952 = vrot.lane.b32.xlu1 %v4850_v45, %s9720_s10  ;;  %v4666_v14 = vshrl.u32 %v4631_v28, 16  ;;  %v4669_v12 = vshll.u32 %v4631_v28, 16  ;;  %v14283_v2 = vld [vmem:[#allocation13_spill] sm:$0xff]  ;;  %v12111_v45 = vld [vmem:[#allocation2 + $0x30] sm:$0xff]  }
 0x3a4   : > { %v4081_v50 = vadd.f32 %v9197_v20, %v12007_v61  ;;  %v5049_v15 = vrot.slane %v5048_v0, 4  ;;  %v9199_v21 = vpop.f32.mrf.mxu1  ;;  %v5055_v55 = vshrl.u32 %v5029_v6, 16  ;;  %v5236_v9 = vshrl.u32 %v12079_v52, 16  ;;  %9233 = vmatprep.subr.bf16.mxu1 %v9619_v3  ;;  %v12114_v0 = vld [vmem:[#allocation2 + $0x38] sm:$0x3] }
 0x3a5   : > { %v8988_v44 = vpack.c.bf16 %v4258_v35, %v4258_v35  ;;  %v4246_v48 = vmax.f32 %v4233_v24, 0.0  ;;  %v9200_v1 = vadd.f32 %v9199_v21, %v9198_v4  ;;  %v12101_v6 = vrot.slane %v4666_v14, 7  ;;  %9234 = vmatpush3.bf16.msra.mxu1 %v9620_v60 }
 0x3a6   : > { %v4169_v54 = vadd.f32 %v11966_v53, %v4081_v50  ;;  %v5054_v26 = vsel %vm9911_vm13, %v5049_v15, %v5053_v40  ;;  %v9201_v11 = vpop.f32.mrf.mxu1  ;;  %v5057_v28 = vrot.slane %v5055_v55, 4  ;;  %v12103_v49 = vrot.slane %v5236_v9, 4 }
 0x3a7   : > { %4324 = vst.msk [vmem:[#allocation2 + $0x14] sm:$0xf] %vm290_vm0, %v8988_v44  ;;  %v4259_v57 = vmul.f32 %v4246_v48, %v14283_v2  ;;  %5170 = vrot.lane.b32.xlu0 %v5054_v26, %s9719_s7  ;;  %v4086_v53 = vadd.f32 %v9200_v1, %v12007_v61  ;;  %v5239_v4 = vshll.u32 %v12079_v52, 16  ;;  %v4671_v24 = vor.u32 %v4669_v12, %v12101_v6 }
 0x3a8   : > { %v4234_v20 = vadd.f32 %v9048_v63, %v4169_v54  ;;  %v9202_v35 = vpop.f32.mrf.mxu1  ;;  %v5058_v50 = vor.u32 %v5057_v28, %v5053_v40  ;;  %v4851_v14 = vrot.slane %v12066_v51, 4  ;;  %v4673_v22 = vrot.slane %v12101_v6, 4  ;;  %v9621_v63 = vld [vmem:[%s14169_s2 + $0x188] sm:$0xff]  }
 0x3a9   : > { %v8989_v15 = vpack.c.bf16 %v4259_v57, %v4259_v57  ;;  %v4174_v55 = vadd.f32 %v11968_v36, %v4086_v53  ;;  %v9203_v52 = vadd.f32 %v9202_v35, %v9201_v11  ;;  %v4672_v40 = vsel %vm9868_vm11, %v4664_v13, %v4671_v24  ;;  %9235 = vmatprep.subr.bf16.mxu1 %v9621_v63  ;;  %v14284_v36 = vld [vmem:[#allocation9_spill] sm:$0xff] }
 0x3aa   : > { %v4247_v21 = vmax.f32 %v4234_v20, 0.0  ;;  %v9204_v9 = vpop.f32.mrf.mxu1  ;;  %v5417_v3 = vld [vmem:[#allocation2 + $0x10] sm:$0xf]  ;;  %v9059_v44 = vunpack.c.l.bf16 %v12111_v45  ;;  %v9060_v48 = vunpack.c.h.bf16 %v12111_v45  ;;  %v5059_v20 = vrot.slane %v5058_v50, 4 }
 0x3ab   : > { %v12123_v60 = vld [vmem:[#allocation2 + $0x10] sm:$0xf]  ;;  %4325 = vst.msk [vmem:[#allocation2 + $0x18] sm:$0xf] %vm290_vm0, %v8989_v15  ;;  %v4235_v26 = vadd.f32 %v9051_v16, %v4174_v55  ;;  %v4089_v11 = vadd.f32 %v9203_v52, %v12007_v61  ;;  %v5444_v28 = vrot.slane %v5417_v3, 5  ;;  %v5241_v24 = vrot.slane %v5239_v4, 5 }
 0x3ac   : > { %v12127_v12 = vld [vmem:[#allocation2 + $0x10] sm:$0xf]  ;;  %v4260_v1 = vmul.f32 %v4247_v21, %v14284_v36  ;;  %v9205_v13 = vpop.f32.mrf.mxu1  ;;  %v4547_v57 = vrot.slane %v12123_v60, 7  ;;  %v9622_v16 = vld [vmem:[%s14169_s2 + $0x148] sm:$0xff]  }
 0x3ad   : > { %v5061_v53 = vshll.u32 %v12127_v12, 16  ;;  %v12139_v35 = vld [vmem:[#allocation2 + $0x10] sm:$0xf]  ;;  %v4248_v54 = vmax.f32 %v4235_v26, 0.0  ;;  %v4177_v15 = vadd.f32 %v11972_v29, %v4089_v11  ;;  %v9206_v21 = vadd.f32 %v9205_v13, %v9204_v9  ;;  %v14285_v9 = vld [vmem:[#allocation20_spill] sm:$0xff]  ;;  %9236 = vmatpush3.bf16.msra.mxu1 %v9622_v16 }
 0x3ae   : > { %v8990_v63 = vpack.c.bf16 %v4260_v1, %v4260_v1  ;;  %v9207_v55 = vpop.f32.mrf.mxu1  ;;  %v5445_v50 = vsel %vm9829_vm9, %v8741_v19, %v5444_v28  ;;  %v4548_v52 = vsel %vm9813_vm7, %v12076_v10, %v4547_v57  ;;  %v5242_v3 = vor.u32 %v5241_v24, %v12103_v49  ;;  %v12155_v29 = vld [vmem:[#allocation2 + $0x14] sm:$0xf]  ;;  %v4818_v10 = vld [vmem:[#allocation2 + $0x10] sm:$0xf] }
 0x3af   : > { %v12152_v4 = vrot.slane %v5061_v53, 5  ;;  %v4261_v60 = vmul.f32 %v4248_v54, %v14285_v9  ;;  %v4236_v25 = vadd.f32 %v9052_v62, %v4177_v15  ;;  %v4094_v1 = vadd.f32 %v9206_v21, %v12007_v61  ;;  %5480 = vrot.lane.b32.xlu0 %v5445_v50, %s9720_s10  ;;  %4582 = vrot.lane.b32.xlu1 %v4548_v52, %s9719_s7  ;;  %v4632_v27 = vld [vmem:[#allocation2 + $0x10] sm:$0xf]  ;;  %v9623_v62 = vld [vmem:[%s14169_s2 + $0x180] sm:$0xff]   ;;  %v5534_v6 = vld [vmem:[#allocation2 + $0x14] sm:$0xf] }
 0x3b0   : > { %4326 = vst.msk [vmem:[#allocation2 + $0x1c] sm:$0xf] %vm290_vm0, %v8990_v63  ;;  %v5245_v19 = vshll.u32 %v12139_v35, 16  ;;  %v9208_v26 = vpop.f32.mrf.mxu1  ;;  %v5243_v11 = vrot.slane %v5242_v3, 4  ;;  %v5446_v13 = vrot.slane %v5444_v28, 4  ;;  %v14211_v54 = vrot.slane %v12155_v29, 5  ;;  %9237 = vmatprep.subr.bf16.mxu1 %v9623_v62 }
 0x3b1   : > { %v5064_v49 = vsel %vm9911_vm13, %v5059_v20, %v12152_v4  ;;  %v8991_v53 = vpack.c.bf16 %v4261_v60, %v4261_v60  ;;  %v4249_v24 = vmax.f32 %v4236_v25, 0.0  ;;  %v4182_v63 = vadd.f32 %v11980_v39, %v4094_v1  ;;  %v9624_v21 = vld [vmem:[%s14169_s2 + $0x140] sm:$0xff]   ;;  %v14286_v3 = vld [vmem:[#allocation11_spill] sm:$0xff] }
 0x3b2   : > { %v9209_v15 = vadd.f32 %v9208_v26, %v9207_v55  ;;  %v9210_v20 = vpop.f32.mrf.mxu1  ;;  %v5247_v50 = vrot.slane %v5245_v19, 5  ;;  %v5448_v28 = vsel %vm9829_vm9, %v5446_v13, %v14211_v54  ;;  %v4853_v16 = vshrl.u32 %v4818_v10, 16  ;;  %v12187_v1 = vld [vmem:[#allocation2 + $0x14] sm:$0xf]  ;;  %9238 = vmatpush3.bf16.msra.mxu1 %v9624_v21 }
 0x3b3   : > { %v4856_v52 = vshll.u32 %v4818_v10, 16  ;;  %4327 = vst.msk [vmem:[#allocation2 + $0x20] sm:$0xf] %vm290_vm0, %v8991_v53  ;;  %v4262_v60 = vmul.f32 %v4249_v24, %v14286_v3  ;;  %v4237_v39 = vadd.f32 %v9055_v59, %v4182_v63  ;;  %4767 = vrot.lane.b32.xlu0 %v4672_v40, %s9721_s23  ;;  %5172 = vrot.lane.b32.xlu1 %v5064_v49, %s9719_s7  ;;  %v4675_v25 = vshrl.u32 %v4632_v27, 16  ;;  %v12193_v53 = vld [vmem:[#allocation2 + $0x14] sm:$0xf] }
 0x3b4   : > { %v4097_v55 = vadd.f32 %v9209_v15, %v12007_v61  ;;  %v9211_v19 = vpop.f32.mrf.mxu1  ;;  %v5248_v10 = vsel %vm9911_vm13, %v5243_v11, %v5247_v50  ;;  %v12191_v26 = vrot.slane %v4853_v16, 7  ;;  %v4678_v13 = vshll.u32 %v4632_v27, 16  ;;  %v4819_v45 = vld [vmem:[#allocation2 + $0x14] sm:$0xf] }
 0x3b5   : > { %v4549_v62 = vrot.slane %v4547_v57, 4  ;;  %v8992_v59 = vpack.c.bf16 %v4262_v60, %v4262_v60  ;;  %v4250_v24 = vmax.f32 %v4237_v39, 0.0  ;;  %v9212_v63 = vadd.f32 %v9211_v19, %v9210_v20  ;;  %v14287_v57 = vld [vmem:[#allocation23_spill] sm:$0xff]  ;;  %v5532_v20 = vld [vmem:[#allocation2 + $0xc] sm:$0xe] }
 0x3b6   : > { %v4185_v40 = vadd.f32 %v11982_v43, %v4097_v55  ;;  %v9213_v49 = vpop.f32.mrf.mxu1  ;;  %v4858_v15 = vor.u32 %v4856_v52, %v12191_v26  ;;  %v12197_v54 = vrot.slane %v4675_v25, 7  ;;  %v4550_v18 = vrot.slane %v12187_v1, 7  ;;  %v5533_v19 = vld [vmem:[#allocation2 + $0x10] sm:$0xf] }
 0x3b7   : > { %v5249_v11 = vshrl.u32 %v12139_v35, 16  ;;  %4328 = vst.msk [vmem:[#allocation2 + $0x24] sm:$0xf] %vm290_vm0, %v8992_v59  ;;  %v4263_v27 = vmul.f32 %v4250_v24, %v14287_v57  ;;  %v4102_v16 = vadd.f32 %v9212_v63, %v12007_v61  ;;  %5364 = vrot.lane.b32.xlu0 %v5248_v10, %s9721_s23  ;;  %5482 = vrot.lane.b32.xlu1 %v5448_v28, %s9720_s10  ;;  %v5255_v43 = vshll.u32 %v12193_v53, 16  ;;  %v9625_v28 = vld [vmem:[%s14169_s2 + $0x178] sm:$0xff]  }
 0x3b8   : > { %v4238_v21 = vadd.f32 %v9056_v42, %v4185_v40  ;;  %v9214_v52 = vpop.f32.mrf.mxu1  ;;  %v4859_v35 = vsel %vm9868_vm11, %v4851_v14, %v4858_v15  ;;  %v4680_v60 = vor.u32 %v4678_v13, %v12197_v54  ;;  %v4551_v5 = vsel %vm9813_vm7, %v4549_v62, %v4550_v18  ;;  %v9626_v14 = vld [vmem:[%s14169_s2 + $0x138] sm:$0xff]   ;;  %9239 = vmatprep.subr.bf16.mxu1 %v9625_v28 }
 0x3b9   : > { %v5251_v42 = vrot.slane %v5249_v11, 4  ;;  %v8993_v39 = vpack.c.bf16 %v4263_v27, %v4263_v27  ;;  %v4190_v25 = vadd.f32 %v11984_v46, %v4102_v16  ;;  %v9215_v51 = vadd.f32 %v9214_v52, %v9213_v49  ;;  %9240 = vmatpush3.bf16.msra.mxu1 %v9626_v14 }
 0x3ba   : > { %v4251_v55 = vmax.f32 %v4238_v21, 0.0  ;;  %v4681_v10 = vsel %vm9868_vm11, %v4673_v22, %v4680_v60  ;;  %v12229_v62 = vrot.slane %v5255_v43, 5  ;;  %v5546_v59 = vshrl.u32 %v5532_v20, 16 }
 0x3bb   : > { %v5252_v13 = vor.u32 %v5251_v42, %v5247_v50  ;;  %4329 = vst.msk [vmem:[#allocation2 + $0x28] sm:$0xf] %vm290_vm0, %v8993_v39  ;;  %v4239_v24 = vadd.f32 %v9059_v44, %v4190_v25  ;;  %v4105_v40 = vadd.f32 %v9215_v51, %v12007_v61  ;;  %4954 = vrot.lane.b32.xlu0 %v4859_v35, %s9720_s10  ;;  %v5549_v22 = vshll.u32 %v5532_v20, 16  ;;  %v9627_v20 = vld [vmem:[%s14169_s2 + $0x170] sm:$0xff]   ;;  %v14288_v42 = vld [vmem:[#allocation24_spill] sm:$0xff] }
 0x3bc   : > { %v4264_v46 = vmul.f32 %v4251_v55, %v11002_v23  ;;  %4769 = vrot.lane.b32.xlu1 %v4681_v10, %s9721_s23  ;;  %v5548_v63 = vrot.slane %v5546_v59, 5  ;;  %v5555_v49 = vshrl.u32 %v5533_v19, 16  ;;  %v5558_v15 = vshll.u32 %v5533_v19, 16  ;;  %v9216_v16 = vpop.f32.mrf.mxu1  ;;  %v12251_v51 = vld [vmem:[#allocation2 + $0x14] sm:$0xf]  ;;  %9241 = vmatprep.subr.bf16.mxu1 %v9627_v20 }
 0x3bd   : > { %v5253_v50 = vrot.slane %v5252_v13, 4  ;;  %v4252_v27 = vmax.f32 %v4239_v24, 0.0  ;;  %v4193_v21 = vadd.f32 %v11986_v41, %v4105_v40  ;;  %v5551_v43 = vrot.slane %v5549_v22, 6  ;;  %v9628_v19 = vld [vmem:[%s14169_s2 + $0x130] sm:$0xff]  }
 0x3be   : > { %v8994_v11 = vpack.c.bf16 %v4264_v46, %v4264_v46  ;;  %v5557_v52 = vrot.slane %v5555_v49, 5  ;;  %v5560_v35 = vrot.slane %v5558_v15, 6  ;;  %v5565_v60 = vshrl.u32 %v5534_v6, 16  ;;  %v9217_v39 = vpop.f32.mrf.mxu1  ;;  %9242 = vmatpush3.bf16.msra.mxu1 %v9628_v19 }
 0x3bf   : > { %v5258_v44 = vsel %vm9911_vm13, %v5253_v50, %v12229_v62  ;;  %v4265_v28 = vmul.f32 %v4252_v27, %v14288_v42  ;;  %v4240_v41 = vadd.f32 %v9060_v48, %v4193_v21  ;;  %4584 = vrot.lane.b32.xlu0 %v4551_v5, %s9719_s7  ;;  %v5552_v55 = vor.u32 %v5551_v43, %v5548_v63 }
 0x3c0   : > { %4330 = vst.msk [vmem:[#allocation2 + $0x2c] sm:$0xf] %vm290_vm0, %v8994_v11  ;;  %5366 = vrot.lane.b32.xlu1 %v5258_v44, %s9721_s23  ;;  %v5568_v25 = vshll.u32 %v5534_v6, 16  ;;  %v9218_v14 = vadd.f32 %v9217_v39, %v9216_v16  ;;  %v5561_v10 = vor.u32 %v5560_v35, %v5557_v52  ;;  %v5567_v13 = vrot.slane %v5565_v60, 5  ;;  %v9219_v40 = vpop.f32.mrf.mxu1  ;;  %v9629_v6 = vld [vmem:[%s14169_s2 + $0x168] sm:$0xff]  }
 0x3c1   : > { %v5065_v59 = vshrl.u32 %v12127_v12, 16  ;;  %v8995_v48 = vpack.c.bf16 %v4265_v28, %v4265_v28  ;;  %v4253_v5 = vmax.f32 %v4240_v41, 0.0  ;;  %v5553_v46 = vrot.slane %v5552_v55, 4  ;;  %v14290_v12 = vld [vmem:[#allocation14_spill] sm:$0xff]  ;;  %v12271_v52 = vld [vmem:[#allocation2 + $0x18] sm:$0xf]  ;;  %9243 = vmatprep.subr.bf16.mxu1 %v9629_v6 }
 0x3c2   : > { %v5570_v24 = vrot.slane %v5568_v25, 6  ;;  %v5563_v22 = vrot.slane %v5561_v10, 4  ;;  %v5071_v63 = vshll.u32 %v12251_v51, 16  ;;  %v14289_v49 = vshrl.u32 %v12018_v32, 16  ;;  %v9220_v44 = vpop.f32.mrf.mxu1  ;;  %v9630_v35 = vld [vmem:[%s14169_s2 + $0x128] sm:$0xff]  }
 0x3c3   : > { %v5067_v50 = vrot.slane %v5065_v59, 4  ;;  %4331 = vst.msk [vmem:[#allocation2 + $0x30] sm:$0xf] %vm290_vm0, %v8995_v48  ;;  %v4266_v11 = vmul.f32 %v4253_v5, %v14290_v12  ;;  %v5562_v21 = vsel %vm10661_vm12, %v5553_v46, %v5561_v10  ;;  %v4862_v43 = vshrl.u32 %v4819_v45, 16  ;;  %v12282_v39 = vld [vmem:[#allocation2 + $0x18] sm:$0xf]  ;;  %9244 = vmatpush3.bf16.msra.mxu1 %v9630_v35 }
 0x3c4   : > { %v12263_v15 = vrot.slane %v14289_v49, 6  ;;  %v12269_v16 = vor.u32 %v5570_v24, %v5567_v13  ;;  %5687 = vst.msk [vmem:[#allocation4 + $0x8] sm:$0xf] %vm290_vm0, %v5562_v21  ;;  %v12278_v20 = vrot.slane %v5071_v63, 5  ;;  %v4860_v28 = vrot.slane %v12191_v26, 4  ;;  %v9631_v5 = vld [vmem:[%s14169_s2 + $0x160] sm:$0xff]  }
 0x3c5   : > { %v5068_v60 = vor.u32 %v5067_v50, %v12152_v4  ;;  %v4110_v41 = vadd.f32 %v9218_v14, %v12007_v61  ;;  %v5535_v55 = vld [vmem:[#allocation2 + $0x18] sm:$0xf]  ;;  %v8996_v25 = vpack.c.bf16 %v4266_v11, %v4266_v11  ;;  %v12287_v10 = vrot.slane %v4862_v43, 7  ;;  %v5536_v48 = vld [vmem:[#allocation2 + $0x1c] sm:$0xf]  ;;  %9245 = vmatprep.subr.bf16.mxu1 %v9631_v5 }
 0x3c6   : > { %v5572_v19 = vsel %vm10661_vm12, %v5563_v22, %v12269_v16  ;;  %v4865_v13 = vshll.u32 %v4819_v45, 16  ;;  %v14292_v26 = vrot.slane %v12155_v29, 5  ;;  %v5450_v14 = vrot.slane %v12271_v52, 5  ;;  %v9632_v29 = vld [vmem:[%s14169_s2 + $0x120] sm:$0xff]   ;;  %v4633_v49 = vld [vmem:[#allocation2 + $0x14] sm:$0xf] }
 0x3c7   : > { %5688 = vst.msk [vmem:[#allocation4 + $0x14] sm:$0xf] %vm290_vm0, %v5572_v19  ;;  %v5069_v4 = vrot.slane %v5068_v60, 4  ;;  %v4198_v59 = vadd.f32 %v12002_v7, %v4110_v41  ;;  %4332 = vst.msk [vmem:[#allocation2 + $0x34] sm:$0xf] %vm290_vm0, %v8996_v25  ;;  %v4552_v46 = vrot.slane %v4550_v18, 4  ;;  %v14293_v6 = vunpack.c.l.bf16 %v12114_v0  ;;  %9246 = vmatpush3.bf16.msra.mxu1 %v9632_v29 }
 0x3c8   : > { %v5449_v61 = vrot.slane %v14292_v26, 4  ;;  %v4867_v45 = vor.u32 %v4865_v13, %v12287_v10  ;;  %v4553_v24 = vrot.slane %v12282_v39, 7  ;;  %v5575_v7 = vshrl.u32 %v5535_v55, 16  ;;  %v12318_v43 = vld [vmem:[#allocation2 + $0x18] sm:$0xf]  ;;  %v14294_v25 = vld [vmem:[#allocation25_spill] sm:$0xff] }
 0x3c9   : > { %v5074_v40 = vsel %vm9911_vm13, %v5069_v4, %v12278_v20  ;;  %v4241_v22 = vadd.f32 %v14293_v6, %v4198_v59  ;;  %v5573_v50 = vrot.slane %v12269_v16, 4  ;;  %v5578_v63 = vshll.u32 %v5535_v55, 16  ;;  %v12325_v26 = vld [vmem:[#allocation2 + $0x18] sm:$0xf]  ;;  %v12339_v6 = vld [vmem:[#allocation2 + $0x1c] sm:$0xf] }
 0x3ca   : > { %5174 = vrot.lane.b32.xlu0 %v5074_v40, %s9719_s7  ;;  %v4868_v18 = vsel %vm9868_vm11, %v4860_v28, %v4867_v45  ;;  %v5451_v1 = vsel %vm9829_vm9, %v5449_v61, %v5450_v14  ;;  %v5577_v11 = vrot.slane %v5575_v7, 5  ;;  %v5585_v21 = vshrl.u32 %v5536_v48, 16  ;;  %v12327_v61 = vld [vmem:[#allocation2] sm:$0xc] }
 0x3cb   : > { %4956 = vrot.lane.b32.xlu1 %v4868_v18, %s9720_s10  ;;  %v4254_v0 = vmax.f32 %v4241_v22, 0.0  ;;  %v5580_v16 = vrot.slane %v5578_v63, 6  ;;  %v5588_v44 = vshll.u32 %v5536_v48, 16  ;;  %v4682_v35 = vrot.slane %v12197_v54, 4  ;;  %v5537_v18 = vld [vmem:[#allocation2 + $0x20] sm:$0xf] }
 0x3cc   : > { %v5587_v60 = vrot.slane %v5585_v21, 5  ;;  %v4684_v41 = vshrl.u32 %v4633_v49, 16  ;;  %v4687_v28 = vshll.u32 %v4633_v49, 16  ;;  %v5075_v55 = vshrl.u32 %v12251_v51, 16 }
 0x3cd   : > { %v4267_v19 = vmul.f32 %v4254_v0, %v14294_v25  ;;  %v5581_v13 = vor.u32 %v5580_v16, %v5577_v11  ;;  %v5590_v4 = vrot.slane %v5588_v44, 6  ;;  %v5081_v59 = vshll.u32 %v12318_v43, 16  ;;  %v5538_v11 = vld [vmem:[#allocation2 + $0x24] sm:$0xf] }
 0x3ce   : > { %v9611_v5 = vld [vmem:[#allocation4 + $0x8] ss:$12 sps:$4 sm:$0xff]   ;;  %5484 = vrot.lane.b32.xlu0 %v5451_v1, %s9720_s10  ;;  %v4554_v54 = vsel %vm9813_vm7, %v4552_v46, %v4553_v24  ;;  %v12334_v48 = vrot.slane %v4684_v41, 7  ;;  %v5077_v51 = vrot.slane %v5075_v55, 4  ;;  %v5259_v49 = vshrl.u32 %v12193_v53, 16 }
 0x3cf   : > { %v8997_v45 = vpack.c.bf16 %v4267_v19, %v4267_v19  ;;  %4586 = vrot.lane.b32.xlu1 %v4554_v54, %s9719_s7  ;;  %v5582_v7 = vsel %vm10661_vm12, %v5573_v50, %v5581_v13  ;;  %v5583_v29 = vrot.slane %v5581_v13, 4  ;;  %v5591_v40 = vor.u32 %v5590_v4, %v5587_v60  ;;  %9443 = vmatmul.mubr.msk.bf16.vlgmr.msra.gmra.mxu0 %vm2071_vm14, %v9611_v5  ;;  %v4820_v41 = vld [vmem:[#allocation2 + $0x18] sm:$0xf] }
 0x3d0   : > { %5689 = vst.msk [vmem:[#allocation4 + $0x20] sm:$0xf] %vm290_vm0, %v5582_v7  ;;  %v4689_v22 = vor.u32 %v4687_v28, %v12334_v48  ;;  %v5078_v46 = vor.u32 %v5077_v51, %v12278_v20  ;;  %v12345_v63 = vrot.slane %v5081_v59, 5  ;;  %9446 = vmatprep.mubr.msk.bf16.mxu0 %vm9723_vm8, %v14266_v34  ;;  %v5265_v1 = vshll.u32 %v12325_v26, 16  ;;  %v4634_v5 = vld [vmem:[#allocation2 + $0x18] sm:$0xf] }
 0x3d1   : > { %4333 = vst.msk [vmem:[#allocation2 + $0x38] sm:$0x3] %vm307_vm1, %v8997_v45  ;;  %v5592_v50 = vsel %vm10661_vm12, %v5583_v29, %v5591_v40  ;;  %v4349_v21 = vshrl.u32 %v12327_v61, 16  ;;  %v14295_v20 = vshll.u32 %v12018_v32, 16  ;;  %v5261_v44 = vrot.slane %v5259_v49, 4 }
 0x3d2   : > { %5690 = vst.msk [vmem:[#allocation4 + $0x2c] sm:$0xf] %vm290_vm0, %v5592_v50  ;;  %v4690_v53 = vsel %vm9868_vm11, %v4682_v35, %v4689_v22  ;;  %v5079_v16 = vrot.slane %v5078_v46, 4  ;;  %v5453_v60 = vrot.slane %v12339_v6, 5  ;;  %v12364_v28 = vrot.slane %v5265_v1, 5 }
 0x3d3   : > { %v12357_v0 = vrot.slane %v14295_v20, 7  ;;  %4771 = vrot.lane.b32.xlu0 %v4690_v53, %s9721_s23  ;;  %v5452_v55 = vrot.slane %v5450_v14, 4  ;;  %v5595_v32 = vshrl.u32 %v5537_v18, 16  ;;  %v5598_v19 = vshll.u32 %v5537_v18, 16  ;;  %v12377_v46 = vld [vmem:[#allocation2 + $0x1c] sm:$0xf] }
 0x3d4   : > { %v5084_v13 = vsel %vm9911_vm13, %v5079_v16, %v12345_v63  ;;  %v5262_v35 = vor.u32 %v5261_v44, %v12229_v62  ;;  %v5605_v4 = vshrl.u32 %v5538_v11, 16  ;;  %v5608_v59 = vshll.u32 %v5538_v11, 16  ;;  %v12385_v53 = vld [vmem:[#allocation2 + $0x1c] sm:$0xf]  ;;  %v5539_v16 = vld [vmem:[#allocation2 + $0x28] sm:$0xf] }
 0x3d5   : > { %5176 = vrot.lane.b32.xlu1 %v5084_v13, %s9719_s7  ;;  %v5593_v54 = vrot.slane %v5591_v40, 4  ;;  %v5597_v51 = vrot.slane %v5595_v32, 5  ;;  %v5600_v45 = vrot.slane %v5598_v19, 6  ;;  %v4871_v7 = vshrl.u32 %v4820_v41, 16 }
 0x3d6   : > { %v5263_v29 = vrot.slane %v5262_v35, 4  ;;  %v5454_v52 = vsel %vm9829_vm9, %v5452_v55, %v5453_v60  ;;  %v5607_v14 = vrot.slane %v5605_v4, 5  ;;  %v5610_v22 = vrot.slane %v5608_v59, 6  ;;  %v5540_v59 = vld [vmem:[#allocation2 + $0x2c] sm:$0xf] }
 0x3d7   : > { %v5601_v62 = vor.u32 %v5600_v45, %v5597_v51  ;;  %v12379_v49 = vrot.slane %v4871_v7, 7  ;;  %v4874_v18 = vshll.u32 %v4820_v41, 16  ;;  %v4693_v50 = vshrl.u32 %v4634_v5, 16  ;;  %v12405_v7 = vld [vmem:[#allocation2 + $0x1c] sm:$0xf] }
 0x3d8   : > { %v5268_v40 = vsel %vm9911_vm13, %v5263_v29, %v12364_v28  ;;  %v5611_v1 = vor.u32 %v5610_v22, %v5607_v14  ;;  %v4869_v11 = vrot.slane %v12287_v10, 4  ;;  %v4696_v20 = vshll.u32 %v4634_v5, 16  ;;  %v4821_v29 = vld [vmem:[#allocation2 + $0x1c] sm:$0xf] }
 0x3d9   : > { %v9612_v44 = vld [vmem:[#allocation4 + $0x20] ss:$12 sps:$4 sm:$0xff]   ;;  %5368 = vrot.lane.b32.xlu0 %v5268_v40, %s9721_s23  ;;  %5486 = vrot.lane.b32.xlu1 %v5454_v52, %s9720_s10  ;;  %v5602_v41 = vsel %vm10661_vm12, %v5593_v54, %v5601_v62  ;;  %v5603_v55 = vrot.slane %v5601_v62, 4  ;;  %v4876_v32 = vor.u32 %v4874_v18, %v12379_v49  ;;  %v12392_v19 = vrot.slane %v4693_v50, 7 }
 0x3da   : > { %5691 = vst.msk [vmem:[#allocation4 + $0x38] sm:$0xf] %vm290_vm0, %v5602_v41  ;;  %v4691_v10 = vrot.slane %v12334_v48, 4  ;;  %v4555_v13 = vrot.slane %v4553_v24, 4  ;;  %v5269_v35 = vshrl.u32 %v12325_v26, 16  ;;  %v5275_v4 = vshll.u32 %v12377_v46, 16  ;;  %9447 = vmatmul.mubr.msk.bf16.gmra.mxu0 %vm2071_vm14, %v9612_v44 }
 0x3db   : > { %v5612_v5 = vsel %vm10661_vm12, %v5603_v55, %v5611_v1  ;;  %v4698_v54 = vor.u32 %v4696_v20, %v12392_v19  ;;  %v4556_v51 = vrot.slane %v12385_v53, 7  ;;  %v5615_v45 = vshrl.u32 %v5539_v16, 16  ;;  %9450 = vmatprep.mubr.msk.bf16.mxu0 %vm9723_vm8, %v14266_v34  ;;  %v12421_v41 = vld [vmem:[#allocation2 + $0x20] sm:$0xf] }
 0x3dc   : > { %5692 = vst.msk [vmem:[#allocation4 + $0x44] sm:$0xf] %vm290_vm0, %v5612_v5  ;;  %v4877_v39 = vsel %vm9868_vm11, %v4869_v11, %v4876_v32  ;;  %v5271_v24 = vrot.slane %v5269_v35, 4  ;;  %v12412_v26 = vrot.slane %v5275_v4, 5  ;;  %v5618_v48 = vshll.u32 %v5539_v16, 16 }
 0x3dd   : > { %4958 = vrot.lane.b32.xlu0 %v4877_v39, %s9720_s10  ;;  %v4699_v52 = vsel %vm9868_vm11, %v4691_v10, %v4698_v54  ;;  %v5617_v14 = vrot.slane %v5615_v45, 5  ;;  %v5625_v22 = vshrl.u32 %v5540_v59, 16  ;;  %v5628_v62 = vshll.u32 %v5540_v59, 16  ;;  %v12425_v4 = vld [vmem:[#allocation2 + $0x20] sm:$0xf] }
 0x3de   : > { %4773 = vrot.lane.b32.xlu1 %v4699_v52, %s9721_s23  ;;  %v5272_v18 = vor.u32 %v5271_v24, %v12364_v28  ;;  %v5620_v50 = vrot.slane %v5618_v48, 6  ;;  %v5085_v40 = vshrl.u32 %v12318_v43, 16  ;;  %v5091_v11 = vshll.u32 %v12405_v7, 16  ;;  %v5541_v28 = vld [vmem:[#allocation2 + $0x30] sm:$0xf] }
 0x3df   : > { %v5613_v20 = vrot.slane %v5611_v1, 4  ;;  %v5627_v53 = vrot.slane %v5625_v22, 5  ;;  %v5630_v16 = vrot.slane %v5628_v62, 6  ;;  %v4880_v44 = vshrl.u32 %v4821_v29, 16  ;;  %v5542_v24 = vld [vmem:[#allocation2 + $0x34] sm:$0xf] }
 0x3e0   : > { %v4557_v55 = vsel %vm9813_vm7, %v4555_v13, %v4556_v51  ;;  %v5273_v32 = vrot.slane %v5272_v18, 4  ;;  %v5621_v10 = vor.u32 %v5620_v50, %v5617_v14  ;;  %v5087_v35 = vrot.slane %v5085_v40, 4  ;;  %v4635_v48 = vld [vmem:[#allocation2 + $0x1c] sm:$0xf]  ;;  %v5004_v52 = vld [vmem:[#allocation2 + $0x10] sm:$0xf] }
 0x3e1   : > { %4588 = vrot.lane.b32.xlu0 %v4557_v55, %s9719_s7  ;;  %v12428_v43 = vor.u32 %v5630_v16, %v5627_v53  ;;  %v12430_v59 = vrot.slane %v5091_v11, 5  ;;  %v12432_v1 = vrot.slane %v4880_v44, 7  ;;  %v4883_v5 = vshll.u32 %v4821_v29, 16  ;;  %5017 = vst.msk [vmem:[#allocation4 + $0x1c] sm:$0xf] %vm290_vm0, %v5004_v52 }
 0x3e2   : > { %v5278_v54 = vsel %vm9911_vm13, %v5273_v32, %v12412_v26  ;;  %v5622_v13 = vsel %vm10661_vm12, %v5613_v20, %v5621_v10  ;;  %v5623_v45 = vrot.slane %v5621_v10, 4  ;;  %v5088_v39 = vor.u32 %v5087_v35, %v12345_v63  ;;  %v12451_v11 = vld [vmem:[#allocation2 + $0x20] sm:$0xf]  ;;  %v5005_v44 = vld [vmem:[#allocation2 + $0x14] sm:$0xf] }
 0x3e3   : > { %v9613_v14 = vld [vmem:[#allocation4 + $0x38] ss:$12 sps:$4 sm:$0xff]   ;;  %5370 = vrot.lane.b32.xlu1 %v5278_v54, %s9721_s23  ;;  %5693 = vst.msk [vmem:[#allocation4 + $0x50] sm:$0xf] %vm290_vm0, %v5622_v13  ;;  %v4878_v29 = vrot.slane %v12379_v49, 4  ;;  %v4885_v22 = vor.u32 %v4883_v5, %v12432_v1  ;;  %v5456_v62 = vrot.slane %v12421_v41, 5 }
 0x3e4   : > { %v5632_v63 = vsel %vm10661_vm12, %v5623_v45, %v12428_v43  ;;  %v5089_v18 = vrot.slane %v5088_v39, 4  ;;  %v5455_v50 = vrot.slane %v5453_v60, 4  ;;  %v4558_v40 = vrot.slane %v4556_v51, 4  ;;  %9451 = vmatmul.mubr.msk.bf16.gmra.mxu0 %vm2071_vm14, %v9613_v14  ;;  %v12464_v32 = vld [vmem:[#allocation2 + $0x20] sm:$0xf] }
 0x3e5   : > { %5694 = vst.msk [vmem:[#allocation4 + $0x5c] sm:$0xf] %vm290_vm0, %v5632_v63  ;;  %v4559_v49 = vrot.slane %v12425_v4, 7  ;;  %v5633_v20 = vrot.slane %v12428_v43, 4  ;;  %v5635_v53 = vshrl.u32 %v5541_v28, 16  ;;  %v5638_v16 = vshll.u32 %v5541_v28, 16  ;;  %9454 = vmatprep.mubr.msk.bf16.mxu0 %vm9723_vm8, %v14266_v34 }
 0x3e6   : > { %v5094_v6 = vsel %vm9911_vm13, %v5089_v18, %v12430_v59  ;;  %v4886_v60 = vsel %vm9868_vm11, %v4878_v29, %v4885_v22  ;;  %v5645_v51 = vshrl.u32 %v5542_v24, 16  ;;  %v5648_v55 = vshll.u32 %v5542_v24, 16  ;;  %5018 = vst.msk [vmem:[#allocation4 + $0x28] sm:$0xf] %vm290_vm0, %v5005_v44  ;;  %v5006_v10 = vld [vmem:[#allocation2 + $0x18] sm:$0xf] }
 0x3e7   : > { %5178 = vrot.lane.b32.xlu0 %v5094_v6, %s9719_s7  ;;  %4960 = vrot.lane.b32.xlu1 %v4886_v60, %s9720_s10  ;;  %v5457_v35 = vsel %vm9829_vm9, %v5455_v50, %v5456_v62  ;;  %v5637_v28 = vrot.slane %v5635_v53, 5  ;;  %v5640_v43 = vrot.slane %v5638_v16, 6  ;;  %v4702_v5 = vshrl.u32 %v4635_v48, 16  ;;  %5019 = vst.msk [vmem:[#allocation4 + $0x34] sm:$0xf] %vm290_vm0, %v5006_v10 }
 0x3e8   : > { %v5007_v54 = vld [vmem:[#allocation2 + $0x1c] sm:$0xf]  ;;  %v5647_v13 = vrot.slane %v5645_v51, 5  ;;  %v5650_v45 = vrot.slane %v5648_v55, 6  ;;  %v4705_v39 = vshll.u32 %v4635_v48, 16  ;;  %v5095_v24 = vshrl.u32 %v12405_v7, 16 }
 0x3e9   : > { %5020 = vst.msk [vmem:[#allocation4 + $0x40] sm:$0xf] %vm290_vm0, %v5007_v54  ;;  %v5641_v52 = vor.u32 %v5640_v43, %v5637_v28  ;;  %v12476_v14 = vrot.slane %v4702_v5, 7  ;;  %v5101_v29 = vshll.u32 %v12451_v11, 16  ;;  %v5279_v22 = vshrl.u32 %v12377_v46, 16 }
 0x3ea   : > { %v5008_v63 = vld [vmem:[#allocation2 + $0x20] sm:$0xf]  ;;  %v4560_v18 = vsel %vm9813_vm7, %v4558_v40, %v4559_v49  ;;  %v12484_v50 = vor.u32 %v5650_v45, %v5647_v13  ;;  %v5097_v48 = vrot.slane %v5095_v24, 4  ;;  %v5285_v7 = vshll.u32 %v12464_v32, 16  ;;  %v12487_v53 = vld [vmem:[#allocation2 + $0x24] sm:$0xf] }
 0x3eb   : > { %v4822_v16 = vld [vmem:[#allocation2 + $0x20] sm:$0xf]  ;;  %5021 = vst.msk [vmem:[#allocation4 + $0x4c] sm:$0xf] %vm290_vm0, %v5008_v63  ;;  %5488 = vrot.lane.b32.xlu0 %v5457_v35, %s9720_s10  ;;  %4590 = vrot.lane.b32.xlu1 %v4560_v18, %s9719_s7  ;;  %v5642_v46 = vsel %vm10661_vm12, %v5633_v20, %v5641_v52  ;;  %v5643_v44 = vrot.slane %v5641_v52, 4  ;;  %v4700_v40 = vrot.slane %v12392_v19, 4  ;;  %v4707_v6 = vor.u32 %v4705_v39, %v12476_v14 }
 0x3ec   : > { %v5543_v60 = vld [vmem:[#allocation2 + $0x38] sm:$0xf]  ;;  %v5009_v51 = vld [vmem:[#allocation2 + $0x24] sm:$0xf]  ;;  %5695 = vst.msk [vmem:[#allocation4 + $0x68] sm:$0xf] %vm290_vm0, %v5642_v46  ;;  %v5098_v10 = vor.u32 %v5097_v48, %v12430_v59  ;;  %v12502_v43 = vor.u32 %v12357_v0, %v12263_v15 }
 0x3ed   : > { %v9614_v55 = vld [vmem:[#allocation4 + $0x50] ss:$12 sps:$4 sm:$0xff]   ;;  %v12498_v28 = vrot.slane %v5101_v29, 5  ;;  %v5281_v35 = vrot.slane %v5279_v22, 4  ;;  %5022 = vst.msk [vmem:[#allocation4 + $0x58] sm:$0xf] %vm290_vm0, %v5009_v51  ;;  %v5652_v19 = vsel %vm10661_vm12, %v5643_v44, %v12484_v50  ;;  %v4708_v20 = vsel %vm9868_vm11, %v4700_v40, %v4707_v6 }
 0x3ee   : > { %v12510_v5 = vrot.slane %v5285_v7, 5  ;;  %v5459_v59 = vrot.slane %v12487_v53, 5  ;;  %v5010_v54 = vld [vmem:[#allocation2 + $0x28] sm:$0xf]  ;;  %9455 = vmatmul.mubr.msk.bf16.gmra.mxu0 %vm2071_vm14, %v9614_v55  ;;  %5696 = vst.msk [vmem:[#allocation4 + $0x74] sm:$0xf] %vm290_vm0, %v5652_v19 }
 0x3ef   : > { %v5099_v15 = vrot.slane %v5098_v10, 4  ;;  %v5282_v0 = vor.u32 %v5281_v35, %v12412_v26  ;;  %v5655_v13 = vshrl.u32 %v5543_v60, 16  ;;  %v5658_v45 = vshll.u32 %v5543_v60, 16  ;;  %v4636_v39 = vld [vmem:[#allocation2 + $0x20] sm:$0xf]  ;;  %9458 = vmatprep.mubr.msk.bf16.mxu0 %vm9723_vm8, %v14266_v34  ;;  %4775 = vrot.lane.b32.xlu0 %v4708_v20, %s9721_s23 }
 0x3f0   : > { %5023 = vst.msk [vmem:[#allocation4 + $0x64] sm:$0xf] %vm290_vm0, %v5010_v54  ;;  %v5458_v24 = vrot.slane %v5456_v62, 4  ;;  %v5653_v52 = vrot.slane %v12484_v50, 4  ;;  %v4889_v29 = vshrl.u32 %v4822_v16, 16  ;;  %v4352_v26 = vshll.u32 %v12327_v61, 16 }
 0x3f1   : > { %v12523_v22 = vld [vmem:[#allocation2 + $0x24] sm:$0xf]  ;;  %v5011_v63 = vld [vmem:[#allocation2 + $0x2c] sm:$0xf]  ;;  %v5104_v18 = vsel %vm9911_vm13, %v5099_v15, %v12498_v28  ;;  %v5283_v48 = vrot.slane %v5282_v0, 4  ;;  %v5657_v7 = vrot.slane %v5655_v13, 5 }
 0x3f2   : > { %v5660_v46 = vrot.slane %v5658_v45, 6  ;;  %v12529_v44 = vld [vmem:[#allocation2 + $0x24] sm:$0xf]  ;;  %5024 = vst.msk [vmem:[#allocation4 + $0x70] sm:$0xf] %vm290_vm0, %v5011_v63  ;;  %5180 = vrot.lane.b32.xlu1 %v5104_v18, %s9719_s7  ;;  %v5460_v62 = vsel %vm9829_vm9, %v5458_v24, %v5459_v59  ;;  %v12537_v50 = vrot.slane %v4889_v29, 7 }
 0x3f3   : > { %v5012_v41 = vld [vmem:[#allocation2 + $0x30] sm:$0xf]  ;;  %v4892_v40 = vshll.u32 %v4822_v16, 16  ;;  %v4711_v6 = vshrl.u32 %v4636_v39, 16  ;;  %v5013_v60 = vld [vmem:[#allocation2 + $0x34] sm:$0xf]  ;;  %v5288_v51 = vsel %vm9911_vm13, %v5283_v48, %v12510_v5 }
 0x3f4   : > { %5025 = vst.msk [vmem:[#allocation4 + $0x7c] sm:$0xf] %vm290_vm0, %v5012_v41  ;;  %v5661_v55 = vor.u32 %v5660_v46, %v5657_v7  ;;  %v4887_v10 = vrot.slane %v12432_v1, 4  ;;  %v4709_v35 = vrot.slane %v12476_v14, 4  ;;  %v12545_v19 = vld [vmem:[#allocation2 + $0x24] sm:$0xf]  ;;  %5372 = vrot.lane.b32.xlu0 %v5288_v51, %s9721_s23 }
 0x3f5   : > { %5026 = vst.msk [vmem:[#allocation4 + $0x88] sm:$0xf] %vm290_vm0, %v5013_v60  ;;  %v5014_v20 = vld [vmem:[#allocation2 + $0x38] sm:$0x3]  ;;  %v4894_v16 = vor.u32 %v4892_v40, %v12537_v50  ;;  %v12550_v54 = vrot.slane %v4711_v6, 7  ;;  %v4714_v15 = vshll.u32 %v4636_v39, 16 }
 0x3f6   : > { %v5289_v0 = vshrl.u32 %v12464_v32, 16  ;;  %5027 = vst.msk [vmem:[#allocation4 + $0x94] sm:$0x3] %vm307_vm1, %v5014_v20  ;;  %v5662_v1 = vsel %vm10661_vm12, %v5653_v52, %v5661_v55  ;;  %v5663_v14 = vrot.slane %v5661_v55, 4  ;;  %v5295_v13 = vshll.u32 %v12523_v22, 16  ;;  %5490 = vrot.lane.b32.xlu1 %v5460_v62, %s9720_s10 }
 0x3f7   : > { %v5105_v45 = vshrl.u32 %v12451_v11, 16  ;;  %v4823_v24 = vld [vmem:[#allocation2 + $0x24] sm:$0xf]  ;;  %v9615_v29 = vld [vmem:[#allocation4 + $0x68] ss:$12 sps:$4 sm:$0xff]   ;;  %v4716_v39 = vor.u32 %v4714_v15, %v12550_v54  ;;  %v4562_v32 = vrot.slane %v12529_v44, 7  ;;  %v4895_v18 = vsel %vm9868_vm11, %v4887_v10, %v4894_v16 }
 0x3f8   : > { %5697 = vst.msk [vmem:[#allocation4 + $0x80] sm:$0xf] %vm290_vm0, %v5662_v1  ;;  %v5291_v63 = vrot.slane %v5289_v0, 4  ;;  %v5672_v52 = vsel %vm10661_vm12, %v5663_v14, %v11898_v37  ;;  %v5111_v11 = vshll.u32 %v12545_v19, 16  ;;  %9459 = vmatmul.mubr.msk.bf16.gmra.mxu0 %vm2071_vm14, %v9615_v29  ;;  %4962 = vrot.lane.b32.xlu0 %v4895_v18, %s9720_s10  ;;  %v4561_v7 = vrot.slane %v4559_v49, 4 }
 0x3f9   : > { %v5107_v48 = vrot.slane %v5105_v45, 4  ;;  %5698 = vst.msk [vmem:[#allocation4 + $0x8c] sm:$0xf] %vm290_vm0, %v5672_v52  ;;  %v4898_v44 = vshrl.u32 %v4823_v24, 16  ;;  %v4637_v41 = vld [vmem:[#allocation2 + $0x24] sm:$0xf]  ;;  %9462 = vmatprep.mubr.msk.bf16.mxu0 %vm9723_vm8, %v14266_v34  ;;  %v4717_v62 = vsel %vm9868_vm11, %v4709_v35, %v4716_v39 }
 0x3fa   : > { %v5292_v46 = vor.u32 %v5291_v63, %v12510_v5  ;;  %v4366_v37 = vrot.slane %v12502_v43, 4  ;;  %v12579_v40 = vrot.slane %v5295_v13, 5  ;;  %v4351_v4 = vrot.slane %v4349_v21, 6  ;;  %4777 = vrot.lane.b32.xlu1 %v4717_v62, %s9721_s23  ;;  %v5423_v35 = vld [vmem:[#allocation2 + $0x28] sm:$0xf]  ;;  %v4577_v62 = vpop.permute.xlu0 %4576 }
 0x3fb   : > { %v5108_v6 = vor.u32 %v5107_v48, %v12498_v28  ;;  %v4563_v49 = vsel %vm9813_vm7, %v4561_v7, %v4562_v32  ;;  %v12587_v60 = vrot.slane %v4898_v44, 7  ;;  %v4354_v51 = vrot.slane %v4352_v26, 7  ;;  %v12590_v28 = vld [vmem:[#allocation2 + $0x28] sm:$0xf] }
 0x3fc   : > { %v5293_v5 = vrot.slane %v5292_v46, 4  ;;  %v5113_v10 = vrot.slane %v5111_v11, 5  ;;  %v4901_v20 = vshll.u32 %v4823_v24, 16  ;;  %v4720_v16 = vshrl.u32 %v4637_v41, 16  ;;  %4592 = vrot.lane.b32.xlu0 %v4563_v49, %s9719_s7  ;;  %v12592_v61 = vld [vmem:[#allocation2 + $0x28] sm:$0xf] }
 0x3fd   : > { %v5109_v55 = vrot.slane %v5108_v6, 4  ;;  %v5229_v21 = vld [vmem:[#allocation2 + $0x28] sm:$0xf]  ;;  %v4896_v0 = vrot.slane %v12537_v50, 4  ;;  %v5115_v1 = vshrl.u32 %v12545_v19, 16  ;;  %v5461_v13 = vrot.slane %v5459_v59, 4 }
 0x3fe   : > { %v5298_v15 = vsel %vm9911_vm13, %v5293_v5, %v12579_v40  ;;  %v4903_v26 = vor.u32 %v4901_v20, %v12587_v60  ;;  %v4824_v14 = vld [vmem:[#allocation2 + $0x28] sm:$0xf]  ;;  %v5462_v45 = vrot.slane %v5423_v35, 5  ;;  %v12603_v24 = vrot.slane %v4720_v16, 7  ;;  %v12619_v49 = vld [vmem:[#allocation2 + $0x2c] sm:$0xf] }
 0x3ff   : > { %5374 = vrot.lane.b32.xlu1 %v5298_v15, %s9721_s23  ;;  %v5299_v29 = vshrl.u32 %v12523_v22, 16  ;;  %v4638_v39 = vld [vmem:[#allocation2 + $0x28] sm:$0xf]  ;;  %v5114_v50 = vsel %vm9911_vm13, %v5109_v55, %v5113_v10  ;;  %v4565_v52 = vrot.slane %v12590_v28, 7  ;;  %v5117_v18 = vrot.slane %v5115_v1, 4 }
 0x400   : > { %v9616_v63 = vld [vmem:[#allocation4 + $0x80] ss:$12 sps:$4 sm:$0xff]   ;;  %v4355_v19 = vor.u32 %v4354_v51, %v4351_v4  ;;  %5182 = vrot.lane.b32.xlu0 %v5114_v50, %s9719_s7  ;;  %v4723_v48 = vshll.u32 %v4637_v41, 16  ;;  %v5121_v53 = vshll.u32 %v12592_v61, 16  ;;  %v5305_v11 = vshll.u32 %v5229_v21, 16 }
 0x401   : > { %v5301_v59 = vrot.slane %v5299_v29, 4  ;;  %9463 = vmatmul.mubr.msk.bf16.gmra.mxu0 %vm2071_vm14, %v9616_v63  ;;  %v4904_v22 = vsel %vm9868_vm11, %v4896_v0, %v4903_v26  ;;  %v4564_v7 = vrot.slane %v4562_v32, 4  ;;  %v5118_v46 = vor.u32 %v5117_v18, %v5113_v10  ;;  %v4336_v28 = vld [vmem:[#allocation2 + $0x8] sm:$0xf]  ;;  %v12644_v50 = vld [vmem:[#allocation2 + $0x2c] sm:$0xf] }
 0x402   : > { %v4907_v44 = vshrl.u32 %v4824_v14, 16  ;;  %v5463_v6 = vsel %vm9829_vm9, %v5461_v13, %v5462_v45  ;;  %v4718_v41 = vrot.slane %v12550_v54, 4  ;;  %v4725_v4 = vor.u32 %v4723_v48, %v12603_v24  ;;  %9466 = vmatprep.mubr.msk.bf16.mxu0 %vm9723_vm8, %v14266_v34  ;;  %v4764_v48 = vpop.permute.xlu0 %4763 }
 0x403   : > { %4964 = vrot.lane.b32.xlu1 %v4904_v22, %s9720_s10  ;;  %v4729_v5 = vshrl.u32 %v4638_v39, 16  ;;  %v4566_v32 = vsel %vm9813_vm7, %v4564_v7, %v4565_v52  ;;  %v5302_v51 = vor.u32 %v5301_v59, %v12579_v40  ;;  %v5464_v55 = vrot.slane %v5462_v45, 4  ;;  %v12637_v40 = vld [vmem:[#allocation2 + $0x2c] sm:$0xf] }
 0x404   : > { %v4356_v10 = vrot.slane %v4355_v19, 4  ;;  %5492 = vrot.lane.b32.xlu0 %v5463_v6, %s9720_s10  ;;  %v5119_v20 = vrot.slane %v5118_v46, 4  ;;  %v12627_v35 = vrot.slane %v5121_v53, 5  ;;  %v5307_v54 = vrot.slane %v5305_v11, 5  ;;  %v12647_v59 = vld [vmem:[#allocation2 + $0x2c] sm:$0xf] }
 0x405   : > { %v12629_v16 = vrot.slane %v4907_v44, 7  ;;  %v5465_v15 = vrot.slane %v12619_v49, 5  ;;  %v12632_v0 = vrot.slane %v4729_v5, 7  ;;  %v5309_v1 = vshrl.u32 %v5229_v21, 16  ;;  %v4825_v22 = vld [vmem:[#allocation2 + $0x2c] sm:$0xf] }
 0x406   : > { %v4365_v26 = vsel %vm10354_vm2, %v4356_v10, %v12502_v43  ;;  %v4726_v13 = vsel %vm9868_vm11, %v4718_v41, %v4725_v4  ;;  %v4905_v45 = vrot.slane %v12587_v60, 4  ;;  %v4910_v29 = vshll.u32 %v4824_v14, 16 }
 0x407   : > { %4594 = vrot.lane.b32.xlu1 %v4566_v32, %s9719_s7  ;;  %v4732_v63 = vshll.u32 %v4638_v39, 16  ;;  %4495 = vst.msk [vmem:[#allocation4] sm:$0xf] %vm290_vm0, %v4365_v26  ;;  %v5303_v18 = vrot.slane %v5302_v51, 4  ;;  %v5311_v19 = vrot.slane %v5309_v1, 4  ;;  %v4368_v53 = vshrl.u32 %v4336_v28, 16 }
 0x408   : > { %4615 = vst.msk [vmem:[#allocation4] sm:$0xf] %vm691_vm3, %v4577_v62  ;;  %v4371_v21 = vshll.u32 %v4336_v28, 16  ;;  %4779 = vrot.lane.b32.xlu0 %v4726_v13, %s9721_s23  ;;  %v5124_v60 = vsel %vm9911_vm13, %v5119_v20, %v12627_v35  ;;  %v4912_v14 = vor.u32 %v4910_v29, %v12629_v16  ;;  %v4568_v39 = vrot.slane %v12637_v40, 7  ;;  %v4337_v32 = vld [vmem:[#allocation2 + $0xc] sm:$0xf] }
 0x409   : > { %4802 = vst.msk [vmem:[#allocation4] sm:$0xf] %vm883_vm4, %v4764_v48  ;;  %v5125_v11 = vshrl.u32 %v12592_v61, 16  ;;  %v4734_v7 = vor.u32 %v4732_v63, %v12632_v0  ;;  %v5315_v46 = vshll.u32 %v12644_v50, 16  ;;  %v4370_v44 = vrot.slane %v4368_v53, 6 }
 0x40a   : > { %v4373_v62 = vrot.slane %v4371_v21, 7  ;;  %v4727_v6 = vrot.slane %v12603_v24, 4  ;;  %v4567_v41 = vrot.slane %v4565_v52, 4  ;;  %v5312_v4 = vor.u32 %v5311_v19, %v5307_v54  ;;  %v4639_v26 = vld [vmem:[#allocation2 + $0x2c] sm:$0xf] }
 0x40b   : > { %5184 = vrot.lane.b32.xlu1 %v5124_v60, %s9719_s7  ;;  %v5131_v5 = vshll.u32 %v12647_v59, 16  ;;  %v5308_v51 = vsel %vm9911_vm13, %v5303_v18, %v5307_v54  ;;  %v5127_v10 = vrot.slane %v5125_v11, 4  ;;  %v4916_v20 = vshrl.u32 %v4825_v22, 16  ;;  %v5425_v13 = vld [vmem:[#allocation2 + $0x30] sm:$0xf] }
 0x40c   : > { %v4374_v61 = vor.u32 %v4373_v62, %v4370_v44  ;;  %5376 = vrot.lane.b32.xlu0 %v5308_v51, %s9721_s23  ;;  %v5466_v28 = vsel %vm9829_vm9, %v5464_v55, %v5465_v15  ;;  %v4913_v24 = vsel %vm9868_vm11, %v4905_v45, %v4912_v14  ;;  %v4569_v52 = vsel %vm9813_vm7, %v4567_v41, %v4568_v39  ;;  %v4579_v45 = vpop.permute.xlu1 %4578  ;;  %v12686_v19 = vld [vmem:[#allocation2 + $0x30] sm:$0xf] }
 0x40d   : > { %v4735_v54 = vsel %vm9868_vm11, %v4727_v6, %v4734_v7  ;;  %v12675_v40 = vrot.slane %v5315_v46, 5  ;;  %v4378_v29 = vshrl.u32 %v4337_v32, 16  ;;  %v5313_v55 = vrot.slane %v5312_v4, 4  ;;  %v5231_v6 = vld [vmem:[#allocation2 + $0x30] sm:$0xf] }
 0x40e   : > { %v4375_v1 = vsel %vm10354_vm2, %v4366_v37, %v4374_v61  ;;  %v12683_v63 = vrot.slane %v5131_v5, 5  ;;  %v4914_v18 = vrot.slane %v12629_v16, 4  ;;  %v4381_v48 = vshll.u32 %v4337_v32, 16  ;;  %v5038_v16 = vld [vmem:[#allocation2 + $0x30] sm:$0xf] }
 0x40f   : > { %5494 = vrot.lane.b32.xlu1 %v5466_v28, %s9720_s10  ;;  %4496 = vst.msk [vmem:[#allocation4 + $0xc] sm:$0xf] %vm290_vm0, %v4375_v1  ;;  %v5128_v43 = vor.u32 %v5127_v10, %v12627_v35  ;;  %v12690_v37 = vrot.slane %v4916_v20, 7  ;;  %v4380_v53 = vrot.slane %v4378_v29, 6  ;;  %v4738_v21 = vshrl.u32 %v4639_v26, 16 }
 0x410   : > { %4616 = vst.msk [vmem:[#allocation4 + $0xc] sm:$0xf] %vm691_vm3, %v4579_v45  ;;  %4966 = vrot.lane.b32.xlu0 %v4913_v24, %s9720_s10  ;;  %v4919_v60 = vshll.u32 %v4825_v22, 16  ;;  %v5467_v14 = vrot.slane %v5465_v15, 4  ;;  %v5468_v11 = vrot.slane %v5425_v13, 5  ;;  %v4383_v7 = vrot.slane %v4381_v48, 7 }
 0x411   : > { %v4570_v46 = vrot.slane %v4568_v39, 4  ;;  %v4571_v44 = vrot.slane %v12686_v19, 7  ;;  %v5135_v62 = vshrl.u32 %v12647_v59, 16  ;;  %v5319_v35 = vshrl.u32 %v12644_v50, 16  ;;  %v4951_v41 = vpop.permute.xlu0 %4950  ;;  %v12706_v39 = vld [vmem:[#allocation2 + $0x34] sm:$0xf]  ;;  %v4766_v50 = vpop.permute.xlu1 %4765 }
 0x412   : > { %v5318_v22 = vsel %vm9911_vm13, %v5313_v55, %v12675_v40  ;;  %v12702_v49 = vor.u32 %v4383_v7, %v4380_v53  ;;  %v4376_v15 = vrot.slane %v4374_v61, 4  ;;  %v12704_v4 = vrot.slane %v4738_v21, 7  ;;  %v12708_v5 = vld [vmem:[#allocation2 + $0x30] sm:$0xf]  ;;  %4989 = vst.msk [vmem:[#allocation4] sm:$0xf] %vm1072_vm10, %v4951_v41 }
 0x413   : > { %4781 = vrot.lane.b32.xlu1 %v4735_v54, %s9721_s23  ;;  %v5129_v59 = vrot.slane %v5128_v43, 4  ;;  %v4921_v32 = vor.u32 %v4919_v60, %v12690_v37  ;;  %v5137_v51 = vrot.slane %v5135_v62, 4  ;;  %v5321_v10 = vrot.slane %v5319_v35, 4  ;;  %v4640_v20 = vld [vmem:[#allocation2 + $0x30] sm:$0xf] }
 0x414   : > { %4596 = vrot.lane.b32.xlu0 %v4569_v52, %s9719_s7  ;;  %4803 = vst.msk [vmem:[#allocation4 + $0xc] sm:$0xf] %vm883_vm4, %v4766_v50  ;;  %v4385_v61 = vsel %vm10354_vm2, %v4376_v15, %v12702_v49  ;;  %v4741_v28 = vshll.u32 %v4639_v26, 16  ;;  %v5141_v24 = vshll.u32 %v5038_v16, 16  ;;  %v5325_v54 = vshll.u32 %v5231_v6, 16 }
 0x415   : > { %v5469_v1 = vsel %vm9829_vm9, %v5467_v14, %v5468_v11  ;;  %4497 = vst.msk [vmem:[#allocation4 + $0x18] sm:$0xf] %vm290_vm0, %v4385_v61  ;;  %v5138_v13 = vor.u32 %v5137_v51, %v12683_v63  ;;  %v5471_v29 = vrot.slane %v12706_v39, 5  ;;  %v4925_v52 = vshrl.u32 %v12708_v5, 16  ;;  %v4581_v55 = vpop.permute.xlu0 %4580  ;;  %v4953_v21 = vpop.permute.xlu1 %4952  ;;  %v4338_v62 = vld [vmem:[#allocation2 + $0x10] sm:$0xf] }
 0x416   : > { %v4572_v26 = vsel %vm9813_vm7, %v4570_v46, %v4571_v44  ;;  %v4743_v45 = vor.u32 %v4741_v28, %v12704_v4  ;;  %v5322_v48 = vor.u32 %v5321_v10, %v12675_v40  ;;  %v4747_v43 = vshrl.u32 %v4640_v20, 16  ;;  %4617 = vst.msk [vmem:[#allocation4 + $0x18] sm:$0xf] %vm691_vm3, %v4581_v55 }
 0x417   : > { %5378 = vrot.lane.b32.xlu1 %v5318_v22, %s9721_s23  ;;  %v5134_v53 = vsel %vm9911_vm13, %v5129_v59, %v12683_v63  ;;  %v4736_v60 = vrot.slane %v12632_v0, 4  ;;  %v5470_v14 = vrot.slane %v5468_v11, 4  ;;  %v5145_v7 = vshrl.u32 %v5038_v16, 16  ;;  %4990 = vst.msk [vmem:[#allocation4 + $0xc] sm:$0xf] %vm1072_vm10, %v4953_v21 }
 0x418   : > { %5186 = vrot.lane.b32.xlu0 %v5134_v53, %s9719_s7  ;;  %v4922_v46 = vsel %vm9868_vm11, %v4914_v18, %v4921_v32  ;;  %v5143_v40 = vrot.slane %v5141_v24, 5  ;;  %v12739_v35 = vrot.slane %v5325_v54, 5  ;;  %v5039_v22 = vld [vmem:[#allocation2 + $0x34] sm:$0xf]  ;;  %v5329_v63 = vshrl.u32 %v5231_v6, 16 }
 0x419   : > { %v5139_v41 = vrot.slane %v5138_v13, 4  ;;  %v12745_v0 = vsel %vm9829_vm9, %v5470_v14, %v5471_v29  ;;  %v12747_v11 = vrot.slane %v4925_v52, 7  ;;  %v5147_v16 = vrot.slane %v5145_v7, 4  ;;  %v5232_v6 = vld [vmem:[#allocation2 + $0x34] sm:$0xf]  ;;  %v5171_v50 = vpop.permute.xlu0 %5170 }
 0x41a   : > { %v4744_v18 = vsel %vm9868_vm11, %v4736_v60, %v4743_v45  ;;  %v5323_v15 = vrot.slane %v5322_v48, 4  ;;  %v4923_v59 = vrot.slane %v12690_v37, 4  ;;  %v12753_v32 = vrot.slane %v4747_v43, 7  ;;  %v4827_v24 = vld [vmem:[#allocation2 + $0x34] sm:$0xf] }
 0x41b   : > { %4968 = vrot.lane.b32.xlu1 %v4922_v46, %s9720_s10  ;;  %v4928_v51 = vshll.u32 %v12708_v5, 16  ;;  %v5151_v10 = vshll.u32 %v5039_v22, 16  ;;  %v5331_v61 = vrot.slane %v5329_v63, 4  ;;  %v4388_v28 = vshrl.u32 %v4338_v62, 16  ;;  %5209 = vst.msk [vmem:[#allocation4 + $0x4] sm:$0xf] %vm691_vm3, %v5171_v50 }
 0x41c   : > { %5496 = vrot.lane.b32.xlu0 %v5469_v1, %s9720_s10  ;;  %v4745_v54 = vrot.slane %v12704_v4, 4  ;;  %v4750_v13 = vshll.u32 %v4640_v20, 16  ;;  %v5148_v52 = vor.u32 %v5147_v16, %v5143_v40  ;;  %v4391_v55 = vshll.u32 %v4338_v62, 16  ;;  %v5427_v4 = vld [vmem:[#allocation2 + $0x38] sm:$0xf] }
 0x41d   : > { %v5144_v37 = vsel %vm9911_vm13, %v5139_v41, %v5143_v40  ;;  %v4930_v45 = vor.u32 %v4928_v51, %v12747_v11  ;;  %v5335_v48 = vshll.u32 %v5232_v6, 16  ;;  %v4390_v5 = vrot.slane %v4388_v28, 6  ;;  %v12771_v7 = vld [vmem:[#allocation2 + $0x38] sm:$0xf]  ;;  %v4521_v50 = vld [vmem:[#allocation2 + $0x34] sm:$0x1] }
 0x41e   : > { %v5328_v1 = vsel %vm9911_vm13, %v5323_v15, %v12739_v35  ;;  %v4752_v43 = vor.u32 %v4750_v13, %v12753_v32  ;;  %v4393_v53 = vrot.slane %v4391_v55, 7  ;;  %v4934_v20 = vshrl.u32 %v4827_v24, 16  ;;  %v12780_v63 = vld [vmem:[#allocation2 + $0x38] sm:$0x7]  ;;  %v12803_v55 = vld [vmem:[#allocation2 + $0x34] sm:$0x3] }
 0x41f   : > { %4598 = vrot.lane.b32.xlu1 %v4572_v26, %s9719_s7  ;;  %v12767_v21 = vrot.slane %v5151_v10, 5  ;;  %v5332_v60 = vor.u32 %v5331_v61, %v12739_v35  ;;  %v4386_v14 = vrot.slane %v12702_v49, 4  ;;  %v5339_v62 = vshrl.u32 %v5232_v6, 16 }
 0x420   : > { %4783 = vrot.lane.b32.xlu0 %v4744_v18, %s9721_s23  ;;  %v12774_v26 = vrot.slane %v5148_v52, 4  ;;  %v12776_v46 = vor.u32 %v4393_v53, %v4390_v5  ;;  %v12778_v40 = vrot.slane %v4934_v20, 7  ;;  %v5155_v41 = vshrl.u32 %v5039_v22, 16  ;;  %v12792_v22 = vld [vmem:[#allocation2 + $0x3c] sm:$0x7] }
 0x421   : > { %v4931_v16 = vsel %vm9868_vm11, %v4923_v59, %v4930_v45  ;;  %v12784_v35 = vrot.slane %v5335_v48, 5  ;;  %v5474_v49 = vrot.slane %v5427_v4, 5  ;;  %v5341_v15 = vrot.slane %v5339_v62, 4  ;;  %v12796_v59 = vpop.permute.xlu0 %5480  ;;  %v4583_v28 = vpop.permute.xlu1 %4582  ;;  %v4339_v45 = vld [vmem:[#allocation2 + $0x14] sm:$0xf] }
 0x422   : > { %v4753_v18 = vsel %vm9868_vm11, %v4745_v54, %v4752_v43  ;;  %v4395_v6 = vsel %vm10354_vm2, %v4386_v14, %v12776_v46  ;;  %v4937_v51 = vshll.u32 %v4827_v24, 16  ;;  %v5157_v10 = vrot.slane %v5155_v41, 4  ;;  %v12825_v20 = vld [vmem:[#allocation2 + $0x3c] sm:$0x7] }
 0x423   : > { %5188 = vrot.lane.b32.xlu1 %v5144_v37, %s9719_s7  ;;  %v12794_v61 = vrot.slane %v5332_v60, 4  ;;  %4498 = vst.msk [vmem:[#allocation4 + $0x24] sm:$0xf] %vm290_vm0, %v4395_v6  ;;  %v5473_v13 = vrot.slane %v5471_v29, 4  ;;  %v4932_v54 = vrot.slane %v12747_v11, 4  ;;  %v5345_v52 = vshll.u32 %v12771_v7, 16 }
 0x424   : > { %5380 = vrot.lane.b32.xlu0 %v5328_v1, %s9721_s23  ;;  %v5154_v24 = vsel %vm9911_vm13, %v12774_v26, %v12767_v21  ;;  %4618 = vst.msk [vmem:[#allocation4 + $0x24] sm:$0xf] %vm691_vm3, %v4583_v28  ;;  %v4939_v37 = vor.u32 %v4937_v51, %v12778_v40  ;;  %v5161_v39 = vshll.u32 %v12780_v63, 16  ;;  %v4574_v29 = vrot.slane %v4521_v50, 7 }
 0x425   : > { %v12815_v11 = vsel %vm9829_vm9, %v5473_v13, %v5474_v49  ;;  %v5342_v48 = vor.u32 %v5341_v15, %v12784_v35  ;;  %v4573_v5 = vrot.slane %v4571_v44, 4  ;;  %v5476_v1 = vrot.slane %v5474_v49, 4  ;;  %v4768_v44 = vpop.permute.xlu0 %4767  ;;  %v5173_v14 = vpop.permute.xlu1 %5172  ;;  %v12846_v49 = vld [vmem:[#allocation2 + $0x38] sm:$0x3] }
 0x426   : > { %v5158_v43 = vor.u32 %v5157_v10, %v12767_v21  ;;  %v14212_v53 = vrot.slane %v12792_v22, 5  ;;  %v4756_v4 = vshrl.u32 %v12803_v55, 16  ;;  %v5349_v60 = vshrl.u32 %v12771_v7, 16  ;;  %4804 = vst.msk [vmem:[#allocation4 + $0x18] sm:$0xf] %vm883_vm4, %v4768_v44 }
 0x427   : > { %5498 = vrot.lane.b32.xlu1 %v12745_v0, %s9720_s10  ;;  %v5338_v19 = vsel %vm9911_vm13, %v12794_v61, %v12784_v35  ;;  %v12832_v62 = vrot.slane %v5345_v52, 5  ;;  %v4398_v0 = vshrl.u32 %v4339_v45, 16  ;;  %v4401_v26 = vshll.u32 %v4339_v45, 16  ;;  %5210 = vst.msk [vmem:[#allocation4 + $0x10] sm:$0xf] %vm691_vm3, %v5173_v14 }
 0x428   : > { %4970 = vrot.lane.b32.xlu0 %v4931_v16, %s9720_s10  ;;  %v4940_v21 = vsel %vm9868_vm11, %v4932_v54, %v4939_v37  ;;  %v12839_v7 = vrot.slane %v5161_v39, 5  ;;  %v12843_v41 = vsel %vm9813_vm7, %v4573_v5, %v4574_v29  ;;  %v4754_v35 = vrot.slane %v12753_v32, 4  ;;  %v4340_v15 = vld [vmem:[#allocation2 + $0x18] sm:$0xf]  ;;  %v4342_v44 = vld [vmem:[#allocation2 + $0x20] sm:$0xf] }
 0x429   : > { %v12848_v50 = vrot.slane %v5342_v48, 4  ;;  %v5355_v16 = vshll.u32 %v12825_v20, 16  ;;  %v4400_v6 = vrot.slane %v4398_v0, 6  ;;  %v4403_v51 = vrot.slane %v4401_v26, 7  ;;  %v5365_v54 = vpop.permute.xlu0 %5364  ;;  %v12862_v52 = vpop.permute.xlu1 %5482 }
 0x42a   : > { %v12852_v10 = vrot.slane %v5158_v43, 4  ;;  %v12858_v61 = vsel %vm9829_vm9, %v5476_v1, %v14212_v53  ;;  %v4758_v28 = vrot.slane %v4756_v4, 7  ;;  %v12860_v13 = vrot.slane %v5349_v60, 4  ;;  %5403 = vst.msk [vmem:[#allocation4 + $0x4] sm:$0xf] %vm883_vm4, %v5365_v54 }
 0x42b   : > { %4785 = vrot.lane.b32.xlu1 %v4753_v18, %s9721_s23  ;;  %v4396_v37 = vrot.slane %v12776_v46, 4  ;;  %v4404_v39 = vor.u32 %v4403_v51, %v4400_v6  ;;  %v4943_v29 = vshrl.u32 %v12846_v49, 16  ;;  %v4408_v18 = vshrl.u32 %v4340_v15, 16  ;;  %v4341_v43 = vld [vmem:[#allocation2 + $0x1c] sm:$0xf] }
 0x42c   : > { %5190 = vrot.lane.b32.xlu0 %v5154_v24, %s9719_s7  ;;  %v5348_v45 = vsel %vm9911_vm13, %v12848_v50, %v12832_v62  ;;  %v4759_v48 = vshll.u32 %v12803_v55, 16  ;;  %v5165_v5 = vshrl.u32 %v12780_v63, 16  ;;  %v4411_v1 = vshll.u32 %v4340_v15, 16  ;;  %5519 = vst.msk [vmem:[#allocation4 + $0x4] sm:$0xf] %vm1072_vm10, %v12796_v59 }
 0x42d   : > { %v5164_v46 = vsel %vm9911_vm13, %v12852_v10, %v12839_v7  ;;  %v12880_v24 = vrot.slane %v5355_v16, 5  ;;  %v4405_v4 = vsel %vm10354_vm2, %v4396_v37, %v4404_v39  ;;  %v4410_v60 = vrot.slane %v4408_v18, 6  ;;  %v4343_v59 = vld [vmem:[#allocation2 + $0x24] sm:$0xf]  ;;  %v4955_v26 = vpop.permute.xlu0 %4954  ;;  %v4344_v37 = vld [vmem:[#allocation2 + $0x28] sm:$0xf] }
 0x42e   : > { %v12885_v63 = vor.u32 %v4759_v48, %v4758_v28  ;;  %v5352_v55 = vor.u32 %v12860_v13, %v12832_v62  ;;  %4499 = vst.msk [vmem:[#allocation4 + $0x30] sm:$0xf] %vm290_vm0, %v4405_v4  ;;  %v4946_v14 = vshll.u32 %v12846_v49, 16  ;;  %v4413_v0 = vrot.slane %v4411_v1, 7  ;;  %v4770_v15 = vpop.permute.xlu1 %4769  ;;  %v4345_v4 = vld [vmem:[#allocation2 + $0x2c] sm:$0xf] }
 0x42f   : > { %5382 = vrot.lane.b32.xlu1 %v5338_v19, %s9721_s23  ;;  %v12891_v50 = vrot.slane %v4943_v29, 7  ;;  %v5359_v16 = vshrl.u32 %v12825_v20, 16  ;;  %v4418_v6 = vshrl.u32 %v4341_v43, 16  ;;  %v4421_v51 = vshll.u32 %v4341_v43, 16  ;;  %4991 = vst.msk [vmem:[#allocation4 + $0x18] sm:$0xf] %vm1072_vm10, %v4955_v26 }
 0x430   : > { %5500 = vrot.lane.b32.xlu0 %v12815_v11, %s9720_s10  ;;  %4805 = vst.msk [vmem:[#allocation4 + $0x24] sm:$0xf] %vm883_vm4, %v4770_v15  ;;  %v12898_v19 = vrot.slane %v5165_v5, 4  ;;  %v4406_v10 = vrot.slane %v4404_v39, 4  ;;  %v4414_v28 = vor.u32 %v4413_v0, %v4410_v60  ;;  %v4428_v54 = vshrl.u32 %v4342_v44, 16 }
 0x431   : > { %v4420_v18 = vrot.slane %v4418_v6, 6  ;;  %v4423_v29 = vrot.slane %v4421_v51, 7  ;;  %v4431_v48 = vshll.u32 %v4342_v44, 16  ;;  %v4438_v1 = vshrl.u32 %v4343_v59, 16  ;;  %v4585_v15 = vpop.permute.xlu0 %4584  ;;  %v4346_v51 = vld [vmem:[#allocation2 + $0x30] sm:$0xf] }
 0x432   : > { %v4415_v11 = vsel %vm10354_vm2, %v4406_v10, %v4414_v28  ;;  %v4416_v43 = vrot.slane %v4414_v28, 4  ;;  %v4430_v26 = vrot.slane %v4428_v54, 6  ;;  %v4441_v53 = vshll.u32 %v4343_v59, 16  ;;  %v5367_v5 = vpop.permute.xlu1 %5366  ;;  %4619 = vst.msk [vmem:[#allocation4 + $0x30] sm:$0xf] %vm691_vm3, %v4585_v15 }
 0x433   : > { %4972 = vrot.lane.b32.xlu1 %v4940_v21, %s9720_s10  ;;  %4500 = vst.msk [vmem:[#allocation4 + $0x3c] sm:$0xf] %vm290_vm0, %v4415_v11  ;;  %v4424_v39 = vor.u32 %v4423_v29, %v4420_v18  ;;  %v4433_v60 = vrot.slane %v4431_v48, 7  ;;  %v4440_v0 = vrot.slane %v4438_v1, 6  ;;  %v4448_v6 = vshrl.u32 %v4344_v37, 16 }
 0x434   : > { %5384 = vrot.lane.b32.xlu0 %v5348_v45, %s9721_s23  ;;  %5404 = vst.msk [vmem:[#allocation4 + $0x10] sm:$0xf] %vm883_vm4, %v5367_v5  ;;  %v4443_v21 = vrot.slane %v4441_v53, 7  ;;  %v4451_v44 = vshll.u32 %v4344_v37, 16  ;;  %v4458_v10 = vshrl.u32 %v4345_v4, 16  ;;  %v4461_v28 = vshll.u32 %v4345_v4, 16 }
 0x435   : > { %5520 = vst.msk [vmem:[#allocation4 + $0x10] sm:$0xf] %vm1072_vm10, %v12862_v52  ;;  %v4425_v59 = vsel %vm10354_vm2, %v4416_v43, %v4424_v39  ;;  %v4426_v54 = vrot.slane %v4424_v39, 4  ;;  %v4434_v18 = vor.u32 %v4433_v60, %v4430_v26  ;;  %v4450_v29 = vrot.slane %v4448_v6, 6  ;;  %v4347_v48 = vld [vmem:[#allocation2 + $0x34] sm:$0x1] }
 0x436   : > { %4501 = vst.msk [vmem:[#allocation4 + $0x48] sm:$0xf] %vm290_vm0, %v4425_v59  ;;  %v4444_v45 = vor.u32 %v4443_v21, %v4440_v0  ;;  %v4453_v1 = vrot.slane %v4451_v44, 7  ;;  %v4460_v53 = vrot.slane %v4458_v10, 6  ;;  %v4463_v37 = vrot.slane %v4461_v28, 7 }
 0x437   : > { %5192 = vrot.lane.b32.xlu1 %v5164_v46, %s9719_s7  ;;  %v4435_v4 = vsel %vm10354_vm2, %v4426_v54, %v4434_v18  ;;  %v4436_v11 = vrot.slane %v4434_v18, 4  ;;  %v4468_v52 = vshrl.u32 %v4346_v51, 16  ;;  %v4471_v15 = vshll.u32 %v4346_v51, 16 }
 0x438   : > { %4600 = vrot.lane.b32.xlu0 %v12843_v41, %s9719_s7  ;;  %4502 = vst.msk [vmem:[#allocation4 + $0x54] sm:$0xf] %vm290_vm0, %v4435_v4  ;;  %v4446_v43 = vrot.slane %v4444_v45, 4  ;;  %v4454_v26 = vor.u32 %v4453_v1, %v4450_v29  ;;  %v4464_v46 = vor.u32 %v4463_v37, %v4460_v53  ;;  %v4478_v5 = vshll.u32 %v4347_v48, 16  ;;  %v7478_v37 = vld [vmem:[#allocation3 + $0x3c] sm:$0xf] }
 0x439   : > { %v5353_v39 = vrot.slane %v5352_v55, 4  ;;  %v4445_v60 = vsel %vm10354_vm2, %v4436_v11, %v4444_v45  ;;  %v4470_v0 = vrot.slane %v4468_v52, 6  ;;  %v4473_v6 = vrot.slane %v4471_v15, 7  ;;  %v9653_v53 = vld [vmem:[#allocation4 + $0x98] ss:$0 sps:$4 sm:$0x33]  }
 0x43a   : > { %v4762_v41 = vsel %vm9868_vm11, %v4754_v35, %v12885_v63  ;;  %v5361_v51 = vrot.slane %v5359_v16, 4  ;;  %4503 = vst.msk [vmem:[#allocation4 + $0x60] sm:$0xf] %vm290_vm0, %v4445_v60  ;;  %v4455_v62 = vsel %vm10354_vm2, %v4446_v43, %v4454_v26  ;;  %v4456_v13 = vrot.slane %v4454_v26, 4  ;;  %v9635_v63 = vld [vmem:[#allocation4] ss:$12 sps:$4 sm:$0xff]   ;;  %9467 = vmatmul.mubr.msk.bf16.gmra.mxu0 %vm2071_vm14, %v9653_v53 }
 0x43b   : > { %5502 = vrot.lane.b32.xlu1 %v12858_v61, %s9720_s10  ;;  %v4948_v55 = vor.u32 %v4946_v14, %v12891_v50  ;;  %4504 = vst.msk [vmem:[#allocation4 + $0x6c] sm:$0xf] %vm290_vm0, %v4455_v62  ;;  %v4466_v61 = vrot.slane %v4464_v46, 4  ;;  %v4474_v32 = vor.u32 %v4473_v6, %v4470_v0  ;;  %v4480_v21 = vrot.slane %v4478_v5, 7  ;;  %9474 = vmatprep.mubr.msk.bf16.mxu0 %vm9723_vm8, %v14266_v34 }
 0x43c   : > { %4787 = vrot.lane.b32.xlu0 %v4762_v41, %s9721_s23  ;;  %v5168_v20 = vor.u32 %v12898_v19, %v12839_v7  ;;  %v9633_v35 = vld [vmem:[#allocation4 + $0x4] ss:$12 sps:$4 sm:$0xff]   ;;  %v4465_v16 = vsel %vm10354_vm2, %v4456_v13, %v4464_v46  ;;  %v5358_v49 = vsel %vm9911_vm13, %v5353_v39, %v12880_v24  ;;  %v4941_v14 = vrot.slane %v12778_v40, 4  ;;  %v5175_v50 = vpop.permute.xlu0 %5174 }
 0x43d   : > { %4505 = vst.msk [vmem:[#allocation4 + $0x78] sm:$0xf] %vm290_vm0, %v4465_v16  ;;  %v4475_v44 = vsel %vm10354_vm2, %v4466_v61, %v4474_v32  ;;  %v4476_v10 = vrot.slane %v4474_v32, 4  ;;  %v4957_v7 = vpop.permute.xlu1 %4956  ;;  %v5362_v19 = vor.u32 %v5361_v51, %v12880_v24  ;;  %6032 = vmatprep.mubr.bf16.mxu1 %v9633_v35  ;;  %v14296_v29 = vrot.slane %v12792_v22, 5 }
 0x43e   : > { %5211 = vst.msk [vmem:[#allocation4 + $0x1c] sm:$0xf] %vm691_vm3, %v5175_v50  ;;  %v4949_v40 = vsel %vm9868_vm11, %v4941_v14, %v4948_v55  ;;  %6033 = vmatmul.mubr.bf16.vlgmr.msra.gmra.mxu1 %v9635_v63  ;;  %v5169_v59 = vrot.slane %v5168_v20, 4  ;;  %v7599_v4 = vshrl.u32 %v7478_v37, 16  ;;  %v7602_v11 = vshll.u32 %v7478_v37, 16 }
 0x43f   : > { %5386 = vrot.lane.b32.xlu1 %v5358_v49, %s9721_s23  ;;  %4506 = vst.msk [vmem:[#allocation4 + $0x84] sm:$0xf] %vm290_vm0, %v4475_v44  ;;  %v4481_v28 = vsel %vm10354_vm2, %v4476_v10, %v4480_v21  ;;  %v5363_v24 = vrot.slane %v5362_v19, 4  ;;  %v5479_v48 = vrot.slane %v14296_v29, 4 }
 0x440   : > { %4992 = vst.msk [vmem:[#allocation4 + $0x24] sm:$0xf] %vm1072_vm10, %v4957_v7  ;;  %4974 = vrot.lane.b32.xlu0 %v4949_v40, %s9720_s10  ;;  %v5485_v54 = vpop.permute.xlu0 %5484  ;;  %v7601_v52 = vrot.slane %v7599_v4, 5  ;;  %v7604_v15 = vrot.slane %v7602_v11, 6 }
 0x441   : > { %4507 = vst.msk [vmem:[#allocation4 + $0x90] sm:$0x3] %vm307_vm1, %v4481_v28  ;;  %v4587_v18 = vpop.permute.xlu1 %4586 }
 0x442   : > { %4620 = vst.msk [vmem:[#allocation4 + $0x3c] sm:$0xf] %vm691_vm3, %v4587_v18  ;;  %v12974_v26 = vor.u32 %v7604_v15, %v7601_v52 }
 0x443   : > { %5194 = vrot.lane.b32.xlu1 %v5169_v59, %s9719_s7 }
 0x444   : > { %v7607_v46 = vrot.slane %v12974_v26, 4 }
 0x445   : > { %v4772_v45 = vpop.permute.xlu0 %4771 }
 0x446   : > { %4806 = vst.msk [vmem:[#allocation4 + $0x30] sm:$0xf] %vm883_vm4, %v4772_v45 }
 0x447   : > { %5388 = vrot.lane.b32.xlu1 %v5363_v24, %s9721_s23  ;;  %v5177_v1 = vpop.permute.xlu1 %5176  ;;  %7633 = vst.msk [vmem:[#allocation4 + $0x98] sm:$0x3] %vm307_vm1, %v7607_v46  ;;  %v9638_v55 = vld [vmem:[#allocation4 + $0x18] ss:$12 sps:$4 sm:$0xff]  }
 0x448   : > { %5212 = vst.msk [vmem:[#allocation4 + $0x28] sm:$0xf] %vm691_vm3, %v5177_v1 }
 0x44b   : > { %5504 = vrot.lane.b32.xlu1 %v5479_v48, %s9720_s10  ;;  %v5369_v22 = vpop.permute.xlu0 %5368  ;;  %v5487_v43 = vpop.permute.xlu1 %5486 }
 0x44c   : > { %5405 = vst.msk [vmem:[#allocation4 + $0x1c] sm:$0xf] %vm883_vm4, %v5369_v22  ;;  %v6442_v22 = vld [vmem:[#allocation3] sm:$0x8] }
 0x44d   : > { %5521 = vst.msk [vmem:[#allocation4 + $0x1c] sm:$0xf] %vm1072_vm10, %v5485_v54 }
 0x44f   : > { %v4959_v5 = vpop.permute.xlu0 %4958 }
 0x450   : > { %4993 = vst.msk [vmem:[#allocation4 + $0x30] sm:$0xf] %vm1072_vm10, %v4959_v5  ;;  %v4774_v39 = vpop.permute.xlu1 %4773  ;;  %v8839_v5 = vrot.slane %v6442_v22, 11 }
 0x451   : > { %4807 = vst.msk [vmem:[#allocation4 + $0x3c] sm:$0xf] %vm883_vm4, %v4774_v39 }
 0x453   : > { %v4589_v60 = vpop.permute.xlu0 %4588 }
 0x454   : > { %4621 = vst.msk [vmem:[#allocation4 + $0x48] sm:$0xf] %vm691_vm3, %v4589_v60 }
 0x455   : > { %v5371_v0 = vpop.permute.xlu1 %5370 }
 0x456   : > { %5406 = vst.msk [vmem:[#allocation4 + $0x28] sm:$0xf] %vm883_vm4, %v5371_v0 }
 0x457   : > { %5522 = vst.msk [vmem:[#allocation4 + $0x28] sm:$0xf] %vm1072_vm10, %v5487_v43  ;;  %v13013_v43 = vld [vmem:[#allocation3 + $0x4] sm:$0xf] }
 0x458   : > { %v6472_v39 = vrot.slane %v13013_v43, 7 }
 0x459   : > { %v5179_v6 = vpop.permute.xlu0 %5178  ;;  %v4961_v41 = vpop.permute.xlu1 %4960 }
 0x45a   : > { %5213 = vst.msk [vmem:[#allocation4 + $0x34] sm:$0xf] %vm691_vm3, %v5179_v6  ;;  %v6473_v6 = vsel %vm9813_vm7, %v8839_v5, %v6472_v39 }
 0x45b   : > { %4994 = vst.msk [vmem:[#allocation4 + $0x3c] sm:$0xf] %vm1072_vm10, %v4961_v41  ;;  %6510 = vrot.lane.b32.xlu0 %v6473_v6, %s9719_s7 }
 0x45d   : > { %v5489_v51 = vpop.permute.xlu0 %5488  ;;  %v4591_v62 = vpop.permute.xlu1 %4590 }
 0x45e   : > { %4622 = vst.msk [vmem:[#allocation4 + $0x54] sm:$0xf] %vm691_vm3, %v4591_v62  ;;  %v9636_v13 = vld [vmem:[#allocation4 + $0x1c] ss:$12 sps:$4 sm:$0xff]  }
 0x45f   : > { %6040 = vmatprep.mubr.bf16.mxu1 %v9636_v13 }
 0x460   : > { %6041 = vmatmul.mubr.bf16.gmra.mxu1 %v9638_v55 }
 0x461   : > { %v4776_v61 = vpop.permute.xlu0 %4775 }
 0x462   : > { %4808 = vst.msk [vmem:[#allocation4 + $0x48] sm:$0xf] %vm883_vm4, %v4776_v61  ;;  %v9641_v19 = vld [vmem:[#allocation4 + $0x30] ss:$12 sps:$4 sm:$0xff]  }
 0x464   : > { %v5181_v32 = vpop.permute.xlu1 %5180 }
 0x465   : > { %5214 = vst.msk [vmem:[#allocation4 + $0x40] sm:$0xf] %vm691_vm3, %v5181_v32 }
 0x466   : > { %v5373_v21 = vpop.permute.xlu0 %5372 }
 0x467   : > { %5407 = vst.msk [vmem:[#allocation4 + $0x34] sm:$0xf] %vm883_vm4, %v5373_v21 }
 0x468   : > { %5523 = vst.msk [vmem:[#allocation4 + $0x34] sm:$0xf] %vm1072_vm10, %v5489_v51  ;;  %v5491_v20 = vpop.permute.xlu1 %5490 }
 0x46a   : > { %v4963_v35 = vpop.permute.xlu0 %4962 }
 0x46b   : > { %4995 = vst.msk [vmem:[#allocation4 + $0x48] sm:$0xf] %vm1072_vm10, %v4963_v35 }
 0x46c   : > { %v4778_v63 = vpop.permute.xlu1 %4777 }
 0x46d   : > { %4809 = vst.msk [vmem:[#allocation4 + $0x54] sm:$0xf] %vm883_vm4, %v4778_v63 }
 0x46e   : > { %v4593_v16 = vpop.permute.xlu0 %4592 }
 0x46f   : > { %4623 = vst.msk [vmem:[#allocation4 + $0x60] sm:$0xf] %vm691_vm3, %v4593_v16 }
 0x471   : > { %v5375_v49 = vpop.permute.xlu1 %5374 }
 0x472   : > { %5408 = vst.msk [vmem:[#allocation4 + $0x40] sm:$0xf] %vm883_vm4, %v5375_v49  ;;  %v5183_v14 = vpop.permute.xlu0 %5182  ;;  %v6562_v49 = vld [vmem:[#allocation3] sm:$0x8] }
 0x473   : > { %5524 = vst.msk [vmem:[#allocation4 + $0x40] sm:$0xf] %vm1072_vm10, %v5491_v20 }
 0x474   : > { %5215 = vst.msk [vmem:[#allocation4 + $0x4c] sm:$0xf] %vm691_vm3, %v5183_v14  ;;  %v6563_v14 = vld [vmem:[#allocation3 + $0x4] sm:$0xf] }
 0x475   : > { %v4965_v50 = vpop.permute.xlu1 %4964 }
 0x476   : > { %4996 = vst.msk [vmem:[#allocation4 + $0x54] sm:$0xf] %vm1072_vm10, %v4965_v50  ;;  %v5493_v44 = vpop.permute.xlu0 %5492  ;;  %v6577_v50 = vshrl.u32 %v6562_v49, 16 }
 0x479   : > { %v4595_v10 = vpop.permute.xlu1 %4594 }
 0x47a   : > { %4624 = vst.msk [vmem:[#allocation4 + $0x6c] sm:$0xf] %vm691_vm3, %v4595_v10  ;;  %v9639_v7 = vld [vmem:[#allocation4 + $0x34] ss:$12 sps:$4 sm:$0xff]   ;;  %v4780_v40 = vpop.permute.xlu0 %4779  ;;  %v6585_v10 = vshll.u32 %v6563_v14, 16 }
 0x47b   : > { %4810 = vst.msk [vmem:[#allocation4 + $0x60] sm:$0xf] %vm883_vm4, %v4780_v40  ;;  %6048 = vmatprep.mubr.bf16.mxu1 %v9639_v7 }
 0x47c   : > { %6049 = vmatmul.mubr.bf16.gmra.mxu1 %v9641_v19  ;;  %v8840_v19 = vrot.slane %v6577_v50, 11 }
 0x47d   : > { %v5185_v28 = vpop.permute.xlu1 %5184  ;;  %v9644_v52 = vld [vmem:[#allocation4 + $0x48] ss:$12 sps:$4 sm:$0xff]  }
 0x47e   : > { %5216 = vst.msk [vmem:[#allocation4 + $0x58] sm:$0xf] %vm691_vm3, %v5185_v28  ;;  %v5377_v59 = vpop.permute.xlu0 %5376 }
 0x47f   : > { %5409 = vst.msk [vmem:[#allocation4 + $0x4c] sm:$0xf] %vm883_vm4, %v5377_v59 }
 0x480   : > { %5525 = vst.msk [vmem:[#allocation4 + $0x4c] sm:$0xf] %vm1072_vm10, %v5493_v44  ;;  %v6582_v44 = vshrl.u32 %v6563_v14, 16 }
 0x481   : > { %v5495_v54 = vpop.permute.xlu1 %5494 }
 0x482   : > { %v4967_v24 = vpop.permute.xlu0 %4966  ;;  %v13037_v40 = vrot.slane %v6582_v44, 7 }
 0x483   : > { %4997 = vst.msk [vmem:[#allocation4 + $0x60] sm:$0xf] %vm1072_vm10, %v4967_v24 }
 0x485   : > { %v4782_v18 = vpop.permute.xlu1 %4781 }
 0x486   : > { %4811 = vst.msk [vmem:[#allocation4 + $0x6c] sm:$0xf] %vm883_vm4, %v4782_v18  ;;  %v4597_v29 = vpop.permute.xlu0 %4596 }
 0x487   : > { %4625 = vst.msk [vmem:[#allocation4 + $0x78] sm:$0xf] %vm691_vm3, %v4597_v29 }
 0x489   : > { %v5379_v48 = vpop.permute.xlu1 %5378 }
 0x48a   : > { %5410 = vst.msk [vmem:[#allocation4 + $0x58] sm:$0xf] %vm883_vm4, %v5379_v48  ;;  %v5187_v45 = vpop.permute.xlu0 %5186 }
 0x48b   : > { %5526 = vst.msk [vmem:[#allocation4 + $0x58] sm:$0xf] %vm1072_vm10, %v5495_v54  ;;  %v6587_v54 = vor.u32 %v6585_v10, %v13037_v40 }
 0x48c   : > { %5217 = vst.msk [vmem:[#allocation4 + $0x64] sm:$0xf] %vm691_vm3, %v5187_v45 }
 0x48d   : > { %v4969_v1 = vpop.permute.xlu1 %4968  ;;  %v6588_v45 = vsel %vm9868_vm11, %v8840_v19, %v6587_v54  ;;  %v9654_v19 = vld [vmem:[%s14169_s2 + $0x238] sm:$0xff]  }
 0x48e   : > { %4998 = vst.msk [vmem:[#allocation4 + $0x6c] sm:$0xf] %vm1072_vm10, %v4969_v1  ;;  %v5497_v53 = vpop.permute.xlu0 %5496  ;;  %6697 = vrot.lane.b32.xlu0 %v6588_v45, %s9721_s23  ;;  %9471 = vmatpush3.bf16.msra.mxu0 %v9654_v19 }
 0x48f   : > { %v13010_v4 = vpop.f32.mrf.mxu0  ;;  %9472 = vmatprep.subr.bf16.mxu0 %v14266_v34 }
 0x491   : > { %v4599_v37 = vpop.permute.xlu1 %4598  ;;  %v9444_v46 = vpop.f32.mrf.mxu0 }
 0x492   : > { %4626 = vst.msk [vmem:[#allocation4 + $0x84] sm:$0xf] %vm691_vm3, %v4599_v37  ;;  %v9642_v11 = vld [vmem:[#allocation4 + $0x4c] ss:$12 sps:$4 sm:$0xff]   ;;  %v4784_v15 = vpop.permute.xlu0 %4783 }
 0x493   : > { %4812 = vst.msk [vmem:[#allocation4 + $0x78] sm:$0xf] %vm883_vm4, %v4784_v15  ;;  %6056 = vmatprep.mubr.bf16.mxu1 %v9642_v11  ;;  %v13017_v0 = vpop.f32.mrf.mxu0 }
 0x494   : > { %6057 = vmatmul.mubr.bf16.gmra.mxu1 %v9644_v52 }
 0x495   : > { %v5189_v60 = vpop.permute.xlu1 %5188  ;;  %v9445_v51 = vpop.f32.mrf.mxu0  ;;  %v9647_v48 = vld [vmem:[#allocation4 + $0x60] ss:$12 sps:$4 sm:$0xff]  }
 0x496   : > { %5218 = vst.msk [vmem:[#allocation4 + $0x70] sm:$0xf] %vm691_vm3, %v5189_v60  ;;  %v5381_v41 = vpop.permute.xlu0 %5380 }
 0x497   : > { %5411 = vst.msk [vmem:[#allocation4 + $0x64] sm:$0xf] %vm883_vm4, %v5381_v41 }
 0x498   : > { %5527 = vst.msk [vmem:[#allocation4 + $0x64] sm:$0xf] %vm1072_vm10, %v5497_v53 }
 0x499   : > { %v5499_v62 = vpop.permute.xlu1 %5498 }
 0x49a   : > { %v4971_v13 = vpop.permute.xlu0 %4970  ;;  %v13028_v55 = vpop.f32.mrf.mxu0 }
 0x49b   : > { %4999 = vst.msk [vmem:[#allocation4 + $0x78] sm:$0xf] %vm1072_vm10, %v4971_v13 }
 0x49c   : > { %v9448_v32 = vpop.f32.mrf.mxu0 }
 0x49d   : > { %v4786_v61 = vpop.permute.xlu1 %4785 }
 0x49e   : > { %4813 = vst.msk [vmem:[#allocation4 + $0x84] sm:$0xf] %vm883_vm4, %v4786_v61  ;;  %v5191_v21 = vpop.permute.xlu0 %5190  ;;  %v13032_v20 = vpop.f32.mrf.mxu0 }
 0x49f   : > { %5219 = vst.msk [vmem:[#allocation4 + $0x7c] sm:$0xf] %vm691_vm3, %v5191_v21 }
 0x4a0   : > { %v9449_v63 = vpop.f32.mrf.mxu0 }
 0x4a1   : > { %v5383_v35 = vpop.permute.xlu1 %5382 }
 0x4a2   : > { %5412 = vst.msk [vmem:[#allocation4 + $0x70] sm:$0xf] %vm883_vm4, %v5383_v35  ;;  %v5501_v16 = vpop.permute.xlu0 %5500 }
 0x4a3   : > { %5528 = vst.msk [vmem:[#allocation4 + $0x70] sm:$0xf] %vm1072_vm10, %v5499_v62 }
 0x4a4   : > { %v13039_v28 = vpop.f32.mrf.mxu0 }
 0x4a5   : > { %v4973_v7 = vpop.permute.xlu1 %4972 }
 0x4a6   : > { %5000 = vst.msk [vmem:[#allocation4 + $0x84] sm:$0xf] %vm1072_vm10, %v4973_v7  ;;  %v5385_v59 = vpop.permute.xlu0 %5384  ;;  %v9452_v24 = vpop.f32.mrf.mxu0 }
 0x4a7   : > { %5413 = vst.msk [vmem:[#allocation4 + $0x7c] sm:$0xf] %vm883_vm4, %v5385_v59  ;;  %v9655_v59 = vld [vmem:[%s14169_s2 + $0x230] sm:$0xff]   ;;  %v13080_v24 = vld [vmem:[%s14170_s3 + $0x2] ss:$0 sm:$0xff] }
 0x4a8   : > { %5529 = vst.msk [vmem:[#allocation4 + $0x7c] sm:$0xf] %vm1072_vm10, %v5501_v16  ;;  %v13047_v1 = vpop.f32.mrf.mxu0  ;;  %9473 = vmatpush3.bf16.msra.mxu0 %v9655_v59  ;;  %v6589_v59 = vrot.slane %v13037_v40, 4 }
 0x4a9   : > { %v5193_v18 = vpop.permute.xlu1 %5192 }
 0x4aa   : > { %5220 = vst.msk [vmem:[#allocation4 + $0x88] sm:$0xf] %vm691_vm3, %v5193_v18  ;;  %v9645_v29 = vld [vmem:[#allocation4 + $0x64] ss:$12 sps:$4 sm:$0xff]   ;;  %v4601_v53 = vpop.permute.xlu0 %4600  ;;  %v9453_v37 = vpop.f32.mrf.mxu0 }
 0x4ab   : > { %4627 = vst.msk [vmem:[#allocation4 + $0x90] sm:$0x3] %vm704_vm15, %v4601_v53  ;;  %6064 = vmatprep.mubr.bf16.mxu1 %v9645_v29 }
 0x4ac   : > { %6065 = vmatmul.mubr.bf16.gmra.mxu1 %v9647_v48 }
 0x4ad   : > { %v5503_v11 = vpop.permute.xlu1 %5502  ;;  %v9650_v61 = vld [vmem:[#allocation4 + $0x78] ss:$12 sps:$4 sm:$0xff]  }
 0x4ae   : > { %v4788_v52 = vpop.permute.xlu0 %4787  ;;  %v13051_v15 = vpop.f32.mrf.mxu0 }
 0x4af   : > { %4814 = vst.msk [vmem:[#allocation4 + $0x90] sm:$0x3] %vm896_vm5, %v4788_v52 }
 0x4b0   : > { %v9456_v46 = vpop.f32.mrf.mxu0 }
 0x4b1   : > { %v5387_v22 = vpop.permute.xlu1 %5386 }
 0x4b2   : > { %5414 = vst.msk [vmem:[#allocation4 + $0x88] sm:$0xf] %vm883_vm4, %v5387_v22  ;;  %v4975_v5 = vpop.permute.xlu0 %4974  ;;  %v13056_v60 = vpop.f32.mrf.mxu0 }
 0x4b3   : > { %5530 = vst.msk [vmem:[#allocation4 + $0x88] sm:$0xf] %vm1072_vm10, %v5503_v11 }
 0x4b4   : > { %5001 = vst.msk [vmem:[#allocation4 + $0x90] sm:$0x3] %vm1085_vm6, %v4975_v5  ;;  %v9457_v41 = vpop.f32.mrf.mxu0 }
 0x4b5   : > { %v5195_v6 = vpop.permute.xlu1 %5194 }
 0x4b6   : > { %5221 = vst.msk [vmem:[#allocation4 + $0x94] sm:$0x3] %vm704_vm15, %v5195_v6 }
 0x4b8   : > { %v13060_v51 = vpop.f32.mrf.mxu0 }
 0x4b9   : > { %v5389_v62 = vpop.permute.xlu1 %5388 }
 0x4ba   : > { %5415 = vst.msk [vmem:[#allocation4 + $0x94] sm:$0x3] %vm896_vm5, %v5389_v62  ;;  %v9648_v13 = vld [vmem:[#allocation4 + $0x7c] ss:$12 sps:$4 sm:$0xff]   ;;  %v9460_v32 = vpop.f32.mrf.mxu0 }
 0x4bb   : > { %6072 = vmatprep.mubr.bf16.mxu1 %v9648_v13  ;;  %v6749_v32 = vld [vmem:[#allocation3 + $0x4] sm:$0x8] }
 0x4bc   : > { %v13063_v21 = vpop.f32.mrf.mxu0  ;;  %6073 = vmatmul.mubr.bf16.gmra.mxu1 %v9650_v61 }
 0x4bd   : > { %v5505_v35 = vpop.permute.xlu1 %5504 }
 0x4be   : > { %5531 = vst.msk [vmem:[#allocation4 + $0x94] sm:$0x3] %vm1085_vm6, %v5505_v35  ;;  %v9461_v63 = vpop.f32.mrf.mxu0 }
 0x4c1   : > { %v13066_v16 = vpop.f32.mrf.mxu0 }
 0x4c3   : > { %v9464_v49 = vpop.f32.mrf.mxu0 }
 0x4c4   : > { %v6474_v49 = vrot.slane %v6472_v39, 4 }
 0x4c5   : > { %v5724_v14 = vld [vmem:[#allocation4 + $0x90] sm:$0x33]  ;;  %v13068_v50 = vpop.f32.mrf.mxu0 }
 0x4c6   : > { %v8799_v44 = vcombine.high %v5724_v14, %v5724_v14  ;;  %v8798_v10 = vcombine.low %v5724_v14, %v5724_v14 }
 0x4c7   : > { %v9465_v7 = vpop.f32.mrf.mxu0 }
 0x4c8   : > { %6080 = vmatprep.mubr.bf16.mxu1 %v8799_v44 }
 0x4c9   : > { %6081 = vmatmul.mubr.bf16.gmra.mxu1 %v8798_v10 }
 0x4fa   : > { %v13089_v13 = vpop.f32.mrf.mxu0 }
 0x4fc   : > { %v9468_v35 = vpop.f32.mrf.mxu0 }
 0x4fe   : > { %v9247_v54 = vpop.f32.mrf.mxu1  ;;  %v6173_v63 = vpop.f32.mrf.mxu0 }
 0x500   : > { %v9248_v18 = vpop.f32.mrf.mxu1  ;;  %v9469_v10 = vpop.f32.mrf.mxu0 }
 0x501   : > { %v9249_v29 = vadd.f32 %v9248_v18, %v9247_v54 }
 0x502   : > { %v9250_v48 = vpop.f32.mrf.mxu1 }
 0x503   : > { %v6035_v45 = vadd.f32 %v9249_v29, %v13080_v24 }
 0x504   : > { %v9251_v53 = vpop.f32.mrf.mxu1 }
 0x505   : > { %v6123_v37 = vadd.f32 %v13010_v4, %v6035_v45  ;;  %v9252_v11 = vadd.f32 %v9251_v53, %v9250_v48  ;;  %v6764_v4 = vshrl.u32 %v6749_v32, 16 }
 0x507   : > { %v6176_v52 = vmax.f32 %v6123_v37, 0.0  ;;  %v6038_v22 = vadd.f32 %v9252_v11, %v13080_v24  ;;  %v8841_v29 = vrot.slane %v6764_v4, 11  ;;  %v6269_v37 = vld [vmem:[#allocation3 + $0x4] sm:$0xf] }
 0x508   : > { %v6295_v35 = vshll.u32 %v6269_v37, 16 }
 0x509   : > { %v6189_v46 = vmul.f32 %v6176_v52, %v10981_v8  ;;  %v6126_v5 = vadd.f32 %v13017_v0, %v6038_v22 }
 0x50b   : > { %v8998_v6 = vpack.c.bf16 %v6189_v46, %v6189_v46  ;;  %v6177_v41 = vmax.f32 %v6126_v5, 0.0 }
 0x50d   : > { %6255 = vst.msk [vmem:[#allocation3 + $0x8] sm:$0xf] %vm290_vm0, %v8998_v6  ;;  %v6190_v62 = vmul.f32 %v6177_v41, %v10989_v56  ;;  %v6292_v41 = vshrl.u32 %v6269_v37, 16 }
 0x50f   : > { %v8999_v61 = vpack.c.bf16 %v6190_v62, %v6190_v62 }
 0x511   : > { %6256 = vst.msk [vmem:[#allocation3 + $0xc] sm:$0xf] %vm290_vm0, %v8999_v61 }
 0x514   : > { %v6444_v14 = vld [vmem:[#allocation3 + $0x8] sm:$0xf] }
 0x515   : > { %v6750_v0 = vld [vmem:[#allocation3 + $0x8] sm:$0xf]  ;;  %v6475_v7 = vrot.slane %v6444_v14, 7 }
 0x516   : > { %v6564_v44 = vld [vmem:[#allocation3 + $0x8] sm:$0xf]  ;;  %v6769_v19 = vshrl.u32 %v6750_v0, 16  ;;  %v6772_v48 = vshll.u32 %v6750_v0, 16 }
 0x517   : > { %v6591_v54 = vshrl.u32 %v6564_v44, 16  ;;  %v6962_v18 = vld [vmem:[#allocation3 + $0x8] sm:$0xf]  ;;  %v6476_v11 = vsel %vm9813_vm7, %v6474_v49, %v6475_v7  ;;  %v6594_v52 = vshll.u32 %v6564_v44, 16 }
 0x518   : > { %v6976_v45 = vshrl.u32 %v6962_v18, 16  ;;  %v6979_v53 = vshll.u32 %v6962_v18, 16  ;;  %v6771_v43 = vrot.slane %v6769_v19, 7  ;;  %6512 = vrot.lane.b32.xlu1 %v6476_v11, %s9719_s7  ;;  %v13100_v22 = vld [vmem:[#allocation3 + $0xc] sm:$0xf] }
 0x519   : > { %v13097_v39 = vrot.slane %v6591_v54, 7  ;;  %v6751_v46 = vld [vmem:[#allocation3 + $0xc] sm:$0xf]  ;;  %v14213_v49 = vrot.slane %v13100_v22, 7  ;;  %v6936_v19 = vld [vmem:[#allocation3 + $0x8] sm:$0xf] }
 0x51a   : > { %v13102_v40 = vld [vmem:[#allocation3 + $0xc] sm:$0xf]  ;;  %v6774_v5 = vor.u32 %v6772_v48, %v6771_v43  ;;  %v6778_v62 = vshrl.u32 %v6751_v46, 16  ;;  %v6978_v61 = vrot.slane %v6976_v45, 4  ;;  %v6981_v32 = vrot.slane %v6979_v53, 5 }
 0x51b   : > { %v6596_v6 = vor.u32 %v6594_v52, %v13097_v39  ;;  %v6985_v14 = vshll.u32 %v13102_v40, 16  ;;  %v6781_v44 = vshll.u32 %v6751_v46, 16  ;;  %v6477_v54 = vrot.slane %v6475_v7, 4  ;;  %6949 = vst.msk [vmem:[#allocation4 + $0x4] sm:$0xf] %vm290_vm0, %v6936_v19 }
 0x51c   : > { %v6775_v4 = vsel %vm9868_vm11, %v8841_v29, %v6774_v5  ;;  %v13113_v0 = vrot.slane %v6778_v62, 7  ;;  %v6982_v10 = vor.u32 %v6981_v32, %v6978_v61  ;;  %v6937_v18 = vld [vmem:[#allocation3 + $0xc] sm:$0xf]  ;;  %v6776_v29 = vrot.slane %v6771_v43, 4  ;;  %v6268_v52 = vld [vmem:[#allocation3] sm:$0xc] }
 0x51d   : > { %v6597_v63 = vsel %vm9868_vm11, %v6589_v59, %v6596_v6  ;;  %6884 = vrot.lane.b32.xlu0 %v6775_v4, %s9720_s10  ;;  %v6294_v48 = vrot.slane %v6292_v41, 6  ;;  %v6297_v45 = vrot.slane %v6295_v35, 7  ;;  %6950 = vst.msk [vmem:[#allocation4 + $0x10] sm:$0xf] %vm290_vm0, %v6937_v18  ;;  %v6479_v53 = vsel %vm9813_vm7, %v6477_v54, %v14213_v49  ;;  %v6270_v43 = vld [vmem:[#allocation3 + $0x8] sm:$0xf] }
 0x51e   : > { %6699 = vrot.lane.b32.xlu1 %v6597_v63, %s9721_s23  ;;  %v6783_v59 = vor.u32 %v6781_v44, %v13113_v0  ;;  %v6983_v37 = vrot.slane %v6982_v10, 4  ;;  %v13122_v11 = vrot.slane %v6985_v14, 5  ;;  %v6283_v5 = vshrl.u32 %v6268_v52, 16  ;;  %v6271_v41 = vld [vmem:[#allocation3 + $0xc] sm:$0xf] }
 0x51f   : > { %v6298_v6 = vor.u32 %v6297_v45, %v6294_v48  ;;  %v6286_v32 = vshll.u32 %v6268_v52, 16  ;;  %v6302_v35 = vshrl.u32 %v6270_v43, 16  ;;  %v6305_v14 = vshll.u32 %v6270_v43, 16 }
 0x520   : > { %v6784_v7 = vsel %vm9868_vm11, %v6776_v29, %v6783_v59  ;;  %v9253_v46 = vpop.f32.mrf.mxu1  ;;  %v6988_v61 = vsel %vm9911_vm13, %v6983_v37, %v13122_v11  ;;  %v6285_v63 = vrot.slane %v6283_v5, 6  ;;  %v6312_v54 = vshrl.u32 %v6271_v41, 16 }
 0x521   : > { %6514 = vrot.lane.b32.xlu0 %v6479_v53, %s9719_s7  ;;  %v6288_v10 = vrot.slane %v6286_v32, 7  ;;  %v6304_v19 = vrot.slane %v6302_v35, 6  ;;  %v6300_v29 = vrot.slane %v6298_v6, 4  ;;  %v6307_v59 = vrot.slane %v6305_v14, 7  ;;  %v6565_v14 = vld [vmem:[#allocation3 + $0xc] sm:$0xf] }
 0x522   : > { %6886 = vrot.lane.b32.xlu1 %v6784_v7, %s9720_s10  ;;  %v9254_v62 = vpop.f32.mrf.mxu1  ;;  %v6315_v48 = vshll.u32 %v6271_v41, 16  ;;  %v6511_v7 = vpop.permute.xlu0 %6510  ;;  %v6314_v37 = vrot.slane %v6312_v54, 6  ;;  %v6989_v35 = vshrl.u32 %v13102_v40, 16 }
 0x523   : > { %v9255_v4 = vadd.f32 %v9254_v62, %v9253_v46  ;;  %v6289_v53 = vor.u32 %v6288_v10, %v6285_v63  ;;  %v6308_v62 = vor.u32 %v6307_v59, %v6304_v19 }
 0x524   : > { %v9256_v44 = vpop.f32.mrf.mxu1  ;;  %v6317_v43 = vrot.slane %v6315_v48, 7 }
 0x525   : > { %7104 = vrot.lane.b32.xlu0 %v6988_v61, %s9719_s7  ;;  %v6043_v18 = vadd.f32 %v9255_v4, %v13080_v24  ;;  %v7156_v61 = vld [vmem:[#allocation3 + $0xc] sm:$0xf]  ;;  %v6290_v5 = vrot.slane %v6289_v53, 4  ;;  %v6309_v41 = vsel %vm10354_vm2, %v6300_v29, %v6308_v62  ;;  %v6600_v53 = vshrl.u32 %v6565_v14, 16 }
 0x526   : > { %v9257_v45 = vpop.f32.mrf.mxu1  ;;  %v7466_v4 = vld [vmem:[#allocation3 + $0xc] sm:$0xe]  ;;  %6430 = vst.msk [vmem:[#allocation4 + $0xc] sm:$0xf] %vm290_vm0, %v6309_v41  ;;  %v7170_v54 = vshrl.u32 %v7156_v61, 16  ;;  %v6698_v29 = vpop.permute.xlu0 %6697 }
 0x527   : > { %v6131_v52 = vadd.f32 %v13028_v55, %v6043_v18  ;;  %v9258_v46 = vadd.f32 %v9257_v45, %v9256_v44  ;;  %v6299_v63 = vsel %vm10354_vm2, %v6290_v5, %v6298_v6  ;;  %v13141_v55 = vor.u32 %v6317_v43, %v6314_v37 }
 0x528   : > { %v6310_v44 = vrot.slane %v6308_v62, 4  ;;  %v7173_v18 = vshll.u32 %v7156_v61, 16  ;;  %6429 = vst.msk [vmem:[#allocation4] sm:$0xf] %vm290_vm0, %v6299_v63  ;;  %v7480_v40 = vshrl.u32 %v7466_v4, 16  ;;  %v7483_v59 = vshll.u32 %v7466_v4, 16 }
 0x529   : > { %v6178_v49 = vmax.f32 %v6131_v52, 0.0  ;;  %v6046_v32 = vadd.f32 %v9258_v46, %v13080_v24  ;;  %6549 = vst.msk [vmem:[#allocation4] sm:$0xf] %vm691_vm3, %v6511_v7  ;;  %v6991_v37 = vrot.slane %v6989_v35, 4  ;;  %v7172_v52 = vrot.slane %v7170_v54, 4  ;;  %v9663_v62 = vld [vmem:[%s14169_s2 + $0x220] sm:$0xff]  }
 0x52a   : > { %v6319_v6 = vsel %vm10354_vm2, %v6310_v44, %v13141_v55  ;;  %6736 = vst.msk [vmem:[#allocation4] sm:$0xf] %vm883_vm4, %v6698_v29  ;;  %v7175_v46 = vrot.slane %v7173_v18, 5  ;;  %v7482_v61 = vrot.slane %v7480_v40, 5  ;;  %v7485_v5 = vrot.slane %v7483_v59, 6 }
 0x52b   : > { %v6191_v10 = vmul.f32 %v6178_v49, %v10995_v33  ;;  %v6134_v19 = vadd.f32 %v13032_v20, %v6046_v32  ;;  %6431 = vst.msk [vmem:[#allocation4 + $0x18] sm:$0xf] %vm290_vm0, %v6319_v6  ;;  %v9661_v20 = vld [vmem:[%s14169_s2 + $0x228] sm:$0xff]   ;;  %v7350_v32 = vld [vmem:[#allocation3 + $0xc] sm:$0xe]  ;;  %v13163_v35 = vrot.slane %v6600_v53, 7  ;;  %v6992_v4 = vor.u32 %v6991_v37, %v13122_v11 }
 0x52c   : > { %v9662_v49 = vld [vmem:[%s14169_s2 + $0x1e8] sm:$0xff]   ;;  %9298 = vmatprep.subr.bf16.mxu1 %v9661_v20  ;;  %v7176_v41 = vor.u32 %v7175_v46, %v7172_v52  ;;  %v8842_v63 = vrot.slane %v7350_v32, 9  ;;  %v14297_v44 = vrot.slane %v13100_v22, 7  ;;  %v7486_v54 = vor.u32 %v7485_v5, %v7482_v61 }
 0x52d   : > { %v9000_v48 = vpack.c.bf16 %v6191_v10, %v6191_v10  ;;  %v6179_v45 = vmax.f32 %v6134_v19, 0.0  ;;  %9299 = vmatpush3.bf16.msra.mxu1 %v9662_v49  ;;  %v6603_v19 = vshll.u32 %v6565_v14, 16  ;;  %v6598_v18 = vrot.slane %v13097_v39, 4 }
 0x52e   : > { %9300 = vmatprep.subr.bf16.mxu1 %v9663_v62  ;;  %v6480_v10 = vrot.slane %v14297_v44, 4  ;;  %v6993_v40 = vrot.slane %v6992_v4, 4  ;;  %v13176_v14 = vrot.slane %v7176_v41, 4  ;;  %v13178_v52 = vrot.slane %v7486_v54, 4 }
 0x52f   : > { %6257 = vst.msk [vmem:[#allocation3 + $0x10] sm:$0xf] %vm290_vm0, %v9000_v48  ;;  %v6192_v7 = vmul.f32 %v6179_v45, %v10983_v31  ;;  %v6605_v48 = vor.u32 %v6603_v19, %v13163_v35 }
 0x531   : > { %v9001_v43 = vpack.c.bf16 %v6192_v7, %v6192_v7 }
 0x533   : > { %6258 = vst.msk [vmem:[#allocation3 + $0x14] sm:$0xf] %vm290_vm0, %v9001_v43 }
 0x536   : > { %v7351_v6 = vld [vmem:[#allocation3 + $0x10] sm:$0xf] }
 0x537   : > { %v6446_v11 = vld [vmem:[#allocation3 + $0x10] sm:$0xf]  ;;  %v7378_v53 = vrot.slane %v7351_v6, 5 }
 0x538   : > { %v13173_v45 = vld [vmem:[#allocation3 + $0x10] sm:$0xf]  ;;  %v6481_v37 = vrot.slane %v6446_v11, 7 }
 0x539   : > { %v6995_v22 = vshll.u32 %v13173_v45, 16  ;;  %v7157_v20 = vld [vmem:[#allocation3 + $0x10] sm:$0xf]  ;;  %v7379_v46 = vsel %vm9829_vm9, %v8842_v63, %v7378_v53  ;;  %v6999_v32 = vshrl.u32 %v13173_v45, 16  ;;  %v7380_v54 = vrot.slane %v7378_v53, 4  ;;  %v9665_v45 = vld [vmem:[%s14169_s2 + $0x1e0] sm:$0xff]  }
 0x53a   : > { %v7179_v49 = vshll.u32 %v7157_v20, 16  ;;  %v6752_v39 = vld [vmem:[#allocation3 + $0x10] sm:$0xf]  ;;  %v6482_v62 = vsel %vm9813_vm7, %v6480_v10, %v6481_v37  ;;  %v7183_v5 = vshrl.u32 %v7157_v20, 16  ;;  %7414 = vrot.lane.b32.xlu0 %v7379_v46, %s9720_s10  ;;  %v13191_v41 = vld [vmem:[#allocation3 + $0x14] sm:$0xf]  ;;  %v6606_v10 = vsel %vm9868_vm11, %v6598_v18, %v6605_v48  ;;  %9301 = vmatpush3.bf16.msra.mxu1 %v9665_v45 }
 0x53b   : > { %v6566_v7 = vld [vmem:[#allocation3 + $0x10] sm:$0xf]  ;;  %v13184_v61 = vrot.slane %v6995_v22, 5  ;;  %6516 = vrot.lane.b32.xlu1 %v6482_v62, %s9719_s7  ;;  %v6787_v44 = vshrl.u32 %v6752_v39, 16  ;;  %v6790_v11 = vshll.u32 %v6752_v39, 16  ;;  %v9666_v53 = vld [vmem:[%s14169_s2 + $0x218] sm:$0xff]  }
 0x53c   : > { %v9259_v43 = vpop.f32.mrf.mxu1  ;;  %v13189_v4 = vrot.slane %v7179_v49, 5  ;;  %v6609_v19 = vshrl.u32 %v6566_v7, 16  ;;  %v7467_v63 = vld [vmem:[#allocation3 + $0x10] sm:$0xf]  ;;  %v13196_v22 = vld [vmem:[#allocation3 + $0x14] sm:$0xf]  ;;  %9302 = vmatprep.subr.bf16.mxu1 %v9666_v53 }
 0x53d   : > { %v6998_v49 = vsel %vm9911_vm13, %v6993_v40, %v13184_v61  ;;  %v13204_v46 = vrot.slane %v6787_v44, 7  ;;  %v6612_v18 = vshll.u32 %v6566_v7, 16  ;;  %v13208_v48 = vld [vmem:[#allocation3 + $0x14] sm:$0xf]  ;;  %v13213_v29 = vrot.slane %v6481_v37, 4 }
 0x53e   : > { %v9260_v20 = vpop.f32.mrf.mxu1  ;;  %v13206_v62 = vrot.slane %v6609_v19, 7  ;;  %v7185_v59 = vrot.slane %v7183_v5, 4  ;;  %v7189_v6 = vshll.u32 %v13208_v48, 16  ;;  %v7468_v31 = vld [vmem:[#allocation3 + $0x14] sm:$0xf]  ;;  %6701 = vrot.lane.b32.xlu0 %v6606_v10, %s9721_s23  ;;  %v7182_v7 = vsel %vm9911_vm13, %v13176_v14, %v13189_v4 }
 0x53f   : > { %v9261_v39 = vadd.f32 %v9260_v20, %v9259_v43  ;;  %7106 = vrot.lane.b32.xlu1 %v6998_v49, %s9719_s7  ;;  %v14298_v44 = vrot.slane %v13191_v41, 5  ;;  %v6792_v5 = vor.u32 %v6790_v11, %v13204_v46  ;;  %v9667_v19 = vld [vmem:[%s14169_s2 + $0x1d8] sm:$0xff]   ;;  %v7489_v14 = vshrl.u32 %v7467_v63, 16 }
 0x540   : > { %v9262_v40 = vpop.f32.mrf.mxu1  ;;  %v6614_v45 = vor.u32 %v6612_v18, %v13206_v62  ;;  %v7186_v11 = vor.u32 %v7185_v59, %v13189_v4  ;;  %v7492_v43 = vshll.u32 %v7467_v63, 16  ;;  %v7499_v33 = vshrl.u32 %v7468_v31, 16  ;;  %v13240_v56 = vld [vmem:[#allocation3 + $0x14] sm:$0xf]  ;;  %9303 = vmatpush3.bf16.msra.mxu1 %v9667_v19  ;;  %v9669_v59 = vld [vmem:[%s14169_s2 + $0x1d0] sm:$0xff]  }
 0x541   : > { %v7382_v37 = vsel %vm9829_vm9, %v7380_v54, %v14298_v44  ;;  %v6051_v10 = vadd.f32 %v9261_v39, %v13080_v24  ;;  %v9668_v54 = vld [vmem:[%s14169_s2 + $0x210] sm:$0xff]   ;;  %v13238_v44 = vrot.slane %v7189_v6, 5  ;;  %v14299_v20 = vrot.slane %v13113_v0, 4 }
 0x542   : > { %v9263_v49 = vpop.f32.mrf.mxu1  ;;  %v7491_v8 = vrot.slane %v7489_v14, 5  ;;  %7298 = vrot.lane.b32.xlu0 %v7182_v7, %s9721_s23  ;;  %v7494_v4 = vrot.slane %v7492_v43, 6  ;;  %v7501_v63 = vrot.slane %v7499_v33, 5  ;;  %v7502_v6 = vshll.u32 %v7468_v31, 16  ;;  %9304 = vmatprep.subr.bf16.mxu1 %v9668_v54  ;;  %v9670_v7 = vld [vmem:[%s14169_s2 + $0x208] sm:$0xff]  }
 0x543   : > { %v6139_v39 = vadd.f32 %v13039_v28, %v6051_v10  ;;  %v9264_v18 = vadd.f32 %v9263_v49, %v9262_v40  ;;  %v6793_v53 = vsel %vm9868_vm11, %v14299_v20, %v6792_v5  ;;  %7416 = vrot.lane.b32.xlu1 %v7382_v37, %s9720_s10  ;;  %v7001_v28 = vrot.slane %v6999_v32, 4  ;;  %v6938_v40 = vld [vmem:[#allocation3 + $0x10] sm:$0xf]  ;;  %v6939_v31 = vld [vmem:[#allocation3 + $0x14] sm:$0xf] }
 0x544   : > { %v14300_v5 = vrot.slane %v13163_v35, 4  ;;  %v7005_v20 = vshll.u32 %v13240_v56, 16  ;;  %6951 = vst.msk [vmem:[#allocation4 + $0x1c] sm:$0xf] %vm290_vm0, %v6938_v40  ;;  %v7187_v33 = vrot.slane %v7186_v11, 4  ;;  %v7495_v32 = vor.u32 %v7494_v4, %v7491_v8  ;;  %9305 = vmatpush3.bf16.msra.mxu1 %v9669_v59  ;;  %v9671_v11 = vld [vmem:[%s14169_s2 + $0x1c8] sm:$0xff]  }
 0x545   : > { %v6180_v10 = vmax.f32 %v6139_v39, 0.0  ;;  %v6054_v0 = vadd.f32 %v9264_v18, %v13080_v24  ;;  %v7504_v37 = vrot.slane %v7502_v6, 6  ;;  %v7002_v43 = vor.u32 %v7001_v28, %v13184_v61  ;;  %v6753_v14 = vld [vmem:[#allocation3 + $0x14] sm:$0xf]  ;;  %6952 = vst.msk [vmem:[#allocation4 + $0x28] sm:$0xf] %vm290_vm0, %v6939_v31  ;;  %9306 = vmatprep.subr.bf16.mxu1 %v9670_v7 }
 0x546   : > { %v6615_v19 = vsel %vm9868_vm11, %v14300_v5, %v6614_v45  ;;  %v13266_v54 = vrot.slane %v7005_v20, 5  ;;  %v7009_v49 = vshrl.u32 %v13240_v56, 16  ;;  %6888 = vrot.lane.b32.xlu0 %v6793_v53, %s9720_s10  ;;  %v7496_v8 = vsel %vm10661_vm12, %v13178_v52, %v7495_v32  ;;  %v6567_v18 = vld [vmem:[#allocation3 + $0x14] sm:$0xf]  ;;  %v9672_v53 = vld [vmem:[%s14169_s2 + $0x200] sm:$0xff]  }
 0x547   : > { %v6193_v35 = vmul.f32 %v6180_v10, %v14283_v2  ;;  %v6142_v45 = vadd.f32 %v13047_v1, %v6054_v0  ;;  %6703 = vrot.lane.b32.xlu1 %v6615_v19, %s9721_s23  ;;  %v7497_v61 = vrot.slane %v7495_v32, 4  ;;  %v13277_v39 = vor.u32 %v7504_v37, %v7501_v63  ;;  %7621 = vst.msk [vmem:[#allocation4 + $0x8] sm:$0xf] %vm290_vm0, %v7496_v8  ;;  %v6272_v19 = vld [vmem:[#allocation3 + $0x10] sm:$0xf]  ;;  %v9673_v20 = vld [vmem:[%s14169_s2 + $0x1c0] sm:$0xff]  }
 0x548   : > { %v7003_v1 = vrot.slane %v7002_v43, 4  ;;  %v6796_v59 = vshrl.u32 %v6753_v14, 16  ;;  %v14301_v6 = vrot.slane %v13196_v22, 7  ;;  %v7192_v63 = vsel %vm9911_vm13, %v7187_v33, %v13238_v44  ;;  %9307 = vmatpush3.bf16.msra.mxu1 %v9671_v11  ;;  %v9674_v8 = vld [vmem:[%s14169_s2 + $0x1f8] sm:$0xff]  }
 0x549   : > { %v9002_v4 = vpack.c.bf16 %v6193_v35, %v6193_v35  ;;  %v6181_v56 = vmax.f32 %v6142_v45, 0.0  ;;  %v7506_v28 = vsel %vm10661_vm12, %v7497_v61, %v13277_v39  ;;  %v6320_v40 = vrot.slane %v13141_v55, 4  ;;  %9308 = vmatprep.subr.bf16.mxu1 %v9672_v53  ;;  %v9675_v22 = vld [vmem:[%s14169_s2 + $0x1b8] sm:$0xff]  }
 0x54a   : > { %v6485_v52 = vsel %vm9813_vm7, %v13213_v29, %v14301_v6  ;;  %7622 = vst.msk [vmem:[#allocation4 + $0x14] sm:$0xf] %vm290_vm0, %v7506_v28  ;;  %v13298_v0 = vrot.slane %v6796_v59, 7  ;;  %v6799_v5 = vshll.u32 %v6753_v14, 16  ;;  %v6618_v29 = vshrl.u32 %v6567_v18, 16 }
 0x54b   : > { %6259 = vst.msk [vmem:[#allocation3 + $0x18] sm:$0xf] %vm290_vm0, %v9002_v4  ;;  %v6194_v10 = vmul.f32 %v6181_v56, %v14284_v36  ;;  %6518 = vrot.lane.b32.xlu0 %v6485_v52, %s9719_s7  ;;  %7300 = vrot.lane.b32.xlu1 %v7192_v63, %s9721_s23  ;;  %v7008_v7 = vsel %vm9911_vm13, %v7003_v1, %v13266_v54  ;;  %v6794_v31 = vrot.slane %v13204_v46, 4  ;;  %v7011_v33 = vrot.slane %v7009_v49, 4  ;;  %v7168_v4 = vld [vmem:[#allocation3 + $0x3c] sm:$0x7] }
 0x54c   : > { %v14302_v32 = vshrl.u32 %v13208_v48, 16  ;;  %v6801_v14 = vor.u32 %v6799_v5, %v13298_v0  ;;  %v14303_v35 = vrot.slane %v13191_v41, 5  ;;  %v13314_v11 = vrot.slane %v6618_v29, 7  ;;  %9309 = vmatpush3.bf16.msra.mxu1 %v9673_v20 }
 0x54d   : > { %v9003_v43 = vpack.c.bf16 %v6194_v10, %v6194_v10  ;;  %v14304_v61 = vmov %v14301_v6  ;;  %v7012_v49 = vor.u32 %v7011_v33, %v13266_v54  ;;  %v6322_v48 = vshrl.u32 %v6272_v19, 16  ;;  %v13327_v6 = vld [vmem:[#allocation3 + $0x14] sm:$0xf]  ;;  %9310 = vmatprep.subr.bf16.mxu1 %v9674_v8 }
 0x54e   : > { %v7195_v37 = vrot.slane %v14302_v32, 4  ;;  %v7383_v45 = vrot.slane %v14303_v35, 4  ;;  %v6486_v46 = vrot.slane %v14304_v61, 4  ;;  %v6325_v1 = vshll.u32 %v6272_v19, 16 }
 0x54f   : > { %6260 = vst.msk [vmem:[#allocation3 + $0x1c] sm:$0xf] %vm290_vm0, %v9003_v43  ;;  %v6802_v41 = vsel %vm9868_vm11, %v6794_v31, %v6801_v14  ;;  %v6616_v56 = vrot.slane %v13206_v62, 4  ;;  %v6621_v59 = vshll.u32 %v6567_v18, 16  ;;  %7108 = vrot.lane.b32.xlu0 %v7008_v7, %s9719_s7  ;;  %v6803_v52 = vrot.slane %v13298_v0, 4  ;;  %v9676_v18 = vld [vmem:[%s14169_s2 + $0x1f0] sm:$0xff]  }
 0x550   : > { %6890 = vrot.lane.b32.xlu1 %v6802_v41, %s9720_s10  ;;  %v7196_v54 = vor.u32 %v7195_v37, %v13238_v44  ;;  %v6324_v63 = vrot.slane %v6322_v48, 6  ;;  %v6327_v62 = vrot.slane %v6325_v1, 7  ;;  %v13340_v10 = vrot.slane %v7012_v49, 4  ;;  %v9677_v44 = vld [vmem:[%s14169_s2 + $0x1b0] sm:$0xff]   ;;  %9311 = vmatpush3.bf16.msra.mxu1 %v9675_v22 }
 0x551   : > { %v6623_v28 = vor.u32 %v6621_v59, %v13314_v11  ;;  %v7289_v29 = vshll.u32 %v7168_v4, 16  ;;  %v9656_v19 = vld [vmem:[#allocation4 + $0x8] ss:$12 sps:$4 sm:$0xff]   ;;  %v6332_v37 = vshrl.u32 %v13327_v6, 16  ;;  %9312 = vmatprep.subr.bf16.mxu1 %v9676_v18 }
 0x552   : > { %v7353_v20 = vld [vmem:[#allocation3 + $0x18] sm:$0xf]  ;;  %v13346_v7 = vor.u32 %v6327_v62, %v6324_v63  ;;  %9475 = vmatmul.mubr.msk.bf16.vlgmr.msra.gmra.mxu0 %vm2071_vm14, %v9656_v19  ;;  %v7197_v61 = vrot.slane %v7196_v54, 4 }
 0x553   : > { %v7384_v31 = vrot.slane %v7353_v20, 5  ;;  %v6448_v33 = vld [vmem:[#allocation3 + $0x18] sm:$0xf]  ;;  %v6624_v1 = vsel %vm9868_vm11, %v6616_v56, %v6623_v28  ;;  %9478 = vmatprep.mubr.msk.bf16.mxu0 %vm9723_vm8, %v14266_v34  ;;  %v13365_v59 = vrot.slane %v7289_v29, 5  ;;  %v13376_v29 = vrot.slane %v6332_v37, 6 }
 0x554   : > { %v13348_v32 = vld [vmem:[#allocation3 + $0x18] sm:$0xf]  ;;  %v9265_v43 = vpop.f32.mrf.mxu1  ;;  %v6487_v14 = vrot.slane %v6448_v33, 7  ;;  %v6329_v49 = vsel %vm10354_vm2, %v6320_v40, %v13346_v7  ;;  %9313 = vmatpush3.bf16.msra.mxu1 %v9677_v44 }
 0x555   : > { %v7015_v35 = vshll.u32 %v13348_v32, 16  ;;  %v7159_v8 = vld [vmem:[#allocation3 + $0x18] sm:$0xf]  ;;  %v7385_v48 = vsel %vm9829_vm9, %v7383_v45, %v7384_v31  ;;  %6432 = vst.msk [vmem:[#allocation4 + $0x24] sm:$0xf] %vm290_vm0, %v6329_v49  ;;  %v7019_v20 = vshrl.u32 %v13348_v32, 16  ;;  %9502 = vmatprep.subr.bf16.mxu1 %v14266_v34 }
 0x556   : > { %v7199_v4 = vshll.u32 %v7159_v8, 16  ;;  %v6754_v41 = vld [vmem:[#allocation3 + $0x18] sm:$0xf]  ;;  %v9266_v55 = vpop.f32.mrf.mxu1  ;;  %7418 = vrot.lane.b32.xlu0 %v7385_v48, %s9720_s10  ;;  %v6488_v40 = vsel %vm9813_vm7, %v6486_v46, %v6487_v14  ;;  %v7203_v45 = vshrl.u32 %v7159_v8, 16  ;;  %v13372_v54 = vld [vmem:[#allocation3 + $0x1c] sm:$0xf] }
 0x557   : > { %v13370_v22 = vrot.slane %v7015_v35, 5  ;;  %v6805_v56 = vshrl.u32 %v6754_v41, 16  ;;  %v9267_v63 = vadd.f32 %v9266_v55, %v9265_v43  ;;  %6520 = vrot.lane.b32.xlu1 %v6488_v40, %s9719_s7  ;;  %v14218_v18 = vrot.slane %v13372_v54, 5  ;;  %v6568_v28 = vld [vmem:[#allocation3 + $0x18] sm:$0xf] }
 0x558   : > { %v7201_v62 = vrot.slane %v7199_v4, 5  ;;  %v9268_v19 = vpop.f32.mrf.mxu1  ;;  %v6808_v33 = vshll.u32 %v6754_v41, 16  ;;  %v6627_v35 = vshrl.u32 %v6568_v28, 16  ;;  %v13381_v8 = vld [vmem:[#allocation3 + $0x1c] sm:$0xf]  ;;  %v7386_v49 = vrot.slane %v7384_v31, 4 }
 0x559   : > { %v13379_v46 = vrot.slane %v6805_v56, 7  ;;  %v6059_v43 = vadd.f32 %v9267_v63, %v13080_v24  ;;  %v7018_v37 = vsel %vm9911_vm13, %v13340_v10, %v13370_v22  ;;  %v6630_v44 = vshll.u32 %v6568_v28, 16  ;;  %v13389_v48 = vld [vmem:[#allocation3 + $0x1c] sm:$0xf]  ;;  %v7469_v56 = vld [vmem:[#allocation3 + $0x18] sm:$0xf] }
 0x55a   : > { %v9269_v32 = vpop.f32.mrf.mxu1  ;;  %6705 = vrot.lane.b32.xlu0 %v6624_v1, %s9721_s23  ;;  %v7202_v4 = vsel %vm9911_vm13, %v7197_v61, %v7201_v62  ;;  %v13395_v55 = vrot.slane %v6627_v35, 7  ;;  %v7205_v40 = vrot.slane %v7203_v45, 4  ;;  %v7388_v10 = vsel %vm9829_vm9, %v7386_v49, %v14218_v18  ;;  %v7470_v1 = vld [vmem:[#allocation3 + $0x1c] sm:$0xf]  ;;  %v6940_v35 = vld [vmem:[#allocation3 + $0x18] sm:$0xf] }
 0x55b   : > { %v6810_v41 = vor.u32 %v6808_v33, %v13379_v46  ;;  %v6147_v63 = vadd.f32 %v13051_v15, %v6059_v43  ;;  %v9270_v53 = vadd.f32 %v9269_v32, %v9268_v19  ;;  %7110 = vrot.lane.b32.xlu1 %v7018_v37, %s9719_s7  ;;  %v7209_v31 = vshll.u32 %v13381_v8, 16  ;;  %6953 = vst.msk [vmem:[#allocation4 + $0x34] sm:$0xf] %vm290_vm0, %v6940_v35  ;;  %v6941_v37 = vld [vmem:[#allocation3 + $0x1c] sm:$0xf] }
 0x55c   : > { %v6489_v61 = vrot.slane %v6487_v14, 4  ;;  %v6490_v28 = vrot.slane %v13389_v48, 7  ;;  %v7206_v33 = vor.u32 %v7205_v40, %v7201_v62  ;;  %v7213_v45 = vshrl.u32 %v13381_v8, 16  ;;  %v6967_v48 = vld [vmem:[#allocation3 + $0x1c] sm:$0xf] }
 0x55d   : > { %v6182_v5 = vmax.f32 %v6147_v63, 0.0  ;;  %v6062_v15 = vadd.f32 %v9270_v53, %v13080_v24  ;;  %v6811_v19 = vsel %vm9868_vm11, %v6803_v52, %v6810_v41  ;;  %v7509_v43 = vshrl.u32 %v7469_v56, 16  ;;  %6954 = vst.msk [vmem:[#allocation4 + $0x40] sm:$0xf] %vm290_vm0, %v6941_v37 }
 0x55e   : > { %7302 = vrot.lane.b32.xlu0 %v7202_v4, %s9721_s23  ;;  %v6632_v14 = vor.u32 %v6630_v44, %v13395_v55  ;;  %v13414_v62 = vrot.slane %v7209_v31, 5  ;;  %v7512_v8 = vshll.u32 %v7469_v56, 16  ;;  %v7519_v49 = vshrl.u32 %v7470_v1, 16  ;;  %v6755_v44 = vld [vmem:[#allocation3 + $0x1c] sm:$0xf] }
 0x55f   : > { %v6195_v0 = vmul.f32 %v6182_v5, %v14285_v9  ;;  %v6150_v53 = vadd.f32 %v13056_v60, %v6062_v15  ;;  %7420 = vrot.lane.b32.xlu1 %v7388_v10, %s9720_s10  ;;  %v7511_v52 = vrot.slane %v7509_v43, 5  ;;  %v7522_v32 = vshll.u32 %v7470_v1, 16 }
 0x560   : > { %v7207_v41 = vrot.slane %v7206_v33, 4  ;;  %v7514_v40 = vrot.slane %v7512_v8, 6  ;;  %v7521_v4 = vrot.slane %v7519_v49, 5  ;;  %v7021_v63 = vrot.slane %v7019_v20, 4 }
 0x561   : > { %v9004_v31 = vpack.c.bf16 %v6195_v0, %v6195_v0  ;;  %v6183_v35 = vmax.f32 %v6150_v53, 0.0  ;;  %v7524_v56 = vrot.slane %v7522_v32, 6  ;;  %v7025_v18 = vshll.u32 %v6967_v48, 16 }
 0x562   : > { %6892 = vrot.lane.b32.xlu0 %v6811_v19, %s9720_s10  ;;  %v14305_v37 = vrot.slane %v13314_v11, 4  ;;  %v6491_v5 = vsel %vm9813_vm7, %v6489_v61, %v6490_v28  ;;  %v7515_v10 = vor.u32 %v7514_v40, %v7511_v52  ;;  %v7022_v1 = vor.u32 %v7021_v63, %v13370_v22  ;;  %v6569_v11 = vld [vmem:[#allocation3 + $0x1c] sm:$0xf] }
 0x563   : > { %6261 = vst.msk [vmem:[#allocation3 + $0x20] sm:$0xf] %vm290_vm0, %v9004_v31  ;;  %v6196_v20 = vmul.f32 %v6183_v35, %v14286_v3  ;;  %v13431_v33 = vor.u32 %v7524_v56, %v7521_v4  ;;  %v7029_v15 = vshrl.u32 %v6967_v48, 16  ;;  %v6814_v19 = vshrl.u32 %v6755_v44, 16 }
 0x564   : > { %v6633_v60 = vsel %vm9868_vm11, %v14305_v37, %v6632_v14  ;;  %v14306_v43 = vrot.slane %v13277_v39, 4  ;;  %v7517_v61 = vrot.slane %v7515_v10, 4  ;;  %v7023_v8 = vrot.slane %v7022_v1, 4 }
 0x565   : > { %6707 = vrot.lane.b32.xlu1 %v6633_v60, %s9721_s23  ;;  %v7027_v49 = vrot.slane %v7025_v18, 5  ;;  %v9005_v22 = vpack.c.bf16 %v6196_v20, %v6196_v20  ;;  %v7212_v0 = vsel %vm9911_vm13, %v7207_v41, %v13414_v62  ;;  %v13441_v53 = vrot.slane %v6814_v19, 7 }
 0x566   : > { %v7516_v14 = vsel %vm10661_vm12, %v14306_v43, %v7515_v10  ;;  %v6817_v48 = vshll.u32 %v6755_v44, 16  ;;  %6522 = vrot.lane.b32.xlu0 %v6491_v5, %s9719_s7  ;;  %v7526_v39 = vsel %vm10661_vm12, %v7517_v61, %v13431_v33  ;;  %v6812_v52 = vrot.slane %v13379_v46, 4 }
 0x567   : > { %7623 = vst.msk [vmem:[#allocation4 + $0x20] sm:$0xf] %vm290_vm0, %v7516_v14  ;;  %v14307_v18 = vrot.slane %v13372_v54, 5  ;;  %v6636_v40 = vshrl.u32 %v6569_v11, 16  ;;  %6262 = vst.msk [vmem:[#allocation3 + $0x24] sm:$0xf] %vm290_vm0, %v9005_v22  ;;  %v7028_v31 = vsel %vm9911_vm13, %v7023_v8, %v7027_v49 }
 0x568   : > { %7624 = vst.msk [vmem:[#allocation4 + $0x2c] sm:$0xf] %vm290_vm0, %v7526_v39  ;;  %v6819_v41 = vor.u32 %v6817_v48, %v13441_v53  ;;  %v6492_v4 = vrot.slane %v6490_v28, 4  ;;  %v7031_v63 = vrot.slane %v7029_v15, 4  ;;  %v7215_v44 = vrot.slane %v7213_v45, 4 }
 0x569   : > { %v7389_v32 = vrot.slane %v14307_v18, 4  ;;  %7304 = vrot.lane.b32.xlu1 %v7212_v0, %s9721_s23  ;;  %v6634_v46 = vrot.slane %v13395_v55, 4  ;;  %v13457_v35 = vrot.slane %v6636_v40, 7  ;;  %v6639_v54 = vshll.u32 %v6569_v11, 16 }
 0x56a   : > { %v7032_v56 = vor.u32 %v7031_v63, %v7027_v49  ;;  %v7216_v37 = vor.u32 %v7215_v44, %v13414_v62  ;;  %v6821_v60 = vrot.slane %v13441_v53, 4  ;;  %v7527_v5 = vrot.slane %v13431_v33, 4  ;;  %7112 = vrot.lane.b32.xlu0 %v7028_v31, %s9719_s7  ;;  %v7355_v45 = vld [vmem:[#allocation3 + $0x20] sm:$0xf] }
 0x56b   : > { %v6820_v28 = vsel %vm9868_vm11, %v6812_v52, %v6819_v41  ;;  %v6450_v10 = vld [vmem:[#allocation3 + $0x20] sm:$0xf]  ;;  %v6641_v1 = vor.u32 %v6639_v54, %v13457_v35  ;;  %v7390_v20 = vrot.slane %v7355_v45, 5  ;;  %v6335_v49 = vshll.u32 %v13327_v6, 16 }
 0x56c   : > { %v13466_v55 = vld [vmem:[#allocation3 + $0x20] sm:$0xf]  ;;  %v6493_v15 = vrot.slane %v6450_v10, 7  ;;  %v9271_v43 = vpop.f32.mrf.mxu1  ;;  %v7033_v14 = vrot.slane %v7032_v56, 4  ;;  %v7217_v39 = vrot.slane %v7216_v37, 4 }
 0x56d   : > { %6894 = vrot.lane.b32.xlu1 %v6820_v28, %s9720_s10  ;;  %v7035_v62 = vshll.u32 %v13466_v55, 16  ;;  %v7161_v19 = vld [vmem:[#allocation3 + $0x20] sm:$0xf]  ;;  %v7039_v61 = vshrl.u32 %v13466_v55, 16  ;;  %v7391_v22 = vsel %vm9829_vm9, %v7389_v32, %v7390_v20  ;;  %v6642_v63 = vsel %vm9868_vm11, %v6634_v46, %v6641_v1 }
 0x56e   : > { %v7219_v8 = vshll.u32 %v7161_v19, 16  ;;  %v6494_v0 = vsel %vm9813_vm7, %v6492_v4, %v6493_v15  ;;  %v6756_v52 = vld [vmem:[#allocation3 + $0x20] sm:$0xf]  ;;  %v9272_v41 = vpop.f32.mrf.mxu1  ;;  %7422 = vrot.lane.b32.xlu0 %v7391_v22, %s9720_s10  ;;  %v7223_v31 = vshrl.u32 %v7161_v19, 16  ;;  %v13486_v4 = vld [vmem:[#allocation3 + $0x24] sm:$0xf] }
 0x56f   : > { %v13477_v48 = vrot.slane %v7035_v62, 5  ;;  %v6570_v18 = vld [vmem:[#allocation3 + $0x20] sm:$0xf]  ;;  %v9657_v40 = vld [vmem:[#allocation4 + $0x20] ss:$12 sps:$4 sm:$0xff]   ;;  %v9273_v54 = vadd.f32 %v9272_v41, %v9271_v43  ;;  %v7392_v56 = vrot.slane %v7390_v20, 4 }
 0x570   : > { %v7221_v44 = vrot.slane %v7219_v8, 5  ;;  %v6823_v37 = vshrl.u32 %v6756_v52, 16  ;;  %v13488_v28 = vld [vmem:[#allocation3 + $0x24] sm:$0xf]  ;;  %9479 = vmatmul.mubr.msk.bf16.gmra.mxu0 %vm2071_vm14, %v9657_v40  ;;  %v9274_v45 = vpop.f32.mrf.mxu1  ;;  %v7393_v10 = vrot.slane %v13486_v4, 5  ;;  %v6826_v1 = vshll.u32 %v6756_v52, 16 }
 0x571   : > { %6524 = vrot.lane.b32.xlu1 %v6494_v0, %s9719_s7  ;;  %v7038_v32 = vsel %vm9911_vm13, %v7033_v14, %v13477_v48  ;;  %v6645_v62 = vshrl.u32 %v6570_v18, 16  ;;  %v13494_v19 = vld [vmem:[#allocation3 + $0x24] sm:$0xf]  ;;  %v6067_v43 = vadd.f32 %v9273_v54, %v13080_v24  ;;  %v6643_v20 = vrot.slane %v13457_v35, 4  ;;  %9482 = vmatprep.mubr.msk.bf16.mxu0 %vm9723_vm8, %v14266_v34  ;;  %v7471_v54 = vld [vmem:[#allocation3 + $0x20] sm:$0xf] }
 0x572   : > { %v7222_v46 = vsel %vm9911_vm13, %v7217_v39, %v7221_v44  ;;  %v13497_v14 = vrot.slane %v6823_v37, 7  ;;  %v6648_v8 = vshll.u32 %v6570_v18, 16  ;;  %v9275_v22 = vpop.f32.mrf.mxu1  ;;  %6709 = vrot.lane.b32.xlu0 %v6642_v63, %s9721_s23  ;;  %v6495_v39 = vrot.slane %v6493_v15, 4  ;;  %v7472_v37 = vld [vmem:[#allocation3 + $0x24] sm:$0xf] }
 0x573   : > { %v13503_v0 = vrot.slane %v6645_v62, 7  ;;  %v6496_v52 = vrot.slane %v13488_v28, 7  ;;  %v7225_v40 = vrot.slane %v7223_v31, 4  ;;  %v6155_v41 = vadd.f32 %v13060_v51, %v6067_v43  ;;  %v6942_v43 = vld [vmem:[#allocation3 + $0x20] sm:$0xf] }
 0x574   : > { %v9276_v24 = vadd.f32 %v9275_v22, %v9274_v45  ;;  %v6828_v35 = vor.u32 %v6826_v1, %v13497_v14  ;;  %v7229_v18 = vshll.u32 %v13494_v19, 16  ;;  %v7394_v63 = vsel %vm9829_vm9, %v7392_v56, %v7393_v10  ;;  %v13522_v45 = vld [vmem:[%s14170_s3 + $0x2] ss:$0 sm:$0xff]  ;;  %6955 = vst.msk [vmem:[#allocation4 + $0x4c] sm:$0xf] %vm290_vm0, %v6942_v43 }
 0x575   : > { %7114 = vrot.lane.b32.xlu1 %v7038_v32, %s9719_s7  ;;  %v6650_v15 = vor.u32 %v6648_v8, %v13503_v0  ;;  %v6497_v51 = vsel %vm9813_vm7, %v6495_v39, %v6496_v52  ;;  %v7226_v31 = vor.u32 %v7225_v40, %v7221_v44  ;;  %v6184_v32 = vmax.f32 %v6155_v41, 0.0  ;;  %v6943_v40 = vld [vmem:[#allocation3 + $0x24] sm:$0xf] }
 0x576   : > { %v6070_v1 = vadd.f32 %v13522_v45, %v9276_v24  ;;  %v6829_v56 = vsel %vm9868_vm11, %v6821_v60, %v6828_v35  ;;  %v7233_v62 = vshrl.u32 %v13494_v19, 16  ;;  %7306 = vrot.lane.b32.xlu0 %v7222_v46, %s9721_s23  ;;  %v13531_v8 = vrot.slane %v7229_v18, 5  ;;  %v6969_v19 = vld [vmem:[#allocation3 + $0x24] sm:$0xf]  ;;  %6956 = vst.msk [vmem:[#allocation4 + $0x58] sm:$0xf] %vm290_vm0, %v6943_v40 }
 0x577   : > { %v7227_v44 = vrot.slane %v7226_v31, 4  ;;  %v7529_v22 = vshrl.u32 %v7471_v54, 16  ;;  %v7532_v39 = vshll.u32 %v7471_v54, 16  ;;  %v6197_v41 = vmul.f32 %v6184_v32, %v14287_v57  ;;  %v6757_v31 = vld [vmem:[#allocation3 + $0x24] sm:$0xf] }
 0x578   : > { %v6158_v53 = vadd.f32 %v13063_v21, %v6070_v1  ;;  %v7539_v60 = vshrl.u32 %v7472_v37, 16  ;;  %v7542_v24 = vshll.u32 %v7472_v37, 16  ;;  %v6651_v46 = vsel %vm9868_vm11, %v6643_v20, %v6650_v15 }
 0x579   : > { %7424 = vrot.lane.b32.xlu1 %v7394_v63, %s9720_s10  ;;  %v7531_v35 = vrot.slane %v7529_v22, 5  ;;  %v7534_v18 = vrot.slane %v7532_v39, 6  ;;  %v7041_v54 = vrot.slane %v7039_v61, 4  ;;  %v9006_v43 = vpack.c.bf16 %v6197_v41, %v6197_v41  ;;  %v6571_v41 = vld [vmem:[#allocation3 + $0x24] sm:$0xf] }
 0x57a   : > { %v6185_v32 = vmax.f32 %v6158_v53, 0.0  ;;  %v7541_v11 = vrot.slane %v7539_v60, 5  ;;  %v7544_v21 = vrot.slane %v7542_v24, 6  ;;  %6896 = vrot.lane.b32.xlu0 %v6829_v56, %s9720_s10  ;;  %v7232_v63 = vsel %vm9911_vm13, %v7227_v44, %v13531_v8 }
 0x57b   : > { %v7535_v37 = vor.u32 %v7534_v18, %v7531_v35  ;;  %v7042_v1 = vor.u32 %v7041_v54, %v13477_v48  ;;  %v7045_v20 = vshll.u32 %v6969_v19, 16  ;;  %6263 = vst.msk [vmem:[#allocation3 + $0x28] sm:$0xf] %vm290_vm0, %v9006_v43  ;;  %v7049_v15 = vshrl.u32 %v6969_v19, 16 }
 0x57c   : > { %v6198_v55 = vmul.f32 %v6185_v32, %v11002_v23  ;;  %v13550_v61 = vor.u32 %v7544_v21, %v7541_v11  ;;  %v6832_v22 = vshrl.u32 %v6757_v31, 16  ;;  %v9277_v39 = vpop.f32.mrf.mxu1  ;;  %v6830_v60 = vrot.slane %v13497_v14, 4 }
 0x57d   : > { %6711 = vrot.lane.b32.xlu1 %v6651_v46, %s9721_s23  ;;  %v7536_v56 = vsel %vm10661_vm12, %v7527_v5, %v7535_v37  ;;  %v7537_v44 = vrot.slane %v7535_v37, 4  ;;  %v7043_v40 = vrot.slane %v7042_v1, 4  ;;  %v7047_v48 = vrot.slane %v7045_v20, 5 }
 0x57e   : > { %v9007_v53 = vpack.c.bf16 %v6198_v55, %v6198_v55  ;;  %7625 = vst.msk [vmem:[#allocation4 + $0x38] sm:$0xf] %vm290_vm0, %v7536_v56  ;;  %v13558_v24 = vrot.slane %v6832_v22, 7  ;;  %v6835_v11 = vshll.u32 %v6757_v31, 16  ;;  %v9278_v19 = vpop.f32.mrf.mxu1  ;;  %6526 = vrot.lane.b32.xlu0 %v6497_v51, %s9719_s7  ;;  %v7395_v46 = vrot.slane %v7393_v10, 4 }
 0x57f   : > { %v7546_v33 = vsel %vm10661_vm12, %v7537_v44, %v13550_v61  ;;  %v7048_v5 = vsel %vm9911_vm13, %v7043_v40, %v7047_v48  ;;  %v6498_v35 = vrot.slane %v6496_v52, 4  ;;  %v9279_v14 = vadd.f32 %v9278_v19, %v9277_v39 }
 0x580   : > { %6264 = vst.msk [vmem:[#allocation3 + $0x2c] sm:$0xf] %vm290_vm0, %v9007_v53  ;;  %7626 = vst.msk [vmem:[#allocation4 + $0x44] sm:$0xf] %vm290_vm0, %v7546_v33  ;;  %v6837_v51 = vor.u32 %v6835_v11, %v13558_v24  ;;  %v6652_v18 = vrot.slane %v13503_v0, 4  ;;  %v6654_v54 = vshrl.u32 %v6571_v41, 16  ;;  %v9280_v31 = vpop.f32.mrf.mxu1 }
 0x581   : > { %7308 = vrot.lane.b32.xlu1 %v7232_v63, %s9721_s23  ;;  %v6657_v43 = vshll.u32 %v6571_v41, 16  ;;  %v7051_v32 = vrot.slane %v7049_v15, 4  ;;  %v7235_v4 = vrot.slane %v7233_v62, 4  ;;  %v6839_v10 = vrot.slane %v13558_v24, 4 }
 0x582   : > { %v6075_v28 = vadd.f32 %v13522_v45, %v9279_v14  ;;  %v13577_v52 = vrot.slane %v6654_v54, 7  ;;  %v7547_v21 = vrot.slane %v13550_v61, 4  ;;  %v13582_v63 = vrot.slane %v6335_v49, 7  ;;  %v9281_v37 = vpop.f32.mrf.mxu1  ;;  %7116 = vrot.lane.b32.xlu0 %v7048_v5, %s9719_s7  ;;  %v7357_v1 = vld [vmem:[#allocation3 + $0x28] sm:$0xf] }
 0x583   : > { %v6838_v0 = vsel %vm9868_vm11, %v6830_v60, %v6837_v51  ;;  %v13587_v62 = vld [vmem:[#allocation3 + $0x28] sm:$0xf]  ;;  %v7052_v55 = vor.u32 %v7051_v32, %v7047_v48  ;;  %v9282_v22 = vadd.f32 %v9281_v37, %v9280_v31  ;;  %v7396_v6 = vrot.slane %v7357_v1, 5 }
 0x584   : > { %v13589_v20 = vld [vmem:[#allocation3 + $0x28] sm:$0xf]  ;;  %v6163_v15 = vadd.f32 %v13066_v16, %v6075_v28  ;;  %v6499_v49 = vrot.slane %v13587_v62, 7  ;;  %v6659_v39 = vor.u32 %v6657_v43, %v13577_v52  ;;  %v7236_v41 = vor.u32 %v7235_v4, %v13531_v8 }
 0x585   : > { %6898 = vrot.lane.b32.xlu1 %v6838_v0, %s9720_s10  ;;  %v7053_v56 = vrot.slane %v7052_v55, 4  ;;  %v7055_v44 = vshll.u32 %v13589_v20, 16  ;;  %v7163_v40 = vld [vmem:[#allocation3 + $0x28] sm:$0xf]  ;;  %v6078_v60 = vadd.f32 %v13522_v45, %v9282_v22  ;;  %v7397_v16 = vsel %vm9829_vm9, %v7395_v46, %v7396_v6 }
 0x586   : > { %v6186_v53 = vmax.f32 %v6163_v15, 0.0  ;;  %v6500_v48 = vsel %vm9813_vm7, %v6498_v35, %v6499_v49  ;;  %v6758_v11 = vld [vmem:[#allocation3 + $0x28] sm:$0xf]  ;;  %7426 = vrot.lane.b32.xlu0 %v7397_v16, %s9720_s10  ;;  %v7059_v5 = vshrl.u32 %v13589_v20, 16  ;;  %v6660_v46 = vsel %vm9868_vm11, %v6652_v18, %v6659_v39 }
 0x587   : > { %v9658_v19 = vld [vmem:[#allocation4 + $0x38] ss:$12 sps:$4 sm:$0xff]   ;;  %v13605_v33 = vrot.slane %v7055_v44, 5  ;;  %v6166_v14 = vadd.f32 %v13068_v50, %v6078_v60  ;;  %v7239_v51 = vshll.u32 %v7163_v40, 16  ;;  %v13613_v54 = vld [vmem:[#allocation3 + $0x2c] sm:$0xf] }
 0x588   : > { %v6199_v8 = vmul.f32 %v6186_v53, %v14288_v42  ;;  %v6572_v35 = vld [vmem:[#allocation3 + $0x28] sm:$0xf]  ;;  %9483 = vmatmul.mubr.msk.bf16.gmra.mxu0 %vm2071_vm14, %v9658_v19  ;;  %v7237_v43 = vrot.slane %v7236_v41, 4  ;;  %v7243_v32 = vshrl.u32 %v7163_v40, 16  ;;  %v7399_v4 = vrot.slane %v13613_v54, 5 }
 0x589   : > { %6528 = vrot.lane.b32.xlu1 %v6500_v48, %s9719_s7  ;;  %v9283_v31 = vpop.f32.mrf.mxu1  ;;  %v6841_v28 = vshrl.u32 %v6758_v11, 16  ;;  %v6187_v0 = vmax.f32 %v6166_v14, 0.0  ;;  %v7241_v50 = vrot.slane %v7239_v51, 5  ;;  %v7398_v1 = vrot.slane %v7396_v6, 4  ;;  %9486 = vmatprep.mubr.msk.bf16.mxu0 %vm9723_vm8, %v14266_v34  ;;  %v13625_v44 = vld [vmem:[#allocation3 + $0x2c] sm:$0xf] }
 0x58a   : > { %v9008_v37 = vpack.c.bf16 %v6199_v8, %v6199_v8  ;;  %6713 = vrot.lane.b32.xlu0 %v6660_v46, %s9721_s23  ;;  %v7058_v55 = vsel %vm9911_vm13, %v7053_v56, %v13605_v33  ;;  %v6844_v22 = vshll.u32 %v6758_v11, 16  ;;  %v6663_v39 = vshrl.u32 %v6572_v35, 16  ;;  %v13635_v53 = vld [vmem:[#allocation3 + $0x2c] sm:$0xf]  ;;  %v6513_v60 = vpop.permute.xlu1 %6512  ;;  %v7473_v14 = vld [vmem:[#allocation3 + $0x28] sm:$0xf] }
 0x58b   : > { %v9284_v18 = vpop.f32.mrf.mxu1  ;;  %v13623_v15 = vrot.slane %v6841_v28, 7  ;;  %v6200_v6 = vmul.f32 %v6187_v0, %v14290_v12  ;;  %v7400_v41 = vsel %vm9829_vm9, %v7398_v1, %v7399_v4  ;;  %v6661_v56 = vrot.slane %v13577_v52, 4  ;;  %6550 = vst.msk [vmem:[#allocation4 + $0xc] sm:$0xf] %vm691_vm3, %v6513_v60  ;;  %v7474_v28 = vld [vmem:[#allocation3 + $0x2c] sm:$0xf] }
 0x58c   : > { %6265 = vst.msk [vmem:[#allocation3 + $0x30] sm:$0xf] %vm290_vm0, %v9008_v37  ;;  %v9285_v40 = vadd.f32 %v9284_v18, %v9283_v31  ;;  %v7242_v48 = vsel %vm9911_vm13, %v7237_v43, %v7241_v50  ;;  %v13640_v19 = vrot.slane %v6663_v39, 7  ;;  %v6666_v8 = vshll.u32 %v6572_v35, 16  ;;  %v6944_v37 = vld [vmem:[#allocation3 + $0x28] sm:$0xf] }
 0x58d   : > { %7118 = vrot.lane.b32.xlu1 %v7058_v55, %s9719_s7  ;;  %v9286_v16 = vpop.f32.mrf.mxu1  ;;  %v6846_v11 = vor.u32 %v6844_v22, %v13623_v15  ;;  %v9009_v46 = vpack.c.bf16 %v6200_v6, %v6200_v6  ;;  %v7245_v31 = vrot.slane %v7243_v32, 4  ;;  %v7249_v52 = vshll.u32 %v13625_v44, 16  ;;  %6957 = vst.msk [vmem:[#allocation4 + $0x64] sm:$0xf] %vm290_vm0, %v6944_v37  ;;  %v6945_v32 = vld [vmem:[#allocation3 + $0x2c] sm:$0xf] }
 0x58e   : > { %v6083_v51 = vadd.f32 %v13522_v45, %v9285_v40  ;;  %7310 = vrot.lane.b32.xlu0 %v7242_v48, %s9721_s23  ;;  %v6668_v35 = vor.u32 %v6666_v8, %v13640_v19  ;;  %v6501_v1 = vrot.slane %v6499_v49, 4  ;;  %v6502_v45 = vrot.slane %v13635_v53, 7  ;;  %v13660_v22 = vld [vmem:[#allocation3 + $0x2c] sm:$0xf]  ;;  %6958 = vst.msk [vmem:[#allocation4 + $0x70] sm:$0xf] %vm290_vm0, %v6945_v32 }
 0x58f   : > { %v9287_v0 = vpop.f32.mrf.mxu1  ;;  %v6847_v43 = vsel %vm9868_vm11, %v6839_v10, %v6846_v11  ;;  %6266 = vst.msk [vmem:[#allocation3 + $0x34] sm:$0xf] %vm290_vm0, %v9009_v46  ;;  %v7246_v24 = vor.u32 %v7245_v31, %v7241_v50  ;;  %v13658_v55 = vrot.slane %v7249_v52, 5  ;;  %v7549_v10 = vshrl.u32 %v7473_v14, 16  ;;  %v6885_v39 = vpop.permute.xlu0 %6884  ;;  %v6573_v32 = vld [vmem:[#allocation3 + $0x2c] sm:$0xf] }
 0x590   : > { %v6171_v18 = vadd.f32 %v13089_v13, %v6083_v51  ;;  %v6700_v62 = vpop.permute.xlu1 %6699  ;;  %v6669_v49 = vsel %vm9868_vm11, %v6661_v56, %v6668_v35  ;;  %v7552_v6 = vshll.u32 %v7473_v14, 16  ;;  %v7559_v40 = vshrl.u32 %v7474_v28, 16  ;;  %6923 = vst.msk [vmem:[#allocation4] sm:$0xf] %vm1072_vm10, %v6885_v39  ;;  %v6759_v14 = vld [vmem:[#allocation3 + $0x2c] sm:$0xf] }
 0x591   : > { %7428 = vrot.lane.b32.xlu1 %v7400_v41, %s9720_s10  ;;  %v7562_v60 = vshll.u32 %v7474_v28, 16  ;;  %6737 = vst.msk [vmem:[#allocation4 + $0xc] sm:$0xf] %vm883_vm4, %v6700_v62  ;;  %v7247_v50 = vrot.slane %v7246_v24, 4  ;;  %v7551_v41 = vrot.slane %v7549_v10, 5  ;;  %v7061_v16 = vrot.slane %v7059_v5, 4 }
 0x592   : > { %v6188_v13 = vmax.f32 %v6171_v18, 0.0  ;;  %6900 = vrot.lane.b32.xlu0 %v6847_v43, %s9720_s10  ;;  %v7554_v48 = vrot.slane %v7552_v6, 6  ;;  %v7561_v11 = vrot.slane %v7559_v40, 5  ;;  %v7065_v56 = vshll.u32 %v13660_v22, 16 }
 0x593   : > { %v7564_v8 = vrot.slane %v7562_v60, 6  ;;  %v6503_v51 = vsel %vm9813_vm7, %v6501_v1, %v6502_v45  ;;  %v7062_v20 = vor.u32 %v7061_v16, %v13605_v33  ;;  %v13678_v5 = vld [vmem:[#allocation3 + $0x30] sm:$0xf]  ;;  %v6515_v31 = vpop.permute.xlu0 %6514  ;;  %v13682_v52 = vor.u32 %v13582_v63, %v13376_v29 }
 0x594   : > { %v6201_v46 = vmul.f32 %v6188_v13, %v14294_v25  ;;  %v7253_v28 = vshrl.u32 %v13625_v44, 16  ;;  %v7555_v37 = vor.u32 %v7554_v48, %v7551_v41  ;;  %v7067_v43 = vrot.slane %v7065_v56, 5  ;;  %6551 = vst.msk [vmem:[#allocation4 + $0x18] sm:$0xf] %vm691_vm3, %v6515_v31  ;;  %v6887_v35 = vpop.permute.xlu1 %6886  ;;  %v13689_v10 = vld [vmem:[#allocation3 + $0x30] sm:$0xf] }
 0x595   : > { %6715 = vrot.lane.b32.xlu1 %v6669_v49, %s9721_s23  ;;  %v13685_v0 = vor.u32 %v7564_v8, %v7561_v11  ;;  %v7063_v18 = vrot.slane %v7062_v20, 4  ;;  %v7069_v33 = vshrl.u32 %v13660_v22, 16  ;;  %v6850_v24 = vshrl.u32 %v6759_v14, 16  ;;  %6924 = vst.msk [vmem:[#allocation4 + $0xc] sm:$0xf] %vm1072_vm10, %v6887_v35 }
 0x596   : > { %v9010_v1 = vpack.c.bf16 %v6201_v46, %v6201_v46  ;;  %6530 = vrot.lane.b32.xlu0 %v6503_v51, %s9719_s7  ;;  %v7252_v29 = vsel %vm9911_vm13, %v7247_v50, %v13658_v55  ;;  %v7556_v63 = vsel %vm10661_vm12, %v7547_v21, %v7555_v37  ;;  %v7557_v44 = vrot.slane %v7555_v37, 4  ;;  %v13709_v6 = vld [vmem:[#allocation3 + $0x30] sm:$0xf]  ;;  %v13734_v53 = vld [vmem:[#allocation3 + $0x34] sm:$0xf] }
 0x597   : > { %v7402_v39 = vrot.slane %v13678_v5, 5  ;;  %7627 = vst.msk [vmem:[#allocation4 + $0x50] sm:$0xf] %vm290_vm0, %v7556_v63  ;;  %v6848_v22 = vrot.slane %v13623_v15, 4  ;;  %v13705_v62 = vrot.slane %v6850_v24, 7  ;;  %v6853_v49 = vshll.u32 %v6759_v14, 16  ;;  %v7105_v21 = vpop.permute.xlu0 %7104 }
 0x598   : > { %6267 = vst.msk [vmem:[#allocation3 + $0x38] sm:$0x3] %vm307_vm1, %v9010_v1  ;;  %v7401_v61 = vrot.slane %v7399_v4, 4  ;;  %v7566_v40 = vsel %vm10661_vm12, %v7557_v44, %v13685_v0  ;;  %v7068_v60 = vsel %vm9911_vm13, %v7063_v18, %v7067_v43  ;;  %v6505_v13 = vrot.slane %v13689_v10, 7  ;;  %v13718_v15 = vld [vmem:[#allocation3 + $0x30] sm:$0xf] }
 0x599   : > { %7312 = vrot.lane.b32.xlu1 %v7252_v29, %s9721_s23  ;;  %v6672_v50 = vshrl.u32 %v6573_v32, 16  ;;  %7143 = vst.msk [vmem:[#allocation4 + $0x4] sm:$0xf] %vm691_vm3, %v7105_v21  ;;  %v6855_v54 = vor.u32 %v6853_v49, %v13705_v62  ;;  %v6504_v41 = vrot.slane %v6502_v45, 4  ;;  %v7071_v16 = vrot.slane %v7069_v33, 4 }
 0x59a   : > { %7628 = vst.msk [vmem:[#allocation4 + $0x5c] sm:$0xf] %vm290_vm0, %v7566_v40  ;;  %v7403_v4 = vsel %vm9829_vm9, %v7401_v61, %v7402_v39  ;;  %7120 = vrot.lane.b32.xlu0 %v7068_v60, %s9719_s7  ;;  %v6675_v11 = vshll.u32 %v6573_v32, 16  ;;  %v7075_v8 = vshll.u32 %v13709_v6, 16  ;;  %v7255_v56 = vrot.slane %v7253_v28, 4 }
 0x59b   : > { %v13727_v48 = vrot.slane %v6672_v50, 7  ;;  %v7475_v14 = vld [vmem:[#allocation3 + $0x30] sm:$0xf]  ;;  %v6856_v46 = vsel %vm9868_vm11, %v6848_v22, %v6855_v54  ;;  %v6670_v51 = vrot.slane %v13640_v19, 4  ;;  %v7072_v20 = vor.u32 %v7071_v16, %v7067_v43  ;;  %v7476_v45 = vld [vmem:[#allocation3 + $0x34] sm:$0xf] }
 0x59c   : > { %v7259_v5 = vshll.u32 %v13718_v15, 16  ;;  %v6506_v31 = vsel %vm9813_vm7, %v6504_v41, %v6505_v13  ;;  %v7079_v37 = vshrl.u32 %v13709_v6, 16  ;;  %v7256_v35 = vor.u32 %v7255_v56, %v13658_v55  ;;  %v6946_v19 = vld [vmem:[#allocation3 + $0x30] sm:$0xf]  ;;  %v6947_v43 = vld [vmem:[#allocation3 + $0x34] sm:$0xf] }
 0x59d   : > { %6902 = vrot.lane.b32.xlu1 %v6856_v46, %s9720_s10  ;;  %v6677_v28 = vor.u32 %v6675_v11, %v13727_v48  ;;  %v7073_v32 = vrot.slane %v7072_v20, 4  ;;  %v13744_v1 = vrot.slane %v7075_v8, 5  ;;  %v7263_v18 = vshrl.u32 %v13718_v15, 16  ;;  %v6760_v24 = vld [vmem:[#allocation3 + $0x30] sm:$0xf] }
 0x59e   : > { %v7404_v33 = vrot.slane %v7402_v39, 4  ;;  %6959 = vst.msk [vmem:[#allocation4 + $0x7c] sm:$0xf] %vm290_vm0, %v6946_v19  ;;  %6960 = vst.msk [vmem:[#allocation4 + $0x88] sm:$0xf] %vm290_vm0, %v6947_v43  ;;  %7430 = vrot.lane.b32.xlu0 %v7403_v4, %s9720_s10  ;;  %v13750_v29 = vrot.slane %v7259_v5, 5 }
 0x59f   : > { %v7405_v63 = vrot.slane %v13734_v53, 5  ;;  %v7569_v55 = vshrl.u32 %v7475_v14, 16  ;;  %v7572_v44 = vshll.u32 %v7475_v14, 16  ;;  %v7257_v22 = vrot.slane %v7256_v35, 4  ;;  %v6574_v21 = vld [vmem:[#allocation3 + $0x30] sm:$0xf] }
 0x5a0   : > { %v7567_v49 = vrot.slane %v13685_v0, 4  ;;  %v7579_v61 = vshrl.u32 %v7476_v45, 16  ;;  %v7582_v6 = vshll.u32 %v7476_v45, 16  ;;  %v6678_v40 = vsel %vm9868_vm11, %v6670_v51, %v6677_v28  ;;  %v13765_v11 = vld [vmem:[#allocation3 + $0x34] sm:$0xf] }
 0x5a1   : > { %v9659_v39 = vld [vmem:[#allocation4 + $0x50] ss:$12 sps:$4 sm:$0xff]   ;;  %6532 = vrot.lane.b32.xlu1 %v6506_v31, %s9719_s7  ;;  %v7571_v60 = vrot.slane %v7569_v55, 5  ;;  %v7574_v50 = vrot.slane %v7572_v44, 6  ;;  %v14308_v15 = vrot.slane %v13346_v7, 4  ;;  %v7078_v0 = vsel %vm9911_vm13, %v7073_v32, %v13744_v1 }
 0x5a2   : > { %v7581_v4 = vrot.slane %v7579_v61, 5  ;;  %v7584_v41 = vrot.slane %v7582_v6, 6  ;;  %v6859_v16 = vshrl.u32 %v6760_v24, 16  ;;  %9487 = vmatmul.mubr.msk.bf16.gmra.mxu0 %vm2071_vm14, %v9659_v39  ;;  %6717 = vrot.lane.b32.xlu0 %v6678_v40, %s9721_s23  ;;  %v7262_v7 = vsel %vm9911_vm13, %v7257_v22, %v13750_v29  ;;  %v7166_v45 = vld [vmem:[#allocation3 + $0x34] sm:$0xf] }
 0x5a3   : > { %v6339_v54 = vsel %vm10354_vm2, %v14308_v15, %v13682_v52  ;;  %v7406_v8 = vsel %vm9829_vm9, %v7404_v33, %v7405_v63  ;;  %v7575_v56 = vor.u32 %v7574_v50, %v7571_v60  ;;  %v6681_v14 = vshrl.u32 %v6574_v21, 16  ;;  %9490 = vmatprep.mubr.msk.bf16.mxu0 %vm9723_vm8, %v14266_v34  ;;  %v6948_v43 = vld [vmem:[#allocation3 + $0x38] sm:$0x3]  ;;  %v13806_v40 = vld [vmem:[#allocation3 + $0x3c] sm:$0x7] }
 0x5a4   : > { %6433 = vst.msk [vmem:[#allocation4 + $0x30] sm:$0xf] %vm290_vm0, %v6339_v54  ;;  %v13779_v46 = vor.u32 %v7584_v41, %v7581_v4  ;;  %v13781_v51 = vrot.slane %v6859_v16, 7  ;;  %v6862_v20 = vshll.u32 %v6760_v24, 16  ;;  %v7081_v5 = vrot.slane %v7079_v37, 4 }
 0x5a5   : > { %7122 = vrot.lane.b32.xlu1 %v7078_v0, %s9719_s7  ;;  %v7576_v31 = vsel %vm10661_vm12, %v7567_v49, %v7575_v56  ;;  %v7577_v28 = vrot.slane %v7575_v56, 4  ;;  %v13786_v35 = vrot.slane %v6681_v14, 7  ;;  %v7085_v19 = vshll.u32 %v13765_v11, 16  ;;  %v7477_v55 = vld [vmem:[#allocation3 + $0x38] sm:$0xf] }
 0x5a6   : > { %7629 = vst.msk [vmem:[#allocation4 + $0x68] sm:$0xf] %vm290_vm0, %v7576_v31  ;;  %v6857_v32 = vrot.slane %v13705_v62, 4  ;;  %v6864_v33 = vor.u32 %v6862_v20, %v13781_v51  ;;  %v6684_v24 = vshll.u32 %v6574_v21, 16  ;;  %v7082_v37 = vor.u32 %v7081_v5, %v13744_v1  ;;  %7314 = vrot.lane.b32.xlu0 %v7262_v7, %s9721_s23  ;;  %v13800_v62 = vld [vmem:[#allocation3 + $0x38] sm:$0xf] }
 0x5a7   : > { %6961 = vst.msk [vmem:[#allocation4 + $0x94] sm:$0x3] %vm307_vm1, %v6948_v43  ;;  %v7586_v44 = vsel %vm10661_vm12, %v7577_v28, %v13779_v46  ;;  %v6679_v22 = vrot.slane %v13727_v48, 4  ;;  %v7089_v49 = vshrl.u32 %v13765_v11, 16  ;;  %v7265_v61 = vrot.slane %v7263_v18, 4 }
 0x5a8   : > { %7630 = vst.msk [vmem:[#allocation4 + $0x74] sm:$0xf] %vm290_vm0, %v7586_v44  ;;  %v6686_v1 = vor.u32 %v6684_v24, %v13786_v35  ;;  %v13804_v6 = vrot.slane %v7085_v19, 5  ;;  %v7269_v21 = vshll.u32 %v7166_v45, 16  ;;  %v7273_v39 = vshrl.u32 %v7166_v45, 16 }
 0x5a9   : > { %7432 = vrot.lane.b32.xlu1 %v7406_v8, %s9720_s10  ;;  %v7083_v60 = vrot.slane %v7082_v37, 4  ;;  %v7266_v48 = vor.u32 %v7265_v61, %v13750_v29  ;;  %v7589_v50 = vshrl.u32 %v7477_v55, 16  ;;  %v7592_v15 = vshll.u32 %v7477_v55, 16  ;;  %v6761_v18 = vld [vmem:[#allocation3 + $0x34] sm:$0xf] }
 0x5aa   : > { %v6865_v54 = vsel %vm9868_vm11, %v6857_v32, %v6864_v33  ;;  %v7271_v0 = vrot.slane %v7269_v21, 5  ;;  %v7275_v4 = vrot.slane %v7273_v39, 4  ;;  %v7279_v41 = vshll.u32 %v13800_v62, 16  ;;  %v7361_v56 = vld [vmem:[#allocation3 + $0x38] sm:$0xf] }
 0x5ab   : > { %6904 = vrot.lane.b32.xlu0 %v6865_v54, %s9720_s10  ;;  %v7267_v16 = vrot.slane %v7266_v48, 4  ;;  %v7591_v11 = vrot.slane %v7589_v50, 5  ;;  %v7594_v7 = vrot.slane %v7592_v15, 6  ;;  %v7411_v8 = vrot.slane %v13806_v40, 5  ;;  %v13818_v45 = vld [vmem:[#allocation3 + $0x38] sm:$0x7] }
 0x5ac   : > { %v7587_v29 = vrot.slane %v13779_v46, 4  ;;  %v6687_v14 = vsel %vm9868_vm11, %v6679_v22, %v6686_v1  ;;  %v7276_v20 = vor.u32 %v7275_v4, %v7271_v0  ;;  %v6868_v5 = vshrl.u32 %v6761_v18, 16  ;;  %v6455_v37 = vld [vmem:[#allocation3 + $0x34] sm:$0x1]  ;;  %v13830_v22 = vpop.permute.xlu0 %7414  ;;  %v6762_v4 = vld [vmem:[#allocation3 + $0x38] sm:$0x3] }
 0x5ad   : > { %6719 = vrot.lane.b32.xlu1 %v6687_v14, %s9721_s23  ;;  %v7088_v31 = vsel %vm9911_vm13, %v7083_v60, %v13804_v6  ;;  %v7595_v28 = vor.u32 %v7594_v7, %v7591_v11  ;;  %v7281_v19 = vrot.slane %v7279_v41, 5  ;;  %v7283_v43 = vshrl.u32 %v13800_v62, 16  ;;  %v6517_v61 = vpop.permute.xlu1 %6516  ;;  %v6575_v50 = vld [vmem:[#allocation3 + $0x34] sm:$0x3]  ;;  %v6274_v14 = vld [vmem:[#allocation3 + $0x18] sm:$0xf] }
 0x5ae   : > { %v13825_v32 = vrot.slane %v6868_v5, 7  ;;  %v6871_v46 = vshll.u32 %v6761_v18, 16  ;;  %v7408_v33 = vrot.slane %v7361_v56, 5  ;;  %v7091_v24 = vrot.slane %v7089_v49, 4  ;;  %6552 = vst.msk [vmem:[#allocation4 + $0x24] sm:$0xf] %vm691_vm3, %v6517_v61 }
 0x5af   : > { %v9660_v55 = vld [vmem:[#allocation4 + $0x68] ss:$12 sps:$4 sm:$0xff]   ;;  %7124 = vrot.lane.b32.xlu0 %v7088_v31, %s9719_s7  ;;  %v7272_v44 = vsel %vm9911_vm13, %v7267_v16, %v7271_v0  ;;  %v7596_v1 = vsel %vm10661_vm12, %v7587_v29, %v7595_v28  ;;  %v7597_v21 = vrot.slane %v7595_v28, 4  ;;  %v7095_v62 = vshll.u32 %v13818_v45, 16  ;;  %v6275_v28 = vld [vmem:[#allocation3 + $0x1c] sm:$0xf] }
 0x5b0   : > { %7631 = vst.msk [vmem:[#allocation4 + $0x80] sm:$0xf] %vm290_vm0, %v7596_v1  ;;  %v7277_v49 = vrot.slane %v7276_v20, 4  ;;  %v6873_v39 = vor.u32 %v6871_v46, %v13825_v32  ;;  %v7407_v60 = vrot.slane %v7405_v63, 4  ;;  %v7092_v48 = vor.u32 %v7091_v24, %v13804_v6  ;;  %9491 = vmatmul.mubr.msk.bf16.gmra.mxu0 %vm2071_vm14, %v9660_v55  ;;  %v6702_v6 = vpop.permute.xlu0 %6701 }
 0x5b1   : > { %7316 = vrot.lane.b32.xlu1 %v7272_v44, %s9721_s23  ;;  %v7606_v15 = vsel %vm10661_vm12, %v7597_v21, %v12974_v26  ;;  %v6866_v18 = vrot.slane %v13781_v51, 4  ;;  %v13847_v54 = vrot.slane %v7095_v62, 5  ;;  %v6508_v0 = vrot.slane %v6455_v37, 7  ;;  %9494 = vmatprep.mubr.msk.bf16.mxu0 %vm9723_vm8, %v14266_v34  ;;  %v7107_v41 = vpop.permute.xlu1 %7106  ;;  %6738 = vst.msk [vmem:[#allocation4 + $0x18] sm:$0xf] %vm883_vm4, %v6702_v6 }
 0x5b2   : > { %7632 = vst.msk [vmem:[#allocation4 + $0x8c] sm:$0xf] %vm290_vm0, %v7606_v15  ;;  %v7282_v53 = vsel %vm9911_vm13, %v7277_v49, %v7281_v19  ;;  %v7409_v63 = vsel %vm9829_vm9, %v7407_v60, %v7408_v33  ;;  %v6507_v27 = vrot.slane %v6505_v13, 4  ;;  %v7285_v26 = vrot.slane %v7283_v43, 4  ;;  %v6277_v60 = vld [vmem:[#allocation3 + $0x24] sm:$0xf] }
 0x5b3   : > { %7318 = vrot.lane.b32.xlu0 %v7282_v53, %s9721_s23  ;;  %v6874_v51 = vsel %vm9868_vm11, %v6866_v18, %v6873_v39  ;;  %v7093_v16 = vrot.slane %v7092_v48, 4  ;;  %v6688_v11 = vrot.slane %v13786_v35, 4  ;;  %v6690_v7 = vshrl.u32 %v6575_v50, 16  ;;  %7144 = vst.msk [vmem:[#allocation4 + $0x10] sm:$0xf] %vm691_vm3, %v7107_v41 }
 0x5b4   : > { %v6509_v10 = vsel %vm9813_vm7, %v6507_v27, %v6508_v0  ;;  %v7286_v13 = vor.u32 %v7285_v26, %v7281_v19  ;;  %v6693_v56 = vshll.u32 %v6575_v50, 16  ;;  %v6877_v29 = vshrl.u32 %v6762_v4, 16  ;;  %v6276_v19 = vld [vmem:[#allocation3 + $0x20] sm:$0xf]  ;;  %v7299_v55 = vpop.permute.xlu0 %7298 }
 0x5b5   : > { %6906 = vrot.lane.b32.xlu1 %v6874_v51, %s9720_s10  ;;  %v7098_v20 = vsel %vm9911_vm13, %v7093_v16, %v13847_v54  ;;  %v6692_v5 = vrot.slane %v6690_v7, 7  ;;  %v7410_v35 = vrot.slane %v7408_v33, 4  ;;  %v7099_v31 = vshrl.u32 %v13818_v45, 16  ;;  %v13872_v44 = vpop.permute.xlu1 %7416  ;;  %7337 = vst.msk [vmem:[#allocation4 + $0x4] sm:$0xf] %vm883_vm4, %v7299_v55 }
 0x5b6   : > { %v7287_v43 = vrot.slane %v7286_v13, 4  ;;  %v6879_v46 = vrot.slane %v6877_v29, 7  ;;  %v6880_v24 = vshll.u32 %v6762_v4, 16  ;;  %v7293_v37 = vshrl.u32 %v9710_v17, 16  ;;  %7453 = vst.msk [vmem:[#allocation4 + $0x4] sm:$0xf] %vm1072_vm10, %v13830_v22 }
 0x5b7   : > { %7434 = vrot.lane.b32.xlu0 %v7409_v63, %s9720_s10  ;;  %v6695_v61 = vor.u32 %v6693_v56, %v6692_v5  ;;  %v13874_v1 = vrot.slane %v7099_v31, 4  ;;  %v6342_v21 = vshrl.u32 %v6274_v14, 16  ;;  %v6345_v62 = vshll.u32 %v6274_v14, 16  ;;  %v6278_v51 = vld [vmem:[#allocation3 + $0x28] sm:$0xf] }
 0x5b8   : > { %v6875_v45 = vrot.slane %v13825_v32, 4  ;;  %v6882_v33 = vor.u32 %v6880_v24, %v6879_v46  ;;  %v13878_v49 = vrot.slane %v7293_v37, 4  ;;  %v6340_v39 = vrot.slane %v13682_v52, 4  ;;  %v6889_v47 = vpop.permute.xlu0 %6888  ;;  %v6280_v46 = vld [vmem:[#allocation3 + $0x30] sm:$0xf] }
 0x5b9   : > { %v9664_v48 = vld [vmem:[#allocation4 + $0x80] ss:$12 sps:$4 sm:$0xff]   ;;  %7126 = vrot.lane.b32.xlu1 %v7098_v20, %s9719_s7  ;;  %v7292_v50 = vsel %vm9911_vm13, %v7287_v43, %v13365_v59  ;;  %v7412_v32 = vsel %vm9829_vm9, %v7410_v35, %v7411_v8  ;;  %v6344_v15 = vrot.slane %v6342_v21, 6  ;;  %v6347_v18 = vrot.slane %v6345_v62, 7  ;;  %v6704_v22 = vpop.permute.xlu1 %6703  ;;  %6925 = vst.msk [vmem:[#allocation4 + $0x18] sm:$0xf] %vm1072_vm10, %v6889_v47 }
 0x5ba   : > { %v6696_v52 = vsel %vm9868_vm11, %v6688_v11, %v6695_v61  ;;  %v7102_v0 = vor.u32 %v13874_v1, %v13847_v54  ;;  %v6352_v4 = vshrl.u32 %v6275_v28, 16  ;;  %v6355_v53 = vshll.u32 %v6275_v28, 16  ;;  %9495 = vmatmul.mubr.msk.bf16.gmra.mxu0 %vm2071_vm14, %v9664_v48  ;;  %6739 = vst.msk [vmem:[#allocation4 + $0x24] sm:$0xf] %vm883_vm4, %v6704_v22  ;;  %v6279_v11 = vld [vmem:[#allocation3 + $0x2c] sm:$0xf] }
 0x5bb   : > { %6534 = vrot.lane.b32.xlu0 %v6509_v10, %s9719_s7  ;;  %v6883_v30 = vsel %vm9868_vm11, %v6875_v45, %v6882_v33  ;;  %v6348_v63 = vor.u32 %v6347_v18, %v6344_v15  ;;  %v6362_v27 = vshrl.u32 %v6276_v19, 16  ;;  %v6365_v26 = vshll.u32 %v6276_v19, 16  ;;  %9498 = vmatprep.mubr.msk.bf16.mxu0 %vm9723_vm8, %v14266_v34  ;;  %v6281_v55 = vld [vmem:[#allocation3 + $0x34] sm:$0x1] }
 0x5bc   : > { %v7296_v54 = vor.u32 %v13878_v49, %v13365_v59  ;;  %v6354_v6 = vrot.slane %v6352_v4, 6  ;;  %v6357_v41 = vrot.slane %v6355_v53, 7  ;;  %v6372_v16 = vshrl.u32 %v6277_v60, 16  ;;  %v9697_v40 = vld [vmem:[#allocation4 + $0x98] ss:$0 sps:$4 sm:$0x33]  }
 0x5bd   : > { %7320 = vrot.lane.b32.xlu1 %v7292_v50, %s9721_s23  ;;  %v6349_v58 = vsel %vm10354_vm2, %v6340_v39, %v6348_v63  ;;  %v6350_v7 = vrot.slane %v6348_v63, 4  ;;  %v6364_v10 = vrot.slane %v6362_v27, 6  ;;  %v6367_v13 = vrot.slane %v6365_v26, 7  ;;  %v6519_v20 = vpop.permute.xlu0 %6518  ;;  %v7301_v5 = vpop.permute.xlu1 %7300 }
 0x5be   : > { %6434 = vst.msk [vmem:[#allocation4 + $0x3c] sm:$0xf] %vm290_vm0, %v6349_v58  ;;  %v6358_v56 = vor.u32 %v6357_v41, %v6354_v6  ;;  %v6374_v29 = vrot.slane %v6372_v16, 6  ;;  %v6375_v59 = vshll.u32 %v6277_v60, 16  ;;  %v6382_v14 = vshrl.u32 %v6278_v51, 16 }
 0x5bf   : > { %6721 = vrot.lane.b32.xlu0 %v6696_v52, %s9721_s23  ;;  %v6368_v35 = vor.u32 %v6367_v13, %v6364_v10  ;;  %v6385_v31 = vshll.u32 %v6278_v51, 16  ;;  %v6392_v28 = vshrl.u32 %v6279_v11, 16  ;;  %v6395_v43 = vshll.u32 %v6279_v11, 16  ;;  %6553 = vst.msk [vmem:[#allocation4 + $0x30] sm:$0xf] %vm691_vm3, %v6519_v20 }
 0x5c0   : > { %7338 = vst.msk [vmem:[#allocation4 + $0x10] sm:$0xf] %vm883_vm4, %v7301_v5  ;;  %v6359_v24 = vsel %vm10354_vm2, %v6350_v7, %v6358_v56  ;;  %v6360_v17 = vrot.slane %v6358_v56, 4  ;;  %v6377_v37 = vrot.slane %v6375_v59, 7  ;;  %v6384_v19 = vrot.slane %v6382_v14, 6 }
 0x5c1   : > { %7436 = vrot.lane.b32.xlu1 %v7412_v32, %s9720_s10  ;;  %7454 = vst.msk [vmem:[#allocation4 + $0x10] sm:$0xf] %vm1072_vm10, %v13872_v44  ;;  %v6370_v61 = vrot.slane %v6368_v35, 4  ;;  %v6387_v1 = vrot.slane %v6385_v31, 7  ;;  %v6394_v21 = vrot.slane %v6392_v28, 6  ;;  %v6397_v62 = vrot.slane %v6395_v43, 7  ;;  %v7109_v48 = vpop.permute.xlu0 %7108 }
 0x5c2   : > { %6435 = vst.msk [vmem:[#allocation4 + $0x48] sm:$0xf] %vm290_vm0, %v6359_v24  ;;  %v6369_v45 = vsel %vm10354_vm2, %v6360_v17, %v6368_v35  ;;  %v6378_v33 = vor.u32 %v6377_v37, %v6374_v29  ;;  %v6402_v49 = vshrl.u32 %v6280_v46, 16  ;;  %v6405_v39 = vshll.u32 %v6280_v46, 16  ;;  %v6891_v50 = vpop.permute.xlu1 %6890  ;;  %v9678_v51 = vld [vmem:[#allocation4] ss:$12 sps:$4 sm:$0xff]   ;;  %9499 = vmatmul.mubr.msk.bf16.gmra.mxu0 %vm2071_vm14, %v9697_v40 }
 0x5c3   : > { %6908 = vrot.lane.b32.xlu0 %v6883_v30, %s9720_s10  ;;  %v7103_v60 = vrot.slane %v7102_v0, 4  ;;  %6436 = vst.msk [vmem:[#allocation4 + $0x54] sm:$0xf] %vm290_vm0, %v6369_v45  ;;  %v6388_v44 = vor.u32 %v6387_v1, %v6384_v19  ;;  %v6398_v32 = vor.u32 %v6397_v62, %v6394_v21  ;;  %v6412_v15 = vshll.u32 %v6281_v55, 16  ;;  %v9698_v40 = vld [vmem:[%s14171_s4 + $0x8] sm:$0xff]  }
 0x5c4   : > { %7145 = vst.msk [vmem:[#allocation4 + $0x1c] sm:$0xf] %vm691_vm3, %v7109_v48  ;;  %v6379_v18 = vsel %vm10354_vm2, %v6370_v61, %v6378_v33  ;;  %v6380_v52 = vrot.slane %v6378_v33, 4  ;;  %v6404_v4 = vrot.slane %v6402_v49, 6  ;;  %v6407_v53 = vrot.slane %v6405_v39, 7 }
 0x5c5   : > { %6926 = vst.msk [vmem:[#allocation4 + $0x24] sm:$0xf] %vm1072_vm10, %v6891_v50  ;;  %7128 = vrot.lane.b32.xlu1 %v7103_v60, %s9719_s7  ;;  %v7297_v0 = vrot.slane %v7296_v54, 4  ;;  %v6390_v47 = vrot.slane %v6388_v44, 4  ;;  %v6400_v30 = vrot.slane %v6398_v32, 4  ;;  %v6414_v27 = vrot.slane %v6412_v15, 7 }
 0x5c6   : > { %6437 = vst.msk [vmem:[#allocation4 + $0x60] sm:$0xf] %vm290_vm0, %v6379_v18  ;;  %v6389_v22 = vsel %vm10354_vm2, %v6380_v52, %v6388_v44  ;;  %v6408_v63 = vor.u32 %v6407_v53, %v6404_v4  ;;  %v7413_v11 = vrot.slane %v7411_v8, 4 }
 0x5c7   : > { %6438 = vst.msk [vmem:[#allocation4 + $0x6c] sm:$0xf] %vm290_vm0, %v6389_v22  ;;  %v6399_v26 = vsel %vm10354_vm2, %v6390_v47, %v6398_v32 }
 0x5c8   : > { %v9680_v6 = vld [vmem:[#allocation4 + $0x4] ss:$12 sps:$4 sm:$0xff]   ;;  %6439 = vst.msk [vmem:[#allocation4 + $0x78] sm:$0xf] %vm290_vm0, %v6399_v26  ;;  %v6409_v54 = vsel %vm10354_vm2, %v6400_v30, %v6408_v63  ;;  %v6410_v41 = vrot.slane %v6408_v63, 4  ;;  %v7419_v16 = vpop.permute.xlu0 %7418 }
 0x5c9   : > { %7322 = vrot.lane.b32.xlu1 %v7297_v0, %s9721_s23  ;;  %6440 = vst.msk [vmem:[#allocation4 + $0x84] sm:$0xf] %vm290_vm0, %v6409_v54  ;;  %v6521_v58 = vpop.permute.xlu1 %6520  ;;  %7966 = vmatprep.mubr.bf16.mxu1 %v9680_v6 }
 0x5ca   : > { %v6415_v7 = vsel %vm10354_vm2, %v6410_v41, %v6414_v27  ;;  %6554 = vst.msk [vmem:[#allocation4 + $0x3c] sm:$0xf] %vm691_vm3, %v6521_v58  ;;  %7967 = vmatmul.mubr.bf16.vlgmr.msra.gmra.mxu1 %v9678_v51 }
 0x5cb   : > { %6441 = vst.msk [vmem:[#allocation4 + $0x90] sm:$0x3] %vm307_vm1, %v6415_v7  ;;  %9503 = vmatpush3.bf16.msra.mxu1 %v9698_v40 }
 0x5cc   : > { %v6706_v10 = vpop.permute.xlu0 %6705  ;;  %v9683_v43 = vld [vmem:[#allocation4 + $0x18] ss:$12 sps:$4 sm:$0xff]   ;;  %9504 = vmatprep.subr.bf16.mxu1 %v14266_v34 }
 0x5cd   : > { %7438 = vrot.lane.b32.xlu1 %v7413_v11, %s9720_s10  ;;  %6740 = vst.msk [vmem:[#allocation4 + $0x30] sm:$0xf] %vm883_vm4, %v6706_v10  ;;  %v7111_v13 = vpop.permute.xlu1 %7110 }
 0x5ce   : > { %7146 = vst.msk [vmem:[#allocation4 + $0x28] sm:$0xf] %vm691_vm3, %v7111_v13 }
 0x5d0   : > { %v7303_v8 = vpop.permute.xlu0 %7302 }
 0x5d1   : > { %7339 = vst.msk [vmem:[#allocation4 + $0x1c] sm:$0xf] %vm883_vm4, %v7303_v8  ;;  %v7421_v38 = vpop.permute.xlu1 %7420 }
 0x5d2   : > { %7455 = vst.msk [vmem:[#allocation4 + $0x1c] sm:$0xf] %vm1072_vm10, %v7419_v16 }
 0x5d4   : > { %v6893_v56 = vpop.permute.xlu0 %6892 }
 0x5d5   : > { %6927 = vst.msk [vmem:[#allocation4 + $0x30] sm:$0xf] %vm1072_vm10, %v6893_v56 }
 0x5d7   : > { %v6708_v29 = vpop.permute.xlu1 %6707 }
 0x5d8   : > { %6741 = vst.msk [vmem:[#allocation4 + $0x3c] sm:$0xf] %vm883_vm4, %v6708_v29  ;;  %v6523_v59 = vpop.permute.xlu0 %6522 }
 0x5d9   : > { %6555 = vst.msk [vmem:[#allocation4 + $0x48] sm:$0xf] %vm691_vm3, %v6523_v59 }
 0x5db   : > { %v7305_v14 = vpop.permute.xlu1 %7304 }
 0x5dc   : > { %7340 = vst.msk [vmem:[#allocation4 + $0x28] sm:$0xf] %vm883_vm4, %v7305_v14  ;;  %v7113_v20 = vpop.permute.xlu0 %7112 }
 0x5dd   : > { %7456 = vst.msk [vmem:[#allocation4 + $0x28] sm:$0xf] %vm1072_vm10, %v7421_v38 }
 0x5de   : > { %7147 = vst.msk [vmem:[#allocation4 + $0x34] sm:$0xf] %vm691_vm3, %v7113_v20 }
 0x5df   : > { %v6895_v5 = vpop.permute.xlu1 %6894 }
 0x5e0   : > { %6928 = vst.msk [vmem:[#allocation4 + $0x3c] sm:$0xf] %vm1072_vm10, %v6895_v5  ;;  %v7423_v35 = vpop.permute.xlu0 %7422 }
 0x5e3   : > { %v6525_v31 = vpop.permute.xlu1 %6524 }
 0x5e4   : > { %6556 = vst.msk [vmem:[#allocation4 + $0x54] sm:$0xf] %vm691_vm3, %v6525_v31  ;;  %v9681_v28 = vld [vmem:[#allocation4 + $0x1c] ss:$12 sps:$4 sm:$0xff]   ;;  %v6710_v46 = vpop.permute.xlu0 %6709 }
 0x5e5   : > { %7974 = vmatprep.mubr.bf16.mxu1 %v9681_v28  ;;  %6742 = vst.msk [vmem:[#allocation4 + $0x48] sm:$0xf] %vm883_vm4, %v6710_v46 }
 0x5e6   : > { %7975 = vmatmul.mubr.bf16.gmra.mxu1 %v9683_v43 }
 0x5e7   : > { %v7115_v24 = vpop.permute.xlu1 %7114  ;;  %v9686_v39 = vld [vmem:[#allocation4 + $0x30] ss:$12 sps:$4 sm:$0xff]  }
 0x5e8   : > { %7148 = vst.msk [vmem:[#allocation4 + $0x40] sm:$0xf] %vm691_vm3, %v7115_v24  ;;  %v7307_v17 = vpop.permute.xlu0 %7306 }
 0x5e9   : > { %7341 = vst.msk [vmem:[#allocation4 + $0x34] sm:$0xf] %vm883_vm4, %v7307_v17 }
 0x5ea   : > { %7457 = vst.msk [vmem:[#allocation4 + $0x34] sm:$0xf] %vm1072_vm10, %v7423_v35 }
 0x5eb   : > { %v7425_v37 = vpop.permute.xlu1 %7424 }
 0x5ec   : > { %v6897_v19 = vpop.permute.xlu0 %6896 }
 0x5ed   : > { %6929 = vst.msk [vmem:[#allocation4 + $0x48] sm:$0xf] %vm1072_vm10, %v6897_v19 }
 0x5ef   : > { %v6712_v55 = vpop.permute.xlu1 %6711 }
 0x5f0   : > { %6743 = vst.msk [vmem:[#allocation4 + $0x54] sm:$0xf] %vm883_vm4, %v6712_v55  ;;  %v6527_v61 = vpop.permute.xlu0 %6526 }
 0x5f1   : > { %6557 = vst.msk [vmem:[#allocation4 + $0x60] sm:$0xf] %vm691_vm3, %v6527_v61 }
 0x5f3   : > { %v7309_v1 = vpop.permute.xlu1 %7308 }
 0x5f4   : > { %7342 = vst.msk [vmem:[#allocation4 + $0x40] sm:$0xf] %vm883_vm4, %v7309_v1  ;;  %v7117_v21 = vpop.permute.xlu0 %7116 }
 0x5f5   : > { %7458 = vst.msk [vmem:[#allocation4 + $0x40] sm:$0xf] %vm1072_vm10, %v7425_v37  ;;  %v9699_v37 = vld [vmem:[%s14171_s4] sm:$0xff]  }
 0x5f6   : > { %7149 = vst.msk [vmem:[#allocation4 + $0x4c] sm:$0xf] %vm691_vm3, %v7117_v21  ;;  %9505 = vmatpush3.bf16.msra.mxu1 %v9699_v37 }
 0x5f7   : > { %v6899_v62 = vpop.permute.xlu1 %6898 }
 0x5f8   : > { %6930 = vst.msk [vmem:[#allocation4 + $0x54] sm:$0xf] %vm1072_vm10, %v6899_v62  ;;  %v7427_v45 = vpop.permute.xlu0 %7426 }
 0x5fb   : > { %v6529_v33 = vpop.permute.xlu1 %6528 }
 0x5fc   : > { %6558 = vst.msk [vmem:[#allocation4 + $0x6c] sm:$0xf] %vm691_vm3, %v6529_v33  ;;  %v9684_v49 = vld [vmem:[#allocation4 + $0x34] ss:$12 sps:$4 sm:$0xff]   ;;  %v6714_v60 = vpop.permute.xlu0 %6713 }
 0x5fd   : > { %7982 = vmatprep.mubr.bf16.mxu1 %v9684_v49  ;;  %6744 = vst.msk [vmem:[#allocation4 + $0x60] sm:$0xf] %vm883_vm4, %v6714_v60 }
 0x5fe   : > { %7983 = vmatmul.mubr.bf16.gmra.mxu1 %v9686_v39 }
 0x5ff   : > { %v7119_v48 = vpop.permute.xlu1 %7118  ;;  %v9689_v30 = vld [vmem:[#allocation4 + $0x48] ss:$12 sps:$4 sm:$0xff]  }
 0x600   : > { %7150 = vst.msk [vmem:[#allocation4 + $0x58] sm:$0xf] %vm691_vm3, %v7119_v48  ;;  %v7311_v50 = vpop.permute.xlu0 %7310 }
 0x601   : > { %7343 = vst.msk [vmem:[#allocation4 + $0x4c] sm:$0xf] %vm883_vm4, %v7311_v50 }
 0x602   : > { %7459 = vst.msk [vmem:[#allocation4 + $0x4c] sm:$0xf] %vm1072_vm10, %v7427_v45 }
 0x603   : > { %v7429_v44 = vpop.permute.xlu1 %7428 }
 0x604   : > { %v6901_v32 = vpop.permute.xlu0 %6900 }
 0x605   : > { %6931 = vst.msk [vmem:[#allocation4 + $0x60] sm:$0xf] %vm1072_vm10, %v6901_v32 }
 0x607   : > { %v6716_v15 = vpop.permute.xlu1 %6715 }
 0x608   : > { %6745 = vst.msk [vmem:[#allocation4 + $0x6c] sm:$0xf] %vm883_vm4, %v6716_v15  ;;  %v6531_v18 = vpop.permute.xlu0 %6530 }
 0x609   : > { %6559 = vst.msk [vmem:[#allocation4 + $0x78] sm:$0xf] %vm691_vm3, %v6531_v18 }
 0x60b   : > { %v7313_v52 = vpop.permute.xlu1 %7312 }
 0x60c   : > { %7344 = vst.msk [vmem:[#allocation4 + $0x58] sm:$0xf] %vm883_vm4, %v7313_v52  ;;  %v7121_v4 = vpop.permute.xlu0 %7120 }
 0x60d   : > { %7460 = vst.msk [vmem:[#allocation4 + $0x58] sm:$0xf] %vm1072_vm10, %v7429_v44 }
 0x60e   : > { %7151 = vst.msk [vmem:[#allocation4 + $0x64] sm:$0xf] %vm691_vm3, %v7121_v4 }
 0x60f   : > { %v6903_v53 = vpop.permute.xlu1 %6902 }
 0x610   : > { %6932 = vst.msk [vmem:[#allocation4 + $0x6c] sm:$0xf] %vm1072_vm10, %v6903_v53  ;;  %v7431_v0 = vpop.permute.xlu0 %7430 }
 0x612   : > { %v13982_v63 = vpop.f32.mrf.mxu0 }
 0x613   : > { %v6533_v47 = vpop.permute.xlu1 %6532 }
 0x614   : > { %v9687_v22 = vld [vmem:[#allocation4 + $0x4c] ss:$12 sps:$4 sm:$0xff]   ;;  %6560 = vst.msk [vmem:[#allocation4 + $0x84] sm:$0xf] %vm691_vm3, %v6533_v47  ;;  %v6718_v27 = vpop.permute.xlu0 %6717  ;;  %v9476_v26 = vpop.f32.mrf.mxu0 }
 0x615   : > { %7990 = vmatprep.mubr.bf16.mxu1 %v9687_v22  ;;  %6746 = vst.msk [vmem:[#allocation4 + $0x78] sm:$0xf] %vm883_vm4, %v6718_v27 }
 0x616   : > { %7991 = vmatmul.mubr.bf16.gmra.mxu1 %v9689_v30  ;;  %v13986_v6 = vpop.f32.mrf.mxu0 }
 0x617   : > { %v7123_v51 = vpop.permute.xlu1 %7122  ;;  %v9692_v59 = vld [vmem:[#allocation4 + $0x60] ss:$12 sps:$4 sm:$0xff]  }
 0x618   : > { %7152 = vst.msk [vmem:[#allocation4 + $0x70] sm:$0xf] %vm691_vm3, %v7123_v51  ;;  %v7315_v54 = vpop.permute.xlu0 %7314  ;;  %v9477_v41 = vpop.f32.mrf.mxu0  ;;  %v14039_v51 = vld [vmem:[%s14170_s3 + $0x3] ss:$0 sm:$0xff] }
 0x619   : > { %7345 = vst.msk [vmem:[#allocation4 + $0x64] sm:$0xf] %vm883_vm4, %v7315_v54 }
 0x61a   : > { %7461 = vst.msk [vmem:[#allocation4 + $0x64] sm:$0xf] %vm1072_vm10, %v7431_v0 }
 0x61b   : > { %v7433_v16 = vpop.permute.xlu1 %7432 }
 0x61d   : > { %v6905_v11 = vpop.permute.xlu0 %6904 }
 0x61e   : > { %6933 = vst.msk [vmem:[#allocation4 + $0x78] sm:$0xf] %vm1072_vm10, %v6905_v11 }
 0x61f   : > { %v6720_v58 = vpop.permute.xlu1 %6719 }
 0x620   : > { %6747 = vst.msk [vmem:[#allocation4 + $0x84] sm:$0xf] %vm883_vm4, %v6720_v58 }
 0x621   : > { %v7125_v7 = vpop.permute.xlu0 %7124 }
 0x622   : > { %7153 = vst.msk [vmem:[#allocation4 + $0x7c] sm:$0xf] %vm691_vm3, %v7125_v7 }
 0x623   : > { %v7317_v10 = vpop.permute.xlu1 %7316 }
 0x624   : > { %7346 = vst.msk [vmem:[#allocation4 + $0x70] sm:$0xf] %vm883_vm4, %v7317_v10 }
 0x625   : > { %7462 = vst.msk [vmem:[#allocation4 + $0x70] sm:$0xf] %vm1072_vm10, %v7433_v16  ;;  %v7319_v13 = vpop.permute.xlu0 %7318  ;;  %v9091_v16 = vld [vmem:[#allocation2 + $0x8] sm:$0xff]  }
 0x626   : > { %7347 = vst.msk [vmem:[#allocation4 + $0x7c] sm:$0xf] %vm883_vm4, %v7319_v13  ;;  %v9063_v13 = vunpack.c.l.bf16 %v9091_v16 }
 0x627   : > { %v6907_v8 = vpop.permute.xlu1 %6906 }
 0x628   : > { %6934 = vst.msk [vmem:[#allocation4 + $0x84] sm:$0xf] %vm1072_vm10, %v6907_v8 }
 0x629   : > { %v7435_v38 = vpop.permute.xlu0 %7434 }
 0x62a   : > { %7463 = vst.msk [vmem:[#allocation4 + $0x7c] sm:$0xf] %vm1072_vm10, %v7435_v38 }
 0x62b   : > { %v7127_v56 = vpop.permute.xlu1 %7126 }
 0x62c   : > { %7154 = vst.msk [vmem:[#allocation4 + $0x88] sm:$0xf] %vm691_vm3, %v7127_v56  ;;  %v9690_v29 = vld [vmem:[#allocation4 + $0x64] ss:$12 sps:$4 sm:$0xff]  }
 0x62d   : > { %v6535_v14 = vpop.permute.xlu0 %6534  ;;  %7998 = vmatprep.mubr.bf16.mxu1 %v9690_v29 }
 0x62e   : > { %6561 = vst.msk [vmem:[#allocation4 + $0x90] sm:$0x3] %vm704_vm15, %v6535_v14  ;;  %7999 = vmatmul.mubr.bf16.gmra.mxu1 %v9692_v59 }
 0x62f   : > { %v7321_v20 = vpop.permute.xlu1 %7320 }
 0x630   : > { %7348 = vst.msk [vmem:[#allocation4 + $0x88] sm:$0xf] %vm883_vm4, %v7321_v20  ;;  %v14005_v5 = vpop.f32.mrf.mxu0  ;;  %v9064_v20 = vunpack.c.h.bf16 %v9091_v16 }
 0x631   : > { %v6722_v35 = vpop.permute.xlu0 %6721  ;;  %v7654_v55 = vld [vmem:[#allocation4 + $0x78] sm:$0xff] }
 0x632   : > { %6748 = vst.msk [vmem:[#allocation4 + $0x90] sm:$0x3] %vm896_vm5, %v6722_v35  ;;  %v9480_v31 = vpop.f32.mrf.mxu0 }
 0x633   : > { %v7437_v28 = vpop.permute.xlu1 %7436  ;;  %v14309_v31 = vld [vmem:[#allocation7_spill] sm:$0xff] }
 0x634   : > { %7464 = vst.msk [vmem:[#allocation4 + $0x88] sm:$0xf] %vm1072_vm10, %v7437_v28  ;;  %v14009_v43 = vpop.f32.mrf.mxu0 }
 0x635   : > { %v6909_v46 = vpop.permute.xlu0 %6908 }
 0x636   : > { %6935 = vst.msk [vmem:[#allocation4 + $0x90] sm:$0x3] %vm1085_vm6, %v6909_v46  ;;  %v9481_v24 = vpop.f32.mrf.mxu0 }
 0x637   : > { %v7129_v17 = vpop.permute.xlu1 %7128 }
 0x638   : > { %7155 = vst.msk [vmem:[#allocation4 + $0x94] sm:$0x3] %vm704_vm15, %v7129_v17 }
 0x63b   : > { %v7323_v19 = vpop.permute.xlu1 %7322  ;;  %v7656_v61 = vld [vmem:[#allocation4 + $0x84] sm:$0xff] }
 0x63c   : > { %v9693_v1 = vld [vmem:[#allocation4 + $0x7c] ss:$12 sps:$4 sm:$0xff]   ;;  %7349 = vst.msk [vmem:[#allocation4 + $0x94] sm:$0x3] %vm896_vm5, %v7323_v19  ;;  %v8896_v21 = vcombine.low %v7654_v55, %v7656_v61 }
 0x63d   : > { %8006 = vmatprep.mubr.bf16.mxu1 %v9693_v1 }
 0x63e   : > { %8007 = vmatmul.mubr.bf16.gmra.mxu1 %v8896_v21 }
 0x63f   : > { %v7439_v62 = vpop.permute.xlu1 %7438 }
 0x640   : > { %7465 = vst.msk [vmem:[#allocation4 + $0x94] sm:$0x3] %vm1085_vm6, %v7439_v62 }
 0x647   : > { %v7658_v45 = vld [vmem:[#allocation4 + $0x90] sm:$0x33] }
 0x648   : > { %v8900_v33 = vcombine.high %v7658_v45, %v7658_v45  ;;  %v8899_v49 = vcombine.low %v7658_v45, %v7658_v45  ;;  %v14018_v39 = vpop.f32.mrf.mxu0 }
 0x64a   : > { %8014 = vmatprep.mubr.bf16.mxu1 %v8900_v33  ;;  %v9484_v60 = vpop.f32.mrf.mxu0 }
 0x64b   : > { %8015 = vmatmul.mubr.bf16.gmra.mxu1 %v8899_v49 }
 0x64c   : > { %9506 = vmatprep.mubr.msk.bf16.mxu1 %vm9723_vm8, %v14266_v34  ;;  %v14022_v48 = vpop.f32.mrf.mxu0 }
 0x64e   : > { %v9485_v50 = vpop.f32.mrf.mxu0 }
 0x662   : > { %v14024_v44 = vpop.f32.mrf.mxu0 }
 0x664   : > { %v9488_v32 = vpop.f32.mrf.mxu0 }
 0x666   : > { %v14026_v15 = vpop.f32.mrf.mxu0 }
 0x668   : > { %v9489_v18 = vpop.f32.mrf.mxu0 }
 0x670   : > { %v14028_v52 = vpop.f32.mrf.mxu0 }
 0x672   : > { %v9492_v4 = vpop.f32.mrf.mxu0 }
 0x674   : > { %v14030_v53 = vpop.f32.mrf.mxu0 }
 0x676   : > { %v9493_v0 = vpop.f32.mrf.mxu0 }
 0x67a   : > { %v14032_v47 = vpop.f32.mrf.mxu0 }
 0x67c   : > { %v9496_v22 = vpop.f32.mrf.mxu0 }
 0x67e   : > { %v14034_v30 = vpop.f32.mrf.mxu0 }
 0x680   : > { %v9497_v27 = vpop.f32.mrf.mxu0 }
 0x682   : > { %v14043_v8 = vpop.f32.mrf.mxu0 }
 0x684   : > { %v9500_v29 = vpop.f32.mrf.mxu0 }
 0x686   : > { %v8107_v35 = vpop.f32.mrf.mxu0 }
 0x688   : > { %v9501_v24 = vpop.f32.mrf.mxu0 }
 0x68a   : > { %v9314_v26 = vpop.f32.mrf.mxu1 }
 0x68c   : > { %v9315_v54 = vpop.f32.mrf.mxu1 }
 0x68d   : > { %v9316_v41 = vadd.f32 %v9315_v54, %v9314_v26  ;;  %v14311_v26 = vld [vmem:[#allocation12_spill] sm:$0xff] }
 0x68e   : > { %v9317_v11 = vpop.f32.mrf.mxu1 }
 0x68f   : > { %v7969_v58 = vadd.f32 %v9316_v41, %v14039_v51 }
 0x690   : > { %v9318_v7 = vpop.f32.mrf.mxu1 }
 0x691   : > { %v8057_v10 = vadd.f32 %v13982_v63, %v7969_v58  ;;  %v9319_v40 = vadd.f32 %v9318_v7, %v9317_v11  ;;  %v14310_v63 = vld [vmem:[#allocation10_spill] sm:$0xff]  ;;  %v14312_v58 = vld [vmem:[#allocation8_spill] sm:$0xff] }
 0x693   : > { %v8136_v38 = vadd.f32 %v9063_v13, %v8057_v10  ;;  %v7972_v56 = vadd.f32 %v9319_v40, %v14039_v51 }
 0x695   : > { %v8149_v59 = vmax.f32 %v8136_v38, 0.0  ;;  %v8060_v14 = vadd.f32 %v13986_v6, %v7972_v56  ;;  %v9092_v6 = vld [vmem:[#allocation2 + $0x10] sm:$0xff]   ;;  %v9093_v38 = vld [vmem:[#allocation2 + $0x18] sm:$0xff]  }
 0x696   : > { %v9067_v50 = vunpack.c.l.bf16 %v9092_v6  ;;  %v9068_v27 = vunpack.c.h.bf16 %v9092_v6  ;;  %v9094_v6 = vld [vmem:[#allocation2 + $0x20] sm:$0xff]  }
 0x697   : > { %v8162_v28 = vmul.f32 %v8149_v59, %v14309_v31  ;;  %v8137_v46 = vadd.f32 %v9064_v20, %v8060_v14  ;;  %v9071_v20 = vunpack.c.l.bf16 %v9093_v38 }
 0x699   : > { %v9011_v17 = vpack.c.bf16 %v8162_v28, %v8162_v28  ;;  %v8150_v37 = vmax.f32 %v8137_v46, 0.0 }
 0x69b   : > { %8228 = vst.msk [vmem:[#allocation2 + $0x8] sm:$0xf] %vm290_vm0, %v9011_v17  ;;  %v8163_v19 = vmul.f32 %v8150_v37, %v14310_v63  ;;  %v9072_v17 = vunpack.c.h.bf16 %v9093_v38 }
 0x69d   : > { %v9012_v55 = vpack.c.bf16 %v8163_v19, %v8163_v19 }
 0x69f   : > { %8229 = vst.msk [vmem:[#allocation2 + $0xc] sm:$0xf] %vm290_vm0, %v9012_v55 }
 0x6a6   : > { %v9320_v61 = vpop.f32.mrf.mxu1  ;;  %v9700_v1 = vld [vmem:[#allocation2 + $0x8] sm:$0xff]  }
 0x6a7   : > { %9507 = vmatmul.mubr.msk.bf16.vlgmr.msra.gmra.mxu1 %vm2071_vm14, %v9700_v1 }
 0x6a8   : > { %v9321_v21 = vpop.f32.mrf.mxu1  ;;  %9510 = vmatprep.mubr.msk.bf16.mxu1 %vm9723_vm8, %v14266_v34 }
 0x6a9   : > { %v9322_v62 = vadd.f32 %v9321_v21, %v9320_v61 }
 0x6aa   : > { %v9323_v45 = vpop.f32.mrf.mxu1 }
 0x6ab   : > { %v7977_v33 = vadd.f32 %v9322_v62, %v14039_v51 }
 0x6ac   : > { %v9324_v49 = vpop.f32.mrf.mxu1 }
 0x6ad   : > { %v8065_v60 = vadd.f32 %v14005_v5, %v7977_v33  ;;  %v9325_v32 = vadd.f32 %v9324_v49, %v9323_v45 }
 0x6af   : > { %v8138_v18 = vadd.f32 %v9067_v50, %v8065_v60  ;;  %v7980_v4 = vadd.f32 %v9325_v32, %v14039_v51  ;;  %v9075_v60 = vunpack.c.l.bf16 %v9094_v6 }
 0x6b1   : > { %v8151_v0 = vmax.f32 %v8138_v18, 0.0  ;;  %v8068_v22 = vadd.f32 %v14009_v43, %v7980_v4 }
 0x6b3   : > { %v8164_v54 = vmul.f32 %v8151_v0, %v14311_v26  ;;  %v8139_v41 = vadd.f32 %v9068_v27, %v8068_v22  ;;  %v9076_v0 = vunpack.c.h.bf16 %v9094_v6 }
 0x6b5   : > { %v9013_v16 = vpack.c.bf16 %v8164_v54, %v8164_v54  ;;  %v8152_v11 = vmax.f32 %v8139_v41, 0.0 }
 0x6b7   : > { %8230 = vst.msk [vmem:[#allocation2 + $0x10] sm:$0xf] %vm290_vm0, %v9013_v16  ;;  %v8165_v7 = vmul.f32 %v8152_v11, %v14312_v58 }
 0x6b9   : > { %v9014_v10 = vpack.c.bf16 %v8165_v7, %v8165_v7 }
 0x6bb   : > { %8231 = vst.msk [vmem:[#allocation2 + $0x14] sm:$0xf] %vm290_vm0, %v9014_v10  ;;  %v9095_v10 = vld [vmem:[#allocation2 + $0x28] sm:$0xff]  }
 0x6be   : > { %v9326_v5 = vpop.f32.mrf.mxu1 }
 0x6c0   : > { %v9327_v13 = vpop.f32.mrf.mxu1 }
 0x6c1   : > { %v9328_v40 = vadd.f32 %v9327_v13, %v9326_v5 }
 0x6c2   : > { %v9329_v56 = vpop.f32.mrf.mxu1  ;;  %v9701_v29 = vld [vmem:[#allocation2 + $0x10] sm:$0xff]  }
 0x6c3   : > { %v7985_v43 = vadd.f32 %v9328_v40, %v14039_v51  ;;  %9511 = vmatmul.mubr.msk.bf16.gmra.mxu1 %vm2071_vm14, %v9701_v29 }
 0x6c4   : > { %v9330_v59 = vpop.f32.mrf.mxu1  ;;  %9514 = vmatprep.mubr.msk.bf16.mxu1 %vm9723_vm8, %v14266_v34 }
 0x6c5   : > { %v8073_v14 = vadd.f32 %v14018_v39, %v7985_v43  ;;  %v9331_v35 = vadd.f32 %v9330_v59, %v9329_v56  ;;  %v9080_v59 = vunpack.c.h.bf16 %v9095_v10 }
 0x6c7   : > { %v8140_v31 = vadd.f32 %v9071_v20, %v8073_v14  ;;  %v7988_v28 = vadd.f32 %v9331_v35, %v14039_v51 }
 0x6c9   : > { %v8153_v46 = vmax.f32 %v8140_v31, 0.0  ;;  %v8076_v24 = vadd.f32 %v14022_v48, %v7988_v28 }
 0x6cb   : > { %v8166_v37 = vmul.f32 %v8153_v46, %v14283_v2  ;;  %v8141_v63 = vadd.f32 %v9072_v17, %v8076_v24 }
 0x6cd   : > { %v9015_v19 = vpack.c.bf16 %v8166_v37, %v8166_v37  ;;  %v8154_v55 = vmax.f32 %v8141_v63, 0.0  ;;  %v9096_v37 = vld [vmem:[#allocation2 + $0x30] sm:$0xff]  }
 0x6cf   : > { %8232 = vst.msk [vmem:[#allocation2 + $0x18] sm:$0xf] %vm290_vm0, %v9015_v19  ;;  %v8167_v39 = vmul.f32 %v8154_v55, %v14284_v36  ;;  %v9083_v55 = vunpack.c.l.bf16 %v9096_v37 }
 0x6d1   : > { %v9016_v61 = vpack.c.bf16 %v8167_v39, %v8167_v39 }
 0x6d3   : > { %8233 = vst.msk [vmem:[#allocation2 + $0x1c] sm:$0xf] %vm290_vm0, %v9016_v61 }
 0x6d6   : > { %v9332_v1 = vpop.f32.mrf.mxu1 }
 0x6d8   : > { %v9333_v21 = vpop.f32.mrf.mxu1 }
 0x6d9   : > { %v9334_v62 = vadd.f32 %v9333_v21, %v9332_v1 }
 0x6da   : > { %v9335_v45 = vpop.f32.mrf.mxu1  ;;  %v9702_v33 = vld [vmem:[#allocation2 + $0x18] sm:$0xff]  }
 0x6db   : > { %v7993_v48 = vadd.f32 %v9334_v62, %v14039_v51  ;;  %9515 = vmatmul.mubr.msk.bf16.gmra.mxu1 %vm2071_vm14, %v9702_v33  ;;  %v9084_v62 = vunpack.c.h.bf16 %v9096_v37 }
 0x6dc   : > { %v9336_v49 = vpop.f32.mrf.mxu1  ;;  %9518 = vmatprep.mubr.msk.bf16.mxu1 %vm9723_vm8, %v14266_v34 }
 0x6dd   : > { %v8081_v2 = vadd.f32 %v14024_v44, %v7993_v48  ;;  %v9337_v50 = vadd.f32 %v9336_v49, %v9335_v45 }
 0x6df   : > { %v8142_v36 = vadd.f32 %v9075_v60, %v8081_v2  ;;  %v7996_v32 = vadd.f32 %v9337_v50, %v14039_v51 }
 0x6e1   : > { %v8155_v18 = vmax.f32 %v8142_v36, 0.0  ;;  %v8084_v4 = vadd.f32 %v14026_v15, %v7996_v32 }
 0x6e3   : > { %v8168_v22 = vmul.f32 %v8155_v18, %v14285_v9  ;;  %v8143_v27 = vadd.f32 %v9076_v0, %v8084_v4 }
 0x6e5   : > { %v9017_v26 = vpack.c.bf16 %v8168_v22, %v8168_v22  ;;  %v8156_v54 = vmax.f32 %v8143_v27, 0.0 }
 0x6e7   : > { %8234 = vst.msk [vmem:[#allocation2 + $0x20] sm:$0xf] %vm290_vm0, %v9017_v26  ;;  %v8169_v44 = vmul.f32 %v8156_v54, %v14286_v3  ;;  %v9079_v3 = vunpack.c.l.bf16 %v9095_v10 }
 0x6e9   : > { %v9018_v41 = vpack.c.bf16 %v8169_v44, %v8169_v44 }
 0x6eb   : > { %8235 = vst.msk [vmem:[#allocation2 + $0x24] sm:$0xf] %vm290_vm0, %v9018_v41 }
 0x6ee   : > { %v9338_v16 = vpop.f32.mrf.mxu1 }
 0x6f0   : > { %v9339_v11 = vpop.f32.mrf.mxu1 }
 0x6f1   : > { %v9340_v58 = vadd.f32 %v9339_v11, %v9338_v16 }
 0x6f2   : > { %v9703_v7 = vld [vmem:[#allocation2 + $0x20] sm:$0xff]   ;;  %v9341_v5 = vpop.f32.mrf.mxu1 }
 0x6f3   : > { %v8001_v15 = vadd.f32 %v9340_v58, %v14039_v51  ;;  %9519 = vmatmul.mubr.msk.bf16.gmra.mxu1 %vm2071_vm14, %v9703_v7 }
 0x6f4   : > { %v9342_v9 = vpop.f32.mrf.mxu1  ;;  %9522 = vmatprep.mubr.msk.bf16.mxu1 %vm9723_vm8, %v14266_v34 }
 0x6f5   : > { %v8089_v13 = vadd.f32 %v14028_v52, %v8001_v15  ;;  %v9343_v40 = vadd.f32 %v9342_v9, %v9341_v5 }
 0x6f7   : > { %v8144_v38 = vadd.f32 %v9079_v3, %v8089_v13  ;;  %v8004_v56 = vadd.f32 %v9343_v40, %v14039_v51 }
 0x6f9   : > { %v8157_v29 = vmax.f32 %v8144_v38, 0.0  ;;  %v8092_v43 = vadd.f32 %v14030_v53, %v8004_v56 }
 0x6fb   : > { %v8170_v14 = vmul.f32 %v8157_v29, %v14287_v57  ;;  %v8145_v20 = vadd.f32 %v9080_v59, %v8092_v43 }
 0x6fd   : > { %v9019_v35 = vpack.c.bf16 %v8170_v14, %v8170_v14  ;;  %v8158_v31 = vmax.f32 %v8145_v20, 0.0 }
 0x6fe   : > { %v9344_v28 = vpop.f32.mrf.mxu1 }
 0x6ff   : > { %8236 = vst.msk [vmem:[#allocation2 + $0x28] sm:$0xf] %vm290_vm0, %v9019_v35  ;;  %v8171_v46 = vmul.f32 %v8158_v31, %v11002_v23 }
 0x700   : > { %v9345_v52 = vpop.f32.mrf.mxu1 }
 0x701   : > { %v9346_v24 = vadd.f32 %v9345_v52, %v9344_v28  ;;  %v9020_v17 = vpack.c.bf16 %v8171_v46, %v8171_v46 }
 0x702   : > { %v9347_v63 = vpop.f32.mrf.mxu1 }
 0x703   : > { %v8009_v19 = vadd.f32 %v9346_v24, %v14039_v51  ;;  %8237 = vst.msk [vmem:[#allocation2 + $0x2c] sm:$0xf] %vm290_vm0, %v9020_v17 }
 0x704   : > { %v9348_v53 = vpop.f32.mrf.mxu1 }
 0x705   : > { %v8097_v57 = vadd.f32 %v14032_v47, %v8009_v19  ;;  %v9349_v39 = vadd.f32 %v9348_v53, %v9347_v63 }
 0x707   : > { %v8146_v61 = vadd.f32 %v9083_v55, %v8097_v57  ;;  %v8012_v1 = vadd.f32 %v9349_v39, %v14039_v51 }
 0x709   : > { %v8159_v21 = vmax.f32 %v8146_v61, 0.0  ;;  %v8100_v23 = vadd.f32 %v14034_v30, %v8012_v1  ;;  %v8122_v30 = vld [vmem:[#allocation2 + $0x38] sm:$0x3] }
 0x70a   : > { %v9704_v48 = vld [vmem:[#allocation2 + $0x28] sm:$0xff]   ;;  %v8135_v0 = vunpack.c.l.bf16 %v8122_v30 }
 0x70b   : > { %v8172_v6 = vmul.f32 %v8159_v21, %v14288_v42  ;;  %v8147_v45 = vadd.f32 %v9084_v62, %v8100_v23  ;;  %v9350_v33 = vpop.f32.mrf.mxu1  ;;  %9523 = vmatmul.mubr.msk.bf16.gmra.mxu1 %vm2071_vm14, %v9704_v48 }
 0x70c   : > { %9526 = vmatprep.mubr.msk.bf16.mxu1 %vm9723_vm8, %v14266_v34 }
 0x70d   : > { %v9021_v49 = vpack.c.bf16 %v8172_v6, %v8172_v6  ;;  %v8160_v2 = vmax.f32 %v8147_v45, 0.0  ;;  %v9351_v60 = vpop.f32.mrf.mxu1 }
 0x70e   : > { %v9352_v47 = vadd.f32 %v9351_v60, %v9350_v33 }
 0x70f   : > { %8238 = vst.msk [vmem:[#allocation2 + $0x30] sm:$0xf] %vm290_vm0, %v9021_v49  ;;  %v8173_v50 = vmul.f32 %v8160_v2, %v14290_v12  ;;  %v9353_v36 = vpop.f32.mrf.mxu1 }
 0x710   : > { %v8017_v42 = vadd.f32 %v9352_v47, %v14039_v51  ;;  %v14117_v51 = vld [vmem:[%s14172_s5] ss:$0 sm:$0xff] }
 0x711   : > { %v9022_v32 = vpack.c.bf16 %v8173_v50, %v8173_v50  ;;  %v9354_v18 = vpop.f32.mrf.mxu1 }
 0x712   : > { %v8105_v4 = vadd.f32 %v14043_v8, %v8017_v42 }
 0x713   : > { %8239 = vst.msk [vmem:[#allocation2 + $0x34] sm:$0xf] %vm290_vm0, %v9022_v32 }
 0x714   : > { %v8148_v22 = vadd.f32 %v8135_v0, %v8105_v4 }
 0x716   : > { %v8161_v27 = vmax.f32 %v8148_v22, 0.0 }
 0x718   : > { %v8174_v26 = vmul.f32 %v8161_v27, %v14294_v25 }
 0x71a   : > { %v9023_v54 = vpack.c.bf16 %v8174_v26, %v8174_v26  ;;  %v9705_v44 = vld [vmem:[#allocation2 + $0x30] sm:$0xff]  }
 0x71b   : > { %9527 = vmatmul.mubr.msk.bf16.gmra.mxu1 %vm2071_vm14, %v9705_v44 }
 0x71c   : > { %8240 = vst.msk [vmem:[#allocation2 + $0x38] sm:$0x3] %vm307_vm1, %v9023_v54  ;;  %9530 = vmatprep.mubr.msk.bf16.mxu1 %vm9723_vm8, %v14266_v34 }
 0x723   : > { %v9706_v12 = vld [vmem:[#allocation2 + $0x38] ss:$0 sps:$4 sm:$0x33]  }
 0x724   : > { %9531 = vmatmul.mubr.msk.bf16.gmra.mxu1 %vm2071_vm14, %v9706_v12 }
 0x767   : > { %v8365_v8 = vpop.f32.mrf.mxu1 }
 0x768   : > { %v8366_v25 = vadd.f32 %v14117_v51, %v8365_v8 }
 0x769   : > { %v9508_v41 = vpop.f32.mrf.mxu1 }
 0x76a   : > { %v8419_v16 = vmax.f32 %v8366_v25, 0.0 }
 0x76b   : > { %v8368_v34 = vpop.f32.mrf.mxu1 }
 0x76c   : > { %v9024_v11 = vpack.c.bf16 %v8419_v16, %v8419_v16  ;;  %v8369_v58 = vadd.f32 %v14117_v51, %v8368_v34 }
 0x76d   : > { %v9509_v7 = vpop.f32.mrf.mxu1 }
 0x76e   : > { %8485 = vst.msk [vmem:[%s14124_s18] sm:$0xf] %vm290_vm0, %v9024_v11  ;;  %v8420_v10 = vmax.f32 %v8369_v58, 0.0 }
 0x770   : > { %v9025_v5 = vpack.c.bf16 %v8420_v10, %v8420_v10 }
 0x772   : > { %8486 = vst.msk [vmem:[%s14124_s18 + $0x4] sm:$0xf] %vm290_vm0, %v9025_v5 }
 0x783   : > { %v8373_v15 = vpop.f32.mrf.mxu1 }
 0x784   : > { %v8374_v9 = vadd.f32 %v14117_v51, %v8373_v15 }
 0x785   : > { %v9512_v13 = vpop.f32.mrf.mxu1 }
 0x786   : > { %v8421_v3 = vmax.f32 %v8374_v9, 0.0 }
 0x787   : > { %v8376_v40 = vpop.f32.mrf.mxu1 }
 0x788   : > { %v9026_v38 = vpack.c.bf16 %v8421_v3, %v8421_v3  ;;  %v8377_v56 = vadd.f32 %v14117_v51, %v8376_v40 }
 0x789   : > { %v9513_v29 = vpop.f32.mrf.mxu1 }
 0x78a   : > { %8487 = vst.msk [vmem:[%s14124_s18 + $0x8] sm:$0xf] %vm290_vm0, %v9026_v38  ;;  %v8422_v43 = vmax.f32 %v8377_v56, 0.0 }
 0x78c   : > { %v9027_v59 = vpack.c.bf16 %v8422_v43, %v8422_v43 }
 0x78e   : > { %8488 = vst.msk [vmem:[%s14124_s18 + $0xc] sm:$0xf] %vm290_vm0, %v9027_v59 }
 0x79b   : > { %v8381_v14 = vpop.f32.mrf.mxu1 }
 0x79c   : > { %v8382_v20 = vadd.f32 %v14117_v51, %v8381_v14 }
 0x79d   : > { %v9516_v35 = vpop.f32.mrf.mxu1 }
 0x79e   : > { %v8423_v31 = vmax.f32 %v8382_v20, 0.0 }
 0x79f   : > { %v8384_v28 = vpop.f32.mrf.mxu1 }
 0x7a0   : > { %v9028_v46 = vpack.c.bf16 %v8423_v31, %v8423_v31  ;;  %v8385_v52 = vadd.f32 %v14117_v51, %v8384_v28 }
 0x7a1   : > { %v9517_v24 = vpop.f32.mrf.mxu1 }
 0x7a2   : > { %8489 = vst.msk [vmem:[%s14124_s18 + $0x10] sm:$0xf] %vm290_vm0, %v9028_v46  ;;  %v8424_v17 = vmax.f32 %v8385_v52, 0.0 }
 0x7a4   : > { %v9029_v37 = vpack.c.bf16 %v8424_v17, %v8424_v17 }
 0x7a6   : > { %8490 = vst.msk [vmem:[%s14124_s18 + $0x14] sm:$0xf] %vm290_vm0, %v9029_v37 }
 0x7b3   : > { %v8389_v63 = vpop.f32.mrf.mxu1 }
 0x7b4   : > { %v8390_v19 = vadd.f32 %v14117_v51, %v8389_v63 }
 0x7b5   : > { %v9520_v53 = vpop.f32.mrf.mxu1 }
 0x7b6   : > { %v8425_v57 = vmax.f32 %v8390_v19, 0.0 }
 0x7b7   : > { %v8392_v55 = vpop.f32.mrf.mxu1 }
 0x7b8   : > { %v9030_v39 = vpack.c.bf16 %v8425_v57, %v8425_v57  ;;  %v8393_v61 = vadd.f32 %v14117_v51, %v8392_v55 }
 0x7b9   : > { %v9521_v1 = vpop.f32.mrf.mxu1 }
 0x7ba   : > { %8491 = vst.msk [vmem:[%s14124_s18 + $0x18] sm:$0xf] %vm290_vm0, %v9030_v39  ;;  %v8426_v21 = vmax.f32 %v8393_v61, 0.0 }
 0x7bc   : > { %v9031_v23 = vpack.c.bf16 %v8426_v21, %v8426_v21 }
 0x7be   : > { %8492 = vst.msk [vmem:[%s14124_s18 + $0x1c] sm:$0xf] %vm290_vm0, %v9031_v23 }
 0x7cb   : > { %v8397_v62 = vpop.f32.mrf.mxu1 }
 0x7cc   : > { %v8398_v6 = vadd.f32 %v14117_v51, %v8397_v62 }
 0x7cd   : > { %v9524_v45 = vpop.f32.mrf.mxu1 }
 0x7ce   : > { %v8427_v33 = vmax.f32 %v8398_v6, 0.0 }
 0x7cf   : > { %v8400_v48 = vpop.f32.mrf.mxu1 }
 0x7d0   : > { %v9032_v49 = vpack.c.bf16 %v8427_v33, %v8427_v33  ;;  %v8401_v2 = vadd.f32 %v14117_v51, %v8400_v48 }
 0x7d1   : > { %v9525_v60 = vpop.f32.mrf.mxu1 }
 0x7d2   : > { %8493 = vst.msk [vmem:[%s14124_s18 + $0x20] sm:$0xf] %vm290_vm0, %v9032_v49  ;;  %v8428_v47 = vmax.f32 %v8401_v2, 0.0 }
 0x7d4   : > { %v9033_v50 = vpack.c.bf16 %v8428_v47, %v8428_v47 }
 0x7d6   : > { %8494 = vst.msk [vmem:[%s14124_s18 + $0x24] sm:$0xf] %vm290_vm0, %v9033_v50 }
 0x7db   : > { %v8405_v30 = vpop.f32.mrf.mxu1 }
 0x7dc   : > { %v8406_v36 = vadd.f32 %v14117_v51, %v8405_v30 }
 0x7dd   : > { %v9528_v42 = vpop.f32.mrf.mxu1 }
 0x7de   : > { %v8429_v32 = vmax.f32 %v8406_v36, 0.0 }
 0x7df   : > { %v8408_v18 = vpop.f32.mrf.mxu1 }
 0x7e0   : > { %v9034_v4 = vpack.c.bf16 %v8429_v32, %v8429_v32  ;;  %v8409_v0 = vadd.f32 %v14117_v51, %v8408_v18 }
 0x7e1   : > { %v9529_v22 = vpop.f32.mrf.mxu1 }
 0x7e2   : > { %8495 = vst.msk [vmem:[%s14124_s18 + $0x28] sm:$0xf] %vm290_vm0, %v9034_v4  ;;  %v8430_v27 = vmax.f32 %v8409_v0, 0.0 }
 0x7e4   : > { %v9035_v26 = vpack.c.bf16 %v8430_v27, %v8430_v27  ;;  %v8413_v54 = vpop.f32.mrf.mxu1 }
 0x7e5   : > { %v8414_v44 = vadd.f32 %v14117_v51, %v8413_v54 }
 0x7e6   : > { %8496 = vst.msk [vmem:[%s14124_s18 + $0x2c] sm:$0xf] %vm290_vm0, %v9035_v26  ;;  %v9532_v12 = vpop.f32.mrf.mxu1 }
 0x7e7   : > { %v8431_v8 = vmax.f32 %v8414_v44, 0.0 }
 0x7e8   : > { %v8416_v25 = vpop.f32.mrf.mxu1 }
 0x7e9   : > { %v9036_v41 = vpack.c.bf16 %v8431_v8, %v8431_v8 }
 0x7ea   : > { %v9533_v16 = vpop.f32.mrf.mxu1 }
 0x7eb   : > { %8497 = vst.msk [vmem:[%s14124_s18 + $0x30] sm:$0x3] %vm307_vm1, %v9036_v41 }
 0x7ec PF: > { %s16_s21 = sadd.s32 1, %s9717_s21  }
 0x7ed   : > { %p13_p4 = scmp.ge.s32.totalorder %s16_s21, 4  }
 0x7ef   :  { %15 = sbr.rel (!%p13_p4) target bundleno = 1 (0x1), region = 83 }

</bundles_post_ra>
